<compile_context>
chip_gen: v7x
topology: tpu7x:2x2x1
jax: 0.10.0
libtpu: 0.0.40
codegen_flags: <defaults>
</compile_context>

<pallas_src>
import jax
import jax.numpy as jnp
from jax import lax
from jax.experimental import pallas as pl
from jax.experimental.pallas import tpu as pltpu


# ---------------- fused Pallas kernel (one image per grid step) ----------------

def fused_forward_kernel(x_ref, a1_ref, b1_ref, s1_ref, r1_ref,
                         a2_ref, b2_ref, t2_ref, u2_ref,
                         w1p_ref, fc1b_ref, fc2w_ref, fc2b_ref, o_ref):
    f32 = jnp.float32
    xv = x_ref[0]                                                   # (64, 64)

    # ---- conv1: 5 banded matmuls -> (60, 600), columns = c*60 + w ----
    c1 = None
    for i in range(5):
        part = jnp.dot(xv[i:i + 60, :], a1_ref[i], preferred_element_type=f32)
        c1 = part if c1 is None else c1 + part
    c1 = c1 + b1_ref[...]                                           # bias per channel

    # ---- maxpool(3,3) + ReLU -> (20, 200), columns = c*20 + wo ----
    p1 = None
    for b in range(3):
        y = jnp.dot(c1, s1_ref[b], preferred_element_type=f32)      # (60, 200)
        for a in range(3):
            z = jnp.dot(r1_ref[a], y, preferred_element_type=f32)   # (20, 200)
            p1 = z if p1 is None else jnp.maximum(p1, z)
    p1 = jnp.maximum(p1, 0.0)

    # ---- conv2: 5 banded matmuls -> (16, 320), columns = d*16 + w2 ----
    c2 = None
    for i in range(5):
        part = jnp.dot(p1[i:i + 16, :], a2_ref[i], preferred_element_type=f32)
        c2 = part if c2 is None else c2 + part
    c2 = c2 + b2_ref[...]

    # ---- maxpool(3,3) + ReLU -> (5, 100), columns = d*5 + wo2 ----
    p2 = None
    for b in range(3):
        y = jnp.dot(c2, t2_ref[b], preferred_element_type=f32)      # (16, 100)
        for a in range(3):
            z = jnp.dot(u2_ref[a], y, preferred_element_type=f32)   # (5, 100)
            p2 = z if p2 is None else jnp.maximum(p2, z)
    p2 = jnp.maximum(p2, 0.0)
    # nn.Dropout() is identity at inference time.
    # TODO(synk): training-mode dropout (p=0.5 masking + 2x scaling) not implemented.

    # ---- fc1 (pre-permuted weights match this layout == torch NCHW flatten) + fc2 ----
    h = None
    for r in range(5):
        part = jnp.dot(p2[r:r + 1, :], w1p_ref[r], preferred_element_type=f32)  # (1, 100)
        h = part if h is None else h + part
    h = h + fc1b_ref[...]
    out = jnp.dot(h, fc2w_ref[...], preferred_element_type=f32) + fc2b_ref[...]  # (1, 15)
    o_ref[0] = out


# ---------------- host-side (one-time / offline-able) weight preparation ----------------

def _conv_band_matrices(w_oihw, win, wout):
    """Band matrices A_i (i = kernel row), shape (k, Cin*win, Cout*wout) with
    A_i[c*win + u, d*wout + w] = W[d, c, i, u - w] for 0 <= u - w < k, else 0,
    so that  conv_out[h, d*wout + w] = sum_i (act[h+i, :] @ A_i)[d*wout + w]."""
    cout, cin, k, _ = w_oihw.shape
    wp = jnp.transpose(w_oihw, (2, 1, 3, 0))                     # (k, Cin, k, Cout) [i,c,j,d]
    u = jnp.arange(win)[:, None]
    w = jnp.arange(wout)[None, :]
    diff = u - w
    mask = (diff >= 0) & (diff < k)
    jidx = jnp.clip(diff, 0, k - 1)
    a = jnp.where(mask[None, None, :, :, None], wp[:, :, jidx, :], 0.0)  # (k,Cin,win,wout,Cout)
    a = jnp.transpose(a, (0, 1, 2, 4, 3))                        # (k, Cin, win, Cout, wout)
    return a.reshape(k, cin * win, cout * wout).astype(jnp.float32)


def _pool_col_select(channels, win, wout, pool=3):
    """(pool, C*win, C*wout) 0/1 matrices: S[b, c*win + pool*wo + b, c*wout + wo] = 1."""
    rows = jnp.arange(channels * win)
    cols = jnp.arange(channels * wout)
    c_r, w_r = rows // win, rows % win
    c_c, w_c = cols // wout, cols % wout
    mats = []
    for b in range(pool):
        m = (c_r[:, None] == c_c[None, :]) & (w_r[:, None] == pool * w_c[None, :] + b)
        mats.append(m.astype(jnp.float32))
    return jnp.stack(mats)


def _pool_row_select(hin, hout, pool=3):
    """(pool, hout, hin) 0/1 matrices: R[a, ho, pool*ho + a] = 1."""
    mats = []
    for a in range(pool):
        m = (jnp.arange(hin)[None, :] == pool * jnp.arange(hout)[:, None] + a)
        mats.append(m.astype(jnp.float32))
    return jnp.stack(mats)


def _prepare_operands(params):
    a1 = _conv_band_matrices(params["conv1_w"], win=64, wout=60)        # (5, 64, 600)
    a2 = _conv_band_matrices(params["conv2_w"], win=20, wout=16)        # (5, 200, 320)
    b1row = jnp.repeat(params["conv1_b"], 60)[None, :].astype(jnp.float32)   # (1, 600)
    b2row = jnp.repeat(params["conv2_b"], 16)[None, :].astype(jnp.float32)   # (1, 320)
    s1 = _pool_col_select(10, 60, 20)                                   # (3, 600, 200)
    r1 = _pool_row_select(60, 20)                                       # (3, 20, 60)
    t2 = _pool_col_select(20, 16, 5)                                    # (3, 320, 100)
    u2 = _pool_row_select(16, 5)                                        # (3, 5, 16)
    # torch flatten index f = d*25 + h*5 + w  ->  kernel layout [h, d*5 + w]
    w1p = params["fc1_w"].reshape(20, 5, 5, 100).transpose(1, 0, 2, 3).reshape(5, 100, 100)
    w1p = w1p.astype(jnp.float32)
    fc1b = params["fc1_b"][None, :].astype(jnp.float32)                 # (1, 100)
    fc2w = params["fc2_w"].astype(jnp.float32)                          # (100, 15)
    fc2b = params["fc2_b"][None, :].astype(jnp.float32)                 # (1, 15)
    return a1, b1row, s1, r1, a2, b2row, t2, u2, w1p, fc1b, fc2w, fc2b


# ---------------- public forward ----------------

def simple_net_dropout_forward(x_nchw, params):
    assert x_nchw.shape[1:] == (1, 64, 64), x_nchw.shape
    n = x_nchw.shape[0]
    x = x_nchw[:, 0, :, :].astype(jnp.float32)                          # (N, 64, 64)
    operands = _prepare_operands(params)                                # one-time weight prep

    in_specs = [
        pl.BlockSpec((1, 64, 64), lambda b: (b, 0, 0)),        # x (per image)
        pl.BlockSpec((5, 64, 600), lambda b: (0, 0, 0)),       # conv1 band matrices
        pl.BlockSpec((1, 600), lambda b: (0, 0)),              # conv1 bias row
        pl.BlockSpec((3, 600, 200), lambda b: (0, 0, 0)),      # pool1 column selectors
        pl.BlockSpec((3, 20, 60), lambda b: (0, 0, 0)),        # pool1 row selectors
        pl.BlockSpec((5, 200, 320), lambda b: (0, 0, 0)),      # conv2 band matrices
        pl.BlockSpec((1, 320), lambda b: (0, 0)),              # conv2 bias row
        pl.BlockSpec((3, 320, 100), lambda b: (0, 0, 0)),      # pool2 column selectors
        pl.BlockSpec((3, 5, 16), lambda b: (0, 0, 0)),         # pool2 row selectors
        pl.BlockSpec((5, 100, 100), lambda b: (0, 0, 0)),      # fc1 weights (pre-permuted)
        pl.BlockSpec((1, 100), lambda b: (0, 0)),              # fc1 bias
        pl.BlockSpec((100, 15), lambda b: (0, 0)),             # fc2 weights
        pl.BlockSpec((1, 15), lambda b: (0, 0)),               # fc2 bias
    ]
    out = pl.pallas_call(
        fused_forward_kernel,
        out_shape=jax.ShapeDtypeStruct((n, 1, 15), jnp.float32),
        grid=(n,),
        in_specs=in_specs,
        out_specs=pl.BlockSpec((1, 1, 15), lambda b: (b, 0, 0)),
        compiler_params=pltpu.CompilerParams(
            dimension_semantics=("parallel",),          # v7x: one image per TensorCore
            vmem_limit_bytes=32 * 1024 * 1024,
        ),
    )(x, *operands)
    return out.reshape(n, 15)


# ---------------- pure-JAX reference for validation ----------------

def reference_forward(x_nchw, params):
    hp = lax.Precision.HIGHEST
    y = lax.conv_general_dilated(
        x_nchw, params["conv1_w"], (1, 1), "VALID",
        dimension_numbers=("NCHW", "OIHW", "NCHW"), precision=hp)
    y = y + params["conv1_b"].reshape(1, -1, 1, 1)
    y = lax.reduce_window(y, -jnp.inf, lax.max, (1, 1, 3, 3), (1, 1, 3, 3), "VALID")
    y = jnp.maximum(y, 0.0)
    y = lax.conv_general_dilated(
        y, params["conv2_w"], (1, 1), "VALID",
        dimension_numbers=("NCHW", "OIHW", "NCHW"), precision=hp)
    y = y + params["conv2_b"].reshape(1, -1, 1, 1)
    y = lax.reduce_window(y, -jnp.inf, lax.max, (1, 1, 3, 3), (1, 1, 3, 3), "VALID")
    y = jnp.maximum(y, 0.0)
    flat = y.reshape(y.shape[0], -1)
    h = jnp.dot(flat, params["fc1_w"], precision=hp) + params["fc1_b"][None, :]
    return jnp.dot(h, params["fc2_w"], precision=hp) + params["fc2_b"][None, :]


if __name__ == "__main__":
    key = jax.random.PRNGKey(0)
    ks = jax.random.split(key, 9)
    # deterministic synthetic parameters; fc weights stored as (in, out)
    params = {
        "conv1_w": jax.random.normal(ks[0], (10, 1, 5, 5), jnp.float32) * 0.1,
        "conv1_b": jax.random.normal(ks[1], (10,), jnp.float32) * 0.1,
        "conv2_w": jax.random.normal(ks[2], (20, 10, 5, 5), jnp.float32) * 0.1,
        "conv2_b": jax.random.normal(ks[3], (20,), jnp.float32) * 0.1,
        "fc1_w": jax.random.normal(ks[4], (500, 100), jnp.float32) * 0.05,
        "fc1_b": jax.random.normal(ks[5], (100,), jnp.float32) * 0.05,
        "fc2_w": jax.random.normal(ks[6], (100, 15), jnp.float32) * 0.05,
        "fc2_b": jax.random.normal(ks[7], (15,), jnp.float32) * 0.05,
    }
    # (N=2, C=1, H=64, W=64) NCHW -- 64x64 yields the 500-dim flatten fc1 expects
    x = jax.random.normal(ks[8], (2, 1, 64, 64), jnp.float32)

    fwd = jax.jit(simple_net_dropout_forward)
    out = jax.block_until_ready(fwd(x, params))

    ref = reference_forward(x, params)
    assert out.shape == (2, 15), out.shape
    # tolerance leaves headroom for MXU f32 pass-precision vs XLA HIGHEST reference
    assert jnp.allclose(out, ref, atol=1e-2, rtol=1e-2), float(jnp.max(jnp.abs(out - ref)))
    print("KERNEL_OK")
</pallas_src>

<mosaic_0001>
module attributes {stable_mosaic.version = 11 : i64} {
  func.func @fused_forward_kernel(%arg0: i32, %arg1: memref<1x64x64xf32, #tpu.memory_space<vmem>>, %arg2: memref<5x64x600xf32, #tpu.memory_space<vmem>>, %arg3: memref<1x600xf32, #tpu.memory_space<vmem>>, %arg4: memref<3x600x200xf32, #tpu.memory_space<vmem>>, %arg5: memref<3x20x60xf32, #tpu.memory_space<vmem>>, %arg6: memref<5x200x320xf32, #tpu.memory_space<vmem>>, %arg7: memref<1x320xf32, #tpu.memory_space<vmem>>, %arg8: memref<3x320x100xf32, #tpu.memory_space<vmem>>, %arg9: memref<3x5x16xf32, #tpu.memory_space<vmem>>, %arg10: memref<5x100x100xf32, #tpu.memory_space<vmem>>, %arg11: memref<1x100xf32, #tpu.memory_space<vmem>>, %arg12: memref<100x15xf32, #tpu.memory_space<vmem>>, %arg13: memref<1x15xf32, #tpu.memory_space<vmem>>, %arg14: memref<1x1x15xf32, #tpu.memory_space<vmem>>) attributes {dimension_semantics = [#tpu.dimension_semantics<parallel>], iteration_bounds = array<i64: 2>, scalar_prefetch = 0 : i64, scratch_operands = 0 : i64, tpu.core_type = #tpu.core_type<tc>, window_params = [{transform_indices = @transform_0, window_bounds = array<i64: 1, 64, 64>}, {pipeline_mode = #tpu.pipeline_mode<synchronous>, transform_indices = @transform_1, window_bounds = array<i64: 5, 64, 600>}, {pipeline_mode = #tpu.pipeline_mode<synchronous>, transform_indices = @transform_2, window_bounds = array<i64: 1, 600>}, {pipeline_mode = #tpu.pipeline_mode<synchronous>, transform_indices = @transform_3, window_bounds = array<i64: 3, 600, 200>}, {pipeline_mode = #tpu.pipeline_mode<synchronous>, transform_indices = @transform_4, window_bounds = array<i64: 3, 20, 60>}, {pipeline_mode = #tpu.pipeline_mode<synchronous>, transform_indices = @transform_5, window_bounds = array<i64: 5, 200, 320>}, {pipeline_mode = #tpu.pipeline_mode<synchronous>, transform_indices = @transform_6, window_bounds = array<i64: 1, 320>}, {pipeline_mode = #tpu.pipeline_mode<synchronous>, transform_indices = @transform_7, window_bounds = array<i64: 3, 320, 100>}, {pipeline_mode = #tpu.pipeline_mode<synchronous>, transform_indices = @transform_8, window_bounds = array<i64: 3, 5, 16>}, {pipeline_mode = #tpu.pipeline_mode<synchronous>, transform_indices = @transform_9, window_bounds = array<i64: 5, 100, 100>}, {pipeline_mode = #tpu.pipeline_mode<synchronous>, transform_indices = @transform_10, window_bounds = array<i64: 1, 100>}, {pipeline_mode = #tpu.pipeline_mode<synchronous>, transform_indices = @transform_11, window_bounds = array<i64: 100, 15>}, {pipeline_mode = #tpu.pipeline_mode<synchronous>, transform_indices = @transform_12, window_bounds = array<i64: 1, 15>}, {transform_indices = @transform_13, window_bounds = array<i64: 1, 1, 15>}]} {
    %c0 = arith.constant 0 : index
    %c0_0 = arith.constant 0 : index
    %c0_1 = arith.constant 0 : index
    %0 = vector.load %arg1[%c0, %c0_0, %c0_1] : memref<1x64x64xf32, #tpu.memory_space<vmem>>, vector<1x64x64xf32>
    %1 = vector.shape_cast %0 : vector<1x64x64xf32> to vector<64x64xf32>
    %2 = vector.extract_strided_slice %1 {offsets = [0, 0], sizes = [60, 64], strides = [1, 1]} : vector<64x64xf32> to vector<60x64xf32>
    %c0_2 = arith.constant 0 : index
    %c0_3 = arith.constant 0 : index
    %c0_4 = arith.constant 0 : index
    %3 = vector.load %arg2[%c0_2, %c0_3, %c0_4] : memref<5x64x600xf32, #tpu.memory_space<vmem>>, vector<1x64x600xf32>
    %4 = vector.shape_cast %3 : vector<1x64x600xf32> to vector<64x600xf32>
    %cst = arith.constant dense<0.000000e+00> : vector<60x600xf32>
    %5 = tpu.matmul %2, %4, %cst {dimension_numbers = #tpu.dot_dimension_numbers<[1], [0], [0], [1], [0, 0, 1, 1], [], []>} : vector<60x64xf32>, vector<64x600xf32>, vector<60x600xf32> -> vector<60x600xf32>
    %6 = vector.extract_strided_slice %1 {offsets = [1, 0], sizes = [60, 64], strides = [1, 1]} : vector<64x64xf32> to vector<60x64xf32>
    %c1 = arith.constant 1 : index
    %c0_5 = arith.constant 0 : index
    %c0_6 = arith.constant 0 : index
    %7 = vector.load %arg2[%c1, %c0_5, %c0_6] : memref<5x64x600xf32, #tpu.memory_space<vmem>>, vector<1x64x600xf32>
    %8 = vector.shape_cast %7 : vector<1x64x600xf32> to vector<64x600xf32>
    %cst_7 = arith.constant dense<0.000000e+00> : vector<60x600xf32>
    %9 = tpu.matmul %6, %8, %cst_7 {dimension_numbers = #tpu.dot_dimension_numbers<[1], [0], [0], [1], [0, 0, 1, 1], [], []>} : vector<60x64xf32>, vector<64x600xf32>, vector<60x600xf32> -> vector<60x600xf32>
    %10 = arith.addf %5, %9 : vector<60x600xf32>
    %11 = vector.extract_strided_slice %1 {offsets = [2, 0], sizes = [60, 64], strides = [1, 1]} : vector<64x64xf32> to vector<60x64xf32>
    %c2 = arith.constant 2 : index
    %c0_8 = arith.constant 0 : index
    %c0_9 = arith.constant 0 : index
    %12 = vector.load %arg2[%c2, %c0_8, %c0_9] : memref<5x64x600xf32, #tpu.memory_space<vmem>>, vector<1x64x600xf32>
    %13 = vector.shape_cast %12 : vector<1x64x600xf32> to vector<64x600xf32>
    %cst_10 = arith.constant dense<0.000000e+00> : vector<60x600xf32>
    %14 = tpu.matmul %11, %13, %cst_10 {dimension_numbers = #tpu.dot_dimension_numbers<[1], [0], [0], [1], [0, 0, 1, 1], [], []>} : vector<60x64xf32>, vector<64x600xf32>, vector<60x600xf32> -> vector<60x600xf32>
    %15 = arith.addf %10, %14 : vector<60x600xf32>
    %16 = vector.extract_strided_slice %1 {offsets = [3, 0], sizes = [60, 64], strides = [1, 1]} : vector<64x64xf32> to vector<60x64xf32>
    %c3 = arith.constant 3 : index
    %c0_11 = arith.constant 0 : index
    %c0_12 = arith.constant 0 : index
    %17 = vector.load %arg2[%c3, %c0_11, %c0_12] : memref<5x64x600xf32, #tpu.memory_space<vmem>>, vector<1x64x600xf32>
    %18 = vector.shape_cast %17 : vector<1x64x600xf32> to vector<64x600xf32>
    %cst_13 = arith.constant dense<0.000000e+00> : vector<60x600xf32>
    %19 = tpu.matmul %16, %18, %cst_13 {dimension_numbers = #tpu.dot_dimension_numbers<[1], [0], [0], [1], [0, 0, 1, 1], [], []>} : vector<60x64xf32>, vector<64x600xf32>, vector<60x600xf32> -> vector<60x600xf32>
    %20 = arith.addf %15, %19 : vector<60x600xf32>
    %21 = vector.extract_strided_slice %1 {offsets = [4, 0], sizes = [60, 64], strides = [1, 1]} : vector<64x64xf32> to vector<60x64xf32>
    %c4 = arith.constant 4 : index
    %c0_14 = arith.constant 0 : index
    %c0_15 = arith.constant 0 : index
    %22 = vector.load %arg2[%c4, %c0_14, %c0_15] : memref<5x64x600xf32, #tpu.memory_space<vmem>>, vector<1x64x600xf32>
    %23 = vector.shape_cast %22 : vector<1x64x600xf32> to vector<64x600xf32>
    %cst_16 = arith.constant dense<0.000000e+00> : vector<60x600xf32>
    %24 = tpu.matmul %21, %23, %cst_16 {dimension_numbers = #tpu.dot_dimension_numbers<[1], [0], [0], [1], [0, 0, 1, 1], [], []>} : vector<60x64xf32>, vector<64x600xf32>, vector<60x600xf32> -> vector<60x600xf32>
    %25 = arith.addf %20, %24 : vector<60x600xf32>
    %c0_17 = arith.constant 0 : index
    %c0_18 = arith.constant 0 : index
    %26 = vector.load %arg3[%c0_17, %c0_18] : memref<1x600xf32, #tpu.memory_space<vmem>>, vector<1x600xf32>
    %27 = vector.broadcast %26 : vector<1x600xf32> to vector<60x600xf32>
    %28 = arith.addf %25, %27 : vector<60x600xf32>
    %c0_19 = arith.constant 0 : index
    %c0_20 = arith.constant 0 : index
    %c0_21 = arith.constant 0 : index
    %29 = vector.load %arg4[%c0_19, %c0_20, %c0_21] : memref<3x600x200xf32, #tpu.memory_space<vmem>>, vector<1x600x200xf32>
    %30 = vector.shape_cast %29 : vector<1x600x200xf32> to vector<600x200xf32>
    %cst_22 = arith.constant dense<0.000000e+00> : vector<60x200xf32>
    %31 = tpu.matmul %28, %30, %cst_22 {dimension_numbers = #tpu.dot_dimension_numbers<[1], [0], [0], [1], [0, 0, 1, 1], [], []>} : vector<60x600xf32>, vector<600x200xf32>, vector<60x200xf32> -> vector<60x200xf32>
    %c0_23 = arith.constant 0 : index
    %c0_24 = arith.constant 0 : index
    %c0_25 = arith.constant 0 : index
    %32 = vector.load %arg5[%c0_23, %c0_24, %c0_25] : memref<3x20x60xf32, #tpu.memory_space<vmem>>, vector<1x20x60xf32>
    %33 = vector.shape_cast %32 : vector<1x20x60xf32> to vector<20x60xf32>
    %cst_26 = arith.constant dense<0.000000e+00> : vector<20x200xf32>
    %34 = tpu.matmul %33, %31, %cst_26 {dimension_numbers = #tpu.dot_dimension_numbers<[1], [0], [0], [1], [0, 0, 1, 1], [], []>} : vector<20x60xf32>, vector<60x200xf32>, vector<20x200xf32> -> vector<20x200xf32>
    %c1_27 = arith.constant 1 : index
    %c0_28 = arith.constant 0 : index
    %c0_29 = arith.constant 0 : index
    %35 = vector.load %arg5[%c1_27, %c0_28, %c0_29] : memref<3x20x60xf32, #tpu.memory_space<vmem>>, vector<1x20x60xf32>
    %36 = vector.shape_cast %35 : vector<1x20x60xf32> to vector<20x60xf32>
    %cst_30 = arith.constant dense<0.000000e+00> : vector<20x200xf32>
    %37 = tpu.matmul %36, %31, %cst_30 {dimension_numbers = #tpu.dot_dimension_numbers<[1], [0], [0], [1], [0, 0, 1, 1], [], []>} : vector<20x60xf32>, vector<60x200xf32>, vector<20x200xf32> -> vector<20x200xf32>
    %38 = arith.maximumf %34, %37 : vector<20x200xf32>
    %c2_31 = arith.constant 2 : index
    %c0_32 = arith.constant 0 : index
    %c0_33 = arith.constant 0 : index
    %39 = vector.load %arg5[%c2_31, %c0_32, %c0_33] : memref<3x20x60xf32, #tpu.memory_space<vmem>>, vector<1x20x60xf32>
    %40 = vector.shape_cast %39 : vector<1x20x60xf32> to vector<20x60xf32>
    %cst_34 = arith.constant dense<0.000000e+00> : vector<20x200xf32>
    %41 = tpu.matmul %40, %31, %cst_34 {dimension_numbers = #tpu.dot_dimension_numbers<[1], [0], [0], [1], [0, 0, 1, 1], [], []>} : vector<20x60xf32>, vector<60x200xf32>, vector<20x200xf32> -> vector<20x200xf32>
    %42 = arith.maximumf %38, %41 : vector<20x200xf32>
    %c1_35 = arith.constant 1 : index
    %c0_36 = arith.constant 0 : index
    %c0_37 = arith.constant 0 : index
    %43 = vector.load %arg4[%c1_35, %c0_36, %c0_37] : memref<3x600x200xf32, #tpu.memory_space<vmem>>, vector<1x600x200xf32>
    %44 = vector.shape_cast %43 : vector<1x600x200xf32> to vector<600x200xf32>
    %cst_38 = arith.constant dense<0.000000e+00> : vector<60x200xf32>
    %45 = tpu.matmul %28, %44, %cst_38 {dimension_numbers = #tpu.dot_dimension_numbers<[1], [0], [0], [1], [0, 0, 1, 1], [], []>} : vector<60x600xf32>, vector<600x200xf32>, vector<60x200xf32> -> vector<60x200xf32>
    %c0_39 = arith.constant 0 : index
    %c0_40 = arith.constant 0 : index
    %c0_41 = arith.constant 0 : index
    %46 = vector.load %arg5[%c0_39, %c0_40, %c0_41] : memref<3x20x60xf32, #tpu.memory_space<vmem>>, vector<1x20x60xf32>
    %47 = vector.shape_cast %46 : vector<1x20x60xf32> to vector<20x60xf32>
    %cst_42 = arith.constant dense<0.000000e+00> : vector<20x200xf32>
    %48 = tpu.matmul %47, %45, %cst_42 {dimension_numbers = #tpu.dot_dimension_numbers<[1], [0], [0], [1], [0, 0, 1, 1], [], []>} : vector<20x60xf32>, vector<60x200xf32>, vector<20x200xf32> -> vector<20x200xf32>
    %49 = arith.maximumf %42, %48 : vector<20x200xf32>
    %c1_43 = arith.constant 1 : index
    %c0_44 = arith.constant 0 : index
    %c0_45 = arith.constant 0 : index
    %50 = vector.load %arg5[%c1_43, %c0_44, %c0_45] : memref<3x20x60xf32, #tpu.memory_space<vmem>>, vector<1x20x60xf32>
    %51 = vector.shape_cast %50 : vector<1x20x60xf32> to vector<20x60xf32>
    %cst_46 = arith.constant dense<0.000000e+00> : vector<20x200xf32>
    %52 = tpu.matmul %51, %45, %cst_46 {dimension_numbers = #tpu.dot_dimension_numbers<[1], [0], [0], [1], [0, 0, 1, 1], [], []>} : vector<20x60xf32>, vector<60x200xf32>, vector<20x200xf32> -> vector<20x200xf32>
    %53 = arith.maximumf %49, %52 : vector<20x200xf32>
    %c2_47 = arith.constant 2 : index
    %c0_48 = arith.constant 0 : index
    %c0_49 = arith.constant 0 : index
    %54 = vector.load %arg5[%c2_47, %c0_48, %c0_49] : memref<3x20x60xf32, #tpu.memory_space<vmem>>, vector<1x20x60xf32>
    %55 = vector.shape_cast %54 : vector<1x20x60xf32> to vector<20x60xf32>
    %cst_50 = arith.constant dense<0.000000e+00> : vector<20x200xf32>
    %56 = tpu.matmul %55, %45, %cst_50 {dimension_numbers = #tpu.dot_dimension_numbers<[1], [0], [0], [1], [0, 0, 1, 1], [], []>} : vector<20x60xf32>, vector<60x200xf32>, vector<20x200xf32> -> vector<20x200xf32>
    %57 = arith.maximumf %53, %56 : vector<20x200xf32>
    %c2_51 = arith.constant 2 : index
    %c0_52 = arith.constant 0 : index
    %c0_53 = arith.constant 0 : index
    %58 = vector.load %arg4[%c2_51, %c0_52, %c0_53] : memref<3x600x200xf32, #tpu.memory_space<vmem>>, vector<1x600x200xf32>
    %59 = vector.shape_cast %58 : vector<1x600x200xf32> to vector<600x200xf32>
    %cst_54 = arith.constant dense<0.000000e+00> : vector<60x200xf32>
    %60 = tpu.matmul %28, %59, %cst_54 {dimension_numbers = #tpu.dot_dimension_numbers<[1], [0], [0], [1], [0, 0, 1, 1], [], []>} : vector<60x600xf32>, vector<600x200xf32>, vector<60x200xf32> -> vector<60x200xf32>
    %c0_55 = arith.constant 0 : index
    %c0_56 = arith.constant 0 : index
    %c0_57 = arith.constant 0 : index
    %61 = vector.load %arg5[%c0_55, %c0_56, %c0_57] : memref<3x20x60xf32, #tpu.memory_space<vmem>>, vector<1x20x60xf32>
    %62 = vector.shape_cast %61 : vector<1x20x60xf32> to vector<20x60xf32>
    %cst_58 = arith.constant dense<0.000000e+00> : vector<20x200xf32>
    %63 = tpu.matmul %62, %60, %cst_58 {dimension_numbers = #tpu.dot_dimension_numbers<[1], [0], [0], [1], [0, 0, 1, 1], [], []>} : vector<20x60xf32>, vector<60x200xf32>, vector<20x200xf32> -> vector<20x200xf32>
    %64 = arith.maximumf %57, %63 : vector<20x200xf32>
    %c1_59 = arith.constant 1 : index
    %c0_60 = arith.constant 0 : index
    %c0_61 = arith.constant 0 : index
    %65 = vector.load %arg5[%c1_59, %c0_60, %c0_61] : memref<3x20x60xf32, #tpu.memory_space<vmem>>, vector<1x20x60xf32>
    %66 = vector.shape_cast %65 : vector<1x20x60xf32> to vector<20x60xf32>
    %cst_62 = arith.constant dense<0.000000e+00> : vector<20x200xf32>
    %67 = tpu.matmul %66, %60, %cst_62 {dimension_numbers = #tpu.dot_dimension_numbers<[1], [0], [0], [1], [0, 0, 1, 1], [], []>} : vector<20x60xf32>, vector<60x200xf32>, vector<20x200xf32> -> vector<20x200xf32>
    %68 = arith.maximumf %64, %67 : vector<20x200xf32>
    %c2_63 = arith.constant 2 : index
    %c0_64 = arith.constant 0 : index
    %c0_65 = arith.constant 0 : index
    %69 = vector.load %arg5[%c2_63, %c0_64, %c0_65] : memref<3x20x60xf32, #tpu.memory_space<vmem>>, vector<1x20x60xf32>
    %70 = vector.shape_cast %69 : vector<1x20x60xf32> to vector<20x60xf32>
    %cst_66 = arith.constant dense<0.000000e+00> : vector<20x200xf32>
    %71 = tpu.matmul %70, %60, %cst_66 {dimension_numbers = #tpu.dot_dimension_numbers<[1], [0], [0], [1], [0, 0, 1, 1], [], []>} : vector<20x60xf32>, vector<60x200xf32>, vector<20x200xf32> -> vector<20x200xf32>
    %72 = arith.maximumf %68, %71 : vector<20x200xf32>
    %cst_67 = arith.constant 0.000000e+00 : f32
    %73 = vector.broadcast %cst_67 : f32 to vector<20x200xf32>
    %74 = arith.maximumf %72, %73 : vector<20x200xf32>
    %75 = vector.extract_strided_slice %74 {offsets = [0, 0], sizes = [16, 200], strides = [1, 1]} : vector<20x200xf32> to vector<16x200xf32>
    %c0_68 = arith.constant 0 : index
    %c0_69 = arith.constant 0 : index
    %c0_70 = arith.constant 0 : index
    %76 = vector.load %arg6[%c0_68, %c0_69, %c0_70] : memref<5x200x320xf32, #tpu.memory_space<vmem>>, vector<1x200x320xf32>
    %77 = vector.shape_cast %76 : vector<1x200x320xf32> to vector<200x320xf32>
    %cst_71 = arith.constant dense<0.000000e+00> : vector<16x320xf32>
    %78 = tpu.matmul %75, %77, %cst_71 {dimension_numbers = #tpu.dot_dimension_numbers<[1], [0], [0], [1], [0, 0, 1, 1], [], []>} : vector<16x200xf32>, vector<200x320xf32>, vector<16x320xf32> -> vector<16x320xf32>
    %79 = vector.extract_strided_slice %74 {offsets = [1, 0], sizes = [16, 200], strides = [1, 1]} : vector<20x200xf32> to vector<16x200xf32>
    %c1_72 = arith.constant 1 : index
    %c0_73 = arith.constant 0 : index
    %c0_74 = arith.constant 0 : index
    %80 = vector.load %arg6[%c1_72, %c0_73, %c0_74] : memref<5x200x320xf32, #tpu.memory_space<vmem>>, vector<1x200x320xf32>
    %81 = vector.shape_cast %80 : vector<1x200x320xf32> to vector<200x320xf32>
    %cst_75 = arith.constant dense<0.000000e+00> : vector<16x320xf32>
    %82 = tpu.matmul %79, %81, %cst_75 {dimension_numbers = #tpu.dot_dimension_numbers<[1], [0], [0], [1], [0, 0, 1, 1], [], []>} : vector<16x200xf32>, vector<200x320xf32>, vector<16x320xf32> -> vector<16x320xf32>
    %83 = arith.addf %78, %82 : vector<16x320xf32>
    %84 = vector.extract_strided_slice %74 {offsets = [2, 0], sizes = [16, 200], strides = [1, 1]} : vector<20x200xf32> to vector<16x200xf32>
    %c2_76 = arith.constant 2 : index
    %c0_77 = arith.constant 0 : index
    %c0_78 = arith.constant 0 : index
    %85 = vector.load %arg6[%c2_76, %c0_77, %c0_78] : memref<5x200x320xf32, #tpu.memory_space<vmem>>, vector<1x200x320xf32>
    %86 = vector.shape_cast %85 : vector<1x200x320xf32> to vector<200x320xf32>
    %cst_79 = arith.constant dense<0.000000e+00> : vector<16x320xf32>
    %87 = tpu.matmul %84, %86, %cst_79 {dimension_numbers = #tpu.dot_dimension_numbers<[1], [0], [0], [1], [0, 0, 1, 1], [], []>} : vector<16x200xf32>, vector<200x320xf32>, vector<16x320xf32> -> vector<16x320xf32>
    %88 = arith.addf %83, %87 : vector<16x320xf32>
    %89 = vector.extract_strided_slice %74 {offsets = [3, 0], sizes = [16, 200], strides = [1, 1]} : vector<20x200xf32> to vector<16x200xf32>
    %c3_80 = arith.constant 3 : index
    %c0_81 = arith.constant 0 : index
    %c0_82 = arith.constant 0 : index
    %90 = vector.load %arg6[%c3_80, %c0_81, %c0_82] : memref<5x200x320xf32, #tpu.memory_space<vmem>>, vector<1x200x320xf32>
    %91 = vector.shape_cast %90 : vector<1x200x320xf32> to vector<200x320xf32>
    %cst_83 = arith.constant dense<0.000000e+00> : vector<16x320xf32>
    %92 = tpu.matmul %89, %91, %cst_83 {dimension_numbers = #tpu.dot_dimension_numbers<[1], [0], [0], [1], [0, 0, 1, 1], [], []>} : vector<16x200xf32>, vector<200x320xf32>, vector<16x320xf32> -> vector<16x320xf32>
    %93 = arith.addf %88, %92 : vector<16x320xf32>
    %94 = vector.extract_strided_slice %74 {offsets = [4, 0], sizes = [16, 200], strides = [1, 1]} : vector<20x200xf32> to vector<16x200xf32>
    %c4_84 = arith.constant 4 : index
    %c0_85 = arith.constant 0 : index
    %c0_86 = arith.constant 0 : index
    %95 = vector.load %arg6[%c4_84, %c0_85, %c0_86] : memref<5x200x320xf32, #tpu.memory_space<vmem>>, vector<1x200x320xf32>
    %96 = vector.shape_cast %95 : vector<1x200x320xf32> to vector<200x320xf32>
    %cst_87 = arith.constant dense<0.000000e+00> : vector<16x320xf32>
    %97 = tpu.matmul %94, %96, %cst_87 {dimension_numbers = #tpu.dot_dimension_numbers<[1], [0], [0], [1], [0, 0, 1, 1], [], []>} : vector<16x200xf32>, vector<200x320xf32>, vector<16x320xf32> -> vector<16x320xf32>
    %98 = arith.addf %93, %97 : vector<16x320xf32>
    %c0_88 = arith.constant 0 : index
    %c0_89 = arith.constant 0 : index
    %99 = vector.load %arg7[%c0_88, %c0_89] : memref<1x320xf32, #tpu.memory_space<vmem>>, vector<1x320xf32>
    %100 = vector.broadcast %99 : vector<1x320xf32> to vector<16x320xf32>
    %101 = arith.addf %98, %100 : vector<16x320xf32>
    %c0_90 = arith.constant 0 : index
    %c0_91 = arith.constant 0 : index
    %c0_92 = arith.constant 0 : index
    %102 = vector.load %arg8[%c0_90, %c0_91, %c0_92] : memref<3x320x100xf32, #tpu.memory_space<vmem>>, vector<1x320x100xf32>
    %103 = vector.shape_cast %102 : vector<1x320x100xf32> to vector<320x100xf32>
    %cst_93 = arith.constant dense<0.000000e+00> : vector<16x100xf32>
    %104 = tpu.matmul %101, %103, %cst_93 {dimension_numbers = #tpu.dot_dimension_numbers<[1], [0], [0], [1], [0, 0, 1, 1], [], []>} : vector<16x320xf32>, vector<320x100xf32>, vector<16x100xf32> -> vector<16x100xf32>
    %c0_94 = arith.constant 0 : index
    %c0_95 = arith.constant 0 : index
    %c0_96 = arith.constant 0 : index
    %105 = vector.load %arg9[%c0_94, %c0_95, %c0_96] : memref<3x5x16xf32, #tpu.memory_space<vmem>>, vector<1x5x16xf32>
    %106 = vector.shape_cast %105 : vector<1x5x16xf32> to vector<5x16xf32>
    %cst_97 = arith.constant dense<0.000000e+00> : vector<5x100xf32>
    %107 = tpu.matmul %106, %104, %cst_97 {dimension_numbers = #tpu.dot_dimension_numbers<[1], [0], [0], [1], [0, 0, 1, 1], [], []>} : vector<5x16xf32>, vector<16x100xf32>, vector<5x100xf32> -> vector<5x100xf32>
    %c1_98 = arith.constant 1 : index
    %c0_99 = arith.constant 0 : index
    %c0_100 = arith.constant 0 : index
    %108 = vector.load %arg9[%c1_98, %c0_99, %c0_100] : memref<3x5x16xf32, #tpu.memory_space<vmem>>, vector<1x5x16xf32>
    %109 = vector.shape_cast %108 : vector<1x5x16xf32> to vector<5x16xf32>
    %cst_101 = arith.constant dense<0.000000e+00> : vector<5x100xf32>
    %110 = tpu.matmul %109, %104, %cst_101 {dimension_numbers = #tpu.dot_dimension_numbers<[1], [0], [0], [1], [0, 0, 1, 1], [], []>} : vector<5x16xf32>, vector<16x100xf32>, vector<5x100xf32> -> vector<5x100xf32>
    %111 = arith.maximumf %107, %110 : vector<5x100xf32>
    %c2_102 = arith.constant 2 : index
    %c0_103 = arith.constant 0 : index
    %c0_104 = arith.constant 0 : index
    %112 = vector.load %arg9[%c2_102, %c0_103, %c0_104] : memref<3x5x16xf32, #tpu.memory_space<vmem>>, vector<1x5x16xf32>
    %113 = vector.shape_cast %112 : vector<1x5x16xf32> to vector<5x16xf32>
    %cst_105 = arith.constant dense<0.000000e+00> : vector<5x100xf32>
    %114 = tpu.matmul %113, %104, %cst_105 {dimension_numbers = #tpu.dot_dimension_numbers<[1], [0], [0], [1], [0, 0, 1, 1], [], []>} : vector<5x16xf32>, vector<16x100xf32>, vector<5x100xf32> -> vector<5x100xf32>
    %115 = arith.maximumf %111, %114 : vector<5x100xf32>
    %c1_106 = arith.constant 1 : index
    %c0_107 = arith.constant 0 : index
    %c0_108 = arith.constant 0 : index
    %116 = vector.load %arg8[%c1_106, %c0_107, %c0_108] : memref<3x320x100xf32, #tpu.memory_space<vmem>>, vector<1x320x100xf32>
    %117 = vector.shape_cast %116 : vector<1x320x100xf32> to vector<320x100xf32>
    %cst_109 = arith.constant dense<0.000000e+00> : vector<16x100xf32>
    %118 = tpu.matmul %101, %117, %cst_109 {dimension_numbers = #tpu.dot_dimension_numbers<[1], [0], [0], [1], [0, 0, 1, 1], [], []>} : vector<16x320xf32>, vector<320x100xf32>, vector<16x100xf32> -> vector<16x100xf32>
    %c0_110 = arith.constant 0 : index
    %c0_111 = arith.constant 0 : index
    %c0_112 = arith.constant 0 : index
    %119 = vector.load %arg9[%c0_110, %c0_111, %c0_112] : memref<3x5x16xf32, #tpu.memory_space<vmem>>, vector<1x5x16xf32>
    %120 = vector.shape_cast %119 : vector<1x5x16xf32> to vector<5x16xf32>
    %cst_113 = arith.constant dense<0.000000e+00> : vector<5x100xf32>
    %121 = tpu.matmul %120, %118, %cst_113 {dimension_numbers = #tpu.dot_dimension_numbers<[1], [0], [0], [1], [0, 0, 1, 1], [], []>} : vector<5x16xf32>, vector<16x100xf32>, vector<5x100xf32> -> vector<5x100xf32>
    %122 = arith.maximumf %115, %121 : vector<5x100xf32>
    %c1_114 = arith.constant 1 : index
    %c0_115 = arith.constant 0 : index
    %c0_116 = arith.constant 0 : index
    %123 = vector.load %arg9[%c1_114, %c0_115, %c0_116] : memref<3x5x16xf32, #tpu.memory_space<vmem>>, vector<1x5x16xf32>
    %124 = vector.shape_cast %123 : vector<1x5x16xf32> to vector<5x16xf32>
    %cst_117 = arith.constant dense<0.000000e+00> : vector<5x100xf32>
    %125 = tpu.matmul %124, %118, %cst_117 {dimension_numbers = #tpu.dot_dimension_numbers<[1], [0], [0], [1], [0, 0, 1, 1], [], []>} : vector<5x16xf32>, vector<16x100xf32>, vector<5x100xf32> -> vector<5x100xf32>
    %126 = arith.maximumf %122, %125 : vector<5x100xf32>
    %c2_118 = arith.constant 2 : index
    %c0_119 = arith.constant 0 : index
    %c0_120 = arith.constant 0 : index
    %127 = vector.load %arg9[%c2_118, %c0_119, %c0_120] : memref<3x5x16xf32, #tpu.memory_space<vmem>>, vector<1x5x16xf32>
    %128 = vector.shape_cast %127 : vector<1x5x16xf32> to vector<5x16xf32>
    %cst_121 = arith.constant dense<0.000000e+00> : vector<5x100xf32>
    %129 = tpu.matmul %128, %118, %cst_121 {dimension_numbers = #tpu.dot_dimension_numbers<[1], [0], [0], [1], [0, 0, 1, 1], [], []>} : vector<5x16xf32>, vector<16x100xf32>, vector<5x100xf32> -> vector<5x100xf32>
    %130 = arith.maximumf %126, %129 : vector<5x100xf32>
    %c2_122 = arith.constant 2 : index
    %c0_123 = arith.constant 0 : index
    %c0_124 = arith.constant 0 : index
    %131 = vector.load %arg8[%c2_122, %c0_123, %c0_124] : memref<3x320x100xf32, #tpu.memory_space<vmem>>, vector<1x320x100xf32>
    %132 = vector.shape_cast %131 : vector<1x320x100xf32> to vector<320x100xf32>
    %cst_125 = arith.constant dense<0.000000e+00> : vector<16x100xf32>
    %133 = tpu.matmul %101, %132, %cst_125 {dimension_numbers = #tpu.dot_dimension_numbers<[1], [0], [0], [1], [0, 0, 1, 1], [], []>} : vector<16x320xf32>, vector<320x100xf32>, vector<16x100xf32> -> vector<16x100xf32>
    %c0_126 = arith.constant 0 : index
    %c0_127 = arith.constant 0 : index
    %c0_128 = arith.constant 0 : index
    %134 = vector.load %arg9[%c0_126, %c0_127, %c0_128] : memref<3x5x16xf32, #tpu.memory_space<vmem>>, vector<1x5x16xf32>
    %135 = vector.shape_cast %134 : vector<1x5x16xf32> to vector<5x16xf32>
    %cst_129 = arith.constant dense<0.000000e+00> : vector<5x100xf32>
    %136 = tpu.matmul %135, %133, %cst_129 {dimension_numbers = #tpu.dot_dimension_numbers<[1], [0], [0], [1], [0, 0, 1, 1], [], []>} : vector<5x16xf32>, vector<16x100xf32>, vector<5x100xf32> -> vector<5x100xf32>
    %137 = arith.maximumf %130, %136 : vector<5x100xf32>
    %c1_130 = arith.constant 1 : index
    %c0_131 = arith.constant 0 : index
    %c0_132 = arith.constant 0 : index
    %138 = vector.load %arg9[%c1_130, %c0_131, %c0_132] : memref<3x5x16xf32, #tpu.memory_space<vmem>>, vector<1x5x16xf32>
    %139 = vector.shape_cast %138 : vector<1x5x16xf32> to vector<5x16xf32>
    %cst_133 = arith.constant dense<0.000000e+00> : vector<5x100xf32>
    %140 = tpu.matmul %139, %133, %cst_133 {dimension_numbers = #tpu.dot_dimension_numbers<[1], [0], [0], [1], [0, 0, 1, 1], [], []>} : vector<5x16xf32>, vector<16x100xf32>, vector<5x100xf32> -> vector<5x100xf32>
    %141 = arith.maximumf %137, %140 : vector<5x100xf32>
    %c2_134 = arith.constant 2 : index
    %c0_135 = arith.constant 0 : index
    %c0_136 = arith.constant 0 : index
    %142 = vector.load %arg9[%c2_134, %c0_135, %c0_136] : memref<3x5x16xf32, #tpu.memory_space<vmem>>, vector<1x5x16xf32>
    %143 = vector.shape_cast %142 : vector<1x5x16xf32> to vector<5x16xf32>
    %cst_137 = arith.constant dense<0.000000e+00> : vector<5x100xf32>
    %144 = tpu.matmul %143, %133, %cst_137 {dimension_numbers = #tpu.dot_dimension_numbers<[1], [0], [0], [1], [0, 0, 1, 1], [], []>} : vector<5x16xf32>, vector<16x100xf32>, vector<5x100xf32> -> vector<5x100xf32>
    %145 = arith.maximumf %141, %144 : vector<5x100xf32>
    %cst_138 = arith.constant 0.000000e+00 : f32
    %146 = vector.broadcast %cst_138 : f32 to vector<5x100xf32>
    %147 = arith.maximumf %145, %146 : vector<5x100xf32>
    %148 = vector.extract_strided_slice %147 {offsets = [0, 0], sizes = [1, 100], strides = [1, 1]} : vector<5x100xf32> to vector<1x100xf32>
    %c0_139 = arith.constant 0 : index
    %c0_140 = arith.constant 0 : index
    %c0_141 = arith.constant 0 : index
    %149 = vector.load %arg10[%c0_139, %c0_140, %c0_141] : memref<5x100x100xf32, #tpu.memory_space<vmem>>, vector<1x100x100xf32>
    %150 = vector.shape_cast %149 : vector<1x100x100xf32> to vector<100x100xf32>
    %cst_142 = arith.constant dense<0.000000e+00> : vector<1x100xf32>
    %151 = tpu.matmul %148, %150, %cst_142 {dimension_numbers = #tpu.dot_dimension_numbers<[1], [0], [0], [1], [0, 0, 1, 1], [], []>} : vector<1x100xf32>, vector<100x100xf32>, vector<1x100xf32> -> vector<1x100xf32>
    %152 = vector.extract_strided_slice %147 {offsets = [1, 0], sizes = [1, 100], strides = [1, 1]} : vector<5x100xf32> to vector<1x100xf32>
    %c1_143 = arith.constant 1 : index
    %c0_144 = arith.constant 0 : index
    %c0_145 = arith.constant 0 : index
    %153 = vector.load %arg10[%c1_143, %c0_144, %c0_145] : memref<5x100x100xf32, #tpu.memory_space<vmem>>, vector<1x100x100xf32>
    %154 = vector.shape_cast %153 : vector<1x100x100xf32> to vector<100x100xf32>
    %cst_146 = arith.constant dense<0.000000e+00> : vector<1x100xf32>
    %155 = tpu.matmul %152, %154, %cst_146 {dimension_numbers = #tpu.dot_dimension_numbers<[1], [0], [0], [1], [0, 0, 1, 1], [], []>} : vector<1x100xf32>, vector<100x100xf32>, vector<1x100xf32> -> vector<1x100xf32>
    %156 = arith.addf %151, %155 : vector<1x100xf32>
    %157 = vector.extract_strided_slice %147 {offsets = [2, 0], sizes = [1, 100], strides = [1, 1]} : vector<5x100xf32> to vector<1x100xf32>
    %c2_147 = arith.constant 2 : index
    %c0_148 = arith.constant 0 : index
    %c0_149 = arith.constant 0 : index
    %158 = vector.load %arg10[%c2_147, %c0_148, %c0_149] : memref<5x100x100xf32, #tpu.memory_space<vmem>>, vector<1x100x100xf32>
    %159 = vector.shape_cast %158 : vector<1x100x100xf32> to vector<100x100xf32>
    %cst_150 = arith.constant dense<0.000000e+00> : vector<1x100xf32>
    %160 = tpu.matmul %157, %159, %cst_150 {dimension_numbers = #tpu.dot_dimension_numbers<[1], [0], [0], [1], [0, 0, 1, 1], [], []>} : vector<1x100xf32>, vector<100x100xf32>, vector<1x100xf32> -> vector<1x100xf32>
    %161 = arith.addf %156, %160 : vector<1x100xf32>
    %162 = vector.extract_strided_slice %147 {offsets = [3, 0], sizes = [1, 100], strides = [1, 1]} : vector<5x100xf32> to vector<1x100xf32>
    %c3_151 = arith.constant 3 : index
    %c0_152 = arith.constant 0 : index
    %c0_153 = arith.constant 0 : index
    %163 = vector.load %arg10[%c3_151, %c0_152, %c0_153] : memref<5x100x100xf32, #tpu.memory_space<vmem>>, vector<1x100x100xf32>
    %164 = vector.shape_cast %163 : vector<1x100x100xf32> to vector<100x100xf32>
    %cst_154 = arith.constant dense<0.000000e+00> : vector<1x100xf32>
    %165 = tpu.matmul %162, %164, %cst_154 {dimension_numbers = #tpu.dot_dimension_numbers<[1], [0], [0], [1], [0, 0, 1, 1], [], []>} : vector<1x100xf32>, vector<100x100xf32>, vector<1x100xf32> -> vector<1x100xf32>
    %166 = arith.addf %161, %165 : vector<1x100xf32>
    %167 = vector.extract_strided_slice %147 {offsets = [4, 0], sizes = [1, 100], strides = [1, 1]} : vector<5x100xf32> to vector<1x100xf32>
    %c4_155 = arith.constant 4 : index
    %c0_156 = arith.constant 0 : index
    %c0_157 = arith.constant 0 : index
    %168 = vector.load %arg10[%c4_155, %c0_156, %c0_157] : memref<5x100x100xf32, #tpu.memory_space<vmem>>, vector<1x100x100xf32>
    %169 = vector.shape_cast %168 : vector<1x100x100xf32> to vector<100x100xf32>
    %cst_158 = arith.constant dense<0.000000e+00> : vector<1x100xf32>
    %170 = tpu.matmul %167, %169, %cst_158 {dimension_numbers = #tpu.dot_dimension_numbers<[1], [0], [0], [1], [0, 0, 1, 1], [], []>} : vector<1x100xf32>, vector<100x100xf32>, vector<1x100xf32> -> vector<1x100xf32>
    %171 = arith.addf %166, %170 : vector<1x100xf32>
    %c0_159 = arith.constant 0 : index
    %c0_160 = arith.constant 0 : index
    %172 = vector.load %arg11[%c0_159, %c0_160] : memref<1x100xf32, #tpu.memory_space<vmem>>, vector<1x100xf32>
    %173 = arith.addf %171, %172 : vector<1x100xf32>
    %c0_161 = arith.constant 0 : index
    %c0_162 = arith.constant 0 : index
    %174 = vector.load %arg12[%c0_161, %c0_162] : memref<100x15xf32, #tpu.memory_space<vmem>>, vector<100x15xf32>
    %cst_163 = arith.constant dense<0.000000e+00> : vector<1x15xf32>
    %175 = tpu.matmul %173, %174, %cst_163 {dimension_numbers = #tpu.dot_dimension_numbers<[1], [0], [0], [1], [0, 0, 1, 1], [], []>} : vector<1x100xf32>, vector<100x15xf32>, vector<1x15xf32> -> vector<1x15xf32>
    %c0_164 = arith.constant 0 : index
    %c0_165 = arith.constant 0 : index
    %176 = vector.load %arg13[%c0_164, %c0_165] : memref<1x15xf32, #tpu.memory_space<vmem>>, vector<1x15xf32>
    %177 = arith.addf %175, %176 : vector<1x15xf32>
    %c0_166 = arith.constant 0 : index
    %c0_167 = arith.constant 0 : index
    %c0_168 = arith.constant 0 : index
    %178 = vector.load %arg14[%c0_166, %c0_167, %c0_168] : memref<1x1x15xf32, #tpu.memory_space<vmem>>, vector<1x1x15xf32>
    %179 = vector.shape_cast %178 : vector<1x1x15xf32> to vector<1x15xf32>
    %180 = vector.shape_cast %177 : vector<1x15xf32> to vector<1x1x15xf32>
    tpu.vector_store %arg14[%c0_166, %c0_167, %c0_168], %180 {strides = array<i32>} : memref<1x1x15xf32, #tpu.memory_space<vmem>>, vector<1x1x15xf32>,
    return
  }
  func.func @transform_0(%arg0: i32) -> (i32, i32, i32) {
    %c0_i32 = arith.constant 0 : i32
    %c0_i32_0 = arith.constant 0 : i32
    %c0_i32_1 = arith.constant 0 : i32
    return %arg0, %c0_i32, %c0_i32_0 : i32, i32, i32
  }
  func.func @transform_1(%arg0: i32) -> (i32, i32, i32) {
    %c0_i32 = arith.constant 0 : i32
    %c0_i32_0 = arith.constant 0 : i32
    %c0_i32_1 = arith.constant 0 : i32
    %c0_i32_2 = arith.constant 0 : i32
    return %c0_i32, %c0_i32_0, %c0_i32_1 : i32, i32, i32
  }
  func.func @transform_2(%arg0: i32) -> (i32, i32) {
    %c0_i32 = arith.constant 0 : i32
    %c0_i32_0 = arith.constant 0 : i32
    %c0_i32_1 = arith.constant 0 : i32
    return %c0_i32, %c0_i32_0 : i32, i32
  }
  func.func @transform_3(%arg0: i32) -> (i32, i32, i32) {
    %c0_i32 = arith.constant 0 : i32
    %c0_i32_0 = arith.constant 0 : i32
    %c0_i32_1 = arith.constant 0 : i32
    %c0_i32_2 = arith.constant 0 : i32
    return %c0_i32, %c0_i32_0, %c0_i32_1 : i32, i32, i32
  }
  func.func @transform_4(%arg0: i32) -> (i32, i32, i32) {
    %c0_i32 = arith.constant 0 : i32
    %c0_i32_0 = arith.constant 0 : i32
    %c0_i32_1 = arith.constant 0 : i32
    %c0_i32_2 = arith.constant 0 : i32
    return %c0_i32, %c0_i32_0, %c0_i32_1 : i32, i32, i32
  }
  func.func @transform_5(%arg0: i32) -> (i32, i32, i32) {
    %c0_i32 = arith.constant 0 : i32
    %c0_i32_0 = arith.constant 0 : i32
    %c0_i32_1 = arith.constant 0 : i32
    %c0_i32_2 = arith.constant 0 : i32
    return %c0_i32, %c0_i32_0, %c0_i32_1 : i32, i32, i32
  }
  func.func @transform_6(%arg0: i32) -> (i32, i32) {
    %c0_i32 = arith.constant 0 : i32
    %c0_i32_0 = arith.constant 0 : i32
    %c0_i32_1 = arith.constant 0 : i32
    return %c0_i32, %c0_i32_0 : i32, i32
  }
  func.func @transform_7(%arg0: i32) -> (i32, i32, i32) {
    %c0_i32 = arith.constant 0 : i32
    %c0_i32_0 = arith.constant 0 : i32
    %c0_i32_1 = arith.constant 0 : i32
    %c0_i32_2 = arith.constant 0 : i32
    return %c0_i32, %c0_i32_0, %c0_i32_1 : i32, i32, i32
  }
  func.func @transform_8(%arg0: i32) -> (i32, i32, i32) {
    %c0_i32 = arith.constant 0 : i32
    %c0_i32_0 = arith.constant 0 : i32
    %c0_i32_1 = arith.constant 0 : i32
    %c0_i32_2 = arith.constant 0 : i32
    return %c0_i32, %c0_i32_0, %c0_i32_1 : i32, i32, i32
  }
  func.func @transform_9(%arg0: i32) -> (i32, i32, i32) {
    %c0_i32 = arith.constant 0 : i32
    %c0_i32_0 = arith.constant 0 : i32
    %c0_i32_1 = arith.constant 0 : i32
    %c0_i32_2 = arith.constant 0 : i32
    return %c0_i32, %c0_i32_0, %c0_i32_1 : i32, i32, i32
  }
  func.func @transform_10(%arg0: i32) -> (i32, i32) {
    %c0_i32 = arith.constant 0 : i32
    %c0_i32_0 = arith.constant 0 : i32
    %c0_i32_1 = arith.constant 0 : i32
    return %c0_i32, %c0_i32_0 : i32, i32
  }
  func.func @transform_11(%arg0: i32) -> (i32, i32) {
    %c0_i32 = arith.constant 0 : i32
    %c0_i32_0 = arith.constant 0 : i32
    %c0_i32_1 = arith.constant 0 : i32
    return %c0_i32, %c0_i32_0 : i32, i32
  }
  func.func @transform_12(%arg0: i32) -> (i32, i32) {
    %c0_i32 = arith.constant 0 : i32
    %c0_i32_0 = arith.constant 0 : i32
    %c0_i32_1 = arith.constant 0 : i32
    return %c0_i32, %c0_i32_0 : i32, i32
  }
  func.func @transform_13(%arg0: i32) -> (i32, i32, i32) {
    %c0_i32 = arith.constant 0 : i32
    %c0_i32_0 = arith.constant 0 : i32
    %c0_i32_1 = arith.constant 0 : i32
    return %arg0, %c0_i32, %c0_i32_0 : i32, i32, i32
  }
}

</mosaic_0001>

<bundles_post_ra>
// kernel: simple_net_dropout_forward.1
= control target key start
LH: loop header
LB: loop body
LE: loop exit
PB: predicated region body
PF: predicated region fallthrough
CT: control target
= control target key end

     0   :  { %18 = vsyncpa [#allocation3], 0  ;;  %s17312_s0 = inlined_call_operand.vmem [shape: f32[2,64,64], index: 0, kind: input, shape index: {}]   ;;  %s17313_s1 = inlined_call_operand.vmem [shape: f32[5,64,600], index: 1, kind: input, shape index: {}]   ;;  %s17314_s2 = inlined_call_operand.vmem [shape: f32[1,600], index: 2, kind: input, shape index: {}]   ;;  %s17315_s3 = inlined_call_operand.vmem [shape: f32[3,600,200], index: 3, kind: input, shape index: {}]   ;;  %s17316_s4 = inlined_call_operand.vmem [shape: f32[3,20,60], index: 4, kind: input, shape index: {}]   ;;  %s17317_s5 = inlined_call_operand.vmem [shape: f32[5,200,320], index: 5, kind: input, shape index: {}]   ;;  %s17318_s6 = inlined_call_operand.vmem [shape: f32[1,320], index: 6, kind: input, shape index: {}]   ;;  %s17319_s7 = inlined_call_operand.vmem [shape: f32[3,320,100], index: 7, kind: input, shape index: {}]   ;;  %s17320_s8 = inlined_call_operand.vmem [shape: f32[3,5,16], index: 8, kind: input, shape index: {}]   ;;  %s17321_s9 = inlined_call_operand.vmem [shape: f32[5,100,100], index: 9, kind: input, shape index: {}]   ;;  %s17322_s10 = inlined_call_operand.vmem [shape: f32[1,100], index: 10, kind: input, shape index: {}]   ;;  %s17323_s11 = inlined_call_operand.vmem [shape: f32[100,15], index: 11, kind: input, shape index: {}]   ;;  %s17324_s12 = inlined_call_operand.vmem [shape: f32[1,15], index: 12, kind: input, shape index: {}]   ;;  %s17325_s13 = inlined_call_operand.hbm [shape: f32[2,1,15], index: 13, kind: output, shape index: {}]  }
   0x1   :  { %20 = vsyncpa [#allocation3 + $0x1], 0  ;;  %s12022_s25 = smov 0   ;;  %s12024_s26 = smov 0  }
   0x2   :  { %s12026_s27 = smov 0   ;;  %s12028_s28 = smov 0  }
   0x3 LB: > { %17347 = sst [smem:[#allocation5_spill]] %s11941_s27  ;;  %s12043_s29 = sadd.s32 4294967295, %s11945_s28   ;;  %s11945_s28 = sphi %s12028_s28, %s17386_s28   ;;  %s11941_s27 = sphi %s12026_s27, %s17388_s27   ;;  %s11937_s26 = sphi %s12024_s26, %s17390_s26   ;;  %s11933_s25 = sphi %s12022_s25, %s17389_s25  }
   0x4   : > { %s8099_s30 = sadd.s32 4294967294, %s11945_s28   ;;  %s12047_s14 = sadd.s32 1, %s11945_s28  }
   0x5   : > { %17348 = sst [smem:[#allocation6_spill]] %s12047_s14  ;;  %s311_s15 = sadd.s32 1, %s11941_s27 }
   0x6   : > { %s308_s16 = ssub.s32 %s11945_s28, %s12047_s14  ;;  %p321_p0 = scmp.ne.s32.totalorder %s11941_s27, %s11937_s26 }
   0x7   : > { %p309_p1 = scmp.eq.s32.totalorder %s308_s16, 0  ;;  %p322_p2 = scmp.eq.s32.totalorder %s12043_s29, 1 }
   0x8   : > { %p327_p3 = scmp.ne.s32.totalorder %s11937_s26, %s11933_s25  ;;  %p328_p4 = scmp.eq.s32.totalorder %s8099_s30, 1 }
   0x9   : > { %s12058_s17 = scalar_select %p309_p1, %s11941_s27, %s311_s15  }
   0xa   : > { %p12060_p5 = por %p322_p2, %p321_p0  ;;  %p12064_p6 = por %p328_p4, %p327_p3 }
   0xb   : > { %17349 = sst [smem:[#allocation7_spill]] %s12058_s17  ;;  %p8102_p7 = scmp.ge.s32.totalorder %s11945_s28, 1 }
   0xc   : > { %s17351_s19 = scalar_select %p12064_p6, 1, 0 }
   0xd   : > { %p390_p8 = scmp.lt.s32.totalorder %s11945_s28, 3 }
   0xe   : > { %17352 = sst [smem:[#allocation8_spill]] %s17351_s19 }
   0xf   : > { %p391_p9 = pnand %p8102_p7, %p390_p8 }
  0x11   : > { %394 = sbr.rel (%p391_p9) target bundleno = 3824 (0xef0), region = 72 }
  0x18   : > { %v8106_v0 = vld [vmem:[%s17313_s1 + $0x148] sm:$0xff]  ;;  %v8111_v1 = vld [vmem:[%s17313_s1 + $0x170] sm:$0xff]  ;;  %v8108_v2 = vld [vmem:[%s17313_s1 + $0x158] sm:$0xff]  ;;  %p433_p10 = scmp.lt.s32.totalorder %s12043_s29, 1  ;;  %v17345_v7 = vmov 0.0   ;;  %vm535_vm0 = vcmask 1046528  }
  0x19   : > { %v10014_v3 = vpack.c.bf16 %v8111_v1, %v8106_v0  ;;  %v8113_v4 = vld [vmem:[%s17313_s1 + $0x180] sm:$0xff]  ;;  %v8110_v6 = vld [vmem:[%s17313_s1 + $0x168] sm:$0xff]  ;;  %632 = vmatprep.mubr.f32.mxu0 %v17345_v7  ;;  %745 = vmatprep.mubr.f32.mxu1 %v17345_v7  ;;  %v8107_v10 = vld [vmem:[%s17313_s1 + $0x150] sm:$0xff]  ;;  %vm551_vm1 = vcmask 523264   ;;  %vm1287_vm2 = vcmask 1045504   ;;  %vm1731_vm3 = vcmask 1044480  }
  0x1a   : > { %v8105_v5 = vld [vmem:[%s17313_s1 + $0x140] sm:$0xff]  ;;  %v10030_v8 = vpack.c.bf16 %v8113_v4, %v8108_v2  ;;  %v8112_v11 = vld [vmem:[%s17313_s1 + $0x178] sm:$0xff]  ;;  %s12101_s15 = scalar_select %p433_p10, %s12043_s29, 1  ;;  %v8118_v15 = vld [vmem:[%s17313_s1 + $0x1a8] sm:$0xff]  ;;  %vm2175_vm4 = vcmask 1043456   ;;  %vm2795_vm5 = vcmask 719872  }
  0x1b   : > { %v10016_v9 = vpack.c.bf16 %v8110_v6, %v8105_v5  ;;  %v8116_v12 = vld [vmem:[%s17313_s1 + $0x198] sm:$0xff]  ;;  %10015 = vmatprep.subr.bf16.mxu0 %v10014_v3  ;;  %v10032_v13 = vpack.c.bf16 %v8112_v11, %v8107_v10  ;;  %v8121_v14 = vld [vmem:[%s17313_s1 + $0x1c0] sm:$0xff]  ;;  %v8123_v16 = vld [vmem:[%s17313_s1 + $0x1d0] sm:$0xff]  ;;  %vm11948_vm6 = vmmov 1   ;;  %vm3162_vm8 = vcmask 490496   ;;  %s431_s24 = sand.u32 1, %s11937_s26  }
  0x1c   : > { %10031 = vmatprep.subr.bf16.mxu1 %v10030_v8  ;;  %v10018_v17 = vpack.c.bf16 %v8121_v14, %v8116_v12  ;;  %v10034_v18 = vpack.c.bf16 %v8123_v16, %v8118_v15  ;;  %v8115_v19 = vld [vmem:[%s17313_s1 + $0x190] sm:$0xff]  ;;  %v8120_v20 = vld [vmem:[%s17313_s1 + $0x1b8] sm:$0xff]  ;;  %v8117_v21 = vld [vmem:[%s17313_s1 + $0x1a0] sm:$0xff]  ;;  %s9244_s21 = sshll.u32 %s12101_s15, 6  ;;  %vm5166_vm9 = vcmask 588800   ;;  %vm11950_vm10 = vmmov 0  }
  0x1d   : > { %10017 = vmatpush1.bf16.msra.mxu0 %v10016_v9  ;;  %10033 = vmatpush1.bf16.msra.mxu1 %v10032_v13  ;;  %v10020_v22 = vpack.c.bf16 %v8120_v20, %v8115_v19  ;;  %v8122_v23 = vld [vmem:[%s17313_s1 + $0x1c8] sm:$0xff]  ;;  %v8131_v25 = vld [vmem:[%s17313_s1 + $0x210] sm:$0xff]  ;;  %v8128_v28 = vld [vmem:[%s17313_s1 + $0x1f8] sm:$0xff]  ;;  %s12152_s16 = scalar_lea.vmem %s17312_s0, %s9244_s21  ;;  %vm6449_vm11 = vcmask 130048   ;;  %vm7513_vm12 = vcmask 818176   ;;  %s9241_s21 = sshll.u32 %s12043_s29, 4 }
  0x1e   : > { %v8126_v24 = vld [vmem:[%s17313_s1 + $0x1e8] sm:$0xff]  ;;  %10019 = vmatprep.subr.bf16.mxu0 %v10018_v17  ;;  %10035 = vmatprep.subr.bf16.mxu1 %v10034_v18  ;;  %v10036_v26 = vpack.c.bf16 %v8122_v23, %v8117_v21  ;;  %v8133_v29 = vld [vmem:[%s17313_s1 + $0x220] sm:$0xff]  ;;  %v8127_v33 = vld [vmem:[%s17313_s1 + $0x1f0] sm:$0xff]  ;;  %s432_s27 = scalar_lea.vmem [#allocation2], %s431_s24  ;;  %vm8029_vm13 = vcmask 114688   ;;  %s17270_s20 = scalar_lea.hbm %s17325_s13, %s9241_s21 }
  0x1f   : > { %v10022_v27 = vpack.c.bf16 %v8131_v25, %v8126_v24  ;;  %v8125_v30 = vld [vmem:[%s17313_s1 + $0x1e0] sm:$0xff]  ;;  %v10038_v31 = vpack.c.bf16 %v8133_v29, %v8128_v28  ;;  %v8130_v32 = vld [vmem:[%s17313_s1 + $0x208] sm:$0xff]  ;;  %v8132_v34 = vld [vmem:[%s17313_s1 + $0x218] sm:$0xff]  ;;  %s8044_s14 = sshll.u32 %s432_s27, 4  ;;  %s8032_s22 = scalar_lea.sflag [#allocation3], %s431_s24  ;;  %s17272_s14 = int_to_ptr.vmem [resolvable:$true] %s8044_s14 }
  0x20   : > { %v10024_v35 = vpack.c.bf16 %v8130_v32, %v8125_v30  ;;  %v8136_v36 = vld [vmem:[%s17313_s1 + $0x238] sm:$0xff]  ;;  %v8141_v37 = vld [vmem:[%s17313_s1 + $0x260] sm:$0xff]  ;;  %v8138_v38 = vld [vmem:[%s17313_s1 + $0x248] sm:$0xff]  ;;  %v10040_v39 = vpack.c.bf16 %v8132_v34, %v8127_v33  ;;  %s11883_s19 = scalar_lea.vmem %s17272_s14, 16  ;;  %s11951_s29 = smov [#allocation2]  }
  0x21   : > { %10021 = vmatpush1.bf16.msra.mxu0 %v10020_v22  ;;  %10037 = vmatpush1.bf16.msra.mxu1 %v10036_v26  ;;  %v10026_v40 = vpack.c.bf16 %v8141_v37, %v8136_v36  ;;  %v8143_v41 = vld [vmem:[%s17313_s1 + $0x270] sm:$0xff]  ;;  %v8140_v43 = vld [vmem:[%s17313_s1 + $0x258] sm:$0xff]  ;;  %v8137_v45 = vld [vmem:[%s17313_s1 + $0x240] sm:$0xff]  ;;  %p11884_p11 = scmp.ne.s32.totalorder %s17272_s14, %s11883_s19  ;;  %s11887_s23 = sshll.u32 %s11951_s29, 4  ;;  %s11888_s23 = int_to_ptr.vmem [resolvable:$false] %s11887_s23 }
  0x22   : > { %10023 = vmatprep.subr.bf16.mxu0 %v10022_v27  ;;  %v8135_v42 = vld [vmem:[%s17313_s1 + $0x230] sm:$0xff]  ;;  %10039 = vmatprep.subr.bf16.mxu1 %v10038_v31  ;;  %v10042_v44 = vpack.c.bf16 %v8143_v41, %v8138_v38  ;;  %v8142_v46 = vld [vmem:[%s17313_s1 + $0x268] sm:$0xff]  ;;  %v12179_v47 = vld [vmem:[%s12152_s16] sm:$0xff]  ;;  %s11889_s30 = scalar_lea.vmem %s11888_s23, 32  ;;  %p11890_p0 = scmp.lt.s32.totalorder %s17272_s14, %s11888_s23 }
  0x23   : > { %v12182_v48 = vld [vmem:[%s12152_s16 + $0x8] sm:$0xff]  ;;  %v8109_v49 = vld [vmem:[%s17313_s1 + $0x160] sm:$0xff]  ;;  %v10028_v51 = vpack.c.bf16 %v8140_v43, %v8135_v42  ;;  %v536_v52 = vrot.slane %v12179_v47, 1  ;;  %v10044_v54 = vpack.c.bf16 %v8142_v46, %v8137_v45  ;;  %v12193_v56 = vld [vmem:[%s12152_s16 + $0x10] sm:$0xff]  ;;  %p11885_p12 = pnand %p11884_p11, %p12060_p5  ;;  %p11891_p1 = scmp.lt.s32.totalorder %s11889_s30, %s11883_s19 }
  0x24   : > { %v8114_v50 = vld [vmem:[%s17313_s1 + $0x188] sm:$0xff]  ;;  %v537_v53 = vrot.slane %v12182_v48, 1  ;;  %v8119_v57 = vld [vmem:[%s17313_s1 + $0x1b0] sm:$0xff]  ;;  %v449_v58 = vld [vmem:[%s17313_s1 + $0x18] sm:$0xff]  ;;  %v539_v1 = vrot.slane %v12193_v56, 1 }
  0x25   : > { %10025 = vmatpush1.bf16.msra.mxu0 %v10024_v35  ;;  %10041 = vmatpush1.bf16.msra.mxu1 %v10040_v39  ;;  %v10046_v55 = vpack.c.bf16 %v8114_v50, %v8109_v49  ;;  %v454_v59 = vld [vmem:[%s17313_s1 + $0x40] sm:$0xff]  ;;  %v8124_v60 = vld [vmem:[%s17313_s1 + $0x1d8] sm:$0xff]  ;;  %v448_v62 = vld [vmem:[%s17313_s1 + $0x10] sm:$0xff]  ;;  %p11886_p13 = pneg %p11885_p12  ;;  %p11892_p2 = por %p11891_p1, %p11890_p0 }
  0x26   : > { %10027 = vmatprep.subr.bf16.mxu0 %v10026_v40  ;;  %10043 = vmatprep.subr.bf16.mxu1 %v10042_v44  ;;  %v10078_v61 = vpack.c.bf16 %v454_v59, %v449_v58  ;;  %v453_v63 = vld [vmem:[%s17313_s1 + $0x38] sm:$0xff]  ;;  %v12214_v0 = vsel %vm535_vm0, %v536_v52, %v537_v53  ;;  %v459_v2 = vld [vmem:[%s17313_s1 + $0x68] sm:$0xff]  ;;  %v464_v3 = vld [vmem:[%s17313_s1 + $0x90] sm:$0xff]  ;;  %v10050_v5 = vpack.c.bf16 %v8124_v60, %v8119_v57 }
  0x27   : > { %v12224_v4 = vld [vmem:[%s12152_s16 + $0x18] sm:$0xff]  ;;  %v10080_v6 = vpack.c.bf16 %v453_v63, %v448_v62  ;;  %v8129_v8 = vld [vmem:[%s17313_s1 + $0x200] sm:$0xff]  ;;  %v8134_v9 = vld [vmem:[%s17313_s1 + $0x228] sm:$0xff]  ;;  %v10082_v10 = vpack.c.bf16 %v464_v3, %v459_v2  ;;  %v12244_v13 = vsel %vm535_vm0, %v537_v53, %v539_v1  ;;  %p11893_p3 = pnand %p11892_p2, %p11886_p13 }
  0x28   : > { %v458_v11 = vld [vmem:[%s17313_s1 + $0x60] sm:$0xff]  ;;  %v463_v12 = vld [vmem:[%s17313_s1 + $0x88] sm:$0xff]  ;;  %v541_v14 = vrot.slane %v12224_v4, 1  ;;  %v469_v15 = vld [vmem:[%s17313_s1 + $0xb8] sm:$0xff]  ;;  %v10054_v18 = vpack.c.bf16 %v8134_v9, %v8129_v8 }
  0x29   : > { %10029 = vmatpush1.bf16.msra.mxu0 %v10028_v51  ;;  %10045 = vmatpush1.bf16.msra.mxu1 %v10044_v54  ;;  %v474_v16 = vld [vmem:[%s17313_s1 + $0xe0] sm:$0xff]  ;;  %v10084_v19 = vpack.c.bf16 %v463_v12, %v458_v11  ;;  %v468_v20 = vld [vmem:[%s17313_s1 + $0xb0] sm:$0xff]  ;;  %v473_v22 = vld [vmem:[%s17313_s1 + $0xd8] sm:$0xff] }
  0x2a   : > { %10047 = vmatprep.subr.bf16.mxu0 %v10046_v55  ;;  %10079 = vmatprep.subr.bf16.mxu1 %v10078_v61  ;;  %v12255_v17 = vld [vmem:[%s12152_s16 + $0x20] sm:$0xff]  ;;  %v10086_v21 = vpack.c.bf16 %v474_v16, %v469_v15  ;;  %v8139_v23 = vld [vmem:[%s17313_s1 + $0x250] sm:$0xff]  ;;  %v8144_v24 = vld [vmem:[%s17313_s1 + $0x278] sm:$0xff]  ;;  %v12275_v25 = vsel %vm535_vm0, %v539_v1, %v541_v14  ;;  %v10088_v30 = vpack.c.bf16 %v473_v22, %v468_v20 }
  0x2b   : > { %v543_v26 = vrot.slane %v12255_v17, 1  ;;  %v479_v27 = vld [vmem:[%s17313_s1 + $0x108] sm:$0xff]  ;;  %v484_v28 = vld [vmem:[%s17313_s1 + $0x130] sm:$0xff]  ;;  %v10058_v31 = vpack.c.bf16 %v8144_v24, %v8139_v23  ;;  %v478_v32 = vld [vmem:[%s17313_s1 + $0x100] sm:$0xff] }
  0x2c   : > { %8145 = vmatmul.mubr.msk.f32.vlgmr.msra.gmra.mrb[0].mxu0 %vm551_vm1, %v12214_v0  ;;  %8153 = vmatmul.mubr.msk.f32.vlgmr.msra.gmra.mrb[0].mxu1 %vm551_vm1, %v12214_v0  ;;  %v12286_v29 = vld [vmem:[%s12152_s16 + $0x28] sm:$0xff]  ;;  %v10090_v33 = vpack.c.bf16 %v484_v28, %v479_v27  ;;  %v452_v36 = vld [vmem:[%s17313_s1 + $0x30] sm:$0xff]  ;;  %v8196_v39 = vld [vmem:[%s17313_s1 + $0x298] sm:$0xff] }
  0x2d   : > { %638 = vmatprep.mubr.f32.mxu0 %v17345_v7  ;;  %751 = vmatprep.mubr.f32.mxu1 %v17345_v7  ;;  %v483_v34 = vld [vmem:[%s17313_s1 + $0x128] sm:$0xff]  ;;  %v12306_v37 = vsel %vm535_vm0, %v541_v14, %v543_v26  ;;  %v545_v38 = vrot.slane %v12286_v29, 1  ;;  %v8201_v40 = vld [vmem:[%s17313_s1 + $0x2c0] sm:$0xff]  ;;  %v12317_v41 = vld [vmem:[%s12152_s16 + $0x30] sm:$0xff] }
  0x2e   : > { %10049 = vmatpush3.bf16.msra.mxu0 %v10046_v55  ;;  %10081 = vmatpush1.bf16.msra.mxu1 %v10080_v6  ;;  %v447_v35 = vld [vmem:[%s17313_s1 + $0x8] sm:$0xff]  ;;  %v10092_v42 = vpack.c.bf16 %v483_v34, %v478_v32  ;;  %v10126_v44 = vpack.c.bf16 %v8201_v40, %v8196_v39  ;;  %v547_v46 = vrot.slane %v12317_v41, 1  ;;  %v12330_v49 = vld [vmem:[%s12152_s16 + $0x38] sm:$0xff]  ;;  %v446_v53 = vld [vmem:[%s17313_s1] sm:$0xff] }
  0x2f   : > { %10051 = vmatprep.subr.bf16.mxu0 %v10050_v5  ;;  %10083 = vmatprep.subr.bf16.mxu1 %v10082_v10  ;;  %v10062_v43 = vpack.c.bf16 %v452_v36, %v447_v35  ;;  %v12325_v45 = vsel %vm535_vm0, %v543_v26, %v545_v38  ;;  %v12341_v51 = vrot.slane %v12330_v49, 1  ;;  %v451_v54 = vld [vmem:[%s17313_s1 + $0x28] sm:$0xff]  ;;  %v457_v55 = vld [vmem:[%s17313_s1 + $0x58] sm:$0xff]  ;;  %v462_v57 = vld [vmem:[%s17313_s1 + $0x80] sm:$0xff] }
  0x30   : > { %8146 = vmatmul.mubr.msk.f32.gmra.mrb[2].mxu0 %vm551_vm1, %v12244_v13  ;;  %8154 = vmatmul.mubr.msk.f32.gmra.mrb[2].mxu1 %vm551_vm1, %v12244_v13  ;;  %v12338_v50 = vsel %vm535_vm0, %v545_v38, %v547_v46  ;;  %v8195_v58 = vld [vmem:[%s17313_s1 + $0x290] sm:$0xff]  ;;  %v8200_v59 = vld [vmem:[%s17313_s1 + $0x2b8] sm:$0xff]  ;;  %v10064_v60 = vpack.c.bf16 %v451_v54, %v446_v53  ;;  %v8206_v61 = vld [vmem:[%s17313_s1 + $0x2e8] sm:$0xff] }
  0x31   : > { %644 = vmatprep.mubr.f32.mxu0 %v17345_v7  ;;  %757 = vmatprep.mubr.f32.mxu1 %v17345_v7  ;;  %v12351_v52 = vsel %vm535_vm0, %v547_v46, %v12341_v51  ;;  %v8211_v62 = vld [vmem:[%s17313_s1 + $0x310] sm:$0xff]  ;;  %v461_v1 = vld [vmem:[%s17313_s1 + $0x78] sm:$0xff]  ;;  %v467_v2 = vld [vmem:[%s17313_s1 + $0xa8] sm:$0xff]  ;;  %v10128_v3 = vpack.c.bf16 %v8200_v59, %v8195_v58  ;;  %v1288_v58 = vrot.slane %v12179_v47, 2  ;;  %v1289_v59 = vrot.slane %v12182_v48, 2 }
  0x32   : > { %10053 = vmatpush3.bf16.msra.mxu0 %v10050_v5  ;;  %10085 = vmatpush1.bf16.msra.mxu1 %v10084_v19  ;;  %v456_v63 = vld [vmem:[%s17313_s1 + $0x50] sm:$0xff]  ;;  %v10130_v6 = vpack.c.bf16 %v8211_v62, %v8206_v61  ;;  %v8205_v8 = vld [vmem:[%s17313_s1 + $0x2e0] sm:$0xff]  ;;  %v8210_v9 = vld [vmem:[%s17313_s1 + $0x308] sm:$0xff] }
  0x33   : > { %10055 = vmatprep.subr.bf16.mxu0 %v10054_v18  ;;  %10087 = vmatprep.subr.bf16.mxu1 %v10086_v21  ;;  %v472_v5 = vld [vmem:[%s17313_s1 + $0xd0] sm:$0xff]  ;;  %v10068_v10 = vpack.c.bf16 %v461_v1, %v456_v63  ;;  %v8216_v11 = vld [vmem:[%s17313_s1 + $0x338] sm:$0xff]  ;;  %v8221_v12 = vld [vmem:[%s17313_s1 + $0x360] sm:$0xff] }
  0x34   : > { %8147 = vmatmul.mubr.msk.f32.gmra.mrb[4].mxu0 %vm551_vm1, %v12275_v25  ;;  %8155 = vmatmul.mubr.msk.f32.gmra.mrb[4].mxu1 %vm551_vm1, %v12275_v25  ;;  %v471_v14 = vld [vmem:[%s17313_s1 + $0xc8] sm:$0xff]  ;;  %v10070_v15 = vpack.c.bf16 %v472_v5, %v467_v2  ;;  %v477_v16 = vld [vmem:[%s17313_s1 + $0xf8] sm:$0xff]  ;;  %v482_v19 = vld [vmem:[%s17313_s1 + $0x120] sm:$0xff]  ;;  %v10134_v20 = vpack.c.bf16 %v8221_v12, %v8216_v11  ;;  %v1291_v2 = vrot.slane %v12193_v56, 2  ;;  %v1293_v12 = vrot.slane %v12224_v4, 2 }
  0x35   : > { %650 = vmatprep.mubr.f32.mxu0 %v17345_v7  ;;  %763 = vmatprep.mubr.f32.mxu1 %v17345_v7  ;;  %v8215_v21 = vld [vmem:[%s17313_s1 + $0x330] sm:$0xff]  ;;  %v8220_v22 = vld [vmem:[%s17313_s1 + $0x358] sm:$0xff]  ;;  %v8226_v24 = vld [vmem:[%s17313_s1 + $0x388] sm:$0xff]  ;;  %v10074_v28 = vpack.c.bf16 %v482_v19, %v477_v16 }
  0x36   : > { %10057 = vmatpush3.bf16.msra.mxu0 %v10054_v18  ;;  %10089 = vmatpush1.bf16.msra.mxu1 %v10088_v30  ;;  %v10132_v18 = vpack.c.bf16 %v8210_v9, %v8205_v8  ;;  %v476_v26 = vld [vmem:[%s17313_s1 + $0xf0] sm:$0xff]  ;;  %v481_v27 = vld [vmem:[%s17313_s1 + $0x118] sm:$0xff]  ;;  %v450_v30 = vld [vmem:[%s17313_s1 + $0x20] sm:$0xff]  ;;  %v12575_v11 = vsel %vm1287_vm2, %v1289_v59, %v1291_v2 }
  0x37   : > { %10059 = vmatprep.subr.bf16.mxu0 %v10058_v31  ;;  %10091 = vmatprep.subr.bf16.mxu1 %v10090_v33  ;;  %v455_v32 = vld [vmem:[%s17313_s1 + $0x48] sm:$0xff]  ;;  %v8225_v34 = vld [vmem:[%s17313_s1 + $0x380] sm:$0xff]  ;;  %v10076_v36 = vpack.c.bf16 %v481_v27, %v476_v26  ;;  %v485_v53 = vld [vmem:[%s17313_s1 + $0x138] sm:$0xff] }
  0x38   : > { %8148 = vmatmul.mubr.msk.f32.gmra.mrb[6].mxu0 %vm551_vm1, %v12306_v37  ;;  %8156 = vmatmul.mubr.msk.f32.gmra.mrb[6].mxu1 %vm551_vm1, %v12306_v37  ;;  %v8230_v35 = vld [vmem:[%s17313_s1 + $0x3a8] sm:$0xff]  ;;  %v8265_v38 = vld [vmem:[%s17313_s1 + $0x400] sm:$0xff]  ;;  %v10094_v39 = vpack.c.bf16 %v455_v32, %v450_v30  ;;  %v8259_v61 = vld [vmem:[%s17313_s1 + $0x3d0] sm:$0xff]  ;;  %v1297_v30 = vrot.slane %v12286_v29, 2 }
  0x39   : > { %656 = vmatprep.mubr.f32.mxu0 %v17345_v7  ;;  %769 = vmatprep.mubr.f32.mxu1 %v17345_v7  ;;  %v10140_v40 = vpack.c.bf16 %v8230_v35, %v8225_v34  ;;  %v470_v46 = vld [vmem:[%s17313_s1 + $0xc0] sm:$0xff]  ;;  %v8264_v62 = vld [vmem:[%s17313_s1 + $0x3f8] sm:$0xff]  ;;  %v8270_v63 = vld [vmem:[%s17313_s1 + $0x428] sm:$0xff] }
  0x3a   : > { %10061 = vmatpush3.bf16.msra.mxu0 %v10058_v31  ;;  %10093 = vmatpush1.bf16.msra.mxu1 %v10092_v42  ;;  %v10136_v31 = vpack.c.bf16 %v8220_v22, %v8215_v21  ;;  %v460_v42 = vld [vmem:[%s17313_s1 + $0x70] sm:$0xff]  ;;  %v8274_v8 = vld [vmem:[%s17313_s1 + $0x448] sm:$0xff]  ;;  %v8280_v9 = vld [vmem:[%s17313_s1 + $0x478] sm:$0xff]  ;;  %v1295_v21 = vrot.slane %v12255_v17, 2 }
  0x3b   : > { %10063 = vmatprep.subr.bf16.mxu0 %v10062_v43  ;;  %10127 = vmatprep.subr.bf16.mxu1 %v10126_v44  ;;  %v465_v43 = vld [vmem:[%s17313_s1 + $0x98] sm:$0xff]  ;;  %v8275_v1 = vld [vmem:[%s17313_s1 + $0x450] sm:$0xff]  ;;  %v8329_v27 = vld [vmem:[%s17313_s1 + $0x540] sm:$0xff] }
  0x3c   : > { %8149 = vmatmul.mubr.msk.f32.gmra.mrb[8].mxu0 %vm551_vm1, %v12325_v45  ;;  %8157 = vmatmul.mubr.msk.f32.gmra.mrb[8].mxu1 %vm551_vm1, %v12325_v45  ;;  %v10178_v5 = vpack.c.bf16 %v8275_v1, %v8270_v63  ;;  %v8284_v16 = vld [vmem:[%s17313_s1 + $0x498] sm:$0xff]  ;;  %v8295_v19 = vld [vmem:[%s17313_s1 + $0x4f0] sm:$0xff]  ;;  %v8198_v32 = vld [vmem:[%s17313_s1 + $0x2a8] sm:$0xff] }
  0x3d   : > { %662 = vmatprep.mubr.f32.mxu0 %v17345_v7  ;;  %775 = vmatprep.mubr.f32.mxu1 %v17345_v7  ;;  %v8324_v26 = vld [vmem:[%s17313_s1 + $0x518] sm:$0xff]  ;;  %v8197_v63 = vld [vmem:[%s17313_s1 + $0x2a0] sm:$0xff]  ;;  %v8202_v1 = vld [vmem:[%s17313_s1 + $0x2c8] sm:$0xff] }
  0x3e   : > { %v10222_v34 = vpack.c.bf16 %v8329_v27, %v8324_v26  ;;  %v8204_v35 = vld [vmem:[%s17313_s1 + $0x2d8] sm:$0xff]  ;;  %v8349_v27 = vld [vmem:[%s17313_s1 + $0x5e0] sm:$0xff]  ;;  %vm13876_vm7 = vmpackc.low %vm2175_vm4, %vm11948_vm6 }
  0x3f   : > { %v8344_v26 = vld [vmem:[%s17313_s1 + $0x5b8] sm:$0xff] }
  0x40   : > { %8150 = vmatmul.mubr.msk.f32.gmra.mrb[10].mxu0 %vm551_vm1, %v12338_v50  ;;  %8158 = vmatmul.mubr.msk.f32.gmra.mrb[10].mxu1 %vm551_vm1, %v12338_v50 }
  0x41   : > { %668 = vmatprep.mubr.f32.mxu0 %v17345_v7  ;;  %781 = vmatprep.mubr.f32.mxu1 %v17345_v7 }
  0x44   : > { %8151 = vmatmul.mubr.msk.f32.gmra.mrb[12].mxu0 %vm551_vm1, %v12351_v52  ;;  %8159 = vmatmul.mubr.msk.f32.gmra.mrb[12].mxu1 %vm551_vm1, %v12351_v52 }
  0x45   : > { %674 = vmatprep.mubr.f32.mxu0 %v17345_v7  ;;  %787 = vmatprep.mubr.f32.mxu1 %v17345_v7 }
  0x48   : > { %8152 = vmatmul.mubr.msk.f32.gmra.mrb[14].mxu0 %vm551_vm1, %v12341_v51  ;;  %8160 = vmatmul.mubr.msk.f32.gmra.mrb[14].mxu1 %vm551_vm1, %v12341_v51 }
  0x49   : > { %9596 = vmatprep.mubr.msk.f32.mxu0 %vm551_vm1, %v12214_v0  ;;  %1092 = vmatprep.mubr.f32.mxu1 %v17345_v7  ;;  %v10066_v0 = vpack.c.bf16 %v462_v57, %v457_v55  ;;  %v8194_v55 = vld [vmem:[%s17313_s1 + $0x288] sm:$0xff]  ;;  %v8199_v57 = vld [vmem:[%s17313_s1 + $0x2b0] sm:$0xff] }
  0x4c   : > { %9597 = vmatmul.mubr.msk.f32.vlgmr.msra.gmra.mrb[16].mxu0 %vm551_vm1, %v12244_v13  ;;  %8177 = vmatmul.mubr.msk.f32.vlgmr.msra.gmra.mrb[0].mxu1 %vm551_vm1, %v12179_v47  ;;  %v466_v13 = vld [vmem:[%s17313_s1 + $0xa0] sm:$0xff] }
  0x4d   : > { %10065 = vmatpush1.bf16.msra.mxu0 %v10064_v60  ;;  %9599 = vmatprep.mubr.msk.f32.mxu0 %vm551_vm1, %v12275_v25  ;;  %v10072_v23 = vpack.c.bf16 %v471_v14, %v466_v13  ;;  %v8231_v25 = vld [vmem:[%s17313_s1 + $0x3b0] sm:$0xff]  ;;  %v10110_v60 = vpack.c.bf16 %v8199_v57, %v8194_v55  ;;  %v8224_v55 = vld [vmem:[%s17313_s1 + $0x378] sm:$0xff]  ;;  %v8229_v57 = vld [vmem:[%s17313_s1 + $0x3a0] sm:$0xff] }
  0x4e   : > { %1098 = vmatprep.mubr.f32.mxu1 %v17345_v7  ;;  %10067 = vmatprep.subr.bf16.mxu0 %v10066_v0  ;;  %v10138_v33 = vpack.c.bf16 %v8231_v25, %v8226_v24  ;;  %v12553_v0 = vsel %vm1287_vm2, %v1288_v58, %v1289_v59  ;;  %v8289_v24 = vld [vmem:[%s17313_s1 + $0x4c0] sm:$0xff]  ;;  %v8294_v25 = vld [vmem:[%s17313_s1 + $0x4e8] sm:$0xff] }
  0x4f   : > { %10129 = vmatpush1.bf16.msra.mxu1 %v10128_v3  ;;  %v10176_v3 = vpack.c.bf16 %v8264_v62, %v8259_v61  ;;  %v8228_v61 = vld [vmem:[%s17313_s1 + $0x398] sm:$0xff]  ;;  %v10122_v62 = vpack.c.bf16 %v8229_v57, %v8224_v55  ;;  %v8258_v55 = vld [vmem:[%s17313_s1 + $0x3c8] sm:$0xff]  ;;  %v8263_v57 = vld [vmem:[%s17313_s1 + $0x3f0] sm:$0xff] }
  0x50   : > { %9600 = vmatmul.mubr.msk.f32.gmra.mrb[18].mxu0 %vm551_vm1, %v12306_v37  ;;  %10131 = vmatprep.subr.bf16.mxu1 %v10130_v6  ;;  %v8260_v37 = vld [vmem:[%s17313_s1 + $0x3d8] sm:$0xff]  ;;  %v8269_v6 = vld [vmem:[%s17313_s1 + $0x420] sm:$0xff] }
  0x51   : > { %8178 = vmatmul.mubr.msk.f32.gmra.mrb[2].mxu1 %vm551_vm1, %v12182_v48  ;;  %10069 = vmatpush1.bf16.msra.mxu0 %v10068_v10  ;;  %v10174_v44 = vpack.c.bf16 %v8265_v38, %v8260_v37  ;;  %v8285_v10 = vld [vmem:[%s17313_s1 + $0x4a0] sm:$0xff]  ;;  %v10180_v13 = vpack.c.bf16 %v8274_v8, %v8269_v6  ;;  %v12642_v38 = vsel %vm1287_vm2, %v1295_v21, %v1297_v30  ;;  %v8207_v8 = vld [vmem:[%s17313_s1 + $0x2f0] sm:$0xff] }
  0x52   : > { %9602 = vmatprep.mubr.msk.f32.mxu0 %vm551_vm1, %v12325_v45  ;;  %1104 = vmatprep.mubr.f32.mxu1 %v17345_v7  ;;  %v10098_v45 = vpack.c.bf16 %v465_v43, %v460_v42  ;;  %v10182_v14 = vpack.c.bf16 %v8285_v10, %v8280_v9  ;;  %v8208_v42 = vld [vmem:[%s17313_s1 + $0x2f8] sm:$0xff]  ;;  %v10142_v6 = vpack.c.bf16 %v8202_v1, %v8197_v63  ;;  %v8323_v10 = vld [vmem:[%s17313_s1 + $0x510] sm:$0xff]  ;;  %v1743_v1 = vrot.slane %v12317_v41, 3 }
  0x53   : > { %10071 = vmatprep.subr.bf16.mxu0 %v10070_v15  ;;  %10133 = vmatpush1.bf16.msra.mxu1 %v10132_v18  ;;  %v8279_v15 = vld [vmem:[%s17313_s1 + $0x470] sm:$0xff]  ;;  %v8290_v18 = vld [vmem:[%s17313_s1 + $0x4c8] sm:$0xff]  ;;  %v8212_v9 = vld [vmem:[%s17313_s1 + $0x318] sm:$0xff] }
  0x54   : > { %9603 = vmatmul.mubr.msk.f32.gmra.mrb[20].mxu0 %vm551_vm1, %v12338_v50  ;;  %10135 = vmatprep.subr.bf16.mxu1 %v10134_v20  ;;  %v475_v50 = vld [vmem:[%s17313_s1 + $0xe8] sm:$0xff]  ;;  %v12597_v20 = vsel %vm1287_vm2, %v1291_v2, %v1293_v12  ;;  %v10184_v22 = vpack.c.bf16 %v8284_v16, %v8279_v15  ;;  %v1735_v16 = vrot.slane %v12193_v56, 3 }
  0x55   : > { %8179 = vmatmul.mubr.msk.f32.gmra.mrb[4].mxu1 %vm551_vm1, %v12193_v56  ;;  %10073 = vmatpush1.bf16.msra.mxu0 %v10072_v23  ;;  %v10186_v23 = vpack.c.bf16 %v8295_v19, %v8290_v18  ;;  %v10146_v18 = vpack.c.bf16 %v8212_v9, %v8207_v8  ;;  %v2177_v8 = vrot.slane %v12182_v48, 4  ;;  %v8257_v9 = vld [vmem:[%s17313_s1 + $0x3c0] sm:$0xff] }
  0x56   : > { %9605 = vmatprep.mubr.msk.f32.mxu0 %vm551_vm1, %v12351_v52  ;;  %1110 = vmatprep.mubr.f32.mxu1 %v17345_v7  ;;  %v480_v52 = vld [vmem:[%s17313_s1 + $0x110] sm:$0xff] }
  0x57   : > { %10075 = vmatprep.subr.bf16.mxu0 %v10074_v28  ;;  %10137 = vmatpush1.bf16.msra.mxu1 %v10136_v31  ;;  %v10106_v54 = vpack.c.bf16 %v485_v53, %v480_v52  ;;  %v12619_v28 = vsel %vm1287_vm2, %v1293_v12, %v1295_v21  ;;  %v8193_v31 = vld [vmem:[%s17313_s1 + $0x280] sm:$0xff]  ;;  %v8218_v53 = vld [vmem:[%s17313_s1 + $0x348] sm:$0xff]  ;;  %v8328_v12 = vld [vmem:[%s17313_s1 + $0x538] sm:$0xff] }
  0x58   : > { %9606 = vmatmul.mubr.msk.f32.gmra.mrb[22].mxu0 %vm551_vm1, %v12341_v51  ;;  %10139 = vmatprep.subr.bf16.mxu1 %v10138_v33  ;;  %v10102_v51 = vpack.c.bf16 %v475_v50, %v470_v46  ;;  %v10188_v33 = vpack.c.bf16 %v8294_v25, %v8289_v24  ;;  %v10112_v37 = vpack.c.bf16 %v8198_v32, %v8193_v31  ;;  %v8213_v52 = vld [vmem:[%s17313_s1 + $0x320] sm:$0xff]  ;;  %v8338_v25 = vld [vmem:[%s17313_s1 + $0x588] sm:$0xff]  ;;  %v1737_v31 = vrot.slane %v12224_v4, 3 }
  0x59   : > { %8180 = vmatmul.mubr.msk.f32.gmra.mrb[6].mxu1 %vm551_vm1, %v12224_v4  ;;  %10077 = vmatpush1.bf16.msra.mxu0 %v10076_v36  ;;  %v8209_v36 = vld [vmem:[%s17313_s1 + $0x300] sm:$0xff]  ;;  %v10120_v58 = vpack.c.bf16 %v8218_v53, %v8213_v52  ;;  %v10224_v19 = vpack.c.bf16 %v8328_v12, %v8323_v10  ;;  %v8262_v10 = vld [vmem:[%s17313_s1 + $0x3e8] sm:$0xff]  ;;  %v8268_v12 = vld [vmem:[%s17313_s1 + $0x418] sm:$0xff] }
  0x5a   : > { %979 = vmatprep.mubr.f32.mxu0 %v17345_v7  ;;  %1116 = vmatprep.mubr.f32.mxu1 %v17345_v7  ;;  %v10114_v43 = vpack.c.bf16 %v8209_v36, %v8204_v35  ;;  %v8217_v21 = vld [vmem:[%s17313_s1 + $0x340] sm:$0xff]  ;;  %v10230_v35 = vpack.c.bf16 %v8349_v27, %v8344_v26  ;;  %v8348_v36 = vld [vmem:[%s17313_s1 + $0x5d8] sm:$0xff]  ;;  %v2183_v27 = vrot.slane %v12255_v17, 4 }
  0x5b   : > { %10095 = vmatprep.subr.bf16.mxu0 %v10094_v39  ;;  %10141 = vmatpush1.bf16.msra.mxu1 %v10140_v40  ;;  %v8203_v40 = vld [vmem:[%s17313_s1 + $0x2d0] sm:$0xff]  ;;  %v8333_v24 = vld [vmem:[%s17313_s1 + $0x560] sm:$0xff] }
  0x5c   : > { %8169 = vmatmul.mubr.msk.f32.vlgmr.msra.gmra.mrb[0].mxu0 %vm551_vm1, %v12179_v47  ;;  %10175 = vmatprep.subr.bf16.mxu1 %v10174_v44  ;;  %v8214_v44 = vld [vmem:[%s17313_s1 + $0x328] sm:$0xff]  ;;  %v10116_v46 = vpack.c.bf16 %v8208_v42, %v8203_v40  ;;  %v8359_v42 = vld [vmem:[%s17313_s1 + $0x630] sm:$0xff]  ;;  %v8353_v52 = vld [vmem:[%s17313_s1 + $0x600] sm:$0xff] }
  0x5d   : > { %8181 = vmatmul.mubr.msk.f32.gmra.mrb[8].mxu1 %vm551_vm1, %v12255_v17  ;;  %985 = vmatprep.mubr.f32.mxu0 %v17345_v7  ;;  %v8354_v40 = vld [vmem:[%s17313_s1 + $0x608] sm:$0xff] }
  0x5e   : > { %1122 = vmatprep.mubr.f32.mxu1 %v17345_v7  ;;  %10097 = vmatpush3.bf16.msra.mxu0 %v10094_v39  ;;  %v1299_v39 = vrot.slane %v12317_v41, 2  ;;  %v10234_v53 = vpack.c.bf16 %v8359_v42, %v8354_v40  ;;  %v8281_v40 = vld [vmem:[%s17313_s1 + $0x480] sm:$0xff]  ;;  %v8286_v42 = vld [vmem:[%s17313_s1 + $0x4a8] sm:$0xff] }
  0x5f   : > { %10099 = vmatprep.subr.bf16.mxu0 %v10098_v45 }
  0x60   : > { %8170 = vmatmul.mubr.msk.f32.gmra.mrb[2].mxu0 %vm551_vm1, %v12182_v48  ;;  %v12665_v50 = vsel %vm1287_vm2, %v1297_v30, %v1299_v39 }
  0x61   : > { %8182 = vmatmul.mubr.msk.f32.gmra.mrb[10].mxu1 %vm551_vm1, %v12286_v29  ;;  %991 = vmatprep.mubr.f32.mxu0 %v17345_v7 }
  0x62   : > { %1128 = vmatprep.mubr.f32.mxu1 %v17345_v7  ;;  %10101 = vmatpush3.bf16.msra.mxu0 %v10098_v45  ;;  %v8219_v45 = vld [vmem:[%s17313_s1 + $0x350] sm:$0xff] }
  0x63   : > { %10103 = vmatprep.subr.bf16.mxu0 %v10102_v51 }
  0x64   : > { %8171 = vmatmul.mubr.msk.f32.gmra.mrb[4].mxu0 %vm551_vm1, %v12193_v56 }
  0x65   : > { %8183 = vmatmul.mubr.msk.f32.gmra.mrb[12].mxu1 %vm551_vm1, %v12317_v41  ;;  %997 = vmatprep.mubr.f32.mxu0 %v17345_v7 }
  0x66   : > { %1134 = vmatprep.mubr.f32.mxu1 %v17345_v7  ;;  %10105 = vmatpush3.bf16.msra.mxu0 %v10102_v51  ;;  %v12668_v51 = vrot.slane %v12330_v49, 2 }
  0x67   : > { %10107 = vmatprep.subr.bf16.mxu0 %v10106_v54 }
  0x68   : > { %8172 = vmatmul.mubr.msk.f32.gmra.mrb[6].mxu0 %vm551_vm1, %v12224_v4  ;;  %v12691_v59 = vsel %vm1287_vm2, %v1299_v39, %v12668_v51  ;;  %v8232_v39 = vld [vmem:[%s17313_s1 + $0x3b8] sm:$0xff] }
  0x69   : > { %8184 = vmatmul.mubr.msk.f32.gmra.mrb[14].mxu1 %vm551_vm1, %v12330_v49  ;;  %1003 = vmatprep.mubr.f32.mxu0 %v17345_v7 }
  0x6a   : > { %1496 = vmatprep.mubr.f32.mxu1 %v17345_v7  ;;  %10109 = vmatpush3.bf16.msra.mxu0 %v10106_v54  ;;  %v10118_v54 = vpack.c.bf16 %v8219_v45, %v8214_v44  ;;  %v1739_v44 = vrot.slane %v12255_v17, 3 }
  0x6b   : > { %10111 = vmatprep.subr.bf16.mxu0 %v10110_v60  ;;  %v8223_v60 = vld [vmem:[%s17313_s1 + $0x370] sm:$0xff] }
  0x6c   : > { %8173 = vmatmul.mubr.msk.f32.gmra.mrb[8].mxu0 %vm551_vm1, %v12255_v17  ;;  %v10124_v2 = vpack.c.bf16 %v8228_v61, %v8223_v60  ;;  %v1741_v60 = vrot.slane %v12286_v29, 3 }
  0x6d   : > { %8241 = vmatmul.mubr.msk.f32.vlgmr.msra.gmra.mrb[0].mxu1 %vm551_vm1, %v12553_v0  ;;  %1009 = vmatprep.mubr.f32.mxu0 %v17345_v7 }
  0x6e   : > { %1502 = vmatprep.mubr.f32.mxu1 %v17345_v7  ;;  %10177 = vmatpush1.bf16.msra.mxu1 %v10176_v3  ;;  %v1732_v3 = vrot.slane %v12179_v47, 3  ;;  %v12827_v63 = vsel %vm1731_vm3, %v1739_v44, %v1741_v60 }
  0x6f   : > { %10179 = vmatprep.subr.bf16.mxu1 %v10178_v5  ;;  %v1733_v5 = vrot.slane %v12182_v48, 3 }
  0x70   : > { %8174 = vmatmul.mubr.msk.f32.gmra.mrb[10].mxu0 %vm551_vm1, %v12286_v29 }
  0x71   : > { %8242 = vmatmul.mubr.msk.f32.gmra.mrb[2].mxu1 %vm551_vm1, %v12575_v11  ;;  %1015 = vmatprep.mubr.f32.mxu0 %v17345_v7  ;;  %v12739_v15 = vsel %vm1731_vm3, %v1732_v3, %v1733_v5  ;;  %v12767_v30 = vsel %vm1731_vm3, %v1733_v5, %v1735_v16  ;;  %v12840_v3 = vrot.slane %v12330_v49, 3 }
  0x72   : > { %1508 = vmatprep.mubr.f32.mxu1 %v17345_v7  ;;  %10181 = vmatpush1.bf16.msra.mxu1 %v10180_v13  ;;  %v8334_v13 = vld [vmem:[%s17313_s1 + $0x568] sm:$0xff] }
  0x73   : > { %10183 = vmatprep.subr.bf16.mxu1 %v10182_v14  ;;  %v8339_v14 = vld [vmem:[%s17313_s1 + $0x590] sm:$0xff]  ;;  %v12850_v5 = vsel %vm1731_vm3, %v1743_v1, %v12840_v3 }
  0x74   : > { %8175 = vmatmul.mubr.msk.f32.gmra.mrb[12].mxu0 %vm551_vm1, %v12317_v41 }
  0x75   : > { %8243 = vmatmul.mubr.msk.f32.gmra.mrb[4].mxu1 %vm551_vm1, %v12597_v20  ;;  %1021 = vmatprep.mubr.f32.mxu0 %v17345_v7 }
  0x76   : > { %1514 = vmatprep.mubr.f32.mxu1 %v17345_v7  ;;  %10185 = vmatpush1.bf16.msra.mxu1 %v10184_v22  ;;  %v8222_v22 = vld [vmem:[%s17313_s1 + $0x368] sm:$0xff] }
  0x77   : > { %10187 = vmatprep.subr.bf16.mxu1 %v10186_v23  ;;  %v10226_v23 = vpack.c.bf16 %v8339_v14, %v8334_v13  ;;  %v10150_v32 = vpack.c.bf16 %v8222_v22, %v8217_v21  ;;  %v2179_v14 = vrot.slane %v12193_v56, 4  ;;  %v2181_v22 = vrot.slane %v12224_v4, 4 }
  0x78   : > { %8176 = vmatmul.mubr.msk.f32.gmra.mrb[14].mxu0 %vm551_vm1, %v12330_v49 }
  0x79   : > { %8244 = vmatmul.mubr.msk.f32.gmra.mrb[6].mxu1 %vm551_vm1, %v12619_v28  ;;  %9624 = vmatprep.mubr.msk.f32.mxu0 %vm551_vm1, %v12179_v47 }
  0x7a   : > { %1520 = vmatprep.mubr.f32.mxu1 %v17345_v7  ;;  %10189 = vmatpush1.bf16.msra.mxu1 %v10188_v33  ;;  %v10228_v33 = vpack.c.bf16 %v8338_v25, %v8333_v24  ;;  %v8282_v24 = vld [vmem:[%s17313_s1 + $0x488] sm:$0xff] }
  0x7b   : > { %10223 = vmatprep.subr.bf16.mxu1 %v10222_v34  ;;  %v8343_v34 = vld [vmem:[%s17313_s1 + $0x5b0] sm:$0xff] }
  0x7c   : > { %9625 = vmatmul.mubr.msk.f32.vlgmr.msra.gmra.mrb[16].mxu0 %vm551_vm1, %v12182_v48  ;;  %v10232_v45 = vpack.c.bf16 %v8348_v36, %v8343_v34  ;;  %v10160_v48 = vpack.c.bf16 %v8262_v10, %v8257_v9  ;;  %v8331_v9 = vld [vmem:[%s17313_s1 + $0x550] sm:$0xff]  ;;  %v8336_v10 = vld [vmem:[%s17313_s1 + $0x578] sm:$0xff] }
  0x7d   : > { %8245 = vmatmul.mubr.msk.f32.gmra.mrb[8].mxu1 %vm551_vm1, %v12642_v38  ;;  %10113 = vmatpush1.bf16.msra.mxu0 %v10112_v37  ;;  %v8227_v37 = vld [vmem:[%s17313_s1 + $0x390] sm:$0xff] }
  0x7e   : > { %9627 = vmatprep.mubr.msk.f32.mxu0 %vm551_vm1, %v12193_v56  ;;  %1526 = vmatprep.mubr.f32.mxu1 %v17345_v7  ;;  %v8283_v56 = vld [vmem:[%s17313_s1 + $0x490] sm:$0xff] }
  0x7f   : > { %10115 = vmatprep.subr.bf16.mxu0 %v10114_v43  ;;  %v12795_v43 = vsel %vm1731_vm3, %v1735_v16, %v1737_v31  ;;  %v8267_v16 = vld [vmem:[%s17313_s1 + $0x410] sm:$0xff] }
  0x80   : > { %9628 = vmatmul.mubr.msk.f32.gmra.mrb[18].mxu0 %vm551_vm1, %v12224_v4  ;;  %v8293_v4 = vld [vmem:[%s17313_s1 + $0x4e0] sm:$0xff] }
  0x81   : > { %8246 = vmatmul.mubr.msk.f32.gmra.mrb[10].mxu1 %vm551_vm1, %v12665_v50  ;;  %10117 = vmatpush1.bf16.msra.mxu0 %v10116_v46  ;;  %v10154_v46 = vpack.c.bf16 %v8232_v39, %v8227_v37  ;;  %v8271_v37 = vld [vmem:[%s17313_s1 + $0x430] sm:$0xff] }
  0x82   : > { %9630 = vmatprep.mubr.msk.f32.mxu0 %vm551_vm1, %v12255_v17  ;;  %1532 = vmatprep.mubr.f32.mxu1 %v17345_v7  ;;  %v8266_v17 = vld [vmem:[%s17313_s1 + $0x408] sm:$0xff] }
  0x83   : > { %10119 = vmatprep.subr.bf16.mxu0 %v10118_v54  ;;  %v8358_v54 = vld [vmem:[%s17313_s1 + $0x628] sm:$0xff] }
  0x84   : > { %9631 = vmatmul.mubr.msk.f32.gmra.mrb[20].mxu0 %vm551_vm1, %v12286_v29  ;;  %v10236_v61 = vpack.c.bf16 %v8358_v54, %v8353_v52  ;;  %v8296_v52 = vld [vmem:[%s17313_s1 + $0x4f8] sm:$0xff]  ;;  %v8322_v54 = vld [vmem:[%s17313_s1 + $0x508] sm:$0xff] }
  0x85   : > { %8247 = vmatmul.mubr.msk.f32.gmra.mrb[12].mxu1 %vm551_vm1, %v12691_v59  ;;  %10121 = vmatpush1.bf16.msra.mxu0 %v10120_v58  ;;  %v12817_v58 = vsel %vm1731_vm3, %v1737_v31, %v1739_v44  ;;  %v8287_v31 = vld [vmem:[%s17313_s1 + $0x4b0] sm:$0xff]  ;;  %v12984_v44 = vrot.slane %v12330_v49, 4 }
  0x86   : > { %9633 = vmatprep.mubr.msk.f32.mxu0 %vm551_vm1, %v12317_v41  ;;  %1538 = vmatprep.mubr.f32.mxu1 %v17345_v7 }
  0x87   : > { %10123 = vmatprep.subr.bf16.mxu0 %v10122_v62  ;;  %v10158_v62 = vpack.c.bf16 %v8263_v57, %v8258_v55  ;;  %v8327_v55 = vld [vmem:[%s17313_s1 + $0x530] sm:$0xff] }
  0x88   : > { %9634 = vmatmul.mubr.msk.f32.gmra.mrb[22].mxu0 %vm551_vm1, %v12330_v49  ;;  %v10206_v57 = vpack.c.bf16 %v8327_v55, %v8322_v54  ;;  %v2657_v55 = vld [vmem:[%s17315_s3 + $0x60] sm:$0xff] }
  0x89   : > { %8248 = vmatmul.mubr.msk.f32.gmra.mrb[14].mxu1 %vm551_vm1, %v12668_v51  ;;  %10125 = vmatpush1.bf16.msra.mxu0 %v10124_v2  ;;  %v12837_v2 = vsel %vm1731_vm3, %v1741_v60, %v1743_v1  ;;  %v8321_v60 = vld [vmem:[%s17313_s1 + $0x500] sm:$0xff] }
  0x8a   : > { %1383 = vmatprep.mubr.f32.mxu0 %v17345_v7  ;;  %1940 = vmatprep.mubr.f32.mxu1 %v17345_v7  ;;  %v8337_v1 = vld [vmem:[%s17313_s1 + $0x580] sm:$0xff] }
  0x8b   : > { %10143 = vmatprep.subr.bf16.mxu0 %v10142_v6 }
  0x8c   : > { %8233 = vmatmul.mubr.msk.f32.vlgmr.msra.gmra.mrb[0].mxu0 %vm551_vm1, %v12553_v0 }
  0x8d   : > { %8305 = vmatmul.mubr.msk.f32.vlgmr.msra.gmra.mrb[0].mxu1 %vm551_vm1, %v12739_v15  ;;  %1389 = vmatprep.mubr.f32.mxu0 %v17345_v7 }
  0x8e   : > { %1946 = vmatprep.mubr.f32.mxu1 %v17345_v7  ;;  %10145 = vmatpush3.bf16.msra.mxu0 %v10142_v6  ;;  %v2176_v6 = vrot.slane %v12179_v47, 4  ;;  %v8273_v47 = vld [vmem:[%s17313_s1 + $0x440] sm:$0xff] }
  0x8f   : > { %10147 = vmatprep.subr.bf16.mxu0 %v10146_v18  ;;  %10225 = vmatpush1.bf16.msra.mxu1 %v10224_v19  ;;  %v10162_v19 = vpack.c.bf16 %v8273_v47, %v8268_v12  ;;  %v8342_v12 = vld [vmem:[%s17313_s1 + $0x5a8] sm:$0xff]  ;;  %v8347_v47 = vld [vmem:[%s17313_s1 + $0x5d0] sm:$0xff] }
  0x90   : > { %8234 = vmatmul.mubr.msk.f32.gmra.mrb[2].mxu0 %vm551_vm1, %v12575_v11  ;;  %10227 = vmatprep.subr.bf16.mxu1 %v10226_v23  ;;  %v12880_v13 = vsel %vm2175_vm4, %v2176_v6, %v2177_v8  ;;  %v8277_v23 = vld [vmem:[%s17313_s1 + $0x460] sm:$0xff] }
  0x91   : > { %8306 = vmatmul.mubr.msk.f32.gmra.mrb[2].mxu1 %vm551_vm1, %v12767_v30  ;;  %1395 = vmatprep.mubr.f32.mxu0 %v17345_v7  ;;  %v10168_v26 = vpack.c.bf16 %v8282_v24, %v8277_v23  ;;  %v8335_v23 = vld [vmem:[%s17313_s1 + $0x570] sm:$0xff]  ;;  %v8340_v24 = vld [vmem:[%s17313_s1 + $0x598] sm:$0xff] }
  0x92   : > { %1952 = vmatprep.mubr.f32.mxu1 %v17345_v7  ;;  %10149 = vmatpush3.bf16.msra.mxu0 %v10146_v18  ;;  %v8272_v18 = vld [vmem:[%s17313_s1 + $0x438] sm:$0xff] }
  0x93   : > { %10151 = vmatprep.subr.bf16.mxu0 %v10150_v32  ;;  %10229 = vmatpush1.bf16.msra.mxu1 %v10228_v33  ;;  %v10164_v21 = vpack.c.bf16 %v8272_v18, %v8267_v16  ;;  %v8346_v16 = vld [vmem:[%s17313_s1 + $0x5c8] sm:$0xff]  ;;  %v8352_v18 = vld [vmem:[%s17313_s1 + $0x5f8] sm:$0xff] }
  0x94   : > { %8235 = vmatmul.mubr.msk.f32.gmra.mrb[4].mxu0 %vm551_vm1, %v12597_v20  ;;  %10231 = vmatprep.subr.bf16.mxu1 %v10230_v35  ;;  %v2185_v35 = vrot.slane %v12286_v29, 4 }
  0x95   : > { %8307 = vmatmul.mubr.msk.f32.gmra.mrb[4].mxu1 %vm551_vm1, %v12795_v43  ;;  %1401 = vmatprep.mubr.f32.mxu0 %v17345_v7 }
  0x96   : > { %1958 = vmatprep.mubr.f32.mxu1 %v17345_v7  ;;  %10153 = vmatpush3.bf16.msra.mxu0 %v10150_v32  ;;  %v8292_v32 = vld [vmem:[%s17313_s1 + $0x4d8] sm:$0xff]  ;;  %v12965_v29 = vsel %vm2175_vm4, %v2183_v27, %v2185_v35 }
  0x97   : > { %10233 = vmatpush1.bf16.msra.mxu1 %v10232_v45  ;;  %10155 = vmatprep.subr.bf16.mxu0 %v10154_v46  ;;  %v10172_v34 = vpack.c.bf16 %v8292_v32, %v8287_v31  ;;  %v10198_v45 = vpack.c.bf16 %v8286_v42, %v8281_v40  ;;  %v2648_v31 = vld [vmem:[%s17315_s3 + $0x18] sm:$0xff] }
  0x98   : > { %8236 = vmatmul.mubr.msk.f32.gmra.mrb[6].mxu0 %vm551_vm1, %v12619_v28  ;;  %10235 = vmatprep.subr.bf16.mxu1 %v10234_v53  ;;  %v2656_v40 = vld [vmem:[%s17315_s3 + $0x58] sm:$0xff] }
  0x99   : > { %8308 = vmatmul.mubr.msk.f32.gmra.mrb[6].mxu1 %vm551_vm1, %v12817_v58  ;;  %1407 = vmatprep.mubr.f32.mxu0 %v17345_v7 }
  0x9a   : > { %1964 = vmatprep.mubr.f32.mxu1 %v17345_v7  ;;  %10157 = vmatpush3.bf16.msra.mxu0 %v10154_v46  ;;  %v8291_v46 = vld [vmem:[%s17313_s1 + $0x4d0] sm:$0xff] }
  0x9b   : > { %10237 = vmatpush1.bf16.msra.mxu1 %v10236_v61  ;;  %10159 = vmatprep.subr.bf16.mxu0 %v10158_v62  ;;  %v10202_v53 = vpack.c.bf16 %v8296_v52, %v8291_v46  ;;  %v8326_v61 = vld [vmem:[%s17313_s1 + $0x528] sm:$0xff]  ;;  %v8332_v62 = vld [vmem:[%s17313_s1 + $0x558] sm:$0xff]  ;;  %v2655_v46 = vld [vmem:[%s17315_s3 + $0x50] sm:$0xff] }
  0x9c   : > { %8237 = vmatmul.mubr.msk.f32.gmra.mrb[8].mxu0 %vm551_vm1, %v12642_v38  ;;  %v10208_v6 = vpack.c.bf16 %v8326_v61, %v8321_v60  ;;  %v2664_v60 = vld [vmem:[%s17315_s3 + $0x98] sm:$0xff] }
  0x9d   : > { %8309 = vmatmul.mubr.msk.f32.gmra.mrb[8].mxu1 %vm551_vm1, %v12827_v63  ;;  %1413 = vmatprep.mubr.f32.mxu0 %v17345_v7 }
  0x9e   : > { %1970 = vmatprep.mubr.f32.mxu1 %v17345_v7 }
  0xa0   : > { %8238 = vmatmul.mubr.msk.f32.gmra.mrb[10].mxu0 %vm551_vm1, %v12665_v50 }
  0xa1   : > { %8310 = vmatmul.mubr.msk.f32.gmra.mrb[10].mxu1 %vm551_vm1, %v12837_v2  ;;  %1419 = vmatprep.mubr.f32.mxu0 %v17345_v7 }
  0xa2   : > { %1976 = vmatprep.mubr.f32.mxu1 %v17345_v7 }
  0xa4   : > { %8239 = vmatmul.mubr.msk.f32.gmra.mrb[12].mxu0 %vm551_vm1, %v12691_v59 }
  0xa5   : > { %8311 = vmatmul.mubr.msk.f32.gmra.mrb[12].mxu1 %vm551_vm1, %v12850_v5  ;;  %1425 = vmatprep.mubr.f32.mxu0 %v17345_v7 }
  0xa6   : > { %1982 = vmatprep.mubr.f32.mxu1 %v17345_v7 }
  0xa8   : > { %8240 = vmatmul.mubr.msk.f32.gmra.mrb[14].mxu0 %vm551_vm1, %v12668_v51 }
  0xa9   : > { %8312 = vmatmul.mubr.msk.f32.gmra.mrb[14].mxu1 %vm551_vm1, %v12840_v3  ;;  %9652 = vmatprep.mubr.msk.f32.mxu0 %vm551_vm1, %v12553_v0  ;;  %v8278_v0 = vld [vmem:[%s17313_s1 + $0x468] sm:$0xff] }
  0xaa   : > { %2384 = vmatprep.mubr.f32.mxu1 %v17345_v7  ;;  %v10166_v25 = vpack.c.bf16 %v8283_v56, %v8278_v0  ;;  %v8351_v0 = vld [vmem:[%s17313_s1 + $0x5f0] sm:$0xff]  ;;  %v8356_v56 = vld [vmem:[%s17313_s1 + $0x618] sm:$0xff] }
  0xac   : > { %9653 = vmatmul.mubr.msk.f32.vlgmr.msra.gmra.mrb[16].mxu0 %vm551_vm1, %v12575_v11  ;;  %v12903_v11 = vsel %vm2175_vm4, %v2177_v8, %v2179_v14  ;;  %v10210_v8 = vpack.c.bf16 %v8337_v1, %v8332_v62  ;;  %v2661_v62 = vld [vmem:[%s17315_s3 + $0x80] sm:$0xff] }
  0xad   : > { %8369 = vmatmul.mubr.msk.f32.vlgmr.msra.gmra.mrb[0].mxu1 %vm551_vm1, %v12880_v13  ;;  %10161 = vmatpush1.bf16.msra.mxu0 %v10160_v48  ;;  %v10214_v48 = vpack.c.bf16 %v8347_v47, %v8342_v12  ;;  %v2672_v12 = vld [vmem:[%s17315_s3 + $0xd8] sm:$0xff] }
  0xae   : > { %9655 = vmatprep.mubr.msk.f32.mxu0 %vm551_vm1, %v12597_v20  ;;  %2390 = vmatprep.mubr.f32.mxu1 %v17345_v7  ;;  %v8288_v20 = vld [vmem:[%s17313_s1 + $0x4b8] sm:$0xff] }
  0xaf   : > { %10163 = vmatprep.subr.bf16.mxu0 %v10162_v19  ;;  %v10170_v33 = vpack.c.bf16 %v8293_v4, %v8288_v20  ;;  %v8355_v20 = vld [vmem:[%s17313_s1 + $0x610] sm:$0xff]  ;;  %v8360_v4 = vld [vmem:[%s17313_s1 + $0x638] sm:$0xff] }
  0xb0   : > { %9656 = vmatmul.mubr.msk.f32.gmra.mrb[18].mxu0 %vm551_vm1, %v12619_v28  ;;  %v12926_v28 = vsel %vm2175_vm4, %v2179_v14, %v2181_v22  ;;  %v8341_v14 = vld [vmem:[%s17313_s1 + $0x5a0] sm:$0xff] }
  0xb1   : > { %8370 = vmatmul.mubr.msk.f32.gmra.mrb[2].mxu1 %vm551_vm1, %v12903_v11  ;;  %10165 = vmatpush1.bf16.msra.mxu0 %v10164_v21  ;;  %v8325_v21 = vld [vmem:[%s17313_s1 + $0x520] sm:$0xff] }
  0xb2   : > { %9658 = vmatprep.mubr.msk.f32.mxu0 %vm551_vm1, %v12642_v38  ;;  %2396 = vmatprep.mubr.f32.mxu1 %v17345_v7  ;;  %v8261_v38 = vld [vmem:[%s17313_s1 + $0x3e0] sm:$0xff] }
  0xb3   : > { %10167 = vmatprep.subr.bf16.mxu0 %v10166_v25  ;;  %v10190_v36 = vpack.c.bf16 %v8266_v17, %v8261_v38  ;;  %v8350_v25 = vld [vmem:[%s17313_s1 + $0x5e8] sm:$0xff]  ;;  %v2647_v38 = vld [vmem:[%s17315_s3 + $0x10] sm:$0xff] }
  0xb4   : > { %9659 = vmatmul.mubr.msk.f32.gmra.mrb[20].mxu0 %vm551_vm1, %v12665_v50  ;;  %v12949_v50 = vsel %vm2175_vm4, %v2181_v22, %v2183_v27  ;;  %v2646_v27 = vld [vmem:[%s17315_s3 + $0x8] sm:$0xff] }
  0xb5   : > { %8371 = vmatmul.mubr.msk.f32.gmra.mrb[4].mxu1 %vm551_vm1, %v12926_v28  ;;  %10169 = vmatpush1.bf16.msra.mxu0 %v10168_v26  ;;  %v10250_v26 = vpack.c.bf16 %v8360_v4, %v8355_v20  ;;  %v10254_v32 = vpack.c.bf16 %v2648_v31, %v2646_v27  ;;  %v2688_v20 = vld [vmem:[%s17315_s3 + $0x158] sm:$0xff]  ;;  %v2685_v27 = vld [vmem:[%s17315_s3 + $0x140] sm:$0xff]  ;;  %v2687_v31 = vld [vmem:[%s17315_s3 + $0x150] sm:$0xff] }
  0xb6   : > { %9661 = vmatprep.mubr.msk.f32.mxu0 %vm551_vm1, %v12691_v59  ;;  %2402 = vmatprep.mubr.f32.mxu1 %v17345_v7  ;;  %v8276_v59 = vld [vmem:[%s17313_s1 + $0x458] sm:$0xff] }
  0xb7   : > { %10171 = vmatprep.subr.bf16.mxu0 %v10170_v33  ;;  %v10194_v39 = vpack.c.bf16 %v8276_v59, %v8271_v37  ;;  %v2645_v33 = vld [vmem:[%s17315_s3] sm:$0xff]  ;;  %10255 = vmatprep.subr.bf16.mxu1 %v10254_v32  ;;  %v2651_v59 = vld [vmem:[%s17315_s3 + $0x30] sm:$0xff]  ;;  %v2690_v32 = vld [vmem:[%s17315_s3 + $0x168] sm:$0xff] }
  0xb8   : > { %9662 = vmatmul.mubr.msk.f32.gmra.mrb[22].mxu0 %vm551_vm1, %v12668_v51  ;;  %v2187_v51 = vrot.slane %v12317_v41, 4  ;;  %v10256_v17 = vpack.c.bf16 %v2647_v38, %v2645_v33  ;;  %v2649_v37 = vld [vmem:[%s17315_s3 + $0x20] sm:$0xff]  ;;  %v2692_v33 = vld [vmem:[%s17315_s3 + $0x178] sm:$0xff]  ;;  %v10296_v38 = vpack.c.bf16 %v2687_v31, %v2685_v27 }
  0xb9   : > { %8372 = vmatmul.mubr.msk.f32.gmra.mrb[6].mxu1 %vm551_vm1, %v12949_v50  ;;  %10173 = vmatpush1.bf16.msra.mxu0 %v10172_v34  ;;  %v2650_v34 = vld [vmem:[%s17315_s3 + $0x28] sm:$0xff]  ;;  %v2716_v27 = vld [vmem:[%s17315_s3 + $0x238] sm:$0xff] }
  0xba   : > { %1827 = vmatprep.mubr.f32.mxu0 %v17345_v7  ;;  %2408 = vmatprep.mubr.f32.mxu1 %v17345_v7  ;;  %v12981_v41 = vsel %vm2175_vm4, %v2185_v35, %v2187_v51  ;;  %v13000_v49 = vsel %vm2175_vm4, %v2187_v51, %v12984_v44  ;;  %v2652_v35 = vld [vmem:[%s17315_s3 + $0x38] sm:$0xff]  ;;  %v10260_v51 = vpack.c.bf16 %v2651_v59, %v2649_v37 }
  0xbb   : > { %10191 = vmatprep.subr.bf16.mxu0 %v10190_v36  ;;  %10257 = vmatpush1.bf16.msra.mxu1 %v10256_v17  ;;  %v10298_v17 = vpack.c.bf16 %v2692_v33, %v2690_v32  ;;  %v2696_v37 = vld [vmem:[%s17315_s3 + $0x198] sm:$0xff] }
  0xbc   : > { %8297 = vmatmul.mubr.msk.f32.vlgmr.msra.gmra.mrb[0].mxu0 %vm551_vm1, %v12739_v15 }
  0xbd   : > { %8373 = vmatmul.mubr.msk.f32.gmra.mrb[8].mxu1 %vm551_vm1, %v12965_v29  ;;  %1833 = vmatprep.mubr.f32.mxu0 %v17345_v7 }
  0xbe   : > { %2414 = vmatprep.mubr.f32.mxu1 %v17345_v7  ;;  %10193 = vmatpush3.bf16.msra.mxu0 %v10190_v36  ;;  %v10258_v36 = vpack.c.bf16 %v2652_v35, %v2650_v34  ;;  %v2689_v34 = vld [vmem:[%s17315_s3 + $0x160] sm:$0xff]  ;;  %v2691_v35 = vld [vmem:[%s17315_s3 + $0x170] sm:$0xff] }
  0xbf   : > { %10195 = vmatprep.subr.bf16.mxu0 %v10194_v39  ;;  %v10300_v59 = vpack.c.bf16 %v2691_v35, %v2689_v34  ;;  %v2713_v34 = vld [vmem:[%s17315_s3 + $0x220] sm:$0xff]  ;;  %v2715_v35 = vld [vmem:[%s17315_s3 + $0x230] sm:$0xff] }
  0xc0   : > { %8298 = vmatmul.mubr.msk.f32.gmra.mrb[2].mxu0 %vm551_vm1, %v12767_v30  ;;  %10259 = vmatprep.subr.bf16.mxu1 %v10258_v36  ;;  %v2694_v36 = vld [vmem:[%s17315_s3 + $0x188] sm:$0xff] }
  0xc1   : > { %8374 = vmatmul.mubr.msk.f32.gmra.mrb[10].mxu1 %vm551_vm1, %v12981_v41  ;;  %1839 = vmatprep.mubr.f32.mxu0 %v17345_v7 }
  0xc2   : > { %2420 = vmatprep.mubr.f32.mxu1 %v17345_v7  ;;  %10197 = vmatpush3.bf16.msra.mxu0 %v10194_v39  ;;  %v2654_v39 = vld [vmem:[%s17315_s3 + $0x48] sm:$0xff] }
  0xc3   : > { %10199 = vmatprep.subr.bf16.mxu0 %v10198_v45  ;;  %10261 = vmatpush1.bf16.msra.mxu1 %v10260_v51  ;;  %v10262_v42 = vpack.c.bf16 %v2656_v40, %v2654_v39  ;;  %v10302_v51 = vpack.c.bf16 %v2696_v37, %v2694_v36  ;;  %v2693_v39 = vld [vmem:[%s17315_s3 + $0x180] sm:$0xff]  ;;  %v2695_v40 = vld [vmem:[%s17315_s3 + $0x190] sm:$0xff]  ;;  %v2718_v37 = vld [vmem:[%s17315_s3 + $0x248] sm:$0xff] }
  0xc4   : > { %8299 = vmatmul.mubr.msk.f32.gmra.mrb[4].mxu0 %vm551_vm1, %v12795_v43 }
  0xc5   : > { %8375 = vmatmul.mubr.msk.f32.gmra.mrb[12].mxu1 %vm551_vm1, %v13000_v49  ;;  %1845 = vmatprep.mubr.f32.mxu0 %v17345_v7 }
  0xc6   : > { %2426 = vmatprep.mubr.f32.mxu1 %v17345_v7  ;;  %10201 = vmatpush3.bf16.msra.mxu0 %v10198_v45  ;;  %v2653_v45 = vld [vmem:[%s17315_s3 + $0x40] sm:$0xff] }
  0xc7   : > { %10203 = vmatprep.subr.bf16.mxu0 %v10202_v53  ;;  %v10264_v52 = vpack.c.bf16 %v2655_v46, %v2653_v45  ;;  %10263 = vmatprep.subr.bf16.mxu1 %v10262_v42  ;;  %v2698_v42 = vld [vmem:[%s17315_s3 + $0x1a8] sm:$0xff]  ;;  %v2700_v45 = vld [vmem:[%s17315_s3 + $0x1b8] sm:$0xff]  ;;  %v10304_v46 = vpack.c.bf16 %v2695_v40, %v2693_v39  ;;  %v10324_v40 = vpack.c.bf16 %v2715_v35, %v2713_v34  ;;  %v2729_v35 = vld [vmem:[%s17315_s3 + $0x2a0] sm:$0xff] }
  0xc8   : > { %8300 = vmatmul.mubr.msk.f32.gmra.mrb[6].mxu0 %vm551_vm1, %v12817_v58 }
  0xc9   : > { %8376 = vmatmul.mubr.msk.f32.gmra.mrb[14].mxu1 %vm551_vm1, %v12984_v44  ;;  %1851 = vmatprep.mubr.f32.mxu0 %v17345_v7 }
  0xca   : > { %10205 = vmatpush3.bf16.msra.mxu0 %v10202_v53  ;;  %10265 = vmatpush1.bf16.msra.mxu1 %v10264_v52  ;;  %v2660_v53 = vld [vmem:[%s17315_s3 + $0x78] sm:$0xff]  ;;  %v10306_v52 = vpack.c.bf16 %v2700_v45, %v2698_v42 }
  0xcb   : > { %10207 = vmatprep.subr.bf16.mxu0 %v10206_v57 }
  0xcc   : > { %8301 = vmatmul.mubr.msk.f32.gmra.mrb[8].mxu0 %vm551_vm1, %v12827_v63 }
  0xcd   : > { %1857 = vmatprep.mubr.f32.mxu0 %v17345_v7 }
  0xd0   : > { %8302 = vmatmul.mubr.msk.f32.gmra.mrb[10].mxu0 %vm551_vm1, %v12837_v2 }
  0xd1   : > { %1863 = vmatprep.mubr.f32.mxu0 %v17345_v7 }
  0xd4   : > { %8303 = vmatmul.mubr.msk.f32.gmra.mrb[12].mxu0 %vm551_vm1, %v12850_v5 }
  0xd5   : > { %1869 = vmatprep.mubr.f32.mxu0 %v17345_v7 }
  0xd8   : > { %8304 = vmatmul.mubr.msk.f32.gmra.mrb[14].mxu0 %vm551_vm1, %v12840_v3 }
  0xd9   : > { %9680 = vmatprep.mubr.msk.f32.mxu0 %vm551_vm1, %v12739_v15  ;;  %v10212_v15 = vpack.c.bf16 %v8336_v10, %v8331_v9  ;;  %v2665_v9 = vld [vmem:[%s17315_s3 + $0xa0] sm:$0xff] }
  0xdc   : > { %9681 = vmatmul.mubr.msk.f32.vlgmr.msra.gmra.mrb[16].mxu0 %vm551_vm1, %v12767_v30  ;;  %v8357_v30 = vld [vmem:[%s17313_s1 + $0x620] sm:$0xff] }
  0xdd   : > { %10209 = vmatpush1.bf16.msra.mxu0 %v10208_v6  ;;  %9683 = vmatprep.mubr.msk.f32.mxu0 %vm551_vm1, %v12795_v43  ;;  %v10216_v43 = vpack.c.bf16 %v8346_v16, %v8341_v14  ;;  %v10218_v19 = vpack.c.bf16 %v8357_v30, %v8352_v18  ;;  %v2668_v6 = vld [vmem:[%s17315_s3 + $0xb8] sm:$0xff]  ;;  %v2674_v14 = vld [vmem:[%s17315_s3 + $0xe8] sm:$0xff]  ;;  %v2673_v30 = vld [vmem:[%s17315_s3 + $0xe0] sm:$0xff] }
  0xde   : > { %10211 = vmatprep.subr.bf16.mxu0 %v10210_v8  ;;  %v2676_v16 = vld [vmem:[%s17315_s3 + $0xf8] sm:$0xff] }
  0xdf   : > { %v10282_v18 = vpack.c.bf16 %v2676_v16, %v2674_v14 }
  0xe0   : > { %9684 = vmatmul.mubr.msk.f32.gmra.mrb[18].mxu0 %vm551_vm1, %v12817_v58  ;;  %v8330_v58 = vld [vmem:[%s17313_s1 + $0x548] sm:$0xff] }
  0xe1   : > { %10213 = vmatpush1.bf16.msra.mxu0 %v10212_v15  ;;  %9686 = vmatprep.mubr.msk.f32.mxu0 %vm551_vm1, %v12827_v63  ;;  %v10220_v63 = vpack.c.bf16 %v8356_v56, %v8351_v0  ;;  %v10238_v22 = vpack.c.bf16 %v8330_v58, %v8325_v21  ;;  %v2669_v15 = vld [vmem:[%s17315_s3 + $0xc0] sm:$0xff]  ;;  %v2680_v56 = vld [vmem:[%s17315_s3 + $0x118] sm:$0xff]  ;;  %v2679_v58 = vld [vmem:[%s17315_s3 + $0x110] sm:$0xff] }
  0xe2   : > { %10215 = vmatprep.subr.bf16.mxu0 %v10214_v48  ;;  %v2677_v21 = vld [vmem:[%s17315_s3 + $0x100] sm:$0xff] }
  0xe4   : > { %9687 = vmatmul.mubr.msk.f32.gmra.mrb[20].mxu0 %vm551_vm1, %v12837_v2  ;;  %v10242_v2 = vpack.c.bf16 %v8340_v24, %v8335_v23  ;;  %v2684_v23 = vld [vmem:[%s17315_s3 + $0x138] sm:$0xff]  ;;  %v10288_v24 = vpack.c.bf16 %v2679_v58, %v2677_v21 }
  0xe5   : > { %10217 = vmatpush1.bf16.msra.mxu0 %v10216_v43  ;;  %9689 = vmatprep.mubr.msk.f32.mxu0 %vm551_vm1, %v12850_v5  ;;  %v8345_v5 = vld [vmem:[%s17313_s1 + $0x5c0] sm:$0xff]  ;;  %v2675_v43 = vld [vmem:[%s17315_s3 + $0xf0] sm:$0xff] }
  0xe6   : > { %10219 = vmatprep.subr.bf16.mxu0 %v10218_v19  ;;  %v2678_v19 = vld [vmem:[%s17315_s3 + $0x108] sm:$0xff]  ;;  %v10284_v0 = vpack.c.bf16 %v2675_v43, %v2673_v30 }
  0xe8   : > { %9690 = vmatmul.mubr.msk.f32.gmra.mrb[22].mxu0 %vm551_vm1, %v12840_v3  ;;  %v10246_v3 = vpack.c.bf16 %v8350_v25, %v8345_v5  ;;  %v2681_v5 = vld [vmem:[%s17315_s3 + $0x120] sm:$0xff]  ;;  %v2683_v25 = vld [vmem:[%s17315_s3 + $0x130] sm:$0xff] }
  0xe9   : > { %10221 = vmatpush1.bf16.msra.mxu0 %v10220_v63  ;;  %2271 = vmatprep.mubr.f32.mxu0 %v17345_v7  ;;  %v10286_v63 = vpack.c.bf16 %v2680_v56, %v2678_v19  ;;  %v10292_v4 = vpack.c.bf16 %v2683_v25, %v2681_v5 }
  0xea   : > { %10239 = vmatprep.subr.bf16.mxu0 %v10238_v22 }
  0xec   : > { %8361 = vmatmul.mubr.msk.f32.vlgmr.msra.gmra.mrb[0].mxu0 %vm551_vm1, %v12880_v13 }
  0xed   : > { %2277 = vmatprep.mubr.f32.mxu0 %v17345_v7  ;;  %10241 = vmatpush3.bf16.msra.mxu0 %v10238_v22  ;;  %v2682_v22 = vld [vmem:[%s17315_s3 + $0x128] sm:$0xff] }
  0xee   : > { %10243 = vmatprep.subr.bf16.mxu0 %v10242_v2 }
  0xf0   : > { %8362 = vmatmul.mubr.msk.f32.gmra.mrb[2].mxu0 %vm551_vm1, %v12903_v11 }
  0xf1   : > { %2283 = vmatprep.mubr.f32.mxu0 %v17345_v7  ;;  %10245 = vmatpush3.bf16.msra.mxu0 %v10242_v2  ;;  %v10290_v2 = vpack.c.bf16 %v2684_v23, %v2682_v22 }
  0xf2   : > { %10247 = vmatprep.subr.bf16.mxu0 %v10246_v3 }
  0xf4   : > { %8363 = vmatmul.mubr.msk.f32.gmra.mrb[4].mxu0 %vm551_vm1, %v12926_v28 }
  0xf5   : > { %2289 = vmatprep.mubr.f32.mxu0 %v17345_v7  ;;  %10249 = vmatpush3.bf16.msra.mxu0 %v10246_v3  ;;  %v2686_v3 = vld [vmem:[%s17315_s3 + $0x148] sm:$0xff] }
  0xf6   : > { %10251 = vmatprep.subr.bf16.mxu0 %v10250_v26 }
  0xf8   : > { %8364 = vmatmul.mubr.msk.f32.gmra.mrb[6].mxu0 %vm551_vm1, %v12949_v50 }
  0xf9   : > { %2295 = vmatprep.mubr.f32.mxu0 %v17345_v7  ;;  %10253 = vmatpush3.bf16.msra.mxu0 %v10250_v26  ;;  %v10294_v26 = vpack.c.bf16 %v2688_v20, %v2686_v3  ;;  %v2709_v3 = vld [vmem:[%s17315_s3 + $0x200] sm:$0xff]  ;;  %v2711_v20 = vld [vmem:[%s17315_s3 + $0x210] sm:$0xff] }
  0xfa   : > { %v10320_v33 = vpack.c.bf16 %v2711_v20, %v2709_v3  ;;  %v2727_v3 = vld [vmem:[%s17315_s3 + $0x290] sm:$0xff] }
  0xfc   : > { %8365 = vmatmul.mubr.msk.f32.gmra.mrb[8].mxu0 %vm551_vm1, %v12965_v29 }
  0xfd   : > { %2301 = vmatprep.mubr.f32.mxu0 %v17345_v7 }
 0x100   : > { %8366 = vmatmul.mubr.msk.f32.gmra.mrb[10].mxu0 %vm551_vm1, %v12981_v41 }
 0x101   : > { %2307 = vmatprep.mubr.f32.mxu0 %v17345_v7 }
 0x104   : > { %8367 = vmatmul.mubr.msk.f32.gmra.mrb[12].mxu0 %vm551_vm1, %v13000_v49 }
 0x105   : > { %2313 = vmatprep.mubr.f32.mxu0 %v17345_v7 }
 0x108   : > { %8368 = vmatmul.mubr.msk.f32.gmra.mrb[14].mxu0 %vm551_vm1, %v12984_v44 }
 0x109   : > { %9708 = vmatprep.mubr.msk.f32.mxu0 %vm551_vm1, %v12880_v13  ;;  %v2658_v13 = vld [vmem:[%s17315_s3 + $0x68] sm:$0xff] }
 0x10a   : > { %v10266_v54 = vpack.c.bf16 %v2660_v53, %v2658_v13  ;;  %v2697_v13 = vld [vmem:[%s17315_s3 + $0x1a0] sm:$0xff]  ;;  %v2699_v53 = vld [vmem:[%s17315_s3 + $0x1b0] sm:$0xff] }
 0x10c   : > { %9709 = vmatmul.mubr.msk.f32.vlgmr.msra.gmra.mrb[16].mxu0 %vm551_vm1, %v12903_v11  ;;  %v2659_v11 = vld [vmem:[%s17315_s3 + $0x70] sm:$0xff]  ;;  %10267 = vmatprep.subr.bf16.mxu1 %v10266_v54  ;;  %v2702_v54 = vld [vmem:[%s17315_s3 + $0x1c8] sm:$0xff] }
 0x10d   : > { %9711 = vmatprep.mubr.msk.f32.mxu0 %vm551_vm1, %v12926_v28  ;;  %v10268_v57 = vpack.c.bf16 %v2659_v11, %v2657_v55  ;;  %v2662_v28 = vld [vmem:[%s17315_s3 + $0x88] sm:$0xff]  ;;  %v2704_v55 = vld [vmem:[%s17315_s3 + $0x1d8] sm:$0xff]  ;;  %v10308_v11 = vpack.c.bf16 %v2699_v53, %v2697_v13 }
 0x10e   : > { %v10270_v61 = vpack.c.bf16 %v2664_v60, %v2662_v28  ;;  %v2701_v28 = vld [vmem:[%s17315_s3 + $0x1c0] sm:$0xff]  ;;  %v2703_v60 = vld [vmem:[%s17315_s3 + $0x1d0] sm:$0xff]  ;;  %v2722_v53 = vld [vmem:[%s17315_s3 + $0x268] sm:$0xff] }
 0x10f   : > { %10269 = vmatpush1.bf16.msra.mxu1 %v10268_v57  ;;  %v10310_v57 = vpack.c.bf16 %v2704_v55, %v2702_v54  ;;  %v2724_v54 = vld [vmem:[%s17315_s3 + $0x278] sm:$0xff] }
 0x110   : > { %9712 = vmatmul.mubr.msk.f32.gmra.mrb[18].mxu0 %vm551_vm1, %v12949_v50  ;;  %v2663_v50 = vld [vmem:[%s17315_s3 + $0x90] sm:$0xff]  ;;  %10271 = vmatprep.subr.bf16.mxu1 %v10270_v61  ;;  %v10312_v61 = vpack.c.bf16 %v2703_v60, %v2701_v28  ;;  %v10330_v60 = vpack.c.bf16 %v2724_v54, %v2722_v53  ;;  %v2733_v53 = vld [vmem:[%s17315_s3 + $0x2c0] sm:$0xff] }
 0x111   : > { %9714 = vmatprep.mubr.msk.f32.mxu0 %vm551_vm1, %v12965_v29  ;;  %v10272_v1 = vpack.c.bf16 %v2663_v50, %v2661_v62  ;;  %v2666_v29 = vld [vmem:[%s17315_s3 + $0xa8] sm:$0xff]  ;;  %v2708_v50 = vld [vmem:[%s17315_s3 + $0x1f8] sm:$0xff]  ;;  %v2735_v54 = vld [vmem:[%s17315_s3 + $0x2d0] sm:$0xff] }
 0x112   : > { %v10274_v8 = vpack.c.bf16 %v2668_v6, %v2666_v29  ;;  %v2706_v62 = vld [vmem:[%s17315_s3 + $0x1e8] sm:$0xff]  ;;  %v2705_v29 = vld [vmem:[%s17315_s3 + $0x1e0] sm:$0xff]  ;;  %v2707_v6 = vld [vmem:[%s17315_s3 + $0x1f0] sm:$0xff] }
 0x113   : > { %10273 = vmatpush1.bf16.msra.mxu1 %v10272_v1  ;;  %v10314_v1 = vpack.c.bf16 %v2708_v50, %v2706_v62  ;;  %v2723_v62 = vld [vmem:[%s17315_s3 + $0x270] sm:$0xff] }
 0x114   : > { %9715 = vmatmul.mubr.msk.f32.gmra.mrb[20].mxu0 %vm551_vm1, %v12981_v41  ;;  %v2667_v41 = vld [vmem:[%s17315_s3 + $0xb0] sm:$0xff]  ;;  %10275 = vmatprep.subr.bf16.mxu1 %v10274_v8  ;;  %v10316_v8 = vpack.c.bf16 %v2707_v6, %v2705_v29  ;;  %v2728_v29 = vld [vmem:[%s17315_s3 + $0x298] sm:$0xff] }
 0x115   : > { %9717 = vmatprep.mubr.msk.f32.mxu0 %vm551_vm1, %v13000_v49  ;;  %v10276_v10 = vpack.c.bf16 %v2667_v41, %v2665_v9  ;;  %v2670_v49 = vld [vmem:[%s17315_s3 + $0xc8] sm:$0xff]  ;;  %v2712_v41 = vld [vmem:[%s17315_s3 + $0x218] sm:$0xff] }
 0x116   : > { %v10278_v47 = vpack.c.bf16 %v2672_v12, %v2670_v49  ;;  %v2710_v9 = vld [vmem:[%s17315_s3 + $0x208] sm:$0xff] }
 0x117   : > { %10277 = vmatpush1.bf16.msra.mxu1 %v10276_v10  ;;  %v10318_v10 = vpack.c.bf16 %v2712_v41, %v2710_v9 }
 0x118   : > { %9718 = vmatmul.mubr.msk.f32.gmra.mrb[22].mxu0 %vm551_vm1, %v12984_v44  ;;  %v2671_v44 = vld [vmem:[%s17315_s3 + $0xd0] sm:$0xff]  ;;  %10279 = vmatprep.subr.bf16.mxu1 %v10278_v47 }
 0x119   : > { %3242 = vmatprep.mubr.f32.mxu0 %v17345_v7  ;;  %v10280_v48 = vpack.c.bf16 %v2671_v44, %v2669_v15 }
 0x11b   : > { %10281 = vmatpush1.bf16.msra.mxu1 %v10280_v48 }
 0x11c   : > { %10283 = vmatprep.subr.bf16.mxu1 %v10282_v18 }
 0x11f   : > { %10285 = vmatpush1.bf16.msra.mxu1 %v10284_v0 }
 0x120   : > { %10287 = vmatprep.subr.bf16.mxu1 %v10286_v63  ;;  %v2580_v63 = vlaneseq }
 0x122   : > { %v13383_v22 = vshrl.u32 %v2580_v63, 7  ;;  %v2725_v63 = vld [vmem:[%s17315_s3 + $0x280] sm:$0xff] }
 0x123   : > { %10289 = vmatpush1.bf16.msra.mxu1 %v10288_v24 }
 0x124   : > { %10291 = vmatprep.subr.bf16.mxu1 %v10290_v2  ;;  %17353 = vst [vmem:[#allocation9_spill] sm:$0xff] %v13383_v22  ;;  %v17332_v23 = vsub.s32 1, %v13383_v22  ;;  %v17331_v24 = vsub.s32 0, %v13383_v22  ;;  %v13390_v2 = vld [vmem:[%s17314_s2] sm:$0x1f] }
 0x126   : > { %v13395_v5 = vrot.slane %v13390_v2, %v17332_v23  ;;  %v13400_v25 = vrot.slane %v13390_v2, %v17331_v24  ;;  %v8433_v24 = vld [vmem:[%s17315_s3 + $0x548] sm:$0xff] }
 0x127   : > { %10293 = vmatpush1.bf16.msra.mxu1 %v10292_v4  ;;  %v8441_v23 = vld [vmem:[%s17315_s3 + $0x588] sm:$0xff] }
 0x128   : > { %10295 = vmatprep.subr.bf16.mxu1 %v10294_v26  ;;  %v2714_v26 = vld [vmem:[%s17315_s3 + $0x228] sm:$0xff] }
 0x12b   : > { %10297 = vmatpush1.bf16.msra.mxu1 %v10296_v38 }
 0x12c   : > { %10299 = vmatprep.subr.bf16.mxu1 %v10298_v17  ;;  %v10322_v17 = vpack.c.bf16 %v2716_v27, %v2714_v26  ;;  %v2732_v26 = vld [vmem:[%s17315_s3 + $0x2b8] sm:$0xff] }
 0x12f   : > { %10301 = vmatpush1.bf16.msra.mxu1 %v10300_v59  ;;  %v2720_v59 = vld [vmem:[%s17315_s3 + $0x258] sm:$0xff] }
 0x130   : > { %10303 = vmatprep.subr.bf16.mxu1 %v10302_v51  ;;  %v10326_v45 = vpack.c.bf16 %v2720_v59, %v2718_v37  ;;  %v2734_v59 = vld [vmem:[%s17315_s3 + $0x2c8] sm:$0xff] }
 0x133   : > { %10305 = vmatpush1.bf16.msra.mxu1 %v10304_v46  ;;  %v2717_v46 = vld [vmem:[%s17315_s3 + $0x240] sm:$0xff] }
 0x134   : > { %10307 = vmatprep.subr.bf16.mxu1 %v10306_v52  ;;  %v2719_v52 = vld [vmem:[%s17315_s3 + $0x250] sm:$0xff] }
 0x137   : > { %10309 = vmatpush1.bf16.msra.mxu1 %v10308_v11 }
 0x138   : > { %10311 = vmatprep.subr.bf16.mxu1 %v10310_v57  ;;  %v10328_v57 = vpack.c.bf16 %v2719_v52, %v2717_v46 }
 0x13b   : > { %10313 = vmatpush1.bf16.msra.mxu1 %v10312_v61  ;;  %v2721_v61 = vld [vmem:[%s17315_s3 + $0x260] sm:$0xff] }
 0x13c   : > { %10315 = vmatprep.subr.bf16.mxu1 %v10314_v1  ;;  %v2726_v1 = vld [vmem:[%s17315_s3 + $0x288] sm:$0xff]  ;;  %v10332_v9 = vpack.c.bf16 %v2723_v62, %v2721_v61  ;;  %v2740_v61 = vld [vmem:[%s17315_s3 + $0x2f8] sm:$0xff] }
 0x13f   : > { %10317 = vmatpush1.bf16.msra.mxu1 %v10316_v8 }
 0x140   : > { %10319 = vmatprep.subr.bf16.mxu1 %v10318_v10  ;;  %v10334_v10 = vpack.c.bf16 %v2728_v29, %v2726_v1  ;;  %v10344_v1 = vpack.c.bf16 %v2735_v54, %v2733_v53  ;;  %v2747_v53 = vld [vmem:[%s17315_s3 + $0x330] sm:$0xff] }
 0x180   : > { %v13351_v49 = vpop.f32.mrb[0].mxu1 }
 0x181   : > { %v13353_v12 = vpop.f32.mrb[1].mxu1 }
 0x184   : > { %v13355_v47 = vpop.f32.mrb[2].mxu1 }
 0x185   : > { %v13357_v15 = vpop.f32.mrb[3].mxu1 }
 0x188   : > { %v13359_v44 = vpop.f32.mrb[4].mxu1 }
 0x189   : > { %v13361_v48 = vpop.f32.mrb[5].mxu1 }
 0x18c   : > { %v13363_v14 = vpop.f32.mrb[6].mxu1 }
 0x18d   : > { %v13365_v16 = vpop.f32.mrb[7].mxu1 }
 0x190   : > { %v13367_v18 = vpop.f32.mrb[8].mxu1 }
 0x191   : > { %v13369_v30 = vpop.f32.mrb[9].mxu1 }
 0x194   : > { %v13371_v43 = vpop.f32.mrb[10].mxu1 }
 0x195   : > { %v13373_v19 = vpop.f32.mrb[11].mxu1 }
 0x198   : > { %v13375_v0 = vpop.f32.mrb[12].mxu1 }
 0x199   : > { %v13377_v56 = vpop.f32.mrb[13].mxu1 }
 0x19c   : > { %v13379_v21 = vpop.f32.mrb[14].mxu1 }
 0x19d   : > { %v13381_v58 = vpop.f32.mrb[15].mxu1 }
 0x1bf   : > { %v2273_v4 = vpop.f32.mrb[0].mxu0 }
 0x1c0   : > { %v2275_v31 = vpop.f32.mrb[1].mxu0  ;;  %v13418_v38 = vadd.f32 %v13400_v25, %v2273_v4  ;;  %v2730_v4 = vld [vmem:[%s17315_s3 + $0x2a8] sm:$0xff] }
 0x1c1   : > { %v13415_v32 = vadd.f32 %v13395_v5, %v2275_v31  ;;  %v10338_v34 = vpack.c.bf16 %v2732_v26, %v2730_v4  ;;  %v2744_v4 = vld [vmem:[%s17315_s3 + $0x318] sm:$0xff] }
 0x1c3   : > { %v2279_v36 = vpop.f32.mrb[2].mxu0  ;;  %2884 = vmatprep.mubr.f32.mxu1 %v13415_v32 }
 0x1c4   : > { %v2281_v51 = vpop.f32.mrb[3].mxu0  ;;  %2885 = vmatmul.mubr.f32.vlgmr.msra.gmra.mrb[16].mxu1 %v13418_v38  ;;  %v13438_v42 = vadd.f32 %v13400_v25, %v2279_v36  ;;  %v2731_v36 = vld [vmem:[%s17315_s3 + $0x2b0] sm:$0xff] }
 0x1c5   : > { %v13435_v39 = vadd.f32 %v13395_v5, %v2281_v51  ;;  %10321 = vmatpush1.bf16.msra.mxu1 %v10320_v33  ;;  %v10336_v33 = vpack.c.bf16 %v2727_v3, %v2725_v63  ;;  %v2736_v51 = vld [vmem:[%s17315_s3 + $0x2d8] sm:$0xff]  ;;  %v10340_v46 = vpack.c.bf16 %v2731_v36, %v2729_v35  ;;  %v2741_v36 = vld [vmem:[%s17315_s3 + $0x300] sm:$0xff] }
 0x1c6   : > { %10323 = vmatprep.subr.bf16.mxu1 %v10322_v17 }
 0x1c7   : > { %v2285_v13 = vpop.f32.mrb[4].mxu0  ;;  %2890 = vmatprep.mubr.f32.mxu1 %v13435_v39 }
 0x1c8   : > { %v2287_v55 = vpop.f32.mrb[5].mxu0  ;;  %2891 = vmatmul.mubr.f32.gmra.mrb[18].mxu1 %v13438_v42  ;;  %v13458_v28 = vadd.f32 %v13400_v25, %v2285_v13  ;;  %v10342_v13 = vpack.c.bf16 %v2736_v51, %v2734_v59  ;;  %v2748_v51 = vld [vmem:[%s17315_s3 + $0x338] sm:$0xff] }
 0x1c9   : > { %v13455_v11 = vadd.f32 %v13395_v5, %v2287_v55  ;;  %10325 = vmatpush1.bf16.msra.mxu1 %v10324_v40  ;;  %v2594_v55 = vsub.s32 3, %v13383_v22 }
 0x1ca   : > { %10327 = vmatprep.subr.bf16.mxu1 %v10326_v45 }
 0x1cb   : > { %v2291_v50 = vpop.f32.mrb[6].mxu0  ;;  %2896 = vmatprep.mubr.f32.mxu1 %v13455_v11  ;;  %v13548_v63 = vrot.slane %v13390_v2, %v2594_v55  ;;  %v2750_v55 = vld [vmem:[%s17315_s3 + $0x348] sm:$0xff] }
 0x1cc   : > { %v2293_v6 = vpop.f32.mrb[7].mxu0  ;;  %2897 = vmatmul.mubr.f32.gmra.mrb[20].mxu1 %v13458_v28  ;;  %v13478_v41 = vadd.f32 %v13400_v25, %v2291_v50 }
 0x1cd   : > { %v13475_v8 = vadd.f32 %v13395_v5, %v2293_v6  ;;  %10329 = vmatpush1.bf16.msra.mxu1 %v10328_v57  ;;  %v13572_v59 = vadd.f32 %v13548_v63, %v13353_v12 }
 0x1ce   : > { %10331 = vmatprep.subr.bf16.mxu1 %v10330_v60  ;;  %v2738_v60 = vld [vmem:[%s17315_s3 + $0x2e8] sm:$0xff] }
 0x1cf   : > { %v2297_v20 = vpop.f32.mrb[8].mxu0  ;;  %2902 = vmatprep.mubr.f32.mxu1 %v13475_v8  ;;  %v10346_v6 = vpack.c.bf16 %v2740_v61, %v2738_v60 }
 0x1d0   : > { %v2299_v27 = vpop.f32.mrb[9].mxu0  ;;  %2903 = vmatmul.mubr.f32.gmra.mrb[22].mxu1 %v13478_v41  ;;  %v13498_v17 = vadd.f32 %v13400_v25, %v2297_v20  ;;  %v2742_v20 = vld [vmem:[%s17315_s3 + $0x308] sm:$0xff] }
 0x1d1   : > { %v13495_v31 = vadd.f32 %v13395_v5, %v2299_v27  ;;  %10333 = vmatpush1.bf16.msra.mxu1 %v10332_v9  ;;  %v2737_v9 = vld [vmem:[%s17315_s3 + $0x2e0] sm:$0xff]  ;;  %v10350_v35 = vpack.c.bf16 %v2744_v4, %v2742_v20 }
 0x1d2   : > { %10335 = vmatprep.subr.bf16.mxu1 %v10334_v10  ;;  %v2739_v10 = vld [vmem:[%s17315_s3 + $0x2f0] sm:$0xff] }
 0x1d3   : > { %v2303_v37 = vpop.f32.mrb[10].mxu0  ;;  %2908 = vmatprep.mubr.f32.mxu1 %v13495_v31 }
 0x1d4   : > { %v2305_v40 = vpop.f32.mrb[11].mxu0  ;;  %2909 = vmatmul.mubr.f32.gmra.mrb[24].mxu1 %v13498_v17  ;;  %v13518_v52 = vadd.f32 %v13400_v25, %v2303_v37  ;;  %v2743_v37 = vld [vmem:[%s17315_s3 + $0x310] sm:$0xff] }
 0x1d5   : > { %v13515_v45 = vadd.f32 %v13395_v5, %v2305_v40  ;;  %10337 = vmatpush1.bf16.msra.mxu1 %v10336_v33  ;;  %v10348_v33 = vpack.c.bf16 %v2739_v10, %v2737_v9  ;;  %v10352_v12 = vpack.c.bf16 %v2743_v37, %v2741_v36  ;;  %v2754_v10 = vld [vmem:[%s17315_s3 + $0x368] sm:$0xff] }
 0x1d6   : > { %10339 = vmatprep.subr.bf16.mxu1 %v10338_v34  ;;  %v2758_v37 = vld [vmem:[%s17315_s3 + $0x388] sm:$0xff] }
 0x1d7   : > { %v2309_v57 = vpop.f32.mrb[12].mxu0  ;;  %2914 = vmatprep.mubr.f32.mxu1 %v13515_v45 }
 0x1d8   : > { %v2311_v62 = vpop.f32.mrb[13].mxu0  ;;  %2915 = vmatmul.mubr.f32.gmra.mrb[26].mxu1 %v13518_v52  ;;  %v13539_v29 = vadd.f32 %v13400_v25, %v2309_v57  ;;  %v2752_v57 = vld [vmem:[%s17315_s3 + $0x358] sm:$0xff] }
 0x1d9   : > { %v13536_v50 = vadd.f32 %v13395_v5, %v2311_v62  ;;  %10341 = vmatpush1.bf16.msra.mxu1 %v10340_v46  ;;  %v10358_v62 = vpack.c.bf16 %v2752_v57, %v2750_v55  ;;  %v2762_v55 = vld [vmem:[%s17315_s3 + $0x3a8] sm:$0xff]  ;;  %v2764_v57 = vld [vmem:[%s17315_s3 + $0x3b8] sm:$0xff] }
 0x1da   : > { %10343 = vmatprep.subr.bf16.mxu1 %v10342_v13  ;;  %v2745_v13 = vld [vmem:[%s17315_s3 + $0x320] sm:$0xff] }
 0x1db   : > { %v2315_v3 = vpop.f32.mrb[14].mxu0  ;;  %2920 = vmatprep.mubr.f32.mxu1 %v13536_v50  ;;  %v10356_v61 = vpack.c.bf16 %v2747_v53, %v2745_v13  ;;  %v2757_v13 = vld [vmem:[%s17315_s3 + $0x380] sm:$0xff]  ;;  %v2759_v53 = vld [vmem:[%s17315_s3 + $0x390] sm:$0xff] }
 0x1dc   : > { %v2317_v26 = vpop.f32.mrb[15].mxu0  ;;  %2921 = vmatmul.mubr.f32.gmra.mrb[28].mxu1 %v13539_v29  ;;  %v13562_v34 = vadd.f32 %v13400_v25, %v2315_v3  ;;  %v2746_v25 = vld [vmem:[%s17315_s3 + $0x328] sm:$0xff]  ;;  %v2756_v3 = vld [vmem:[%s17315_s3 + $0x378] sm:$0xff] }
 0x1dd   : > { %v13559_v27 = vadd.f32 %v13395_v5, %v2317_v26  ;;  %10345 = vmatpush1.bf16.msra.mxu1 %v10344_v1  ;;  %v10354_v46 = vpack.c.bf16 %v2748_v51, %v2746_v25  ;;  %v2749_v1 = vld [vmem:[%s17315_s3 + $0x340] sm:$0xff]  ;;  %v10362_v26 = vpack.c.bf16 %v2756_v3, %v2754_v10  ;;  %v2760_v25 = vld [vmem:[%s17315_s3 + $0x398] sm:$0xff]  ;;  %v2766_v10 = vld [vmem:[%s17315_s3 + $0x3c8] sm:$0xff] }
 0x1de   : > { %10347 = vmatprep.subr.bf16.mxu1 %v10346_v6  ;;  %v2751_v6 = vld [vmem:[%s17315_s3 + $0x350] sm:$0xff]  ;;  %v2768_v3 = vld [vmem:[%s17315_s3 + $0x3d8] sm:$0xff] }
 0x1df   : > { %v13574_v5 = vpop.f32.mrb[16].mxu0  ;;  %2926 = vmatprep.mubr.f32.mxu1 %v13559_v27  ;;  %v10360_v4 = vpack.c.bf16 %v2751_v6, %v2749_v1  ;;  %v2761_v1 = vld [vmem:[%s17315_s3 + $0x3a0] sm:$0xff]  ;;  %v2763_v6 = vld [vmem:[%s17315_s3 + $0x3b0] sm:$0xff] }
 0x1e0   : > { %v13583_v40 = vpop.f32.mrb[17].mxu0  ;;  %2927 = vmatmul.mubr.f32.gmra.mrb[30].mxu1 %v13562_v34 }
 0x1e1   : > { %10349 = vmatpush1.bf16.msra.mxu1 %v10348_v33  ;;  %2997 = vmatprep.mubr.f32.mxu1 %v13572_v59  ;;  %v2753_v33 = vld [vmem:[%s17315_s3 + $0x360] sm:$0xff] }
 0x1e2   : > { %10351 = vmatprep.subr.bf16.mxu1 %v10350_v35  ;;  %v2755_v35 = vld [vmem:[%s17315_s3 + $0x370] sm:$0xff] }
 0x1e3   : > { %v13593_v54 = vpop.f32.mrb[18].mxu0 }
 0x1e4   : > { %v13601_v60 = vpop.f32.mrb[19].mxu0 }
 0x1e5   : > { %10353 = vmatpush1.bf16.msra.mxu1 %v10352_v12  ;;  %v10364_v12 = vpack.c.bf16 %v2755_v35, %v2753_v33  ;;  %v2765_v33 = vld [vmem:[%s17315_s3 + $0x3c0] sm:$0xff]  ;;  %v2767_v35 = vld [vmem:[%s17315_s3 + $0x3d0] sm:$0xff] }
 0x1e6   : > { %10355 = vmatprep.subr.bf16.mxu1 %v10354_v46  ;;  %v10366_v46 = vpack.c.bf16 %v2760_v25, %v2758_v37  ;;  %v2770_v37 = vld [vmem:[%s17315_s3 + $0x3e8] sm:$0xff]  ;;  %v2772_v25 = vld [vmem:[%s17315_s3 + $0x3f8] sm:$0xff] }
 0x1e7   : > { %v13609_v9 = vpop.f32.mrb[20].mxu0 }
 0x1e8   : > { %v13617_v20 = vpop.f32.mrb[21].mxu0 }
 0x1e9   : > { %10357 = vmatpush1.bf16.msra.mxu1 %v10356_v61  ;;  %v10368_v61 = vpack.c.bf16 %v2759_v53, %v2757_v13  ;;  %v10378_v13 = vpack.c.bf16 %v2772_v25, %v2770_v37  ;;  %v2769_v53 = vld [vmem:[%s17315_s3 + $0x3e0] sm:$0xff] }
 0x1ea   : > { %10359 = vmatprep.subr.bf16.mxu1 %v10358_v62  ;;  %v10370_v62 = vpack.c.bf16 %v2764_v57, %v2762_v55  ;;  %v2771_v55 = vld [vmem:[%s17315_s3 + $0x3f0] sm:$0xff]  ;;  %v2774_v57 = vld [vmem:[%s17315_s3 + $0x408] sm:$0xff]  ;;  %v2777_v25 = vld [vmem:[%s17315_s3 + $0x420] sm:$0xff] }
 0x1eb   : > { %v13625_v36 = vpop.f32.mrb[22].mxu0 }
 0x1ec   : > { %v13633_v51 = vpop.f32.mrb[23].mxu0 }
 0x1ed   : > { %10361 = vmatpush1.bf16.msra.mxu1 %v10360_v4  ;;  %v10372_v4 = vpack.c.bf16 %v2763_v6, %v2761_v1 }
 0x1ee   : > { %10363 = vmatprep.subr.bf16.mxu1 %v10362_v26  ;;  %v10374_v26 = vpack.c.bf16 %v2768_v3, %v2766_v10  ;;  %v2773_v10 = vld [vmem:[%s17315_s3 + $0x400] sm:$0xff]  ;;  %v2775_v3 = vld [vmem:[%s17315_s3 + $0x410] sm:$0xff] }
 0x1f1   : > { %10365 = vmatpush1.bf16.msra.mxu1 %v10364_v12  ;;  %v10376_v12 = vpack.c.bf16 %v2767_v35, %v2765_v33  ;;  %v10384_v33 = vpack.c.bf16 %v2775_v3, %v2773_v10  ;;  %v2786_v10 = vld [vmem:[%s17315_s3 + $0x468] sm:$0xff] }
 0x1f2   : > { %10367 = vmatprep.subr.bf16.mxu1 %v10366_v46  ;;  %v17330_v46 = vsub.s32 2, %v13383_v22 }
 0x1f4   : > { %v13687_v1 = vrot.slane %v13390_v2, %v17330_v46  ;;  %v8429_v46 = vld [vmem:[%s17315_s3 + $0x528] sm:$0xff] }
 0x1f5   : > { %10369 = vmatpush1.bf16.msra.mxu1 %v10368_v61  ;;  %v2776_v61 = vld [vmem:[%s17315_s3 + $0x418] sm:$0xff] }
 0x1f6   : > { %10371 = vmatprep.subr.bf16.mxu1 %v10370_v62  ;;  %v10380_v62 = vpack.c.bf16 %v2771_v55, %v2769_v53  ;;  %v10382_v6 = vpack.c.bf16 %v2776_v61, %v2774_v57  ;;  %v13703_v35 = vadd.f32 %v13687_v1, %v13351_v49  ;;  %v2782_v53 = vld [vmem:[%s17315_s3 + $0x448] sm:$0xff]  ;;  %v2784_v49 = vld [vmem:[%s17315_s3 + $0x458] sm:$0xff]  ;;  %v13725_v57 = vadd.f32 %v13687_v1, %v13355_v47  ;;  %v2781_v61 = vld [vmem:[%s17315_s3 + $0x440] sm:$0xff] }
 0x1f7   : > { %v2788_v47 = vld [vmem:[%s17315_s3 + $0x478] sm:$0xff] }
 0x1f9   : > { %10373 = vmatpush1.bf16.msra.mxu1 %v10372_v4  ;;  %v2778_v4 = vld [vmem:[%s17315_s3 + $0x428] sm:$0xff] }
 0x1fa   : > { %10375 = vmatprep.subr.bf16.mxu1 %v10374_v26  ;;  %v2780_v26 = vld [vmem:[%s17315_s3 + $0x438] sm:$0xff] }
 0x1fb   : > { %v10386_v37 = vpack.c.bf16 %v2780_v26, %v2778_v4  ;;  %v13747_v4 = vadd.f32 %v13687_v1, %v13359_v44  ;;  %v2785_v26 = vld [vmem:[%s17315_s3 + $0x460] sm:$0xff]  ;;  %v2792_v44 = vld [vmem:[%s17315_s3 + $0x498] sm:$0xff] }
 0x1fd   : > { %10377 = vmatpush1.bf16.msra.mxu1 %v10376_v12  ;;  %v2779_v12 = vld [vmem:[%s17315_s3 + $0x430] sm:$0xff] }
 0x1fe   : > { %10379 = vmatprep.subr.bf16.mxu1 %v10378_v13  ;;  %v13713_v13 = vadd.f32 %v13548_v63, %v13357_v15  ;;  %v10388_v55 = vpack.c.bf16 %v2779_v12, %v2777_v25  ;;  %v10390_v15 = vpack.c.bf16 %v2784_v49, %v2782_v53  ;;  %v2790_v25 = vld [vmem:[%s17315_s3 + $0x488] sm:$0xff]  ;;  %v13769_v53 = vadd.f32 %v13687_v1, %v13363_v14  ;;  %v2789_v49 = vld [vmem:[%s17315_s3 + $0x480] sm:$0xff] }
 0x201   : > { %10381 = vmatpush1.bf16.msra.mxu1 %v10380_v62  ;;  %v2783_v62 = vld [vmem:[%s17315_s3 + $0x450] sm:$0xff] }
 0x202   : > { %10383 = vmatprep.subr.bf16.mxu1 %v10382_v6  ;;  %v13735_v6 = vadd.f32 %v13548_v63, %v13361_v48  ;;  %v10392_v3 = vpack.c.bf16 %v2783_v62, %v2781_v61  ;;  %v10394_v48 = vpack.c.bf16 %v2788_v47, %v2786_v10  ;;  %v13785_v61 = vadd.f32 %v13687_v1, %v13367_v18  ;;  %v2793_v18 = vld [vmem:[%s17315_s3 + $0x4a0] sm:$0xff] }
 0x203   : > { %v13789_v62 = vadd.f32 %v13548_v63, %v13373_v19  ;;  %v13798_v10 = vadd.f32 %v13687_v1, %v13371_v43  ;;  %v13805_v19 = vadd.f32 %v13548_v63, %v13377_v56  ;;  %v13811_v47 = vadd.f32 %v13687_v1, %v13375_v0 }
 0x204   : > { %2998 = vmatmul.mubr.f32.vlgmr.msra.gmra.mrb[16].mxu1 %v13703_v35  ;;  %v2598_v43 = vsub.s32 4, %v13383_v22  ;;  %v13822_v56 = vadd.f32 %v13687_v1, %v13379_v21 }
 0x205   : > { %3003 = vmatprep.mubr.f32.mxu1 %v13713_v13  ;;  %10385 = vmatpush1.bf16.msra.mxu1 %v10384_v33  ;;  %v2787_v33 = vld [vmem:[%s17315_s3 + $0x470] sm:$0xff] }
 0x206   : > { %10387 = vmatprep.subr.bf16.mxu1 %v10386_v37  ;;  %v13757_v37 = vadd.f32 %v13548_v63, %v13365_v16  ;;  %v10396_v12 = vpack.c.bf16 %v2787_v33, %v2785_v26  ;;  %v10398_v16 = vpack.c.bf16 %v2792_v44, %v2790_v25  ;;  %17355 = vst [vmem:[#allocation11_spill] sm:$0xff] %v13822_v56 }
 0x208   : > { %3004 = vmatmul.mubr.f32.gmra.mrb[18].mxu1 %v13725_v57 }
 0x209   : > { %3009 = vmatprep.mubr.f32.mxu1 %v13735_v6  ;;  %10389 = vmatpush1.bf16.msra.mxu1 %v10388_v55  ;;  %v2791_v55 = vld [vmem:[%s17315_s3 + $0x490] sm:$0xff] }
 0x20a   : > { %10391 = vmatprep.subr.bf16.mxu1 %v10390_v15  ;;  %v13779_v15 = vadd.f32 %v13548_v63, %v13369_v30  ;;  %v10400_v14 = vpack.c.bf16 %v2791_v55, %v2789_v49  ;;  %v2794_v30 = vld [vmem:[%s17315_s3 + $0x4a8] sm:$0xff] }
 0x20c   : > { %3010 = vmatmul.mubr.f32.gmra.mrb[20].mxu1 %v13747_v4 }
 0x20d   : > { %3015 = vmatprep.mubr.f32.mxu1 %v13757_v37  ;;  %10393 = vmatpush1.bf16.msra.mxu1 %v10392_v3  ;;  %v13816_v3 = vadd.f32 %v13548_v63, %v13381_v58 }
 0x20e   : > { %10395 = vmatprep.subr.bf16.mxu1 %v10394_v48  ;;  %v2599_v48 = vrot.slane %v13390_v2, %v2598_v43 }
 0x20f   : > { %17354 = vst [vmem:[#allocation10_spill] sm:$0xff] %v13816_v3 }
 0x210   : > { %3016 = vmatmul.mubr.f32.gmra.mrb[22].mxu1 %v13769_v53  ;;  %v13828_v0 = vadd.f32 %v2599_v48, %v13583_v40  ;;  %v13834_v58 = vadd.f32 %v13574_v5, %v2599_v48  ;;  %v13840_v21 = vadd.f32 %v2599_v48, %v13601_v60  ;;  %v13846_v2 = vadd.f32 %v13593_v54, %v2599_v48 }
 0x211   : > { %3021 = vmatprep.mubr.f32.mxu1 %v13779_v15  ;;  %10397 = vmatpush1.bf16.msra.mxu1 %v10396_v12  ;;  %v13852_v63 = vadd.f32 %v2599_v48, %v13617_v20  ;;  %v13858_v5 = vadd.f32 %v13609_v9, %v2599_v48  ;;  %v13864_v40 = vadd.f32 %v2599_v48, %v13633_v51 }
 0x212   : > { %10399 = vmatprep.subr.bf16.mxu1 %v10398_v16  ;;  %17356 = vst [vmem:[#allocation12_spill] sm:$0xff] %v13828_v0  ;;  %17357 = vst [vmem:[#allocation13_spill] sm:$0xff] %v13834_v58  ;;  %v13870_v54 = vadd.f32 %v13625_v36, %v2599_v48 }
 0x213   : > { %17358 = vst [vmem:[#allocation14_spill] sm:$0xff] %v13840_v21  ;;  %17359 = vst [vmem:[#allocation15_spill] sm:$0xff] %v13846_v2 }
 0x214   : > { %3022 = vmatmul.mubr.f32.gmra.mrb[24].mxu1 %v13785_v61  ;;  %17360 = vst [vmem:[#allocation16_spill] sm:$0xff] %v13852_v63  ;;  %17361 = vst [vmem:[#allocation17_spill] sm:$0xff] %v13858_v5 }
 0x215   : > { %3027 = vmatprep.mubr.f32.mxu1 %v13789_v62  ;;  %10401 = vmatpush1.bf16.msra.mxu1 %v10400_v14  ;;  %17362 = vst [vmem:[#allocation18_spill] sm:$0xff] %v13864_v40  ;;  %17363 = vst [vmem:[#allocation19_spill] sm:$0xff] %v13870_v54 }
 0x216   : > { %3066 = vmatprep.subr.mxu1 %v2794_v30 }
 0x218   : > { %3028 = vmatmul.mubr.f32.gmra.mrb[26].mxu1 %v13798_v10 }
 0x219   : > { %3033 = vmatprep.mubr.f32.mxu1 %v13805_v19  ;;  %3067 = vmatpush1.msra.mxu1 %v2793_v18 }
 0x21c   : > { %3034 = vmatmul.mubr.f32.gmra.mrb[28].mxu1 %v13811_v47 }
 0x21d   : > { %3039 = vmatprep.mubr.f32.mxu1 %v13816_v3 }
 0x220   : > { %3040 = vmatmul.mubr.f32.gmra.mrb[30].mxu1 %v13822_v56 }
 0x221   : > { %3110 = vmatprep.mubr.f32.mxu1 %v17345_v7 }
 0x224   : > { %8385 = vmatmul.mubr.msk.f32.vlgmr.msra.gmra.mrb[16].mxu1 %vm2795_vm5, %v13828_v0 }
 0x225   : > { %3116 = vmatprep.mubr.f32.mxu1 %v17345_v7 }
 0x228   : > { %8386 = vmatmul.mubr.msk.f32.gmra.mrb[18].mxu1 %vm2795_vm5, %v13834_v58 }
 0x229   : > { %3122 = vmatprep.mubr.f32.mxu1 %v17345_v7 }
 0x22c   : > { %8387 = vmatmul.mubr.msk.f32.gmra.mrb[20].mxu1 %vm2795_vm5, %v13840_v21 }
 0x22d   : > { %3128 = vmatprep.mubr.f32.mxu1 %v17345_v7 }
 0x230   : > { %8388 = vmatmul.mubr.msk.f32.gmra.mrb[22].mxu1 %vm2795_vm5, %v13846_v2 }
 0x231   : > { %3134 = vmatprep.mubr.f32.mxu1 %v17345_v7 }
 0x234   : > { %8389 = vmatmul.mubr.msk.f32.gmra.mrb[24].mxu1 %vm2795_vm5, %v13852_v63 }
 0x235   : > { %3140 = vmatprep.mubr.f32.mxu1 %v17345_v7 }
 0x238   : > { %8390 = vmatmul.mubr.msk.f32.gmra.mrb[26].mxu1 %vm2795_vm5, %v13858_v5 }
 0x239   : > { %3146 = vmatprep.mubr.f32.mxu1 %v17345_v7 }
 0x23c   : > { %8391 = vmatmul.mubr.msk.f32.gmra.mrb[28].mxu1 %vm2795_vm5, %v13864_v40 }
 0x23d   : > { %3152 = vmatprep.mubr.f32.mxu1 %v17345_v7 }
 0x240   : > { %8392 = vmatmul.mubr.msk.f32.gmra.mrb[30].mxu1 %vm2795_vm5, %v13870_v54 }
 0x241   : > { %4025 = vmatprep.mubr.f32.mxu1 %v17345_v7 }
 0x2f7   : > { %v3112_v60 = vpop.f32.mrb[16].mxu1 }
 0x2f8   : > { %v3114_v9 = vpop.f32.mrb[17].mxu1 }
 0x2fb   : > { %v3118_v20 = vpop.f32.mrb[18].mxu1 }
 0x2fc   : > { %v10404_v1 = vpack.c.bf16 %v3118_v20, %v3112_v60  ;;  %v3120_v26 = vpop.f32.mrb[19].mxu1 }
 0x2fd   : > { %v10402_v51 = vpack.c.bf16 %v3120_v26, %v3114_v9 }
 0x2ff   : > { %v3124_v33 = vpop.f32.mrb[20].mxu1  ;;  %10403 = vmatprep.subr.bf16.mxu0 %v10402_v51 }
 0x300   : > { %v3126_v25 = vpop.f32.mrb[21].mxu1  ;;  %10405 = vmatpush1.bf16.msra.mxu0 %v10404_v1 }
 0x303   : > { %v3130_v44 = vpop.f32.mrb[22].mxu1 }
 0x304   : > { %v10408_v12 = vpack.c.bf16 %v3130_v44, %v3124_v33  ;;  %v3132_v16 = vpop.f32.mrb[23].mxu1  ;;  %v13887_v44 = vld [vmem:[%s17316_s4] sm:$0xff] }
 0x305   : > { %v10406_v36 = vpack.c.bf16 %v3132_v16, %v3126_v25  ;;  %v13895_v16 = vld [vmem:[%s17316_s4 + $0x8] sm:$0xff]  ;;  %v11882_v33 = vld [vmem:[%s17316_s4 + $0x40] sm:$0xf] }
 0x307   : > { %v3136_v49 = vpop.f32.mrb[24].mxu1  ;;  %10407 = vmatprep.subr.bf16.mxu0 %v10406_v36 }
 0x308   : > { %v3138_v55 = vpop.f32.mrb[25].mxu1  ;;  %10409 = vmatpush1.bf16.msra.mxu0 %v10408_v12 }
 0x30b   : > { %v3142_v14 = vpop.f32.mrb[26].mxu1 }
 0x30c   : > { %v10412_v30 = vpack.c.bf16 %v3142_v14, %v3136_v49  ;;  %v3144_v18 = vpop.f32.mrb[27].mxu1  ;;  %v13903_v49 = vld [vmem:[%s17316_s4 + $0x10] sm:$0xf]  ;;  %v13923_v14 = vld [vmem:[%s17316_s4 + $0x20] sm:$0xff] }
 0x30d   : > { %v10410_v43 = vpack.c.bf16 %v3144_v18, %v3138_v55  ;;  %v13915_v55 = vld [vmem:[%s17316_s4 + $0x18] sm:$0xff]  ;;  %v8414_v18 = vld [vmem:[%s17315_s3 + $0x4b0] sm:$0xff] }
 0x30f   : > { %v3148_v48 = vpop.f32.mrb[28].mxu1  ;;  %10411 = vmatprep.subr.bf16.mxu0 %v10410_v43 }
 0x310   : > { %v3150_v60 = vpop.f32.mrb[29].mxu1  ;;  %10413 = vmatpush1.bf16.msra.mxu0 %v10412_v30 }
 0x313   : > { %v3154_v9 = vpop.f32.mrb[30].mxu1 }
 0x314   : > { %v10417_v20 = vpack.c.bf16 %v3154_v9, %v3148_v48  ;;  %v3156_v26 = vpop.f32.mrb[31].mxu1  ;;  %v8419_v48 = vld [vmem:[%s17315_s3 + $0x4d8] sm:$0xff] }
 0x315   : > { %v10414_v25 = vpack.c.bf16 %v3156_v26, %v3150_v60  ;;  %v13961_v60 = vld [vmem:[%s17316_s4 + $0x30] sm:$0xff] }
 0x317   : > { %10416 = vmatprep.subr.msk.bf16.mxu0 %vm13876_vm7, %v10414_v25 }
 0x318   : > { %10419 = vmatpush1.bf16.msk.msra.mxu0 %vm13876_vm7, %v10417_v20 }
 0x319   : > { %10421 = vmatprep.subr.bf16.mxu0 %v10402_v51 }
 0x31b   : > { %8395 = vmatmul.mubr.msk.f32.vlgmr.msra.gmra.mrb[24].mxu0 %vm3162_vm8, %v13887_v44 }
 0x31c   : > { %10423 = vmatpush1.bf16.msra.mxu0 %v10404_v1  ;;  %3248 = vmatprep.mubr.f32.mxu0 %v17345_v7 }
 0x31d   : > { %10425 = vmatprep.subr.bf16.mxu0 %v10406_v36 }
 0x31f   : > { %8396 = vmatmul.mubr.msk.f32.gmra.mrb[26].mxu0 %vm3162_vm8, %v13895_v16 }
 0x320   : > { %10427 = vmatpush1.bf16.msra.mxu0 %v10408_v12  ;;  %3254 = vmatprep.mubr.f32.mxu0 %v17345_v7 }
 0x321   : > { %10429 = vmatprep.subr.bf16.mxu0 %v10410_v43 }
 0x323   : > { %8397 = vmatmul.mubr.msk.f32.gmra.mrb[28].mxu0 %vm3162_vm8, %v13903_v49 }
 0x324   : > { %10431 = vmatpush1.bf16.msra.mxu0 %v10412_v30  ;;  %3338 = vmatprep.mubr.f32.mxu0 %v17345_v7 }
 0x325   : > { %10434 = vmatprep.subr.msk.bf16.mxu0 %vm13876_vm7, %v10414_v25 }
 0x328   : > { %10437 = vmatpush1.bf16.msk.msra.mxu0 %vm13876_vm7, %v10417_v20 }
 0x329   : > { %10439 = vmatprep.subr.bf16.mxu0 %v10402_v51  ;;  %v13931_v51 = vld [vmem:[%s17316_s4 + $0x28] sm:$0xf] }
 0x32b   : > { %8403 = vmatmul.mubr.msk.f32.vlgmr.msra.gmra.mrb[30].mxu0 %vm3162_vm8, %v13915_v55 }
 0x32c   : > { %10441 = vmatpush1.bf16.msra.mxu0 %v10404_v1  ;;  %3344 = vmatprep.mubr.f32.mxu0 %v17345_v7  ;;  %v8415_v1 = vld [vmem:[%s17315_s3 + $0x4b8] sm:$0xff] }
 0x32d   : > { %10443 = vmatprep.subr.bf16.mxu0 %v10406_v36  ;;  %v8417_v36 = vld [vmem:[%s17315_s3 + $0x4c8] sm:$0xff] }
 0x32f   : > { %8404 = vmatmul.mubr.msk.f32.gmra.mrb[32].mxu0 %vm3162_vm8, %v13923_v14 }
 0x330   : > { %10445 = vmatpush1.bf16.msra.mxu0 %v10408_v12  ;;  %3350 = vmatprep.mubr.f32.mxu0 %v17345_v7  ;;  %v10456_v12 = vpack.c.bf16 %v8417_v36, %v8415_v1  ;;  %v8420_v1 = vld [vmem:[%s17315_s3 + $0x4e0] sm:$0xff]  ;;  %v8425_v36 = vld [vmem:[%s17315_s3 + $0x508] sm:$0xff] }
 0x331   : > { %10447 = vmatprep.subr.bf16.mxu0 %v10410_v43  ;;  %v8416_v43 = vld [vmem:[%s17315_s3 + $0x4c0] sm:$0xff] }
 0x332   : > { %v10458_v9 = vpack.c.bf16 %v8416_v43, %v8414_v18 }
 0x333   : > { %8405 = vmatmul.mubr.msk.f32.gmra.mrb[34].mxu0 %vm3162_vm8, %v13931_v51 }
 0x334   : > { %10449 = vmatpush1.bf16.msra.mxu0 %v10412_v30  ;;  %3440 = vmatprep.mubr.f32.mxu0 %v17345_v7  ;;  %v8421_v30 = vld [vmem:[%s17315_s3 + $0x4e8] sm:$0xff] }
 0x335   : > { %10452 = vmatprep.subr.msk.bf16.mxu0 %vm13876_vm7, %v10414_v25  ;;  %v10460_v26 = vpack.c.bf16 %v8421_v30, %v8419_v48  ;;  %v8418_v25 = vld [vmem:[%s17315_s3 + $0x4d0] sm:$0xff]  ;;  %v8424_v30 = vld [vmem:[%s17315_s3 + $0x500] sm:$0xff] }
 0x336   : > { %v10462_v18 = vpack.c.bf16 %v8420_v1, %v8418_v25  ;;  %v8422_v48 = vld [vmem:[%s17315_s3 + $0x4f0] sm:$0xff] }
 0x337   : > { %v10466_v25 = vpack.c.bf16 %v8424_v30, %v8422_v48  ;;  %v8430_v48 = vld [vmem:[%s17315_s3 + $0x530] sm:$0xff]  ;;  %v8432_v30 = vld [vmem:[%s17315_s3 + $0x540] sm:$0xff] }
 0x338   : > { %10455 = vmatpush1.bf16.msk.msra.mxu0 %vm13876_vm7, %v10417_v20  ;;  %v8423_v20 = vld [vmem:[%s17315_s3 + $0x4f8] sm:$0xff] }
 0x339   : > { %10457 = vmatprep.subr.bf16.mxu0 %v10456_v12  ;;  %v13981_v12 = vld [vmem:[%s17316_s4 + $0x38] sm:$0xff]  ;;  %v10464_v43 = vpack.c.bf16 %v8425_v36, %v8423_v20  ;;  %v8426_v20 = vld [vmem:[%s17315_s3 + $0x510] sm:$0xff]  ;;  %v8428_v36 = vld [vmem:[%s17315_s3 + $0x520] sm:$0xff] }
 0x33b   : > { %8411 = vmatmul.mubr.msk.f32.vlgmr.msra.gmra.mrb[36].mxu0 %vm3162_vm8, %v13961_v60 }
 0x33c   : > { %10459 = vmatpush1.bf16.msra.mxu0 %v10458_v9  ;;  %3446 = vmatprep.mubr.f32.mxu0 %v17345_v7  ;;  %v8427_v9 = vld [vmem:[%s17315_s3 + $0x518] sm:$0xff] }
 0x33d   : > { %10461 = vmatprep.subr.bf16.mxu0 %v10460_v26  ;;  %v14001_v26 = vld [vmem:[%s17316_s4 + $0x40] sm:$0xf]  ;;  %v10468_v1 = vpack.c.bf16 %v8429_v46, %v8427_v9  ;;  %v10470_v46 = vpack.c.bf16 %v8428_v36, %v8426_v20  ;;  %v8435_v9 = vld [vmem:[%s17315_s3 + $0x558] sm:$0xff]  ;;  %v10474_v20 = vpack.c.bf16 %v8432_v30, %v8430_v48  ;;  %v8438_v48 = vld [vmem:[%s17315_s3 + $0x570] sm:$0xff] }
 0x33e   : > { %v8436_v36 = vld [vmem:[%s17315_s3 + $0x560] sm:$0xff] }
 0x33f   : > { %8412 = vmatmul.mubr.msk.f32.gmra.mrb[38].mxu0 %vm3162_vm8, %v13981_v12  ;;  %v8440_v30 = vld [vmem:[%s17315_s3 + $0x580] sm:$0xff] }
 0x340   : > { %10463 = vmatpush1.bf16.msra.mxu0 %v10462_v18  ;;  %3452 = vmatprep.mubr.f32.mxu0 %v17345_v7  ;;  %v8431_v18 = vld [vmem:[%s17315_s3 + $0x538] sm:$0xff] }
 0x341   : > { %10465 = vmatprep.subr.bf16.mxu0 %v10464_v43  ;;  %v10472_v43 = vpack.c.bf16 %v8433_v24, %v8431_v18  ;;  %v8439_v18 = vld [vmem:[%s17315_s3 + $0x578] sm:$0xff] }
 0x343   : > { %8413 = vmatmul.mubr.msk.f32.gmra.mrb[40].mxu0 %vm3162_vm8, %v14001_v26 }
 0x344   : > { %10467 = vmatpush1.bf16.msra.mxu0 %v10466_v25  ;;  %3680 = vmatprep.mubr.f32.mxu0 %v13415_v32  ;;  %v8437_v25 = vld [vmem:[%s17315_s3 + $0x568] sm:$0xff] }
 0x345   : > { %10469 = vmatprep.subr.bf16.mxu0 %v10468_v1  ;;  %v10476_v24 = vpack.c.bf16 %v8437_v25, %v8435_v9  ;;  %v8434_v1 = vld [vmem:[%s17315_s3 + $0x550] sm:$0xff]  ;;  %v8443_v9 = vld [vmem:[%s17315_s3 + $0x598] sm:$0xff]  ;;  %v8445_v25 = vld [vmem:[%s17315_s3 + $0x5a8] sm:$0xff] }
 0x348   : > { %10471 = vmatpush1.bf16.msra.mxu0 %v10470_v46  ;;  %v10478_v46 = vpack.c.bf16 %v8436_v36, %v8434_v1  ;;  %v8444_v1 = vld [vmem:[%s17315_s3 + $0x5a0] sm:$0xff]  ;;  %v8447_v36 = vld [vmem:[%s17315_s3 + $0x5b8] sm:$0xff] }
 0x349   : > { %10473 = vmatprep.subr.bf16.mxu0 %v10472_v43  ;;  %v10480_v43 = vpack.c.bf16 %v8441_v23, %v8439_v18  ;;  %v10484_v23 = vpack.c.bf16 %v8445_v25, %v8443_v9  ;;  %v8449_v18 = vld [vmem:[%s17315_s3 + $0x5c8] sm:$0xff]  ;;  %v8451_v9 = vld [vmem:[%s17315_s3 + $0x5d8] sm:$0xff] }
 0x34a   : > { %v8453_v25 = vld [vmem:[%s17315_s3 + $0x5e8] sm:$0xff] }
 0x34c   : > { %10475 = vmatpush1.bf16.msra.mxu0 %v10474_v20  ;;  %v10482_v20 = vpack.c.bf16 %v8440_v30, %v8438_v48  ;;  %v8446_v48 = vld [vmem:[%s17315_s3 + $0x5b0] sm:$0xff]  ;;  %v8448_v30 = vld [vmem:[%s17315_s3 + $0x5c0] sm:$0xff] }
 0x34d   : > { %10477 = vmatprep.subr.bf16.mxu0 %v10476_v24  ;;  %v8442_v24 = vld [vmem:[%s17315_s3 + $0x590] sm:$0xff] }
 0x350   : > { %10479 = vmatpush1.bf16.msra.mxu0 %v10478_v46  ;;  %v10486_v46 = vpack.c.bf16 %v8444_v1, %v8442_v24  ;;  %v8450_v24 = vld [vmem:[%s17315_s3 + $0x5d0] sm:$0xff]  ;;  %v8452_v1 = vld [vmem:[%s17315_s3 + $0x5e0] sm:$0xff] }
 0x351   : > { %10481 = vmatprep.subr.bf16.mxu0 %v10480_v43  ;;  %v10488_v43 = vpack.c.bf16 %v8449_v18, %v8447_v36  ;;  %v8455_v36 = vld [vmem:[%s17315_s3 + $0x5f8] sm:$0xff]  ;;  %v8457_v18 = vld [vmem:[%s17315_s3 + $0x608] sm:$0xff] }
 0x354   : > { %10483 = vmatpush1.bf16.msra.mxu0 %v10482_v20  ;;  %v10490_v20 = vpack.c.bf16 %v8448_v30, %v8446_v48  ;;  %v8454_v48 = vld [vmem:[%s17315_s3 + $0x5f0] sm:$0xff]  ;;  %v8456_v30 = vld [vmem:[%s17315_s3 + $0x600] sm:$0xff] }
 0x355   : > { %10485 = vmatprep.subr.bf16.mxu0 %v10484_v23  ;;  %v10492_v23 = vpack.c.bf16 %v8453_v25, %v8451_v9  ;;  %v8459_v9 = vld [vmem:[%s17315_s3 + $0x618] sm:$0xff]  ;;  %v8461_v25 = vld [vmem:[%s17315_s3 + $0x628] sm:$0xff] }
 0x358   : > { %10487 = vmatpush1.bf16.msra.mxu0 %v10486_v46  ;;  %v10494_v46 = vpack.c.bf16 %v8452_v1, %v8450_v24  ;;  %v8458_v24 = vld [vmem:[%s17315_s3 + $0x610] sm:$0xff]  ;;  %v8460_v1 = vld [vmem:[%s17315_s3 + $0x620] sm:$0xff] }
 0x359   : > { %10489 = vmatprep.subr.bf16.mxu0 %v10488_v43  ;;  %v10496_v43 = vpack.c.bf16 %v8457_v18, %v8455_v36  ;;  %v8463_v36 = vld [vmem:[%s17315_s3 + $0x638] sm:$0xff]  ;;  %v8465_v18 = vld [vmem:[%s17315_s3 + $0x648] sm:$0xff] }
 0x35c   : > { %10491 = vmatpush1.bf16.msra.mxu0 %v10490_v20  ;;  %v10498_v20 = vpack.c.bf16 %v8456_v30, %v8454_v48  ;;  %v8462_v48 = vld [vmem:[%s17315_s3 + $0x630] sm:$0xff]  ;;  %v8464_v30 = vld [vmem:[%s17315_s3 + $0x640] sm:$0xff] }
 0x35d   : > { %10493 = vmatprep.subr.bf16.mxu0 %v10492_v23  ;;  %v10500_v23 = vpack.c.bf16 %v8461_v25, %v8459_v9  ;;  %v8467_v9 = vld [vmem:[%s17315_s3 + $0x658] sm:$0xff]  ;;  %v8469_v25 = vld [vmem:[%s17315_s3 + $0x668] sm:$0xff] }
 0x360   : > { %10495 = vmatpush1.bf16.msra.mxu0 %v10494_v46  ;;  %v10502_v46 = vpack.c.bf16 %v8460_v1, %v8458_v24  ;;  %v8466_v24 = vld [vmem:[%s17315_s3 + $0x650] sm:$0xff]  ;;  %v8468_v1 = vld [vmem:[%s17315_s3 + $0x660] sm:$0xff] }
 0x361   : > { %10497 = vmatprep.subr.bf16.mxu0 %v10496_v43  ;;  %v10504_v43 = vpack.c.bf16 %v8465_v18, %v8463_v36  ;;  %v8471_v36 = vld [vmem:[%s17315_s3 + $0x678] sm:$0xff]  ;;  %v8473_v18 = vld [vmem:[%s17315_s3 + $0x688] sm:$0xff] }
 0x364   : > { %10499 = vmatpush1.bf16.msra.mxu0 %v10498_v20  ;;  %v10506_v20 = vpack.c.bf16 %v8464_v30, %v8462_v48  ;;  %v8470_v48 = vld [vmem:[%s17315_s3 + $0x670] sm:$0xff]  ;;  %v8472_v30 = vld [vmem:[%s17315_s3 + $0x680] sm:$0xff] }
 0x365   : > { %10501 = vmatprep.subr.bf16.mxu0 %v10500_v23  ;;  %v10508_v23 = vpack.c.bf16 %v8469_v25, %v8467_v9  ;;  %v8475_v9 = vld [vmem:[%s17315_s3 + $0x698] sm:$0xff]  ;;  %v8477_v25 = vld [vmem:[%s17315_s3 + $0x6a8] sm:$0xff] }
 0x368   : > { %10503 = vmatpush1.bf16.msra.mxu0 %v10502_v46  ;;  %v10510_v46 = vpack.c.bf16 %v8468_v1, %v8466_v24  ;;  %v8474_v24 = vld [vmem:[%s17315_s3 + $0x690] sm:$0xff]  ;;  %v8476_v1 = vld [vmem:[%s17315_s3 + $0x6a0] sm:$0xff] }
 0x369   : > { %10505 = vmatprep.subr.bf16.mxu0 %v10504_v43  ;;  %v10512_v43 = vpack.c.bf16 %v8473_v18, %v8471_v36  ;;  %v8479_v36 = vld [vmem:[%s17315_s3 + $0x6b8] sm:$0xff]  ;;  %v8481_v18 = vld [vmem:[%s17315_s3 + $0x6c8] sm:$0xff] }
 0x36c   : > { %10507 = vmatpush1.bf16.msra.mxu0 %v10506_v20  ;;  %v10514_v20 = vpack.c.bf16 %v8472_v30, %v8470_v48  ;;  %v8478_v48 = vld [vmem:[%s17315_s3 + $0x6b0] sm:$0xff]  ;;  %v8480_v30 = vld [vmem:[%s17315_s3 + $0x6c0] sm:$0xff] }
 0x36d   : > { %10509 = vmatprep.subr.bf16.mxu0 %v10508_v23  ;;  %v10516_v23 = vpack.c.bf16 %v8477_v25, %v8475_v9  ;;  %v8483_v9 = vld [vmem:[%s17315_s3 + $0x6d8] sm:$0xff]  ;;  %v8485_v25 = vld [vmem:[%s17315_s3 + $0x6e8] sm:$0xff] }
 0x370   : > { %10511 = vmatpush1.bf16.msra.mxu0 %v10510_v46  ;;  %v10518_v46 = vpack.c.bf16 %v8476_v1, %v8474_v24  ;;  %v8482_v24 = vld [vmem:[%s17315_s3 + $0x6d0] sm:$0xff]  ;;  %v8484_v1 = vld [vmem:[%s17315_s3 + $0x6e0] sm:$0xff] }
 0x371   : > { %10513 = vmatprep.subr.bf16.mxu0 %v10512_v43  ;;  %v10520_v43 = vpack.c.bf16 %v8481_v18, %v8479_v36  ;;  %v8487_v36 = vld [vmem:[%s17315_s3 + $0x6f8] sm:$0xff]  ;;  %v8489_v18 = vld [vmem:[%s17315_s3 + $0x708] sm:$0xff] }
 0x374   : > { %10515 = vmatpush1.bf16.msra.mxu0 %v10514_v20  ;;  %v10522_v20 = vpack.c.bf16 %v8480_v30, %v8478_v48  ;;  %v8486_v48 = vld [vmem:[%s17315_s3 + $0x6f0] sm:$0xff]  ;;  %v8488_v30 = vld [vmem:[%s17315_s3 + $0x700] sm:$0xff] }
 0x375   : > { %10517 = vmatprep.subr.bf16.mxu0 %v10516_v23  ;;  %v10524_v23 = vpack.c.bf16 %v8485_v25, %v8483_v9  ;;  %v8491_v9 = vld [vmem:[%s17315_s3 + $0x718] sm:$0xff]  ;;  %v8493_v25 = vld [vmem:[%s17315_s3 + $0x728] sm:$0xff] }
 0x378   : > { %10519 = vmatpush1.bf16.msra.mxu0 %v10518_v46  ;;  %v10526_v46 = vpack.c.bf16 %v8484_v1, %v8482_v24  ;;  %v8490_v24 = vld [vmem:[%s17315_s3 + $0x710] sm:$0xff]  ;;  %v8492_v1 = vld [vmem:[%s17315_s3 + $0x720] sm:$0xff] }
 0x379   : > { %10521 = vmatprep.subr.bf16.mxu0 %v10520_v43  ;;  %v10528_v43 = vpack.c.bf16 %v8489_v18, %v8487_v36  ;;  %v8495_v36 = vld [vmem:[%s17315_s3 + $0x738] sm:$0xff]  ;;  %v8497_v18 = vld [vmem:[%s17315_s3 + $0x748] sm:$0xff] }
 0x37b   : > { %3681 = vmatmul.mubr.f32.vlgmr.msra.gmra.mrb[42].mxu0 %v13418_v38 }
 0x37c   : > { %3686 = vmatprep.mubr.f32.mxu0 %v13435_v39  ;;  %10523 = vmatpush1.bf16.msra.mxu0 %v10522_v20  ;;  %v10530_v20 = vpack.c.bf16 %v8488_v30, %v8486_v48  ;;  %v8494_v48 = vld [vmem:[%s17315_s3 + $0x730] sm:$0xff]  ;;  %v8496_v30 = vld [vmem:[%s17315_s3 + $0x740] sm:$0xff] }
 0x37d   : > { %10525 = vmatprep.subr.bf16.mxu0 %v10524_v23  ;;  %v10532_v23 = vpack.c.bf16 %v8493_v25, %v8491_v9  ;;  %v8499_v9 = vld [vmem:[%s17315_s3 + $0x758] sm:$0xff]  ;;  %v8501_v25 = vld [vmem:[%s17315_s3 + $0x768] sm:$0xff] }
 0x37f   : > { %3687 = vmatmul.mubr.f32.gmra.mrb[44].mxu0 %v13438_v42 }
 0x380   : > { %3692 = vmatprep.mubr.f32.mxu0 %v13455_v11  ;;  %10527 = vmatpush1.bf16.msra.mxu0 %v10526_v46  ;;  %v10534_v46 = vpack.c.bf16 %v8492_v1, %v8490_v24  ;;  %v8498_v24 = vld [vmem:[%s17315_s3 + $0x750] sm:$0xff]  ;;  %v8500_v1 = vld [vmem:[%s17315_s3 + $0x760] sm:$0xff] }
 0x381   : > { %10529 = vmatprep.subr.bf16.mxu0 %v10528_v43  ;;  %v10536_v43 = vpack.c.bf16 %v8497_v18, %v8495_v36  ;;  %v8503_v36 = vld [vmem:[%s17315_s3 + $0x778] sm:$0xff]  ;;  %v8505_v18 = vld [vmem:[%s17315_s3 + $0x788] sm:$0xff] }
 0x383   : > { %3693 = vmatmul.mubr.f32.gmra.mrb[46].mxu0 %v13458_v28 }
 0x384   : > { %3698 = vmatprep.mubr.f32.mxu0 %v13475_v8  ;;  %10531 = vmatpush1.bf16.msra.mxu0 %v10530_v20  ;;  %v10538_v20 = vpack.c.bf16 %v8496_v30, %v8494_v48  ;;  %v8502_v48 = vld [vmem:[%s17315_s3 + $0x770] sm:$0xff]  ;;  %v8504_v30 = vld [vmem:[%s17315_s3 + $0x780] sm:$0xff] }
 0x385   : > { %10533 = vmatprep.subr.bf16.mxu0 %v10532_v23  ;;  %v10540_v23 = vpack.c.bf16 %v8501_v25, %v8499_v9  ;;  %v8507_v9 = vld [vmem:[%s17315_s3 + $0x798] sm:$0xff]  ;;  %v8509_v25 = vld [vmem:[%s17315_s3 + $0x7a8] sm:$0xff] }
 0x387   : > { %3699 = vmatmul.mubr.f32.gmra.mrb[48].mxu0 %v13478_v41 }
 0x388   : > { %3704 = vmatprep.mubr.f32.mxu0 %v13495_v31  ;;  %10535 = vmatpush1.bf16.msra.mxu0 %v10534_v46  ;;  %v10542_v46 = vpack.c.bf16 %v8500_v1, %v8498_v24  ;;  %v8506_v24 = vld [vmem:[%s17315_s3 + $0x790] sm:$0xff]  ;;  %v8508_v1 = vld [vmem:[%s17315_s3 + $0x7a0] sm:$0xff] }
 0x389   : > { %10537 = vmatprep.subr.bf16.mxu0 %v10536_v43  ;;  %v10544_v43 = vpack.c.bf16 %v8505_v18, %v8503_v36  ;;  %v8511_v36 = vld [vmem:[%s17315_s3 + $0x7b8] sm:$0xff]  ;;  %v8513_v18 = vld [vmem:[%s17315_s3 + $0x7c8] sm:$0xff] }
 0x38b   : > { %3705 = vmatmul.mubr.f32.gmra.mrb[50].mxu0 %v13498_v17 }
 0x38c   : > { %3710 = vmatprep.mubr.f32.mxu0 %v13515_v45  ;;  %10539 = vmatpush1.bf16.msra.mxu0 %v10538_v20  ;;  %v10546_v20 = vpack.c.bf16 %v8504_v30, %v8502_v48  ;;  %v8510_v48 = vld [vmem:[%s17315_s3 + $0x7b0] sm:$0xff]  ;;  %v8512_v30 = vld [vmem:[%s17315_s3 + $0x7c0] sm:$0xff] }
 0x38d   : > { %10541 = vmatprep.subr.bf16.mxu0 %v10540_v23  ;;  %v10548_v23 = vpack.c.bf16 %v8509_v25, %v8507_v9  ;;  %v8515_v9 = vld [vmem:[%s17315_s3 + $0x7d8] sm:$0xff]  ;;  %v8517_v25 = vld [vmem:[%s17315_s3 + $0x7e8] sm:$0xff] }
 0x38f   : > { %3711 = vmatmul.mubr.f32.gmra.mrb[52].mxu0 %v13518_v52 }
 0x390   : > { %3716 = vmatprep.mubr.f32.mxu0 %v13536_v50  ;;  %10543 = vmatpush1.bf16.msra.mxu0 %v10542_v46  ;;  %v10550_v46 = vpack.c.bf16 %v8508_v1, %v8506_v24  ;;  %v8514_v24 = vld [vmem:[%s17315_s3 + $0x7d0] sm:$0xff]  ;;  %v8516_v1 = vld [vmem:[%s17315_s3 + $0x7e0] sm:$0xff] }
 0x391   : > { %10545 = vmatprep.subr.bf16.mxu0 %v10544_v43  ;;  %v10552_v43 = vpack.c.bf16 %v8513_v18, %v8511_v36  ;;  %v8519_v36 = vld [vmem:[%s17315_s3 + $0x7f8] sm:$0xff]  ;;  %v8521_v18 = vld [vmem:[%s17315_s3 + $0x808] sm:$0xff] }
 0x393   : > { %3717 = vmatmul.mubr.f32.gmra.mrb[54].mxu0 %v13539_v29 }
 0x394   : > { %3722 = vmatprep.mubr.f32.mxu0 %v13559_v27  ;;  %10547 = vmatpush1.bf16.msra.mxu0 %v10546_v20  ;;  %v10554_v20 = vpack.c.bf16 %v8512_v30, %v8510_v48  ;;  %v8518_v48 = vld [vmem:[%s17315_s3 + $0x7f0] sm:$0xff]  ;;  %v8520_v30 = vld [vmem:[%s17315_s3 + $0x800] sm:$0xff] }
 0x395   : > { %10549 = vmatprep.subr.bf16.mxu0 %v10548_v23  ;;  %v10556_v23 = vpack.c.bf16 %v8517_v25, %v8515_v9  ;;  %v8523_v9 = vld [vmem:[%s17315_s3 + $0x818] sm:$0xff]  ;;  %v8525_v25 = vld [vmem:[%s17315_s3 + $0x828] sm:$0xff] }
 0x397   : > { %3723 = vmatmul.mubr.f32.gmra.mrb[56].mxu0 %v13562_v34 }
 0x398   : > { %10551 = vmatpush1.bf16.msra.mxu0 %v10550_v46  ;;  %3793 = vmatprep.mubr.f32.mxu0 %v13572_v59  ;;  %v10558_v46 = vpack.c.bf16 %v8516_v1, %v8514_v24  ;;  %v8522_v24 = vld [vmem:[%s17315_s3 + $0x810] sm:$0xff]  ;;  %v8524_v1 = vld [vmem:[%s17315_s3 + $0x820] sm:$0xff] }
 0x399   : > { %10553 = vmatprep.subr.bf16.mxu0 %v10552_v43  ;;  %v10560_v43 = vpack.c.bf16 %v8521_v18, %v8519_v36  ;;  %v8527_v36 = vld [vmem:[%s17315_s3 + $0x838] sm:$0xff]  ;;  %v8529_v18 = vld [vmem:[%s17315_s3 + $0x848] sm:$0xff] }
 0x39c   : > { %10555 = vmatpush1.bf16.msra.mxu0 %v10554_v20  ;;  %v10562_v20 = vpack.c.bf16 %v8520_v30, %v8518_v48  ;;  %v8526_v48 = vld [vmem:[%s17315_s3 + $0x830] sm:$0xff]  ;;  %v8528_v30 = vld [vmem:[%s17315_s3 + $0x840] sm:$0xff] }
 0x39d   : > { %10557 = vmatprep.subr.bf16.mxu0 %v10556_v23  ;;  %v10564_v23 = vpack.c.bf16 %v8525_v25, %v8523_v9  ;;  %v8531_v9 = vld [vmem:[%s17315_s3 + $0x858] sm:$0xff]  ;;  %v8533_v25 = vld [vmem:[%s17315_s3 + $0x868] sm:$0xff] }
 0x3a0   : > { %10559 = vmatpush1.bf16.msra.mxu0 %v10558_v46  ;;  %v10566_v46 = vpack.c.bf16 %v8524_v1, %v8522_v24  ;;  %v8530_v24 = vld [vmem:[%s17315_s3 + $0x850] sm:$0xff]  ;;  %v8532_v1 = vld [vmem:[%s17315_s3 + $0x860] sm:$0xff] }
 0x3a1   : > { %10561 = vmatprep.subr.bf16.mxu0 %v10560_v43  ;;  %v10568_v43 = vpack.c.bf16 %v8529_v18, %v8527_v36  ;;  %v8535_v36 = vld [vmem:[%s17315_s3 + $0x878] sm:$0xff]  ;;  %v8537_v18 = vld [vmem:[%s17315_s3 + $0x888] sm:$0xff] }
 0x3a4   : > { %10563 = vmatpush1.bf16.msra.mxu0 %v10562_v20  ;;  %v10570_v20 = vpack.c.bf16 %v8528_v30, %v8526_v48  ;;  %v8534_v48 = vld [vmem:[%s17315_s3 + $0x870] sm:$0xff]  ;;  %v8536_v30 = vld [vmem:[%s17315_s3 + $0x880] sm:$0xff] }
 0x3a5   : > { %10565 = vmatprep.subr.bf16.mxu0 %v10564_v23  ;;  %v10572_v23 = vpack.c.bf16 %v8533_v25, %v8531_v9  ;;  %v8539_v9 = vld [vmem:[%s17315_s3 + $0x898] sm:$0xff]  ;;  %v8541_v25 = vld [vmem:[%s17315_s3 + $0x8a8] sm:$0xff] }
 0x3a8   : > { %10567 = vmatpush1.bf16.msra.mxu0 %v10566_v46  ;;  %v10574_v46 = vpack.c.bf16 %v8532_v1, %v8530_v24  ;;  %v8538_v24 = vld [vmem:[%s17315_s3 + $0x890] sm:$0xff]  ;;  %v8540_v1 = vld [vmem:[%s17315_s3 + $0x8a0] sm:$0xff] }
 0x3a9   : > { %10569 = vmatprep.subr.bf16.mxu0 %v10568_v43  ;;  %v10576_v43 = vpack.c.bf16 %v8537_v18, %v8535_v36  ;;  %v8543_v36 = vld [vmem:[%s17315_s3 + $0x8b8] sm:$0xff]  ;;  %v8545_v18 = vld [vmem:[%s17315_s3 + $0x8c8] sm:$0xff] }
 0x3ac   : > { %10571 = vmatpush1.bf16.msra.mxu0 %v10570_v20  ;;  %v10578_v20 = vpack.c.bf16 %v8536_v30, %v8534_v48  ;;  %v8542_v48 = vld [vmem:[%s17315_s3 + $0x8b0] sm:$0xff]  ;;  %v8544_v30 = vld [vmem:[%s17315_s3 + $0x8c0] sm:$0xff] }
 0x3ad   : > { %10573 = vmatprep.subr.bf16.mxu0 %v10572_v23  ;;  %v10580_v23 = vpack.c.bf16 %v8541_v25, %v8539_v9  ;;  %v8547_v9 = vld [vmem:[%s17315_s3 + $0x8d8] sm:$0xff]  ;;  %v8549_v25 = vld [vmem:[%s17315_s3 + $0x8e8] sm:$0xff] }
 0x3b0   : > { %10575 = vmatpush1.bf16.msra.mxu0 %v10574_v46  ;;  %v10582_v46 = vpack.c.bf16 %v8540_v1, %v8538_v24  ;;  %v8546_v24 = vld [vmem:[%s17315_s3 + $0x8d0] sm:$0xff]  ;;  %v8548_v1 = vld [vmem:[%s17315_s3 + $0x8e0] sm:$0xff] }
 0x3b1   : > { %10577 = vmatprep.subr.bf16.mxu0 %v10576_v43  ;;  %v10584_v43 = vpack.c.bf16 %v8545_v18, %v8543_v36  ;;  %v8551_v36 = vld [vmem:[%s17315_s3 + $0x8f8] sm:$0xff]  ;;  %v8553_v18 = vld [vmem:[%s17315_s3 + $0x908] sm:$0xff] }
 0x3b4   : > { %10579 = vmatpush1.bf16.msra.mxu0 %v10578_v20  ;;  %v10586_v20 = vpack.c.bf16 %v8544_v30, %v8542_v48  ;;  %v8550_v48 = vld [vmem:[%s17315_s3 + $0x8f0] sm:$0xff]  ;;  %v8552_v30 = vld [vmem:[%s17315_s3 + $0x900] sm:$0xff] }
 0x3b5   : > { %10581 = vmatprep.subr.bf16.mxu0 %v10580_v23  ;;  %v10588_v23 = vpack.c.bf16 %v8549_v25, %v8547_v9  ;;  %v8555_v9 = vld [vmem:[%s17315_s3 + $0x918] sm:$0xff]  ;;  %v8557_v25 = vld [vmem:[%s17315_s3 + $0x928] sm:$0xff] }
 0x3b8   : > { %10583 = vmatpush1.bf16.msra.mxu0 %v10582_v46  ;;  %v10590_v46 = vpack.c.bf16 %v8548_v1, %v8546_v24  ;;  %v8554_v24 = vld [vmem:[%s17315_s3 + $0x910] sm:$0xff]  ;;  %v8556_v1 = vld [vmem:[%s17315_s3 + $0x920] sm:$0xff] }
 0x3b9   : > { %10585 = vmatprep.subr.bf16.mxu0 %v10584_v43  ;;  %v10592_v43 = vpack.c.bf16 %v8553_v18, %v8551_v36  ;;  %v8559_v36 = vld [vmem:[%s17315_s3 + $0x938] sm:$0xff]  ;;  %v8561_v18 = vld [vmem:[%s17315_s3 + $0x948] sm:$0xff] }
 0x3bb   : > { %3794 = vmatmul.mubr.f32.vlgmr.msra.gmra.mrb[42].mxu0 %v13703_v35 }
 0x3bc   : > { %3799 = vmatprep.mubr.f32.mxu0 %v13713_v13  ;;  %10587 = vmatpush1.bf16.msra.mxu0 %v10586_v20  ;;  %v10594_v20 = vpack.c.bf16 %v8552_v30, %v8550_v48  ;;  %v8558_v48 = vld [vmem:[%s17315_s3 + $0x930] sm:$0xff]  ;;  %v8560_v30 = vld [vmem:[%s17315_s3 + $0x940] sm:$0xff] }
 0x3bd   : > { %10589 = vmatprep.subr.bf16.mxu0 %v10588_v23  ;;  %v10596_v23 = vpack.c.bf16 %v8557_v25, %v8555_v9  ;;  %v10602_v9 = vpack.c.bf16 %v8560_v30, %v8558_v48  ;;  %v8563_v25 = vld [vmem:[%s17315_s3 + $0x958] sm:$0xff] }
 0x3bf   : > { %3800 = vmatmul.mubr.f32.gmra.mrb[44].mxu0 %v13725_v57 }
 0x3c0   : > { %3805 = vmatprep.mubr.f32.mxu0 %v13735_v6  ;;  %10591 = vmatpush1.bf16.msra.mxu0 %v10590_v46  ;;  %v10598_v46 = vpack.c.bf16 %v8556_v1, %v8554_v24 }
 0x3c1   : > { %10593 = vmatprep.subr.bf16.mxu0 %v10592_v43  ;;  %v10600_v43 = vpack.c.bf16 %v8561_v18, %v8559_v36 }
 0x3c3   : > { %3806 = vmatmul.mubr.f32.gmra.mrb[46].mxu0 %v13747_v4 }
 0x3c4   : > { %3811 = vmatprep.mubr.f32.mxu0 %v13757_v37  ;;  %10595 = vmatpush1.bf16.msra.mxu0 %v10594_v20  ;;  %v8562_v20 = vld [vmem:[%s17315_s3 + $0x950] sm:$0xff] }
 0x3c5   : > { %10597 = vmatprep.subr.bf16.mxu0 %v10596_v23 }
 0x3c7   : > { %3812 = vmatmul.mubr.f32.gmra.mrb[48].mxu0 %v13769_v53 }
 0x3c8   : > { %3817 = vmatprep.mubr.f32.mxu0 %v13779_v15  ;;  %10599 = vmatpush1.bf16.msra.mxu0 %v10598_v46 }
 0x3c9   : > { %10601 = vmatprep.subr.bf16.mxu0 %v10600_v43 }
 0x3cb   : > { %3818 = vmatmul.mubr.f32.gmra.mrb[50].mxu0 %v13785_v61 }
 0x3cc   : > { %3823 = vmatprep.mubr.f32.mxu0 %v13789_v62  ;;  %10603 = vmatpush1.bf16.msra.mxu0 %v10602_v9 }
 0x3cd   : > { %3862 = vmatprep.subr.mxu0 %v8563_v25 }
 0x3cf   : > { %3824 = vmatmul.mubr.f32.gmra.mrb[52].mxu0 %v13798_v10 }
 0x3d0   : > { %3829 = vmatprep.mubr.f32.mxu0 %v13805_v19  ;;  %3863 = vmatpush1.msra.mxu0 %v8562_v20 }
 0x3d3   : > { %3830 = vmatmul.mubr.f32.gmra.mrb[54].mxu0 %v13811_v47 }
 0x3d4   : > { %3835 = vmatprep.mubr.f32.mxu0 %v13816_v3 }
 0x3d7   : > { %3836 = vmatmul.mubr.f32.gmra.mrb[56].mxu0 %v13822_v56 }
 0x3d8   : > { %3906 = vmatprep.mubr.f32.mxu0 %v17345_v7 }
 0x3db   : > { %8564 = vmatmul.mubr.msk.f32.vlgmr.msra.gmra.mrb[42].mxu0 %vm2795_vm5, %v13828_v0 }
 0x3dc   : > { %3912 = vmatprep.mubr.f32.mxu0 %v17345_v7 }
 0x3df   : > { %8565 = vmatmul.mubr.msk.f32.gmra.mrb[44].mxu0 %vm2795_vm5, %v13834_v58 }
 0x3e0   : > { %3918 = vmatprep.mubr.f32.mxu0 %v17345_v7 }
 0x3e3   : > { %8566 = vmatmul.mubr.msk.f32.gmra.mrb[46].mxu0 %vm2795_vm5, %v13840_v21 }
 0x3e4   : > { %3924 = vmatprep.mubr.f32.mxu0 %v17345_v7 }
 0x3e7   : > { %8567 = vmatmul.mubr.msk.f32.gmra.mrb[48].mxu0 %vm2795_vm5, %v13846_v2 }
 0x3e8   : > { %3930 = vmatprep.mubr.f32.mxu0 %v17345_v7 }
 0x3eb   : > { %8568 = vmatmul.mubr.msk.f32.gmra.mrb[50].mxu0 %vm2795_vm5, %v13852_v63 }
 0x3ec   : > { %3936 = vmatprep.mubr.f32.mxu0 %v17345_v7 }
 0x3ee   : > { %v3244_v23 = vpop.f32.mrb[24].mxu0 }
 0x3ef   : > { %v3246_v24 = vpop.f32.mrb[25].mxu0  ;;  %8569 = vmatmul.mubr.msk.f32.gmra.mrb[52].mxu0 %vm2795_vm5, %v13858_v5 }
 0x3f0   : > { %3942 = vmatprep.mubr.f32.mxu0 %v17345_v7 }
 0x3f2   : > { %v3250_v1 = vpop.f32.mrb[26].mxu0 }
 0x3f3   : > { %8570 = vmatmul.mubr.msk.f32.gmra.mrb[54].mxu0 %vm2795_vm5, %v13864_v40  ;;  %v3252_v36 = vpop.f32.mrb[27].mxu0 }
 0x3f4   : > { %3948 = vmatprep.mubr.f32.mxu0 %v17345_v7 }
 0x3f6   : > { %v3256_v18 = vpop.f32.mrb[28].mxu0 }
 0x3f7   : > { %8571 = vmatmul.mubr.msk.f32.gmra.mrb[56].mxu0 %vm2795_vm5, %v13870_v54  ;;  %v3258_v46 = vpop.f32.mrb[29].mxu0 }
 0x3f8   : > { %4788 = vmatprep.mubr.f32.mxu0 %v17345_v7 }
 0x3fe   : > { %v3340_v43 = vpop.f32.mrb[30].mxu0 }
 0x3ff   : > { %v3357_v48 = vmax.f32 %v3244_v23, %v3340_v43  ;;  %v3342_v30 = vpop.f32.mrb[31].mxu0 }
 0x400   : > { %v3358_v9 = vmax.f32 %v3246_v24, %v3342_v30 }
 0x402   : > { %v3346_v25 = vpop.f32.mrb[32].mxu0 }
 0x403   : > { %v3359_v20 = vmax.f32 %v3250_v1, %v3346_v25  ;;  %v3348_v22 = vpop.f32.mrb[33].mxu0 }
 0x404   : > { %v3360_v5 = vmax.f32 %v3252_v36, %v3348_v22 }
 0x406   : > { %v3352_v63 = vpop.f32.mrb[34].mxu0 }
 0x407   : > { %v3361_v40 = vmax.f32 %v3256_v18, %v3352_v63  ;;  %v3354_v2 = vpop.f32.mrb[35].mxu0 }
 0x408   : > { %v3362_v21 = vmax.f32 %v3258_v46, %v3354_v2 }
 0x40e   : > { %v3442_v58 = vpop.f32.mrb[36].mxu0 }
 0x40f   : > { %v14470_v0 = vmax.f32 %v3357_v48, %v3442_v58  ;;  %v3444_v56 = vpop.f32.mrb[37].mxu0 }
 0x410   : > { %v14472_v54 = vmax.f32 %v3358_v9, %v3444_v56 }
 0x412   : > { %v3448_v3 = vpop.f32.mrb[38].mxu0 }
 0x413   : > { %v14474_v7 = vmax.f32 %v3359_v20, %v3448_v3  ;;  %v3450_v23 = vpop.f32.mrb[39].mxu0 }
 0x414   : > { %v14476_v43 = vmax.f32 %v3360_v5, %v3450_v23 }
 0x416   : > { %v3454_v24 = vpop.f32.mrb[40].mxu0 }
 0x417   : > { %v14478_v1 = vmax.f32 %v3361_v40, %v3454_v24  ;;  %v3456_v22 = vpop.f32.mrb[41].mxu0 }
 0x418   : > { %v14480_v36 = vmax.f32 %v3362_v21, %v3456_v22 }
 0x419   : > { %17366 = vst [vmem:[#allocation20_spill] sm:$0xff] %v14478_v1 }
 0x41a   : > { %17367 = vst [vmem:[#allocation21_spill] sm:$0xff] %v14480_v36 }
 0x4ae   : > { %v3908_v63 = vpop.f32.mrb[42].mxu0 }
 0x4af   : > { %v3910_v2 = vpop.f32.mrb[43].mxu0 }
 0x4b2   : > { %v3914_v18 = vpop.f32.mrb[44].mxu0 }
 0x4b3   : > { %v10606_v58 = vpack.c.bf16 %v3914_v18, %v3908_v63  ;;  %v3916_v46 = vpop.f32.mrb[45].mxu0 }
 0x4b4   : > { %v10604_v48 = vpack.c.bf16 %v3916_v46, %v3910_v2 }
 0x4b6   : > { %v3920_v56 = vpop.f32.mrb[46].mxu0  ;;  %10605 = vmatprep.subr.bf16.mxu1 %v10604_v48 }
 0x4b7   : > { %v3922_v30 = vpop.f32.mrb[47].mxu0  ;;  %10607 = vmatpush1.bf16.msra.mxu1 %v10606_v58 }
 0x4ba   : > { %v3926_v3 = vpop.f32.mrb[48].mxu0 }
 0x4bb   : > { %v10610_v9 = vpack.c.bf16 %v3926_v3, %v3920_v56  ;;  %v3928_v5 = vpop.f32.mrb[49].mxu0  ;;  %v17368_v56 = vmov 0.0   ;;  %v8596_v3 = vld [vmem:[%s17315_s3 + $0x9a8] sm:$0xff] }
 0x4bc   : > { %v10608_v25 = vpack.c.bf16 %v3928_v5, %v3922_v30  ;;  %v8593_v30 = vld [vmem:[%s17315_s3 + $0x990] sm:$0xff] }
 0x4be   : > { %v3932_v20 = vpop.f32.mrb[50].mxu0  ;;  %10609 = vmatprep.subr.bf16.mxu1 %v10608_v25 }
 0x4bf   : > { %v3934_v40 = vpop.f32.mrb[51].mxu0  ;;  %10611 = vmatpush1.bf16.msra.mxu1 %v10610_v9 }
 0x4c2   : > { %v3938_v21 = vpop.f32.mrb[52].mxu0 }
 0x4c3   : > { %v10614_v23 = vpack.c.bf16 %v3938_v21, %v3932_v20  ;;  %v3940_v24 = vpop.f32.mrb[53].mxu0  ;;  %v8595_v20 = vld [vmem:[%s17315_s3 + $0x9a0] sm:$0xff]  ;;  %v8600_v21 = vld [vmem:[%s17315_s3 + $0x9c8] sm:$0xff] }
 0x4c4   : > { %v10612_v22 = vpack.c.bf16 %v3940_v24, %v3934_v40  ;;  %v8597_v40 = vld [vmem:[%s17315_s3 + $0x9b0] sm:$0xff] }
 0x4c6   : > { %v3944_v36 = vpop.f32.mrb[54].mxu0  ;;  %10613 = vmatprep.subr.bf16.mxu1 %v10612_v22 }
 0x4c7   : > { %v3946_v63 = vpop.f32.mrb[55].mxu0  ;;  %10615 = vmatpush1.bf16.msra.mxu1 %v10614_v23 }
 0x4ca   : > { %v3950_v2 = vpop.f32.mrb[56].mxu0 }
 0x4cb   : > { %v10619_v18 = vpack.c.bf16 %v3950_v2, %v3944_v36  ;;  %v3952_v46 = vpop.f32.mrb[57].mxu0  ;;  %v8592_v36 = vld [vmem:[%s17315_s3 + $0x988] sm:$0xff] }
 0x4cc   : > { %v10616_v1 = vpack.c.bf16 %v3952_v46, %v3946_v63  ;;  %v8601_v63 = vld [vmem:[%s17315_s3 + $0x9d0] sm:$0xff]  ;;  %v8604_v2 = vld [vmem:[%s17315_s3 + $0x9e8] sm:$0xff] }
 0x4ce   : > { %10618 = vmatprep.subr.msk.bf16.mxu1 %vm13876_vm7, %v10616_v1 }
 0x4cf   : > { %10621 = vmatpush1.bf16.msk.msra.mxu1 %vm13876_vm7, %v10619_v18 }
 0x4d0   : > { %10623 = vmatprep.subr.bf16.mxu1 %v10604_v48 }
 0x4d2   : > { %8574 = vmatmul.mubr.msk.f32.vlgmr.msra.gmra.mrb[32].mxu1 %vm3162_vm8, %v13887_v44  ;;  %v8588_v44 = vld [vmem:[%s17315_s3 + $0x968] sm:$0xff] }
 0x4d3   : > { %10625 = vmatpush1.bf16.msra.mxu1 %v10606_v58  ;;  %4031 = vmatprep.mubr.f32.mxu1 %v17368_v56 }
 0x4d4   : > { %10627 = vmatprep.subr.bf16.mxu1 %v10608_v25 }
 0x4d6   : > { %8575 = vmatmul.mubr.msk.f32.gmra.mrb[34].mxu1 %vm3162_vm8, %v13895_v16  ;;  %v8590_v16 = vld [vmem:[%s17315_s3 + $0x978] sm:$0xff] }
 0x4d7   : > { %10629 = vmatpush1.bf16.msra.mxu1 %v10610_v9  ;;  %4037 = vmatprep.mubr.f32.mxu1 %v17368_v56 }
 0x4d8   : > { %10631 = vmatprep.subr.bf16.mxu1 %v10612_v22 }
 0x4da   : > { %8576 = vmatmul.mubr.msk.f32.gmra.mrb[36].mxu1 %vm3162_vm8, %v13903_v49  ;;  %v10658_v49 = vpack.c.bf16 %v8590_v16, %v8588_v44  ;;  %v8603_v44 = vld [vmem:[%s17315_s3 + $0x9e0] sm:$0xff]  ;;  %v8605_v16 = vld [vmem:[%s17315_s3 + $0x9f0] sm:$0xff] }
 0x4db   : > { %10633 = vmatpush1.bf16.msra.mxu1 %v10614_v23  ;;  %4114 = vmatprep.mubr.f32.mxu1 %v17368_v56 }
 0x4dc   : > { %10636 = vmatprep.subr.msk.bf16.mxu1 %vm13876_vm7, %v10616_v1 }
 0x4df   : > { %10639 = vmatpush1.bf16.msk.msra.mxu1 %vm13876_vm7, %v10619_v18 }
 0x4e0   : > { %10641 = vmatprep.subr.bf16.mxu1 %v10604_v48  ;;  %v8591_v48 = vld [vmem:[%s17315_s3 + $0x980] sm:$0xff] }
 0x4e1   : > { %v10664_v5 = vpack.c.bf16 %v8593_v30, %v8591_v48  ;;  %v8611_v30 = vld [vmem:[%s17315_s3 + $0xa20] sm:$0xff] }
 0x4e2   : > { %8579 = vmatmul.mubr.msk.f32.vlgmr.msra.gmra.mrb[38].mxu1 %vm3162_vm8, %v13915_v55  ;;  %v8587_v55 = vld [vmem:[%s17315_s3 + $0x960] sm:$0xff] }
 0x4e3   : > { %10643 = vmatpush1.bf16.msra.mxu1 %v10606_v58  ;;  %4120 = vmatprep.mubr.f32.mxu1 %v17368_v56 }
 0x4e4   : > { %10645 = vmatprep.subr.bf16.mxu1 %v10608_v25 }
 0x4e6   : > { %8580 = vmatmul.mubr.msk.f32.gmra.mrb[40].mxu1 %vm3162_vm8, %v13923_v14  ;;  %v8589_v14 = vld [vmem:[%s17315_s3 + $0x970] sm:$0xff] }
 0x4e7   : > { %10647 = vmatpush1.bf16.msra.mxu1 %v10610_v9  ;;  %4126 = vmatprep.mubr.f32.mxu1 %v17368_v56  ;;  %v8598_v9 = vld [vmem:[%s17315_s3 + $0x9b8] sm:$0xff] }
 0x4e8   : > { %10649 = vmatprep.subr.bf16.mxu1 %v10612_v22  ;;  %v10666_v25 = vpack.c.bf16 %v8598_v9, %v8596_v3  ;;  %v8599_v22 = vld [vmem:[%s17315_s3 + $0x9c0] sm:$0xff]  ;;  %v8613_v3 = vld [vmem:[%s17315_s3 + $0xa30] sm:$0xff]  ;;  %v8616_v9 = vld [vmem:[%s17315_s3 + $0xa48] sm:$0xff] }
 0x4ea   : > { %8581 = vmatmul.mubr.msk.f32.gmra.mrb[42].mxu1 %vm3162_vm8, %v13931_v51  ;;  %v8594_v51 = vld [vmem:[%s17315_s3 + $0x998] sm:$0xff] }
 0x4eb   : > { %10651 = vmatpush1.bf16.msra.mxu1 %v10614_v23  ;;  %4203 = vmatprep.mubr.f32.mxu1 %v17368_v56  ;;  %v10662_v58 = vpack.c.bf16 %v8594_v51, %v8592_v36  ;;  %v10668_v23 = vpack.c.bf16 %v8597_v40, %v8595_v20  ;;  %v8609_v36 = vld [vmem:[%s17315_s3 + $0xa10] sm:$0xff]  ;;  %v8612_v51 = vld [vmem:[%s17315_s3 + $0xa28] sm:$0xff]  ;;  %v8615_v40 = vld [vmem:[%s17315_s3 + $0xa40] sm:$0xff] }
 0x4ec   : > { %10654 = vmatprep.subr.msk.bf16.mxu1 %vm13876_vm7, %v10616_v1  ;;  %v10660_v1 = vpack.c.bf16 %v8589_v14, %v8587_v55  ;;  %v8607_v14 = vld [vmem:[%s17315_s3 + $0xa00] sm:$0xff] }
 0x4ef   : > { %10657 = vmatpush1.bf16.msk.msra.mxu1 %vm13876_vm7, %v10619_v18  ;;  %v10672_v18 = vpack.c.bf16 %v8601_v63, %v8599_v22  ;;  %v8619_v63 = vld [vmem:[%s17315_s3 + $0xa60] sm:$0xff] }
 0x4f0   : > { %10659 = vmatprep.subr.bf16.mxu1 %v10658_v49  ;;  %v8608_v49 = vld [vmem:[%s17315_s3 + $0xa08] sm:$0xff] }
 0x4f2   : > { %8584 = vmatmul.mubr.msk.f32.vlgmr.msra.gmra.mrb[44].mxu1 %vm3162_vm8, %v13961_v60  ;;  %v8602_v60 = vld [vmem:[%s17315_s3 + $0x9d8] sm:$0xff] }
 0x4f3   : > { %10661 = vmatpush1.bf16.msra.mxu1 %v10660_v1  ;;  %4209 = vmatprep.mubr.f32.mxu1 %v17368_v56  ;;  %v10670_v24 = vpack.c.bf16 %v8602_v60, %v8600_v21  ;;  %v8614_v1 = vld [vmem:[%s17315_s3 + $0xa38] sm:$0xff]  ;;  %v8617_v21 = vld [vmem:[%s17315_s3 + $0xa50] sm:$0xff]  ;;  %v8620_v60 = vld [vmem:[%s17315_s3 + $0xa68] sm:$0xff] }
 0x4f4   : > { %10663 = vmatprep.subr.bf16.mxu1 %v10662_v58  ;;  %v10680_v58 = vpack.c.bf16 %v8609_v36, %v8607_v14  ;;  %v10682_v48 = vpack.c.bf16 %v8614_v1, %v8612_v51  ;;  %v8627_v36 = vld [vmem:[%s17315_s3 + $0xaa0] sm:$0xff]  ;;  %v8629_v51 = vld [vmem:[%s17315_s3 + $0xab0] sm:$0xff]  ;;  %v8632_v1 = vld [vmem:[%s17315_s3 + $0xac8] sm:$0xff] }
 0x4f6   : > { %8585 = vmatmul.mubr.msk.f32.gmra.mrb[46].mxu1 %vm3162_vm8, %v13981_v12  ;;  %v8606_v12 = vld [vmem:[%s17315_s3 + $0x9f8] sm:$0xff] }
 0x4f7   : > { %10665 = vmatpush1.bf16.msra.mxu1 %v10664_v5  ;;  %4215 = vmatprep.mubr.f32.mxu1 %v17368_v56  ;;  %v10674_v46 = vpack.c.bf16 %v8606_v12, %v8604_v2  ;;  %v8618_v5 = vld [vmem:[%s17315_s3 + $0xa58] sm:$0xff]  ;;  %v8621_v2 = vld [vmem:[%s17315_s3 + $0xa70] sm:$0xff]  ;;  %v8624_v12 = vld [vmem:[%s17315_s3 + $0xa88] sm:$0xff] }
 0x4f8   : > { %10667 = vmatprep.subr.bf16.mxu1 %v10666_v25  ;;  %v10684_v25 = vpack.c.bf16 %v8613_v3, %v8611_v30  ;;  %v10686_v20 = vpack.c.bf16 %v8618_v5, %v8616_v9  ;;  %v8631_v3 = vld [vmem:[%s17315_s3 + $0xac0] sm:$0xff]  ;;  %v8633_v9 = vld [vmem:[%s17315_s3 + $0xad0] sm:$0xff]  ;;  %v8636_v5 = vld [vmem:[%s17315_s3 + $0xae8] sm:$0xff] }
 0x4fa   : > { %8586 = vmatmul.mubr.msk.f32.gmra.mrb[48].mxu1 %vm3162_vm8, %v14001_v26  ;;  %v8610_v26 = vld [vmem:[%s17315_s3 + $0xa18] sm:$0xff] }
 0x4fb   : > { %10669 = vmatpush1.bf16.msra.mxu1 %v10668_v23  ;;  %4443 = vmatprep.mubr.f32.mxu1 %v13415_v32  ;;  %v10676_v32 = vpack.c.bf16 %v8605_v16, %v8603_v44  ;;  %v10678_v55 = vpack.c.bf16 %v8610_v26, %v8608_v49  ;;  %v8622_v23 = vld [vmem:[%s17315_s3 + $0xa78] sm:$0xff]  ;;  %v8623_v16 = vld [vmem:[%s17315_s3 + $0xa80] sm:$0xff]  ;;  %v8625_v49 = vld [vmem:[%s17315_s3 + $0xa90] sm:$0xff] }
 0x4fc   : > { %10671 = vmatprep.subr.bf16.mxu1 %v10670_v24  ;;  %v10688_v24 = vpack.c.bf16 %v8617_v21, %v8615_v40  ;;  %v10690_v22 = vpack.c.bf16 %v8622_v23, %v8620_v60  ;;  %v8628_v26 = vld [vmem:[%s17315_s3 + $0xaa8] sm:$0xff]  ;;  %v8635_v21 = vld [vmem:[%s17315_s3 + $0xae0] sm:$0xff]  ;;  %v8637_v60 = vld [vmem:[%s17315_s3 + $0xaf0] sm:$0xff] }
 0x4fd   : > { %v8640_v23 = vld [vmem:[%s17315_s3 + $0xb08] sm:$0xff] }
 0x4ff   : > { %10673 = vmatpush1.bf16.msra.mxu1 %v10672_v18  ;;  %v8626_v18 = vld [vmem:[%s17315_s3 + $0xa98] sm:$0xff] }
 0x500   : > { %10675 = vmatprep.subr.bf16.mxu1 %v10674_v46  ;;  %v10692_v46 = vpack.c.bf16 %v8621_v2, %v8619_v63  ;;  %v10694_v44 = vpack.c.bf16 %v8626_v18, %v8624_v12  ;;  %v8639_v2 = vld [vmem:[%s17315_s3 + $0xb00] sm:$0xff]  ;;  %v8641_v12 = vld [vmem:[%s17315_s3 + $0xb10] sm:$0xff]  ;;  %v8644_v18 = vld [vmem:[%s17315_s3 + $0xb28] sm:$0xff] }
 0x503   : > { %10677 = vmatpush1.bf16.msra.mxu1 %v10676_v32  ;;  %v8630_v32 = vld [vmem:[%s17315_s3 + $0xab8] sm:$0xff] }
 0x504   : > { %10679 = vmatprep.subr.bf16.mxu1 %v10678_v55  ;;  %v10696_v55 = vpack.c.bf16 %v8625_v49, %v8623_v16  ;;  %v10698_v14 = vpack.c.bf16 %v8630_v32, %v8628_v26  ;;  %v8643_v49 = vld [vmem:[%s17315_s3 + $0xb20] sm:$0xff]  ;;  %v8645_v26 = vld [vmem:[%s17315_s3 + $0xb30] sm:$0xff]  ;;  %v8648_v32 = vld [vmem:[%s17315_s3 + $0xb48] sm:$0xff] }
 0x507   : > { %10681 = vmatpush1.bf16.msra.mxu1 %v10680_v58  ;;  %v8634_v58 = vld [vmem:[%s17315_s3 + $0xad8] sm:$0xff] }
 0x508   : > { %10683 = vmatprep.subr.bf16.mxu1 %v10682_v48  ;;  %v10700_v48 = vpack.c.bf16 %v8629_v51, %v8627_v36  ;;  %v10702_v30 = vpack.c.bf16 %v8634_v58, %v8632_v1  ;;  %v8647_v51 = vld [vmem:[%s17315_s3 + $0xb40] sm:$0xff]  ;;  %v8649_v1 = vld [vmem:[%s17315_s3 + $0xb50] sm:$0xff]  ;;  %v8652_v58 = vld [vmem:[%s17315_s3 + $0xb68] sm:$0xff] }
 0x50b   : > { %10685 = vmatpush1.bf16.msra.mxu1 %v10684_v25  ;;  %v8638_v25 = vld [vmem:[%s17315_s3 + $0xaf8] sm:$0xff] }
 0x50c   : > { %10687 = vmatprep.subr.bf16.mxu1 %v10686_v20  ;;  %v10704_v20 = vpack.c.bf16 %v8633_v9, %v8631_v3  ;;  %v10706_v40 = vpack.c.bf16 %v8638_v25, %v8636_v5  ;;  %v8651_v9 = vld [vmem:[%s17315_s3 + $0xb60] sm:$0xff]  ;;  %v8653_v5 = vld [vmem:[%s17315_s3 + $0xb70] sm:$0xff]  ;;  %v8656_v25 = vld [vmem:[%s17315_s3 + $0xb88] sm:$0xff] }
 0x50f   : > { %10689 = vmatpush1.bf16.msra.mxu1 %v10688_v24  ;;  %v8642_v24 = vld [vmem:[%s17315_s3 + $0xb18] sm:$0xff] }
 0x510   : > { %10691 = vmatprep.subr.bf16.mxu1 %v10690_v22  ;;  %v10708_v22 = vpack.c.bf16 %v8637_v60, %v8635_v21  ;;  %v10710_v63 = vpack.c.bf16 %v8642_v24, %v8640_v23  ;;  %v8655_v60 = vld [vmem:[%s17315_s3 + $0xb80] sm:$0xff]  ;;  %v8657_v23 = vld [vmem:[%s17315_s3 + $0xb90] sm:$0xff]  ;;  %v8660_v24 = vld [vmem:[%s17315_s3 + $0xba8] sm:$0xff] }
 0x513   : > { %10693 = vmatpush1.bf16.msra.mxu1 %v10692_v46  ;;  %v8646_v46 = vld [vmem:[%s17315_s3 + $0xb38] sm:$0xff] }
 0x514   : > { %10695 = vmatprep.subr.bf16.mxu1 %v10694_v44  ;;  %v10712_v44 = vpack.c.bf16 %v8641_v12, %v8639_v2  ;;  %v10714_v16 = vpack.c.bf16 %v8646_v46, %v8644_v18  ;;  %v8659_v12 = vld [vmem:[%s17315_s3 + $0xba0] sm:$0xff]  ;;  %v8661_v18 = vld [vmem:[%s17315_s3 + $0xbb0] sm:$0xff]  ;;  %v8664_v46 = vld [vmem:[%s17315_s3 + $0xbc8] sm:$0xff] }
 0x517   : > { %10697 = vmatpush1.bf16.msra.mxu1 %v10696_v55  ;;  %v8650_v55 = vld [vmem:[%s17315_s3 + $0xb58] sm:$0xff] }
 0x518   : > { %10699 = vmatprep.subr.bf16.mxu1 %v10698_v14  ;;  %v10716_v14 = vpack.c.bf16 %v8645_v26, %v8643_v49  ;;  %v10718_v36 = vpack.c.bf16 %v8650_v55, %v8648_v32  ;;  %v8665_v49 = vld [vmem:[%s17315_s3 + $0xbd0] sm:$0xff]  ;;  %v8668_v26 = vld [vmem:[%s17315_s3 + $0xbe8] sm:$0xff]  ;;  %v8667_v55 = vld [vmem:[%s17315_s3 + $0xbe0] sm:$0xff] }
 0x51b   : > { %10701 = vmatpush1.bf16.msra.mxu1 %v10700_v48  ;;  %v8654_v48 = vld [vmem:[%s17315_s3 + $0xb78] sm:$0xff] }
 0x51c   : > { %10703 = vmatprep.subr.bf16.mxu1 %v10702_v30  ;;  %v10720_v30 = vpack.c.bf16 %v8649_v1, %v8647_v51  ;;  %v10722_v3 = vpack.c.bf16 %v8654_v48, %v8652_v58  ;;  %v8671_v1 = vld [vmem:[%s17315_s3 + $0xc00] sm:$0xff]  ;;  %v8673_v58 = vld [vmem:[%s17315_s3 + $0xc10] sm:$0xff]  ;;  %v8676_v48 = vld [vmem:[%s17315_s3 + $0xc28] sm:$0xff] }
 0x51f   : > { %10705 = vmatpush1.bf16.msra.mxu1 %v10704_v20  ;;  %v8658_v20 = vld [vmem:[%s17315_s3 + $0xb98] sm:$0xff] }
 0x520   : > { %10707 = vmatprep.subr.bf16.mxu1 %v10706_v40  ;;  %v10724_v40 = vpack.c.bf16 %v8653_v5, %v8651_v9  ;;  %v10726_v21 = vpack.c.bf16 %v8658_v20, %v8656_v25  ;;  %v8677_v9 = vld [vmem:[%s17315_s3 + $0xc30] sm:$0xff]  ;;  %v8680_v5 = vld [vmem:[%s17315_s3 + $0xc48] sm:$0xff]  ;;  %v8679_v20 = vld [vmem:[%s17315_s3 + $0xc40] sm:$0xff] }
 0x523   : > { %10709 = vmatpush1.bf16.msra.mxu1 %v10708_v22  ;;  %v8662_v22 = vld [vmem:[%s17315_s3 + $0xbb8] sm:$0xff] }
 0x524   : > { %10711 = vmatprep.subr.bf16.mxu1 %v10710_v63  ;;  %v10728_v63 = vpack.c.bf16 %v8657_v23, %v8655_v60  ;;  %v10730_v2 = vpack.c.bf16 %v8662_v22, %v8660_v24  ;;  %v8683_v23 = vld [vmem:[%s17315_s3 + $0xc60] sm:$0xff]  ;;  %v8685_v24 = vld [vmem:[%s17315_s3 + $0xc70] sm:$0xff]  ;;  %v8688_v22 = vld [vmem:[%s17315_s3 + $0xc88] sm:$0xff] }
 0x527   : > { %10713 = vmatpush1.bf16.msra.mxu1 %v10712_v44 }
 0x528   : > { %10715 = vmatprep.subr.bf16.mxu1 %v10714_v16  ;;  %v8663_v16 = vld [vmem:[%s17315_s3 + $0xbc0] sm:$0xff] }
 0x52b   : > { %10717 = vmatpush1.bf16.msra.mxu1 %v10716_v14  ;;  %v8669_v14 = vld [vmem:[%s17315_s3 + $0xbf0] sm:$0xff] }
 0x52c   : > { %10719 = vmatprep.subr.bf16.mxu1 %v10718_v36  ;;  %v8672_v36 = vld [vmem:[%s17315_s3 + $0xc08] sm:$0xff] }
 0x52f   : > { %10721 = vmatpush1.bf16.msra.mxu1 %v10720_v30 }
 0x530   : > { %10723 = vmatprep.subr.bf16.mxu1 %v10722_v3  ;;  %v8675_v3 = vld [vmem:[%s17315_s3 + $0xc20] sm:$0xff] }
 0x532   : > { %4444 = vmatmul.mubr.f32.vlgmr.msra.gmra.mrb[50].mxu1 %v13418_v38  ;;  %v8666_v38 = vld [vmem:[%s17315_s3 + $0xbd8] sm:$0xff] }
 0x533   : > { %4449 = vmatprep.mubr.f32.mxu1 %v13435_v39  ;;  %10725 = vmatpush1.bf16.msra.mxu1 %v10724_v40  ;;  %v10732_v39 = vpack.c.bf16 %v8661_v18, %v8659_v12  ;;  %v10734_v44 = vpack.c.bf16 %v8666_v38, %v8664_v46  ;;  %v8681_v40 = vld [vmem:[%s17315_s3 + $0xc50] sm:$0xff]  ;;  %v8692_v18 = vld [vmem:[%s17315_s3 + $0xca8] sm:$0xff]  ;;  %v8691_v38 = vld [vmem:[%s17315_s3 + $0xca0] sm:$0xff] }
 0x534   : > { %10727 = vmatprep.subr.bf16.mxu1 %v10726_v21  ;;  %v8684_v21 = vld [vmem:[%s17315_s3 + $0xc68] sm:$0xff]  ;;  %v8689_v12 = vld [vmem:[%s17315_s3 + $0xc90] sm:$0xff] }
 0x536   : > { %4450 = vmatmul.mubr.f32.gmra.mrb[52].mxu1 %v13438_v42  ;;  %v8670_v42 = vld [vmem:[%s17315_s3 + $0xbf8] sm:$0xff] }
 0x537   : > { %4455 = vmatprep.mubr.f32.mxu1 %v13455_v11  ;;  %10729 = vmatpush1.bf16.msra.mxu1 %v10728_v63  ;;  %v10736_v11 = vpack.c.bf16 %v8665_v49, %v8663_v16  ;;  %v10738_v32 = vpack.c.bf16 %v8670_v42, %v8668_v26  ;;  %v8698_v16 = vld [vmem:[%s17315_s3 + $0xcd8] sm:$0xff]  ;;  %v8695_v42 = vld [vmem:[%s17315_s3 + $0xcc0] sm:$0xff] }
 0x538   : > { %10731 = vmatprep.subr.bf16.mxu1 %v10730_v2  ;;  %v8687_v2 = vld [vmem:[%s17315_s3 + $0xc80] sm:$0xff] }
 0x53a   : > { %4456 = vmatmul.mubr.f32.gmra.mrb[54].mxu1 %v13458_v28  ;;  %v8674_v28 = vld [vmem:[%s17315_s3 + $0xc18] sm:$0xff] }
 0x53b   : > { %4461 = vmatprep.mubr.f32.mxu1 %v13475_v8  ;;  %10733 = vmatpush1.bf16.msra.mxu1 %v10732_v39  ;;  %v10740_v8 = vpack.c.bf16 %v8669_v14, %v8667_v55  ;;  %v10742_v51 = vpack.c.bf16 %v8674_v28, %v8672_v36  ;;  %v8693_v39 = vld [vmem:[%s17315_s3 + $0xcb0] sm:$0xff]  ;;  %v8702_v55 = vld [vmem:[%s17315_s3 + $0xcf8] sm:$0xff]  ;;  %v8699_v28 = vld [vmem:[%s17315_s3 + $0xce0] sm:$0xff] }
 0x53c   : > { %10735 = vmatprep.subr.bf16.mxu1 %v10734_v44  ;;  %v8696_v44 = vld [vmem:[%s17315_s3 + $0xcc8] sm:$0xff]  ;;  %v10764_v49 = vpack.c.bf16 %v8693_v39, %v8691_v38  ;;  %v8726_v38 = vld [vmem:[%s17315_s3 + $0xdb8] sm:$0xff] }
 0x53d   : > { %v10766_v26 = vpack.c.bf16 %v8698_v16, %v8696_v44  ;;  %v8723_v16 = vld [vmem:[%s17315_s3 + $0xda0] sm:$0xff] }
 0x53e   : > { %4462 = vmatmul.mubr.f32.gmra.mrb[56].mxu1 %v13478_v41  ;;  %v8678_v41 = vld [vmem:[%s17315_s3 + $0xc38] sm:$0xff] }
 0x53f   : > { %4467 = vmatprep.mubr.f32.mxu1 %v13495_v31  ;;  %10737 = vmatpush1.bf16.msra.mxu1 %v10736_v11  ;;  %v10744_v31 = vpack.c.bf16 %v8673_v58, %v8671_v1  ;;  %v10746_v30 = vpack.c.bf16 %v8678_v41, %v8676_v48  ;;  %v8697_v11 = vld [vmem:[%s17315_s3 + $0xcd0] sm:$0xff]  ;;  %v8706_v1 = vld [vmem:[%s17315_s3 + $0xd18] sm:$0xff]  ;;  %v8703_v41 = vld [vmem:[%s17315_s3 + $0xd00] sm:$0xff] }
 0x540   : > { %10739 = vmatprep.subr.bf16.mxu1 %v10738_v32  ;;  %v8700_v32 = vld [vmem:[%s17315_s3 + $0xce8] sm:$0xff]  ;;  %v10768_v14 = vpack.c.bf16 %v8697_v11, %v8695_v42  ;;  %v8727_v11 = vld [vmem:[%s17315_s3 + $0xdc0] sm:$0xff] }
 0x541   : > { %v10770_v36 = vpack.c.bf16 %v8702_v55, %v8700_v32  ;;  %v8729_v32 = vld [vmem:[%s17315_s3 + $0xdd0] sm:$0xff]  ;;  %v8732_v55 = vld [vmem:[%s17315_s3 + $0xde8] sm:$0xff] }
 0x542   : > { %4468 = vmatmul.mubr.f32.gmra.mrb[58].mxu1 %v13498_v17  ;;  %v8682_v17 = vld [vmem:[%s17315_s3 + $0xc58] sm:$0xff] }
 0x543   : > { %4473 = vmatprep.mubr.f32.mxu1 %v13515_v45  ;;  %10741 = vmatpush1.bf16.msra.mxu1 %v10740_v8  ;;  %v10748_v45 = vpack.c.bf16 %v8677_v9, %v8675_v3  ;;  %v10750_v25 = vpack.c.bf16 %v8682_v17, %v8680_v5  ;;  %v8701_v8 = vld [vmem:[%s17315_s3 + $0xcf0] sm:$0xff]  ;;  %v8710_v3 = vld [vmem:[%s17315_s3 + $0xd38] sm:$0xff]  ;;  %v8707_v17 = vld [vmem:[%s17315_s3 + $0xd20] sm:$0xff] }
 0x544   : > { %10743 = vmatprep.subr.bf16.mxu1 %v10742_v51  ;;  %v8704_v51 = vld [vmem:[%s17315_s3 + $0xd08] sm:$0xff]  ;;  %v10772_v58 = vpack.c.bf16 %v8701_v8, %v8699_v28  ;;  %v8733_v28 = vld [vmem:[%s17315_s3 + $0xdf0] sm:$0xff]  ;;  %v8735_v8 = vld [vmem:[%s17315_s3 + $0xe00] sm:$0xff] }
 0x545   : > { %v10774_v48 = vpack.c.bf16 %v8706_v1, %v8704_v51 }
 0x546   : > { %4474 = vmatmul.mubr.f32.gmra.mrb[60].mxu1 %v13518_v52  ;;  %v8686_v52 = vld [vmem:[%s17315_s3 + $0xc78] sm:$0xff] }
 0x547   : > { %4479 = vmatprep.mubr.f32.mxu1 %v13536_v50  ;;  %10745 = vmatpush1.bf16.msra.mxu1 %v10744_v31  ;;  %v10752_v50 = vpack.c.bf16 %v8681_v40, %v8679_v20  ;;  %v10754_v60 = vpack.c.bf16 %v8686_v52, %v8684_v21  ;;  %v8705_v31 = vld [vmem:[%s17315_s3 + $0xd10] sm:$0xff]  ;;  %v8714_v20 = vld [vmem:[%s17315_s3 + $0xd58] sm:$0xff]  ;;  %v8711_v52 = vld [vmem:[%s17315_s3 + $0xd40] sm:$0xff] }
 0x548   : > { %10747 = vmatprep.subr.bf16.mxu1 %v10746_v30  ;;  %v8708_v30 = vld [vmem:[%s17315_s3 + $0xd28] sm:$0xff]  ;;  %v10776_v9 = vpack.c.bf16 %v8705_v31, %v8703_v41 }
 0x549   : > { %v10778_v5 = vpack.c.bf16 %v8710_v3, %v8708_v30 }
 0x54a   : > { %4480 = vmatmul.mubr.f32.gmra.mrb[62].mxu1 %v13539_v29  ;;  %v8690_v29 = vld [vmem:[%s17315_s3 + $0xc98] sm:$0xff] }
 0x54b   : > { %4485 = vmatprep.mubr.f32.mxu1 %v13559_v27  ;;  %10749 = vmatpush1.bf16.msra.mxu1 %v10748_v45  ;;  %v10756_v27 = vpack.c.bf16 %v8685_v24, %v8683_v23  ;;  %v10758_v63 = vpack.c.bf16 %v8690_v29, %v8688_v22  ;;  %v8709_v45 = vld [vmem:[%s17315_s3 + $0xd30] sm:$0xff]  ;;  %v8718_v23 = vld [vmem:[%s17315_s3 + $0xd78] sm:$0xff]  ;;  %v8715_v29 = vld [vmem:[%s17315_s3 + $0xd60] sm:$0xff] }
 0x54c   : > { %10751 = vmatprep.subr.bf16.mxu1 %v10750_v25  ;;  %v8712_v25 = vld [vmem:[%s17315_s3 + $0xd48] sm:$0xff]  ;;  %v10780_v40 = vpack.c.bf16 %v8709_v45, %v8707_v17  ;;  %v17378_v17 = vld [vmem:[#allocation20_spill] sm:$0xff] }
 0x54d   : > { %v10782_v21 = vpack.c.bf16 %v8714_v20, %v8712_v25  ;;  %v17379_v20 = vld [vmem:[#allocation19_spill] sm:$0xff] }
 0x54e   : > { %4486 = vmatmul.mubr.f32.gmra.mrb[64].mxu1 %v13562_v34  ;;  %v8694_v34 = vld [vmem:[%s17315_s3 + $0xcb8] sm:$0xff] }
 0x54f   : > { %10753 = vmatpush1.bf16.msra.mxu1 %v10752_v50  ;;  %4556 = vmatprep.mubr.f32.mxu1 %v13572_v59  ;;  %v10760_v59 = vpack.c.bf16 %v8689_v12, %v8687_v2  ;;  %v10762_v46 = vpack.c.bf16 %v8694_v34, %v8692_v18  ;;  %v8713_v50 = vld [vmem:[%s17315_s3 + $0xd50] sm:$0xff]  ;;  %v8722_v2 = vld [vmem:[%s17315_s3 + $0xd98] sm:$0xff]  ;;  %v8719_v34 = vld [vmem:[%s17315_s3 + $0xd80] sm:$0xff] }
 0x550   : > { %10755 = vmatprep.subr.bf16.mxu1 %v10754_v60  ;;  %v8716_v60 = vld [vmem:[%s17315_s3 + $0xd68] sm:$0xff]  ;;  %v10784_v24 = vpack.c.bf16 %v8713_v50, %v8711_v52 }
 0x551   : > { %v10786_v22 = vpack.c.bf16 %v8718_v23, %v8716_v60 }
 0x553   : > { %10757 = vmatpush1.bf16.msra.mxu1 %v10756_v27  ;;  %v8717_v27 = vld [vmem:[%s17315_s3 + $0xd70] sm:$0xff] }
 0x554   : > { %10759 = vmatprep.subr.bf16.mxu1 %v10758_v63  ;;  %v8720_v63 = vld [vmem:[%s17315_s3 + $0xd88] sm:$0xff]  ;;  %v10788_v12 = vpack.c.bf16 %v8717_v27, %v8715_v29 }
 0x555   : > { %v10790_v18 = vpack.c.bf16 %v8722_v2, %v8720_v63 }
 0x557   : > { %10761 = vmatpush1.bf16.msra.mxu1 %v10760_v59  ;;  %v8721_v59 = vld [vmem:[%s17315_s3 + $0xd90] sm:$0xff] }
 0x558   : > { %10763 = vmatprep.subr.bf16.mxu1 %v10762_v46  ;;  %v8724_v46 = vld [vmem:[%s17315_s3 + $0xda8] sm:$0xff]  ;;  %v10792_v39 = vpack.c.bf16 %v8721_v59, %v8719_v34 }
 0x559   : > { %v10794_v44 = vpack.c.bf16 %v8726_v38, %v8724_v46 }
 0x55b   : > { %10765 = vmatpush1.bf16.msra.mxu1 %v10764_v49  ;;  %v8725_v49 = vld [vmem:[%s17315_s3 + $0xdb0] sm:$0xff] }
 0x55c   : > { %10767 = vmatprep.subr.bf16.mxu1 %v10766_v26  ;;  %v8728_v26 = vld [vmem:[%s17315_s3 + $0xdc8] sm:$0xff] }
 0x55f   : > { %10769 = vmatpush1.bf16.msra.mxu1 %v10768_v14 }
 0x560   : > { %10771 = vmatprep.subr.bf16.mxu1 %v10770_v36  ;;  %v8731_v36 = vld [vmem:[%s17315_s3 + $0xde0] sm:$0xff] }
 0x563   : > { %10773 = vmatpush1.bf16.msra.mxu1 %v10772_v58 }
 0x564   : > { %10775 = vmatprep.subr.bf16.mxu1 %v10774_v48  ;;  %v17376_v48 = vld [vmem:[#allocation17_spill] sm:$0xff] }
 0x567   : > { %10777 = vmatpush1.bf16.msra.mxu1 %v10776_v9  ;;  %v17377_v9 = vld [vmem:[#allocation18_spill] sm:$0xff] }
 0x568   : > { %10779 = vmatprep.subr.bf16.mxu1 %v10778_v5 }
 0x56b   : > { %10781 = vmatpush1.bf16.msra.mxu1 %v10780_v40 }
 0x56c   : > { %10783 = vmatprep.subr.bf16.mxu1 %v10782_v21 }
 0x56f   : > { %10785 = vmatpush1.bf16.msra.mxu1 %v10784_v24 }
 0x570   : > { %10787 = vmatprep.subr.bf16.mxu1 %v10786_v22 }
 0x572   : > { %4557 = vmatmul.mubr.f32.vlgmr.msra.gmra.mrb[50].mxu1 %v13703_v35  ;;  %v8730_v35 = vld [vmem:[%s17315_s3 + $0xdd8] sm:$0xff] }
 0x573   : > { %4562 = vmatprep.mubr.f32.mxu1 %v13713_v13  ;;  %10789 = vmatpush1.bf16.msra.mxu1 %v10788_v12  ;;  %v10796_v13 = vpack.c.bf16 %v8725_v49, %v8723_v16  ;;  %v10798_v42 = vpack.c.bf16 %v8730_v35, %v8728_v26  ;;  %v11949_v35 = vmov 0.0|0.0  }
 0x574   : > { %10791 = vmatprep.subr.bf16.mxu1 %v10790_v18 }
 0x576   : > { %4563 = vmatmul.mubr.f32.gmra.mrb[52].mxu1 %v13725_v57  ;;  %v8734_v57 = vld [vmem:[%s17315_s3 + $0xdf8] sm:$0xff] }
 0x577   : > { %4568 = vmatprep.mubr.f32.mxu1 %v13735_v6  ;;  %10793 = vmatpush1.bf16.msra.mxu1 %v10792_v39  ;;  %v10800_v6 = vpack.c.bf16 %v8729_v32, %v8727_v11  ;;  %v10802_v14 = vpack.c.bf16 %v8734_v57, %v8732_v55 }
 0x578   : > { %10795 = vmatprep.subr.bf16.mxu1 %v10794_v44 }
 0x57a   : > { %4569 = vmatmul.mubr.f32.gmra.mrb[54].mxu1 %v13747_v4  ;;  %v10804_v4 = vpack.c.bf16 %v8733_v28, %v8731_v36 }
 0x57b   : > { %4574 = vmatprep.mubr.f32.mxu1 %v13757_v37  ;;  %10797 = vmatpush1.bf16.msra.mxu1 %v10796_v13  ;;  %v8736_v37 = vld [vmem:[%s17315_s3 + $0xe08] sm:$0xff] }
 0x57c   : > { %10799 = vmatprep.subr.bf16.mxu1 %v10798_v42  ;;  %v8762_v13 = vld [vmem:[%s17317_s5 + $0x268] sm:$0xff]  ;;  %v8765_v42 = vld [vmem:[%s17317_s5 + $0x280] sm:$0xff] }
 0x57d   : > { %v10909_v11 = vpack.c.bf16 %v8765_v42, %v8762_v13  ;;  %v11881_v13 = vld [vmem:[%s17316_s4 + $0x38] sm:$0xff]  ;;  %v8766_v42 = vld [vmem:[%s17317_s5 + $0x288] sm:$0xff] }
 0x57e   : > { %4575 = vmatmul.mubr.f32.gmra.mrb[56].mxu1 %v13769_v53  ;;  %v17369_v53 = vld [vmem:[#allocation10_spill] sm:$0xff] }
 0x57f   : > { %4580 = vmatprep.mubr.f32.mxu1 %v13779_v15  ;;  %10801 = vmatpush1.bf16.msra.mxu1 %v10800_v6  ;;  %v17370_v15 = vld [vmem:[#allocation11_spill] sm:$0xff] }
 0x580   : > { %10803 = vmatprep.subr.bf16.mxu1 %v10802_v14 }
 0x582   : > { %4581 = vmatmul.mubr.f32.gmra.mrb[58].mxu1 %v13785_v61  ;;  %v17371_v61 = vld [vmem:[#allocation12_spill] sm:$0xff] }
 0x583   : > { %4586 = vmatprep.mubr.f32.mxu1 %v13789_v62  ;;  %10805 = vmatpush1.bf16.msra.mxu1 %v10804_v4  ;;  %v17372_v62 = vld [vmem:[#allocation13_spill] sm:$0xff] }
 0x584   : > { %4625 = vmatprep.subr.mxu1 %v8736_v37 }
 0x586   : > { %4587 = vmatmul.mubr.f32.gmra.mrb[60].mxu1 %v13798_v10  ;;  %v17373_v10 = vld [vmem:[#allocation14_spill] sm:$0xff] }
 0x587   : > { %4592 = vmatprep.mubr.f32.mxu1 %v13805_v19  ;;  %4626 = vmatpush1.msra.mxu1 %v8735_v8  ;;  %v17374_v19 = vld [vmem:[#allocation15_spill] sm:$0xff] }
 0x588   : > { %10908 = vmatprep.subr.bf16.mxu1 %v11949_v35 }
 0x58a   : > { %4593 = vmatmul.mubr.f32.gmra.mrb[62].mxu1 %v13811_v47  ;;  %v17375_v47 = vld [vmem:[#allocation16_spill] sm:$0xff] }
 0x58b   : > { %4598 = vmatprep.mubr.f32.mxu1 %v17369_v53 }
 0x58e   : > { %4599 = vmatmul.mubr.f32.gmra.mrb[64].mxu1 %v17370_v15 }
 0x58f   : > { %4669 = vmatprep.mubr.f32.mxu1 %v17368_v56 }
 0x592   : > { %8737 = vmatmul.mubr.msk.f32.vlgmr.msra.gmra.mrb[50].mxu1 %vm2795_vm5, %v17371_v61 }
 0x593   : > { %4675 = vmatprep.mubr.f32.mxu1 %v17368_v56  ;;  %10910 = vmatpush1.bf16.msra.mxu1 %v10909_v11  ;;  %v8769_v11 = vld [vmem:[%s17317_s5 + $0x2a0] sm:$0xff] }
 0x594   : > { %10911 = vmatprep.subr.bf16.mxu1 %v11949_v35 }
 0x596   : > { %8738 = vmatmul.mubr.msk.f32.gmra.mrb[52].mxu1 %vm2795_vm5, %v17372_v62 }
 0x597   : > { %4681 = vmatprep.mubr.f32.mxu1 %v17368_v56 }
 0x59a   : > { %8739 = vmatmul.mubr.msk.f32.gmra.mrb[54].mxu1 %vm2795_vm5, %v17373_v10 }
 0x59b   : > { %4687 = vmatprep.mubr.f32.mxu1 %v17368_v56 }
 0x59e   : > { %8740 = vmatmul.mubr.msk.f32.gmra.mrb[56].mxu1 %vm2795_vm5, %v17374_v19 }
 0x59f   : > { %4693 = vmatprep.mubr.f32.mxu1 %v17368_v56 }
 0x5a2   : > { %8741 = vmatmul.mubr.msk.f32.gmra.mrb[58].mxu1 %vm2795_vm5, %v17375_v47 }
 0x5a3   : > { %4699 = vmatprep.mubr.f32.mxu1 %v17368_v56 }
 0x5a5   : > { %v4027_v51 = vpop.f32.mrb[32].mxu1 }
 0x5a6   : > { %v4044_v1 = vmax.f32 %v14470_v0, %v4027_v51  ;;  %v4029_v58 = vpop.f32.mrb[33].mxu1  ;;  %8742 = vmatmul.mubr.msk.f32.gmra.mrb[60].mxu1 %vm2795_vm5, %v17376_v48 }
 0x5a7   : > { %v4045_v41 = vmax.f32 %v14472_v54, %v4029_v58  ;;  %4705 = vmatprep.mubr.f32.mxu1 %v17368_v56  ;;  %v17380_v54 = vld [vmem:[#allocation21_spill] sm:$0xff] }
 0x5a9   : > { %v4033_v31 = vpop.f32.mrb[34].mxu1 }
 0x5aa   : > { %v4046_v30 = vmax.f32 %v14474_v7, %v4033_v31  ;;  %v4035_v3 = vpop.f32.mrb[35].mxu1  ;;  %8743 = vmatmul.mubr.msk.f32.gmra.mrb[62].mxu1 %vm2795_vm5, %v17377_v9  ;;  %v11875_v9 = vld [vmem:[%s17316_s4 + $0x8] sm:$0xff] }
 0x5ab   : > { %v4047_v5 = vmax.f32 %v14476_v43, %v4035_v3  ;;  %4711 = vmatprep.mubr.f32.mxu1 %v17368_v56  ;;  %v11874_v3 = vld [vmem:[%s17316_s4] sm:$0xff] }
 0x5ad   : > { %v4039_v0 = vpop.f32.mrb[36].mxu1 }
 0x5ae   : > { %v4048_v45 = vmax.f32 %v17378_v17, %v4039_v0  ;;  %v4041_v25 = vpop.f32.mrb[37].mxu1  ;;  %8744 = vmatmul.mubr.msk.f32.gmra.mrb[64].mxu1 %vm2795_vm5, %v17379_v20  ;;  %v11877_v0 = vld [vmem:[%s17316_s4 + $0x18] sm:$0xff]  ;;  %v11878_v17 = vld [vmem:[%s17316_s4 + $0x20] sm:$0xff]  ;;  %v11879_v20 = vld [vmem:[%s17316_s4 + $0x28] sm:$0xf] }
 0x5af   : > { %v4049_v40 = vmax.f32 %v17380_v54, %v4041_v25  ;;  %v8764_v25 = vld [vmem:[%s17317_s5 + $0x278] sm:$0xff] }
 0x5b5   : > { %v4116_v21 = vpop.f32.mrb[38].mxu1 }
 0x5b6   : > { %v15032_v52 = vmax.f32 %v4044_v1, %v4116_v21  ;;  %v4118_v7 = vpop.f32.mrb[39].mxu1  ;;  %v8763_v21 = vld [vmem:[%s17317_s5 + $0x270] sm:$0xff] }
 0x5b7   : > { %v15034_v50 = vmax.f32 %v4045_v41, %v4118_v7  ;;  %v8767_v7 = vld [vmem:[%s17317_s5 + $0x290] sm:$0xff] }
 0x5b9   : > { %v4122_v60 = vpop.f32.mrb[40].mxu1 }
 0x5ba   : > { %v15036_v23 = vmax.f32 %v4046_v30, %v4122_v60  ;;  %v4124_v43 = vpop.f32.mrb[41].mxu1  ;;  %v8770_v60 = vld [vmem:[%s17317_s5 + $0x2a8] sm:$0xff] }
 0x5bb   : > { %v15038_v24 = vmax.f32 %v4047_v5, %v4124_v43  ;;  %v11876_v5 = vld [vmem:[%s17316_s4 + $0x10] sm:$0xf] }
 0x5bd   : > { %v4128_v22 = vpop.f32.mrb[42].mxu1 }
 0x5be   : > { %v15040_v29 = vmax.f32 %v4048_v45, %v4128_v22  ;;  %v4130_v27 = vpop.f32.mrb[43].mxu1  ;;  %v8761_v45 = vld [vmem:[%s17317_s5 + $0x260] sm:$0xff]  ;;  %v10864_v22 = vpack.c.bf16 %v8770_v60, %v8767_v7  ;;  %v8792_v60 = vld [vmem:[%s17317_s5 + $0x358] sm:$0xff] }
 0x5bf   : > { %v15042_v63 = vmax.f32 %v4049_v40, %v4130_v27  ;;  %v10860_v54 = vpack.c.bf16 %v8764_v25, %v8761_v45  ;;  %v8760_v40 = vld [vmem:[%s17317_s5 + $0x258] sm:$0xff]  ;;  %v11880_v27 = vld [vmem:[%s17316_s4 + $0x30] sm:$0xff]  ;;  %v8789_v45 = vld [vmem:[%s17317_s5 + $0x340] sm:$0xff] }
 0x5c0   : > { %v10862_v43 = vpack.c.bf16 %v8763_v21, %v8760_v40  ;;  %v8791_v25 = vld [vmem:[%s17317_s5 + $0x350] sm:$0xff]  ;;  %v8790_v21 = vld [vmem:[%s17317_s5 + $0x348] sm:$0xff]  ;;  %v8793_v7 = vld [vmem:[%s17317_s5 + $0x360] sm:$0xff] }
 0x5c5   : > { %v15044_v2 = vpop.f32.mrb[44].mxu1 }
 0x5c6   : > { %v4222_v12 = vmax.f32 %v15032_v52, %v15044_v2  ;;  %v15048_v18 = vpop.f32.mrb[45].mxu1 }
 0x5c7   : > { %v4223_v34 = vmax.f32 %v15034_v50, %v15048_v18 }
 0x5c9   : > { %v15052_v59 = vpop.f32.mrb[46].mxu1 }
 0x5ca   : > { %v4224_v46 = vmax.f32 %v15036_v23, %v15052_v59  ;;  %v15056_v38 = vpop.f32.mrb[47].mxu1 }
 0x5cb   : > { %v4225_v39 = vmax.f32 %v15038_v24, %v15056_v38 }
 0x5cd   : > { %v15060_v44 = vpop.f32.mrb[48].mxu1 }
 0x5ce   : > { %v4226_v16 = vmax.f32 %v15040_v29, %v15060_v44  ;;  %v15064_v49 = vpop.f32.mrb[49].mxu1 }
 0x5cf   : > { %v4227_v26 = vmax.f32 %v15042_v63, %v15064_v49  ;;  %v4997_v63 = vld [vmem:[%s17317_s5] sm:$0xff]  ;;  %v5000_v49 = vld [vmem:[%s17317_s5 + $0x18] sm:$0xff] }
 0x665   : > { %v4671_v32 = vpop.f32.mrb[50].mxu1 }
 0x666   : > { %v4673_v55 = vpop.f32.mrb[51].mxu1 }
 0x669   : > { %v4677_v57 = vpop.f32.mrb[52].mxu1 }
 0x66a   : > { %v10808_v6 = vpack.c.bf16 %v4677_v57, %v4671_v32  ;;  %v4679_v14 = vpop.f32.mrb[53].mxu1  ;;  %v8768_v32 = vld [vmem:[%s17317_s5 + $0x298] sm:$0xff]  ;;  %v8771_v57 = vld [vmem:[%s17317_s5 + $0x2b0] sm:$0xff] }
 0x66b   : > { %v10806_v36 = vpack.c.bf16 %v4679_v14, %v4673_v55  ;;  %v10866_v55 = vpack.c.bf16 %v8769_v11, %v8766_v42  ;;  %v8773_v14 = vld [vmem:[%s17317_s5 + $0x2c0] sm:$0xff]  ;;  %v8796_v11 = vld [vmem:[%s17317_s5 + $0x378] sm:$0xff] }
 0x66d   : > { %v4683_v28 = vpop.f32.mrb[54].mxu1  ;;  %10807 = vmatprep.subr.bf16.mxu0 %v10806_v36 }
 0x66e   : > { %v4685_v4 = vpop.f32.mrb[55].mxu1  ;;  %10809 = vmatpush1.bf16.msra.mxu0 %v10808_v6 }
 0x671   : > { %v4689_v37 = vpop.f32.mrb[56].mxu1 }
 0x672   : > { %v10812_v8 = vpack.c.bf16 %v4689_v37, %v4683_v28  ;;  %v4691_v53 = vpop.f32.mrb[57].mxu1  ;;  %v8775_v37 = vld [vmem:[%s17317_s5 + $0x2d0] sm:$0xff] }
 0x673   : > { %v10810_v15 = vpack.c.bf16 %v4691_v53, %v4685_v4  ;;  %v8772_v4 = vld [vmem:[%s17317_s5 + $0x2b8] sm:$0xff] }
 0x674   : > { %v10870_v53 = vpack.c.bf16 %v8775_v37, %v8772_v4  ;;  %v8802_v37 = vld [vmem:[%s17317_s5 + $0x3a8] sm:$0xff] }
 0x675   : > { %v4695_v61 = vpop.f32.mrb[58].mxu1  ;;  %10811 = vmatprep.subr.bf16.mxu0 %v10810_v15 }
 0x676   : > { %v4697_v62 = vpop.f32.mrb[59].mxu1  ;;  %10813 = vmatpush1.bf16.msra.mxu0 %v10812_v8 }
 0x679   : > { %v4701_v10 = vpop.f32.mrb[60].mxu1 }
 0x67a   : > { %v10816_v19 = vpack.c.bf16 %v4701_v10, %v4695_v61  ;;  %v4703_v47 = vpop.f32.mrb[61].mxu1  ;;  %v8782_v10 = vld [vmem:[%s17317_s5 + $0x308] sm:$0xff] }
 0x67b   : > { %v10814_v51 = vpack.c.bf16 %v4703_v47, %v4697_v62  ;;  %v8779_v62 = vld [vmem:[%s17317_s5 + $0x2f0] sm:$0xff]  ;;  %v8778_v47 = vld [vmem:[%s17317_s5 + $0x2e8] sm:$0xff] }
 0x67d   : > { %v4707_v1 = vpop.f32.mrb[62].mxu1  ;;  %10815 = vmatprep.subr.bf16.mxu0 %v10814_v51 }
 0x67e   : > { %v4709_v58 = vpop.f32.mrb[63].mxu1  ;;  %10817 = vmatpush1.bf16.msra.mxu0 %v10816_v19 }
 0x681   : > { %v4713_v48 = vpop.f32.mrb[64].mxu1 }
 0x682   : > { %v10821_v41 = vpack.c.bf16 %v4713_v48, %v4707_v1  ;;  %v4715_v31 = vpop.f32.mrb[65].mxu1  ;;  %v8780_v1 = vld [vmem:[%s17317_s5 + $0x2f8] sm:$0xff]  ;;  %v8783_v48 = vld [vmem:[%s17317_s5 + $0x310] sm:$0xff] }
 0x683   : > { %v10818_v30 = vpack.c.bf16 %v4715_v31, %v4709_v58  ;;  %v8785_v31 = vld [vmem:[%s17317_s5 + $0x320] sm:$0xff] }
 0x685   : > { %10820 = vmatprep.subr.msk.bf16.mxu0 %vm13876_vm7, %v10818_v30 }
 0x686   : > { %10823 = vmatpush1.bf16.msk.msra.mxu0 %vm13876_vm7, %v10821_v41 }
 0x687   : > { %10825 = vmatprep.subr.bf16.mxu0 %v10806_v36 }
 0x689   : > { %8747 = vmatmul.mubr.msk.f32.vlgmr.msra.gmra.mrb[58].mxu0 %vm3162_vm8, %v11874_v3 }
 0x68a   : > { %10827 = vmatpush1.bf16.msra.mxu0 %v10808_v6  ;;  %4794 = vmatprep.mubr.f32.mxu0 %v17368_v56 }
 0x68b   : > { %10829 = vmatprep.subr.bf16.mxu0 %v10810_v15 }
 0x68d   : > { %8748 = vmatmul.mubr.msk.f32.gmra.mrb[60].mxu0 %vm3162_vm8, %v11875_v9  ;;  %v8784_v9 = vld [vmem:[%s17317_s5 + $0x318] sm:$0xff] }
 0x68e   : > { %10831 = vmatpush1.bf16.msra.mxu0 %v10812_v8  ;;  %4800 = vmatprep.mubr.f32.mxu0 %v17368_v56 }
 0x68f   : > { %10833 = vmatprep.subr.bf16.mxu0 %v10814_v51 }
 0x691   : > { %8749 = vmatmul.mubr.msk.f32.gmra.mrb[62].mxu0 %vm3162_vm8, %v11876_v5  ;;  %v8787_v5 = vld [vmem:[%s17317_s5 + $0x330] sm:$0xff] }
 0x692   : > { %10835 = vmatpush1.bf16.msra.mxu0 %v10816_v19  ;;  %4877 = vmatprep.mubr.f32.mxu0 %v17368_v56 }
 0x693   : > { %10838 = vmatprep.subr.msk.bf16.mxu0 %vm13876_vm7, %v10818_v30 }
 0x696   : > { %10841 = vmatpush1.bf16.msk.msra.mxu0 %vm13876_vm7, %v10821_v41 }
 0x697   : > { %10843 = vmatprep.subr.bf16.mxu0 %v10806_v36  ;;  %v8776_v36 = vld [vmem:[%s17317_s5 + $0x2d8] sm:$0xff] }
 0x698   : > { %v10868_v28 = vpack.c.bf16 %v8776_v36, %v8773_v14  ;;  %v8803_v36 = vld [vmem:[%s17317_s5 + $0x3b0] sm:$0xff] }
 0x699   : > { %8752 = vmatmul.mubr.msk.f32.vlgmr.msra.gmra.mrb[64].mxu0 %vm3162_vm8, %v11877_v0  ;;  %v8786_v0 = vld [vmem:[%s17317_s5 + $0x328] sm:$0xff] }
 0x69a   : > { %10845 = vmatpush1.bf16.msra.mxu0 %v10808_v6  ;;  %4883 = vmatprep.mubr.f32.mxu0 %v17368_v56  ;;  %v10912_v6 = vpack.c.bf16 %v8771_v57, %v8768_v32  ;;  %v8799_v32 = vld [vmem:[%s17317_s5 + $0x390] sm:$0xff] }
 0x69b   : > { %10847 = vmatprep.subr.bf16.mxu0 %v10810_v15  ;;  %v8777_v15 = vld [vmem:[%s17317_s5 + $0x2e0] sm:$0xff]  ;;  %v10886_v57 = vpack.c.bf16 %v8799_v32, %v8796_v11  ;;  %v8826_v32 = vld [vmem:[%s17317_s5 + $0x468] sm:$0xff] }
 0x69c   : > { %10913 = vmatpush1.bf16.msra.mxu1 %v10912_v6  ;;  %v8801_v6 = vld [vmem:[%s17317_s5 + $0x3a0] sm:$0xff] }
 0x69d   : > { %8753 = vmatmul.mubr.msk.f32.gmra.mrb[66].mxu0 %vm3162_vm8, %v11878_v17  ;;  %10914 = vmatprep.subr.bf16.mxu1 %v11949_v35  ;;  %v10878_v17 = vpack.c.bf16 %v8787_v5, %v8784_v9  ;;  %v8814_v5 = vld [vmem:[%s17317_s5 + $0x408] sm:$0xff] }
 0x69e   : > { %10849 = vmatpush1.bf16.msra.mxu0 %v10812_v8  ;;  %4889 = vmatprep.mubr.f32.mxu0 %v17368_v56  ;;  %v8774_v8 = vld [vmem:[%s17317_s5 + $0x2c8] sm:$0xff] }
 0x69f   : > { %10851 = vmatprep.subr.bf16.mxu0 %v10814_v51  ;;  %v10915_v61 = vpack.c.bf16 %v8777_v15, %v8774_v8  ;;  %v8781_v51 = vld [vmem:[%s17317_s5 + $0x300] sm:$0xff] }
 0x6a0   : > { %v10874_v58 = vpack.c.bf16 %v8781_v51, %v8778_v47  ;;  %v8805_v8 = vld [vmem:[%s17317_s5 + $0x3c0] sm:$0xff]  ;;  %v8808_v51 = vld [vmem:[%s17317_s5 + $0x3d8] sm:$0xff] }
 0x6a1   : > { %8754 = vmatmul.mubr.msk.f32.gmra.mrb[68].mxu0 %vm3162_vm8, %v11879_v20  ;;  %10916 = vmatpush1.bf16.msra.mxu1 %v10915_v61  ;;  %v8794_v20 = vld [vmem:[%s17317_s5 + $0x368] sm:$0xff]  ;;  %v10890_v15 = vpack.c.bf16 %v8805_v8, %v8802_v37  ;;  %v8807_v61 = vld [vmem:[%s17317_s5 + $0x3d0] sm:$0xff]  ;;  %v5001_v37 = vld [vmem:[%s17317_s5 + $0x20] sm:$0xff] }
 0x6a2   : > { %10853 = vmatpush1.bf16.msra.mxu0 %v10816_v19  ;;  %4966 = vmatprep.mubr.f32.mxu0 %v17368_v56  ;;  %v10872_v19 = vpack.c.bf16 %v8782_v10, %v8779_v62  ;;  %v10880_v40 = vpack.c.bf16 %v8794_v20, %v8791_v25  ;;  %v8809_v10 = vld [vmem:[%s17317_s5 + $0x3e0] sm:$0xff]  ;;  %v8819_v25 = vld [vmem:[%s17317_s5 + $0x430] sm:$0xff]  ;;  %v8832_v8 = vld [vmem:[%s17317_s5 + $0x498] sm:$0xff] }
 0x6a3   : > { %10856 = vmatprep.subr.msk.bf16.mxu0 %vm13876_vm7, %v10818_v30  ;;  %10917 = vmatprep.subr.bf16.mxu1 %v11949_v35  ;;  %v8788_v30 = vld [vmem:[%s17317_s5 + $0x338] sm:$0xff] }
 0x6a4   : > { %v10876_v3 = vpack.c.bf16 %v8788_v30, %v8785_v31  ;;  %v8815_v31 = vld [vmem:[%s17317_s5 + $0x410] sm:$0xff]  ;;  %v8818_v30 = vld [vmem:[%s17317_s5 + $0x428] sm:$0xff] }
 0x6a5   : > { %v10896_v9 = vpack.c.bf16 %v8818_v30, %v8815_v31 }
 0x6a6   : > { %10859 = vmatpush1.bf16.msk.msra.mxu0 %vm13876_vm7, %v10821_v41  ;;  %v10918_v41 = vpack.c.bf16 %v8783_v48, %v8780_v1  ;;  %v8811_v1 = vld [vmem:[%s17317_s5 + $0x3f0] sm:$0xff] }
 0x6a7   : > { %10861 = vmatprep.subr.bf16.mxu0 %v10860_v54  ;;  %v10921_v54 = vpack.c.bf16 %v8789_v45, %v8786_v0  ;;  %v10894_v48 = vpack.c.bf16 %v8811_v1, %v8808_v51  ;;  %v8817_v0 = vld [vmem:[%s17317_s5 + $0x420] sm:$0xff] }
 0x6a8   : > { %10919 = vmatpush1.bf16.msra.mxu1 %v10918_v41  ;;  %v8813_v41 = vld [vmem:[%s17317_s5 + $0x400] sm:$0xff]  ;;  %v10898_v45 = vpack.c.bf16 %v8817_v0, %v8814_v5 }
 0x6a9   : > { %8757 = vmatmul.mubr.msk.f32.vlgmr.msra.gmra.mrb[70].mxu0 %vm3162_vm8, %v11880_v27  ;;  %10920 = vmatprep.subr.bf16.mxu1 %v11949_v35 }
 0x6aa   : > { %4972 = vmatprep.mubr.f32.mxu0 %v17368_v56  ;;  %10863 = vmatpush1.bf16.msra.mxu0 %v10862_v43  ;;  %v10882_v43 = vpack.c.bf16 %v8793_v7, %v8790_v21  ;;  %v8820_v7 = vld [vmem:[%s17317_s5 + $0x438] sm:$0xff] }
 0x6ab   : > { %10865 = vmatprep.subr.bf16.mxu0 %v10864_v22  ;;  %v8795_v22 = vld [vmem:[%s17317_s5 + $0x370] sm:$0xff] }
 0x6ac   : > { %10922 = vmatpush1.bf16.msra.mxu1 %v10921_v54  ;;  %v10924_v27 = vpack.c.bf16 %v8795_v22, %v8792_v60  ;;  %v8821_v54 = vld [vmem:[%s17317_s5 + $0x440] sm:$0xff]  ;;  %v8823_v60 = vld [vmem:[%s17317_s5 + $0x450] sm:$0xff] }
 0x6ad   : > { %8758 = vmatmul.mubr.msk.f32.gmra.mrb[72].mxu0 %vm3162_vm8, %v11881_v13  ;;  %10923 = vmatprep.subr.bf16.mxu1 %v11949_v35  ;;  %v8797_v13 = vld [vmem:[%s17317_s5 + $0x380] sm:$0xff]  ;;  %v10902_v22 = vpack.c.bf16 %v8823_v60, %v8820_v7 }
 0x6ae   : > { %4978 = vmatprep.mubr.f32.mxu0 %v17368_v56  ;;  %10867 = vmatpush1.bf16.msra.mxu0 %v10866_v55  ;;  %v8798_v55 = vld [vmem:[%s17317_s5 + $0x388] sm:$0xff] }
 0x6af   : > { %10869 = vmatprep.subr.bf16.mxu0 %v10868_v28  ;;  %v10927_v14 = vpack.c.bf16 %v8801_v6, %v8798_v55  ;;  %v8806_v28 = vld [vmem:[%s17317_s5 + $0x3c8] sm:$0xff]  ;;  %v8829_v55 = vld [vmem:[%s17317_s5 + $0x480] sm:$0xff] }
 0x6b0   : > { %10925 = vmatpush1.bf16.msra.mxu1 %v10924_v27  ;;  %v10888_v4 = vpack.c.bf16 %v8806_v28, %v8803_v36  ;;  %v8825_v27 = vld [vmem:[%s17317_s5 + $0x460] sm:$0xff]  ;;  %v10906_v6 = vpack.c.bf16 %v8829_v55, %v8826_v32 }
 0x6b1   : > { %8759 = vmatmul.mubr.msk.f32.gmra.mrb[74].mxu0 %vm3162_vm8, %v11882_v33  ;;  %v8800_v33 = vld [vmem:[%s17317_s5 + $0x398] sm:$0xff]  ;;  %10926 = vmatprep.subr.bf16.mxu1 %v11949_v35  ;;  %v8833_v28 = vld [vmem:[%s17317_s5 + $0x4a0] sm:$0xff] }
 0x6b2   : > { %10871 = vmatpush1.bf16.msra.mxu0 %v10870_v53  ;;  %v10884_v42 = vpack.c.bf16 %v8800_v33, %v8797_v13  ;;  %v8804_v53 = vld [vmem:[%s17317_s5 + $0x3b8] sm:$0xff]  ;;  %v8827_v33 = vld [vmem:[%s17317_s5 + $0x470] sm:$0xff] }
 0x6b3   : > { %10873 = vmatprep.subr.bf16.mxu0 %v10872_v19  ;;  %v10930_v62 = vpack.c.bf16 %v8807_v61, %v8804_v53  ;;  %v8812_v19 = vld [vmem:[%s17317_s5 + $0x3f8] sm:$0xff]  ;;  %v8834_v53 = vld [vmem:[%s17317_s5 + $0x4a8] sm:$0xff] }
 0x6b4   : > { %10928 = vmatpush1.bf16.msra.mxu1 %v10927_v14  ;;  %v10892_v47 = vpack.c.bf16 %v8812_v19, %v8809_v10  ;;  %v8831_v14 = vld [vmem:[%s17317_s5 + $0x490] sm:$0xff] }
 0x6b5   : > { %10929 = vmatprep.subr.bf16.mxu1 %v11949_v35 }
 0x6b6   : > { %10875 = vmatpush1.bf16.msra.mxu0 %v10874_v58  ;;  %v8810_v58 = vld [vmem:[%s17317_s5 + $0x3e8] sm:$0xff] }
 0x6b7   : > { %10877 = vmatprep.subr.bf16.mxu0 %v10876_v3  ;;  %v10933_v3 = vpack.c.bf16 %v8813_v41, %v8810_v58 }
 0x6b8   : > { %10931 = vmatpush1.bf16.msra.mxu1 %v10930_v62 }
 0x6b9   : > { %10932 = vmatprep.subr.bf16.mxu1 %v11949_v35 }
 0x6ba   : > { %10879 = vmatpush1.bf16.msra.mxu0 %v10878_v17  ;;  %v8816_v17 = vld [vmem:[%s17317_s5 + $0x418] sm:$0xff] }
 0x6bb   : > { %10881 = vmatprep.subr.bf16.mxu0 %v10880_v40  ;;  %v10936_v20 = vpack.c.bf16 %v8819_v25, %v8816_v17  ;;  %v8824_v40 = vld [vmem:[%s17317_s5 + $0x458] sm:$0xff]  ;;  %v5002_v17 = vld [vmem:[%s17317_s5 + $0x28] sm:$0xff]  ;;  %v5007_v25 = vld [vmem:[%s17317_s5 + $0x50] sm:$0xff] }
 0x6bc   : > { %10934 = vmatpush1.bf16.msra.mxu1 %v10933_v3  ;;  %v10900_v21 = vpack.c.bf16 %v8824_v40, %v8821_v54 }
 0x6bd   : > { %10935 = vmatprep.subr.bf16.mxu1 %v11949_v35 }
 0x6be   : > { %10883 = vmatpush1.bf16.msra.mxu0 %v10882_v43  ;;  %v8822_v43 = vld [vmem:[%s17317_s5 + $0x448] sm:$0xff] }
 0x6bf   : > { %10885 = vmatprep.subr.bf16.mxu0 %v10884_v42  ;;  %v10939_v13 = vpack.c.bf16 %v8825_v27, %v8822_v43  ;;  %v8830_v42 = vld [vmem:[%s17317_s5 + $0x488] sm:$0xff]  ;;  %v15415_v27 = vld [vmem:[%s17317_s5 + $0x30] sm:$0xff] }
 0x6c0   : > { %10937 = vmatpush1.bf16.msra.mxu1 %v10936_v20  ;;  %v10904_v11 = vpack.c.bf16 %v8830_v42, %v8827_v33 }
 0x6c1   : > { %10938 = vmatprep.subr.bf16.mxu1 %v11949_v35 }
 0x6c2   : > { %10887 = vmatpush1.bf16.msra.mxu0 %v10886_v57  ;;  %v8828_v57 = vld [vmem:[%s17317_s5 + $0x478] sm:$0xff] }
 0x6c3   : > { %10889 = vmatprep.subr.bf16.mxu0 %v10888_v4  ;;  %v10942_v36 = vpack.c.bf16 %v8831_v14, %v8828_v57  ;;  %v4998_v4 = vld [vmem:[%s17317_s5 + $0x8] sm:$0xff] }
 0x6c4   : > { %10940 = vmatpush1.bf16.msra.mxu1 %v10939_v13 }
 0x6c5   : > { %10941 = vmatprep.subr.bf16.mxu1 %v11949_v35 }
 0x6c6   : > { %10891 = vmatpush1.bf16.msra.mxu0 %v10890_v15  ;;  %v10944_v15 = vpack.c.bf16 %v5001_v37, %v4998_v4 }
 0x6c7   : > { %10893 = vmatprep.subr.bf16.mxu0 %v10892_v47 }
 0x6c8   : > { %10943 = vmatpush1.bf16.msra.mxu1 %v10942_v36  ;;  %v5005_v36 = vld [vmem:[%s17317_s5 + $0x40] sm:$0xff] }
 0x6c9   : > { %5296 = vmatprep.subr.mxu1 %v17368_v56 }
 0x6ca   : > { %10895 = vmatpush1.bf16.msra.mxu0 %v10894_v48 }
 0x6cb   : > { %10897 = vmatprep.subr.bf16.mxu0 %v10896_v9 }
 0x6cc   : > { %5297 = vmatpush1.msra.mxu1 %v8834_v53  ;;  %v5008_v53 = vld [vmem:[%s17317_s5 + $0x58] sm:$0xff] }
 0x6cd   : > { %10992 = vmatprep.subr.bf16.mxu1 %v11949_v35 }
 0x6ce   : > { %10899 = vmatpush1.bf16.msra.mxu0 %v10898_v45  ;;  %v5004_v45 = vld [vmem:[%s17317_s5 + $0x38] sm:$0xff] }
 0x6cf   : > { %10901 = vmatprep.subr.bf16.mxu0 %v10900_v21  ;;  %v10946_v21 = vpack.c.bf16 %v5000_v49, %v4997_v63 }
 0x6d2   : > { %10903 = vmatpush1.bf16.msra.mxu0 %v10902_v22  ;;  %v10948_v22 = vpack.c.bf16 %v5007_v25, %v5004_v45 }
 0x6d3   : > { %10905 = vmatprep.subr.bf16.mxu0 %v10904_v11  ;;  %v15423_v11 = vld [vmem:[%s17317_s5 + $0x48] sm:$0xff] }
 0x6d6   : > { %10907 = vmatpush1.bf16.msra.mxu0 %v10906_v6 }
 0x6d7   : > { %5219 = vmatprep.subr.mxu0 %v8833_v28 }
 0x6da   : > { %5220 = vmatpush1.msra.mxu0 %v8832_v8 }
 0x6db   : > { %10945 = vmatprep.subr.bf16.mxu0 %v10944_v15  ;;  %v15440_v15 = vld [vmem:[%s17317_s5 + $0x68] sm:$0xff] }
 0x75c   : > { %v4790_v61 = vpop.f32.mrb[58].mxu0 }
 0x75d   : > { %v4807_v62 = vmax.f32 %v4222_v12, %v4790_v61  ;;  %v4792_v10 = vpop.f32.mrb[59].mxu0  ;;  %v15445_v61 = vld [vmem:[%s17317_s5 + $0x80] sm:$0xff] }
 0x75e   : > { %v4808_v19 = vmax.f32 %v4223_v34, %v4792_v10 }
 0x760   : > { %v4796_v47 = vpop.f32.mrb[60].mxu0 }
 0x761   : > { %v4809_v51 = vmax.f32 %v4224_v46, %v4796_v47  ;;  %v4798_v1 = vpop.f32.mrb[61].mxu0 }
 0x762   : > { %v4810_v58 = vmax.f32 %v4225_v39, %v4798_v1 }
 0x764   : > { %v4802_v48 = vpop.f32.mrb[62].mxu0 }
 0x765   : > { %v4811_v52 = vmax.f32 %v4226_v16, %v4802_v48  ;;  %v4804_v2 = vpop.f32.mrb[63].mxu0 }
 0x766   : > { %v4812_v50 = vmax.f32 %v4227_v26, %v4804_v2  ;;  %v4999_v26 = vld [vmem:[%s17317_s5 + $0x10] sm:$0xff] }
 0x767   : > { %v10993_v43 = vpack.c.bf16 %v5002_v17, %v4999_v26  ;;  %v5019_v17 = vld [vmem:[%s17317_s5 + $0xb0] sm:$0xff] }
 0x76c   : > { %v4879_v12 = vpop.f32.mrb[64].mxu0 }
 0x76d   : > { %v4896_v18 = vmax.f32 %v4807_v62, %v4879_v12  ;;  %v4881_v34 = vpop.f32.mrb[65].mxu0  ;;  %v10996_v12 = vpack.c.bf16 %v5008_v53, %v5005_v36  ;;  %v5024_v53 = vld [vmem:[%s17317_s5 + $0xd8] sm:$0xff] }
 0x76e   : > { %v4897_v23 = vmax.f32 %v4808_v19, %v4881_v34 }
 0x770   : > { %v4885_v59 = vpop.f32.mrb[66].mxu0 }
 0x771   : > { %v4898_v46 = vmax.f32 %v4809_v51, %v4885_v59  ;;  %v4887_v41 = vpop.f32.mrb[67].mxu0  ;;  %v10950_v51 = vpack.c.bf16 %v15423_v11, %v15415_v27  ;;  %v5015_v27 = vld [vmem:[%s17317_s5 + $0x90] sm:$0xff] }
 0x772   : > { %v4899_v31 = vmax.f32 %v4810_v58, %v4887_v41 }
 0x774   : > { %v4891_v24 = vpop.f32.mrb[68].mxu0 }
 0x775   : > { %v4900_v38 = vmax.f32 %v4811_v52, %v4891_v24  ;;  %v4893_v39 = vpop.f32.mrb[69].mxu0  ;;  %v5009_v24 = vld [vmem:[%s17317_s5 + $0x60] sm:$0xff] }
 0x776   : > { %v4901_v30 = vmax.f32 %v4812_v50, %v4893_v39 }
 0x77c   : > { %v4968_v3 = vpop.f32.mrb[70].mxu0 }
 0x77d   : > { %v4985_v29 = vmax.f32 %v4896_v18, %v4968_v3  ;;  %v4970_v44 = vpop.f32.mrb[71].mxu0  ;;  %v10952_v18 = vpack.c.bf16 %v15445_v61, %v15440_v15  ;;  %v5023_v15 = vld [vmem:[%s17317_s5 + $0xd0] sm:$0xff]  ;;  %v5026_v61 = vld [vmem:[%s17317_s5 + $0xe8] sm:$0xff] }
 0x77e   : > { %v4986_v16 = vmax.f32 %v4897_v23, %v4970_v44  ;;  %v5011_v44 = vld [vmem:[%s17317_s5 + $0x70] sm:$0xff] }
 0x77f   : > { %v15387_v9 = vmax.f32 %v4985_v29, 0.0  ;;  %v5012_v29 = vld [vmem:[%s17317_s5 + $0x78] sm:$0xff] }
 0x780   : > { %v15398_v5 = vmax.f32 %v4986_v16, 0.0  ;;  %v4974_v0 = vpop.f32.mrb[72].mxu0  ;;  %v5014_v16 = vld [vmem:[%s17317_s5 + $0x88] sm:$0xff] }
 0x781   : > { %v4987_v20 = vmax.f32 %v4898_v46, %v4974_v0  ;;  %v4976_v54 = vpop.f32.mrb[73].mxu0  ;;  %v5154_v60 = vrot.slane %v15387_v9, 1  ;;  %v5555_v55 = vrot.slane %v15387_v9, 2  ;;  %v5805_v46 = vrot.slane %v15387_v9, 3  ;;  %v5016_v0 = vld [vmem:[%s17317_s5 + $0x98] sm:$0xff] }
 0x782   : > { %v4988_v40 = vmax.f32 %v4899_v31, %v4976_v54  ;;  %v5157_v42 = vrot.slane %v15398_v5, 1  ;;  %v5558_v32 = vrot.slane %v15398_v5, 2  ;;  %v5808_v4 = vrot.slane %v15398_v5, 3 }
 0x783   : > { %v15409_v7 = vmax.f32 %v4987_v20, 0.0  ;;  %v6058_v49 = vrot.slane %v15398_v5, 4  ;;  %v6055_v20 = vrot.slane %v15387_v9, 4  ;;  %v10956_v11 = vpack.c.bf16 %v5019_v17, %v5016_v0  ;;  %v5041_v0 = vld [vmem:[%s17317_s5 + $0x160] sm:$0xff]  ;;  %v5044_v17 = vld [vmem:[%s17317_s5 + $0x178] sm:$0xff] }
 0x784   : > { %v15417_v13 = vmax.f32 %v4988_v40, 0.0  ;;  %v4980_v33 = vpop.f32.mrb[74].mxu0 }
 0x785   : > { %v4989_v57 = vmax.f32 %v4900_v38, %v4980_v33  ;;  %v4982_v6 = vpop.f32.mrb[75].mxu0  ;;  %v5155_v14 = vrot.slane %v15409_v7, 1  ;;  %v5556_v28 = vrot.slane %v15409_v7, 2  ;;  %v5806_v41 = vrot.slane %v15409_v7, 3 }
 0x786   : > { %v4990_v37 = vmax.f32 %v4901_v30, %v4982_v6  ;;  %v5158_v8 = vrot.slane %v15417_v13, 1  ;;  %v5559_v62 = vrot.slane %v15417_v13, 2  ;;  %v5809_v10 = vrot.slane %v15417_v13, 3 }
 0x787   : > { %v15449_v19 = vmax.f32 %v4989_v57, 0.0  ;;  %v5156_v47 = vsel %vm535_vm0, %v5154_v60, %v5155_v14  ;;  %v15455_v1 = vsel %vm1287_vm2, %v5555_v55, %v5556_v28  ;;  %v6059_v26 = vrot.slane %v15417_v13, 4  ;;  %v5017_v55 = vld [vmem:[%s17317_s5 + $0xa0] sm:$0xff]  ;;  %v5020_v57 = vld [vmem:[%s17317_s5 + $0xb8] sm:$0xff] }
 0x788   : > { %v4996_v58 = vmax.f32 %v4990_v37, 0.0  ;;  %v5159_v48 = vsel %vm535_vm0, %v5157_v42, %v5158_v8  ;;  %v15459_v52 = vsel %vm1287_vm2, %v5558_v32, %v5559_v62  ;;  %v15462_v2 = vsel %vm1731_vm3, %v5808_v4, %v5809_v10  ;;  %v5018_v32 = vld [vmem:[%s17317_s5 + $0xa8] sm:$0xff]  ;;  %v5021_v37 = vld [vmem:[%s17317_s5 + $0xc0] sm:$0xff] }
 0x789   : > { %8835 = vmatprep.mubr.msk.f32.mxu0 %vm5166_vm9, %v5159_v48  ;;  %8837 = vmatprep.mubr.msk.f32.mxu1 %vm5166_vm9, %v5159_v48  ;;  %v5160_v50 = vrot.slane %v15449_v19, 1  ;;  %v5561_v34 = vrot.slane %v15449_v19, 2  ;;  %v5811_v30 = vrot.slane %v15449_v19, 3  ;;  %v15505_v45 = vsel %vm1731_vm3, %v5805_v46, %v5806_v41  ;;  %v5030_v48 = vld [vmem:[%s17317_s5 + $0x108] sm:$0xff]  ;;  %v5033_v46 = vld [vmem:[%s17317_s5 + $0x120] sm:$0xff] }
 0x78a   : > { %5236 = vmatmul.mubr.f32.vlgmr.msra.gmra.mrb[76].mxu0 %v5156_v47  ;;  %5313 = vmatmul.mubr.f32.vlgmr.msra.gmra.mrb[66].mxu1 %v5156_v47  ;;  %v5162_v23 = vrot.slane %v4996_v58, 1  ;;  %v5563_v59 = vrot.slane %v4996_v58, 2  ;;  %v5813_v39 = vrot.slane %v4996_v58, 3  ;;  %v6056_v54 = vrot.slane %v15409_v7, 4 }
 0x78b   : > { %10947 = vmatpush1.bf16.msra.mxu0 %v10946_v21  ;;  %10994 = vmatpush1.bf16.msra.mxu1 %v10993_v43  ;;  %v5161_v31 = vsel %vm535_vm0, %v5155_v14, %v5160_v50  ;;  %v15477_v38 = vsel %vm1287_vm2, %v5556_v28, %v5561_v34  ;;  %v15513_v40 = vsel %vm1731_vm3, %v5806_v41, %v5811_v30  ;;  %v6063_v60 = vrot.slane %v4996_v58, 4  ;;  %v5025_v14 = vld [vmem:[%s17317_s5 + $0xe0] sm:$0xff]  ;;  %v5040_v30 = vld [vmem:[%s17317_s5 + $0x158] sm:$0xff] }
 0x78c   : > { %v5163_v3 = vsel %vm535_vm0, %v5158_v8, %v5162_v23  ;;  %10949 = vmatprep.subr.bf16.mxu0 %v10948_v22  ;;  %10995 = vmatprep.subr.bf16.mxu1 %v11949_v35  ;;  %v15492_v63 = vsel %vm1287_vm2, %v5559_v62, %v5563_v59  ;;  %v15508_v25 = vsel %vm1731_vm3, %v5809_v10, %v5813_v39  ;;  %v6061_v42 = vrot.slane %v15449_v19, 4  ;;  %v5028_v62 = vld [vmem:[%s17317_s5 + $0xf8] sm:$0xff]  ;;  %v5031_v10 = vld [vmem:[%s17317_s5 + $0x110] sm:$0xff]  ;;  %v5029_v50 = vld [vmem:[%s17317_s5 + $0x100] sm:$0xff] }
 0x78d   : > { %8836 = vmatprep.mubr.msk.f32.mxu0 %vm5166_vm9, %v5163_v3  ;;  %8838 = vmatprep.mubr.msk.f32.mxu1 %vm5166_vm9, %v5163_v3  ;;  %v15516_v21 = vsel %vm2175_vm4, %v6058_v49, %v6059_v26  ;;  %v10954_v43 = vpack.c.bf16 %v5012_v29, %v5009_v24  ;;  %v10999_v22 = vpack.c.bf16 %v5014_v16, %v5011_v44  ;;  %v5037_v34 = vld [vmem:[%s17317_s5 + $0x140] sm:$0xff]  ;;  %v5035_v24 = vld [vmem:[%s17317_s5 + $0x130] sm:$0xff]  ;;  %v5038_v39 = vld [vmem:[%s17317_s5 + $0x148] sm:$0xff] }
 0x78e   : > { %5242 = vmatmul.mubr.f32.gmra.mrb[78].mxu0 %v5161_v31  ;;  %5318 = vmatmul.mubr.f32.gmra.mrb[68].mxu1 %v5161_v31  ;;  %v15522_v33 = vsel %vm2175_vm4, %v6055_v20, %v6056_v54  ;;  %v15539_v6 = vsel %vm2175_vm4, %v6059_v26, %v6063_v60  ;;  %v15549_v36 = vsel %vm2175_vm4, %v6056_v54, %v6061_v42  ;;  %v5036_v31 = vld [vmem:[%s17317_s5 + $0x138] sm:$0xff]  ;;  %v5043_v3 = vld [vmem:[%s17317_s5 + $0x170] sm:$0xff]  ;;  %v5042_v26 = vld [vmem:[%s17317_s5 + $0x168] sm:$0xff] }
 0x78f   : > { %10951 = vmatpush1.bf16.msra.mxu0 %v10950_v51  ;;  %10997 = vmatpush1.bf16.msra.mxu1 %v10996_v12  ;;  %v10958_v28 = vpack.c.bf16 %v5018_v32, %v5015_v27  ;;  %v11002_v4 = vpack.c.bf16 %v5020_v57, %v5017_v55  ;;  %v10962_v19 = vpack.c.bf16 %v5024_v53, %v5021_v37  ;;  %v5027_v51 = vld [vmem:[%s17317_s5 + $0xf0] sm:$0xff]  ;;  %v5032_v12 = vld [vmem:[%s17317_s5 + $0x118] sm:$0xff]  ;;  %v5046_v20 = vld [vmem:[%s17317_s5 + $0x188] sm:$0xff] }
 0x790   : > { %8839 = vmatprep.mubr.msk.f32.mxu0 %vm5166_vm9, %v15398_v5  ;;  %8841 = vmatprep.mubr.msk.f32.mxu1 %vm5166_vm9, %v15398_v5  ;;  %v5022_v5 = vld [vmem:[%s17317_s5 + $0xc8] sm:$0xff]  ;;  %v11005_v47 = vpack.c.bf16 %v5026_v61, %v5023_v15  ;;  %v10964_v58 = vpack.c.bf16 %v5031_v10, %v5028_v62  ;;  %v10966_v23 = vpack.c.bf16 %v5030_v48, %v5027_v51  ;;  %v5039_v16 = vld [vmem:[%s17317_s5 + $0x150] sm:$0xff]  ;;  %v5049_v54 = vld [vmem:[%s17317_s5 + $0x1a0] sm:$0xff] }
 0x791   : > { %10953 = vmatprep.subr.bf16.mxu0 %v10952_v18  ;;  %10998 = vmatprep.subr.bf16.mxu1 %v11949_v35  ;;  %v10960_v8 = vpack.c.bf16 %v5025_v14, %v5022_v5  ;;  %v5034_v18 = vld [vmem:[%s17317_s5 + $0x128] sm:$0xff]  ;;  %v11008_v59 = vpack.c.bf16 %v5032_v12, %v5029_v50  ;;  %v10970_v29 = vpack.c.bf16 %v5036_v31, %v5033_v46  ;;  %v5048_v42 = vld [vmem:[%s17317_s5 + $0x198] sm:$0xff]  ;;  %v5055_v57 = vld [vmem:[%s17317_s5 + $0x1d0] sm:$0xff] }
 0x792   : > { %v10968_v41 = vpack.c.bf16 %v5037_v34, %v5034_v18  ;;  %v11011_v44 = vpack.c.bf16 %v5038_v39, %v5035_v24  ;;  %v10972_v49 = vpack.c.bf16 %v5043_v3, %v5040_v30  ;;  %v10974_v60 = vpack.c.bf16 %v5042_v26, %v5039_v16  ;;  %v5050_v32 = vld [vmem:[%s17317_s5 + $0x1a8] sm:$0xff]  ;;  %v5052_v55 = vld [vmem:[%s17317_s5 + $0x1b8] sm:$0xff]  ;;  %v5061_v61 = vld [vmem:[%s17317_s5 + $0x200] sm:$0xff] }
 0x793   : > { %10955 = vmatpush1.bf16.msra.mxu0 %v10954_v43  ;;  %11000 = vmatpush1.bf16.msra.mxu1 %v10999_v22  ;;  %v11014_v43 = vpack.c.bf16 %v5044_v17, %v5041_v0  ;;  %v5045_v22 = vld [vmem:[%s17317_s5 + $0x180] sm:$0xff]  ;;  %v10976_v27 = vpack.c.bf16 %v5049_v54, %v5046_v20  ;;  %v5054_v37 = vld [vmem:[%s17317_s5 + $0x1c8] sm:$0xff]  ;;  %v5056_v53 = vld [vmem:[%s17317_s5 + $0x1d8] sm:$0xff] }
 0x794   : > { %10957 = vmatprep.subr.bf16.mxu0 %v10956_v11  ;;  %11001 = vmatprep.subr.bf16.mxu1 %v11949_v35  ;;  %v5047_v11 = vld [vmem:[%s17317_s5 + $0x190] sm:$0xff]  ;;  %v10978_v5 = vpack.c.bf16 %v5048_v42, %v5045_v22  ;;  %v5058_v15 = vld [vmem:[%s17317_s5 + $0x1e8] sm:$0xff]  ;;  %v5060_v51 = vld [vmem:[%s17317_s5 + $0x1f8] sm:$0xff] }
 0x795   : > { %v11017_v14 = vpack.c.bf16 %v5050_v32, %v5047_v11  ;;  %v5062_v48 = vld [vmem:[%s17317_s5 + $0x208] sm:$0xff]  ;;  %v5064_v50 = vld [vmem:[%s17317_s5 + $0x218] sm:$0xff]  ;;  %v5067_v12 = vld [vmem:[%s17317_s5 + $0x230] sm:$0xff] }
 0x796   : > { %v5066_v46 = vld [vmem:[%s17317_s5 + $0x228] sm:$0xff]  ;;  %v5068_v31 = vld [vmem:[%s17317_s5 + $0x238] sm:$0xff]  ;;  %v5071_v16 = vld [vmem:[%s17317_s5 + $0x250] sm:$0xff] }
 0x797   : > { %10959 = vmatpush1.bf16.msra.mxu0 %v10958_v28  ;;  %11003 = vmatpush1.bf16.msra.mxu1 %v11002_v4  ;;  %v5051_v28 = vld [vmem:[%s17317_s5 + $0x1b0] sm:$0xff]  ;;  %v10980_v4 = vpack.c.bf16 %v5055_v57, %v5052_v55  ;;  %v5070_v30 = vld [vmem:[%s17317_s5 + $0x248] sm:$0xff]  ;;  %v8844_v3 = vld [vmem:[%s17317_s5 + $0x4b8] sm:$0xff] }
 0x798   : > { %10961 = vmatprep.subr.bf16.mxu0 %v10960_v8  ;;  %11004 = vmatprep.subr.bf16.mxu1 %v11949_v35  ;;  %v5053_v8 = vld [vmem:[%s17317_s5 + $0x1c0] sm:$0xff]  ;;  %v10982_v62 = vpack.c.bf16 %v5054_v37, %v5051_v28  ;;  %v8846_v26 = vld [vmem:[%s17317_s5 + $0x4c8] sm:$0xff]  ;;  %v8848_v17 = vld [vmem:[%s17317_s5 + $0x4d8] sm:$0xff] }
 0x799   : > { %v11020_v10 = vpack.c.bf16 %v5056_v53, %v5053_v8  ;;  %v8845_v0 = vld [vmem:[%s17317_s5 + $0x4c0] sm:$0xff]  ;;  %v8850_v54 = vld [vmem:[%s17317_s5 + $0x4e8] sm:$0xff]  ;;  %v8852_v42 = vld [vmem:[%s17317_s5 + $0x4f8] sm:$0xff] }
 0x79a   : > { %v11077_v22 = vpack.c.bf16 %v8848_v17, %v8845_v0  ;;  %v8851_v11 = vld [vmem:[%s17317_s5 + $0x4f0] sm:$0xff]  ;;  %v8854_v32 = vld [vmem:[%s17317_s5 + $0x508] sm:$0xff]  ;;  %v8860_v8 = vld [vmem:[%s17317_s5 + $0x538] sm:$0xff] }
 0x79b   : > { %10963 = vmatpush1.bf16.msra.mxu0 %v10962_v19  ;;  %11006 = vmatpush1.bf16.msra.mxu1 %v11005_v47  ;;  %v5057_v19 = vld [vmem:[%s17317_s5 + $0x1e0] sm:$0xff]  ;;  %v10984_v47 = vpack.c.bf16 %v5061_v61, %v5058_v15  ;;  %v8859_v57 = vld [vmem:[%s17317_s5 + $0x530] sm:$0xff]  ;;  %v8858_v37 = vld [vmem:[%s17317_s5 + $0x528] sm:$0xff] }
 0x79c   : > { %10965 = vmatprep.subr.bf16.mxu0 %v10964_v58  ;;  %11007 = vmatprep.subr.bf16.mxu1 %v11949_v35  ;;  %v5059_v58 = vld [vmem:[%s17317_s5 + $0x1f0] sm:$0xff]  ;;  %v10986_v18 = vpack.c.bf16 %v5060_v51, %v5057_v19  ;;  %v8865_v53 = vld [vmem:[%s17317_s5 + $0x560] sm:$0xff]  ;;  %v8864_v19 = vld [vmem:[%s17317_s5 + $0x558] sm:$0xff] }
 0x79d   : > { %v11023_v34 = vpack.c.bf16 %v5062_v48, %v5059_v58  ;;  %v8855_v28 = vld [vmem:[%s17317_s5 + $0x510] sm:$0xff]  ;;  %v8868_v51 = vld [vmem:[%s17317_s5 + $0x578] sm:$0xff] }
 0x79e   : > { %v11038_v15 = vpack.c.bf16 %v8858_v37, %v8855_v28  ;;  %v8871_v58 = vld [vmem:[%s17317_s5 + $0x590] sm:$0xff] }
 0x79f   : > { %10967 = vmatpush1.bf16.msra.mxu0 %v10966_v23  ;;  %11009 = vmatpush1.bf16.msra.mxu1 %v11008_v59  ;;  %v5063_v23 = vld [vmem:[%s17317_s5 + $0x210] sm:$0xff]  ;;  %v10988_v59 = vpack.c.bf16 %v5067_v12, %v5064_v50 }
 0x7a0   : > { %10969 = vmatprep.subr.bf16.mxu0 %v10968_v41  ;;  %11010 = vmatprep.subr.bf16.mxu1 %v11949_v35  ;;  %v5065_v41 = vld [vmem:[%s17317_s5 + $0x220] sm:$0xff]  ;;  %v10990_v24 = vpack.c.bf16 %v5066_v46, %v5063_v23  ;;  %v8867_v12 = vld [vmem:[%s17317_s5 + $0x570] sm:$0xff]  ;;  %v8874_v46 = vld [vmem:[%s17317_s5 + $0x5a8] sm:$0xff] }
 0x7a1   : > { %v11026_v39 = vpack.c.bf16 %v5068_v31, %v5065_v41  ;;  %v8869_v23 = vld [vmem:[%s17317_s5 + $0x580] sm:$0xff]  ;;  %v8879_v17 = vld [vmem:[%s17317_s5 + $0x5d0] sm:$0xff] }
 0x7a2   : > { %v8877_v41 = vld [vmem:[%s17317_s5 + $0x5c0] sm:$0xff]  ;;  %v8895_v28 = vld [vmem:[%s17317_s5 + $0x650] sm:$0xff] }
 0x7a3   : > { %10971 = vmatpush1.bf16.msra.mxu0 %v10970_v29  ;;  %11012 = vmatpush1.bf16.msra.mxu1 %v11011_v44  ;;  %v8847_v29 = vld [vmem:[%s17317_s5 + $0x4d0] sm:$0xff]  ;;  %v5069_v44 = vld [vmem:[%s17317_s5 + $0x240] sm:$0xff] }
 0x7a4   : > { %10973 = vmatprep.subr.bf16.mxu0 %v10972_v49  ;;  %11013 = vmatprep.subr.bf16.mxu1 %v11949_v35  ;;  %v8843_v49 = vld [vmem:[%s17317_s5 + $0x4b0] sm:$0xff]  ;;  %v11028_v20 = vpack.c.bf16 %v8847_v29, %v8844_v3  ;;  %v8876_v3 = vld [vmem:[%s17317_s5 + $0x5b8] sm:$0xff] }
 0x7a5   : > { %v8875_v29 = vld [vmem:[%s17317_s5 + $0x5b0] sm:$0xff] }
 0x7a7   : > { %10975 = vmatpush1.bf16.msra.mxu0 %v10974_v60  ;;  %11015 = vmatpush1.bf16.msra.mxu1 %v11014_v43  ;;  %v8853_v60 = vld [vmem:[%s17317_s5 + $0x500] sm:$0xff]  ;;  %v11030_v43 = vpack.c.bf16 %v8846_v26, %v8843_v49  ;;  %v8883_v49 = vld [vmem:[%s17317_s5 + $0x5f0] sm:$0xff] }
 0x7a8   : > { %10977 = vmatprep.subr.bf16.mxu0 %v10976_v27  ;;  %11016 = vmatprep.subr.bf16.mxu1 %v11949_v35  ;;  %v8849_v27 = vld [vmem:[%s17317_s5 + $0x4e0] sm:$0xff]  ;;  %v11032_v55 = vpack.c.bf16 %v8853_v60, %v8850_v54  ;;  %v8882_v54 = vld [vmem:[%s17317_s5 + $0x5e8] sm:$0xff] }
 0x7a9   : > { %v8881_v60 = vld [vmem:[%s17317_s5 + $0x5e0] sm:$0xff] }
 0x7ab   : > { %10979 = vmatpush1.bf16.msra.mxu0 %v10978_v5  ;;  %11018 = vmatpush1.bf16.msra.mxu1 %v11017_v14  ;;  %v11034_v5 = vpack.c.bf16 %v8852_v42, %v8849_v27  ;;  %v11080_v14 = vpack.c.bf16 %v8854_v32, %v8851_v11  ;;  %v8889_v27 = vld [vmem:[%s17317_s5 + $0x620] sm:$0xff]  ;;  %v11054_v42 = vpack.c.bf16 %v8882_v54, %v8879_v17  ;;  %v8923_v54 = vld [vmem:[%s17317_s5 + $0x710] sm:$0xff] }
 0x7ac   : > { %10981 = vmatprep.subr.bf16.mxu0 %v10980_v4  ;;  %11019 = vmatprep.subr.bf16.mxu1 %v11949_v35  ;;  %v8885_v32 = vld [vmem:[%s17317_s5 + $0x600] sm:$0xff] }
 0x7af   : > { %10983 = vmatpush1.bf16.msra.mxu0 %v10982_v62  ;;  %11021 = vmatpush1.bf16.msra.mxu1 %v11020_v10  ;;  %v8861_v62 = vld [vmem:[%s17317_s5 + $0x540] sm:$0xff] }
 0x7b0   : > { %10985 = vmatprep.subr.bf16.mxu0 %v10984_v47  ;;  %11022 = vmatprep.subr.bf16.mxu1 %v11949_v35  ;;  %v8866_v47 = vld [vmem:[%s17317_s5 + $0x568] sm:$0xff]  ;;  %v11042_v48 = vpack.c.bf16 %v8864_v19, %v8861_v62  ;;  %v8901_v62 = vld [vmem:[%s17317_s5 + $0x680] sm:$0xff] }
 0x7b3   : > { %10987 = vmatpush1.bf16.msra.mxu0 %v10986_v18  ;;  %11024 = vmatpush1.bf16.msra.mxu1 %v11023_v34  ;;  %v11044_v18 = vpack.c.bf16 %v8871_v58, %v8868_v51  ;;  %v8870_v34 = vld [vmem:[%s17317_s5 + $0x588] sm:$0xff]  ;;  %v8900_v51 = vld [vmem:[%s17317_s5 + $0x678] sm:$0xff]  ;;  %v8899_v58 = vld [vmem:[%s17317_s5 + $0x670] sm:$0xff] }
 0x7b4   : > { %10989 = vmatprep.subr.bf16.mxu0 %v10988_v59  ;;  %11025 = vmatprep.subr.bf16.mxu1 %v11949_v35  ;;  %v8872_v59 = vld [vmem:[%s17317_s5 + $0x598] sm:$0xff]  ;;  %v11046_v31 = vpack.c.bf16 %v8870_v34, %v8867_v12  ;;  %v8907_v12 = vld [vmem:[%s17317_s5 + $0x6b0] sm:$0xff] }
 0x7b7   : > { %10991 = vmatpush1.bf16.msra.mxu0 %v10990_v24  ;;  %11027 = vmatpush1.bf16.msra.mxu1 %v11026_v39  ;;  %v11089_v24 = vpack.c.bf16 %v8872_v59, %v8869_v23  ;;  %v8873_v39 = vld [vmem:[%s17317_s5 + $0x5a0] sm:$0xff]  ;;  %v8903_v23 = vld [vmem:[%s17317_s5 + $0x690] sm:$0xff] }
 0x7b8   : > { %5375 = vmatprep.subr.mxu0 %v5070_v30  ;;  %5452 = vmatprep.subr.mxu1 %v17368_v56  ;;  %v11048_v30 = vpack.c.bf16 %v8877_v41, %v8874_v46  ;;  %v11050_v26 = vpack.c.bf16 %v8876_v3, %v8873_v39  ;;  %v8906_v46 = vld [vmem:[%s17317_s5 + $0x6a8] sm:$0xff]  ;;  %v8905_v41 = vld [vmem:[%s17317_s5 + $0x6a0] sm:$0xff] }
 0x7b9   : > { %v8913_v39 = vld [vmem:[%s17317_s5 + $0x6e0] sm:$0xff] }
 0x7bb   : > { %5376 = vmatpush1.msra.mxu0 %v5069_v44  ;;  %5453 = vmatpush1.msra.mxu1 %v5071_v16  ;;  %v8878_v44 = vld [vmem:[%s17317_s5 + $0x5c8] sm:$0xff]  ;;  %v8880_v16 = vld [vmem:[%s17317_s5 + $0x5d8] sm:$0xff] }
 0x7bc   : > { %5392 = vmatmul.mubr.f32.vlgmr.msra.gmra.mrb[76].mxu0 %v15387_v9  ;;  %5469 = vmatmul.mubr.f32.vlgmr.msra.gmra.mrb[70].mxu1 %v15387_v9  ;;  %v8856_v9 = vld [vmem:[%s17317_s5 + $0x518] sm:$0xff]  ;;  %v11092_v0 = vpack.c.bf16 %v8878_v44, %v8875_v29  ;;  %v8909_v29 = vld [vmem:[%s17317_s5 + $0x6c0] sm:$0xff] }
 0x7bd   : > { %11029 = vmatprep.subr.bf16.mxu0 %v11028_v20  ;;  %11076 = vmatprep.subr.bf16.mxu1 %v11949_v35  ;;  %v11036_v4 = vpack.c.bf16 %v8859_v57, %v8856_v9  ;;  %v11052_v20 = vpack.c.bf16 %v8883_v49, %v8880_v16  ;;  %v8888_v9 = vld [vmem:[%s17317_s5 + $0x618] sm:$0xff]  ;;  %v8887_v57 = vld [vmem:[%s17317_s5 + $0x610] sm:$0xff] }
 0x7be   : > { %8840 = vmatprep.mubr.msk.f32.mxu0 %vm5166_vm9, %v15417_v13  ;;  %8842 = vmatprep.mubr.msk.f32.mxu1 %vm5166_vm9, %v15417_v13  ;;  %v8857_v13 = vld [vmem:[%s17317_s5 + $0x520] sm:$0xff]  ;;  %v8912_v16 = vld [vmem:[%s17317_s5 + $0x6d8] sm:$0xff]  ;;  %v8911_v49 = vld [vmem:[%s17317_s5 + $0x6d0] sm:$0xff] }
 0x7bf   : > { %11031 = vmatpush1.bf16.msra.mxu0 %v11030_v43  ;;  %11078 = vmatpush1.bf16.msra.mxu1 %v11077_v22  ;;  %v11083_v61 = vpack.c.bf16 %v8860_v8, %v8857_v13  ;;  %v8884_v43 = vld [vmem:[%s17317_s5 + $0x5f8] sm:$0xff]  ;;  %v8886_v22 = vld [vmem:[%s17317_s5 + $0x608] sm:$0xff]  ;;  %v8891_v13 = vld [vmem:[%s17317_s5 + $0x630] sm:$0xff] }
 0x7c0   : > { %5398 = vmatmul.mubr.f32.gmra.mrb[78].mxu0 %v15409_v7  ;;  %5474 = vmatmul.mubr.f32.gmra.mrb[72].mxu1 %v15409_v7  ;;  %v8862_v7 = vld [vmem:[%s17317_s5 + $0x548] sm:$0xff]  ;;  %v11095_v11 = vpack.c.bf16 %v8884_v43, %v8881_v60  ;;  %v8915_v43 = vld [vmem:[%s17317_s5 + $0x6f0] sm:$0xff] }
 0x7c1   : > { %11033 = vmatprep.subr.bf16.mxu0 %v11032_v55  ;;  %11079 = vmatprep.subr.bf16.mxu1 %v11949_v35  ;;  %v11040_v10 = vpack.c.bf16 %v8865_v53, %v8862_v7  ;;  %v11056_v55 = vpack.c.bf16 %v8889_v27, %v8886_v22  ;;  %v8894_v7 = vld [vmem:[%s17317_s5 + $0x648] sm:$0xff]  ;;  %v8893_v53 = vld [vmem:[%s17317_s5 + $0x640] sm:$0xff] }
 0x7c2   : > { %8918 = vmatprep.mubr.msk.f32.mxu0 %vm5166_vm9, %v15459_v52  ;;  %8920 = vmatprep.mubr.msk.f32.mxu1 %vm5166_vm9, %v15459_v52  ;;  %v8863_v52 = vld [vmem:[%s17317_s5 + $0x550] sm:$0xff]  ;;  %v8926_v60 = vld [vmem:[%s17317_s5 + $0x728] sm:$0xff]  ;;  %v8917_v22 = vld [vmem:[%s17317_s5 + $0x700] sm:$0xff] }
 0x7c3   : > { %11035 = vmatpush1.bf16.msra.mxu0 %v11034_v5  ;;  %11081 = vmatpush1.bf16.msra.mxu1 %v11080_v14  ;;  %v11086_v50 = vpack.c.bf16 %v8866_v47, %v8863_v52  ;;  %v8890_v5 = vld [vmem:[%s17317_s5 + $0x628] sm:$0xff]  ;;  %v8892_v14 = vld [vmem:[%s17317_s5 + $0x638] sm:$0xff]  ;;  %v8897_v52 = vld [vmem:[%s17317_s5 + $0x660] sm:$0xff] }
 0x7c4   : > { %11037 = vmatprep.subr.bf16.mxu0 %v11036_v4  ;;  %11082 = vmatprep.subr.bf16.mxu1 %v11949_v35  ;;  %v11058_v4 = vpack.c.bf16 %v8888_v9, %v8885_v32  ;;  %v11098_v37 = vpack.c.bf16 %v8890_v5, %v8887_v57  ;;  %v11060_v8 = vpack.c.bf16 %v8895_v28, %v8892_v14  ;;  %v8922_v27 = vld [vmem:[%s17317_s5 + $0x708] sm:$0xff]  ;;  %v8927_v32 = vld [vmem:[%s17317_s5 + $0x730] sm:$0xff]  ;;  %v8929_v9 = vld [vmem:[%s17317_s5 + $0x740] sm:$0xff] }
 0x7c5   : > { %v8932_v57 = vld [vmem:[%s17317_s5 + $0x758] sm:$0xff] }
 0x7c6   : > { %v8928_v28 = vld [vmem:[%s17317_s5 + $0x738] sm:$0xff] }
 0x7c7   : > { %11039 = vmatpush1.bf16.msra.mxu0 %v11038_v15  ;;  %11084 = vmatpush1.bf16.msra.mxu1 %v11083_v61  ;;  %v8896_v15 = vld [vmem:[%s17317_s5 + $0x658] sm:$0xff]  ;;  %v8898_v61 = vld [vmem:[%s17317_s5 + $0x668] sm:$0xff] }
 0x7c8   : > { %11041 = vmatprep.subr.bf16.mxu0 %v11040_v10  ;;  %11085 = vmatprep.subr.bf16.mxu1 %v11949_v35  ;;  %v11062_v10 = vpack.c.bf16 %v8894_v7, %v8891_v13  ;;  %v11101_v19 = vpack.c.bf16 %v8896_v15, %v8893_v53  ;;  %v11064_v47 = vpack.c.bf16 %v8901_v62, %v8898_v61  ;;  %v8933_v13 = vld [vmem:[%s17317_s5 + $0x760] sm:$0xff]  ;;  %v8938_v7 = vld [vmem:[%s17317_s5 + $0x788] sm:$0xff] }
 0x7c9   : > { %v8934_v61 = vld [vmem:[%s17317_s5 + $0x768] sm:$0xff] }
 0x7cb   : > { %11043 = vmatpush1.bf16.msra.mxu0 %v11042_v48  ;;  %11087 = vmatpush1.bf16.msra.mxu1 %v11086_v50  ;;  %v8902_v48 = vld [vmem:[%s17317_s5 + $0x688] sm:$0xff]  ;;  %v8904_v50 = vld [vmem:[%s17317_s5 + $0x698] sm:$0xff] }
 0x7cc   : > { %11045 = vmatprep.subr.bf16.mxu0 %v11044_v18  ;;  %11088 = vmatprep.subr.bf16.mxu1 %v11949_v35  ;;  %v11066_v18 = vpack.c.bf16 %v8900_v51, %v8897_v52  ;;  %v11104_v34 = vpack.c.bf16 %v8902_v48, %v8899_v58  ;;  %v11068_v59 = vpack.c.bf16 %v8907_v12, %v8904_v50  ;;  %v8944_v52 = vld [vmem:[%s17317_s5 + $0x7b8] sm:$0xff]  ;;  %v8943_v50 = vld [vmem:[%s17317_s5 + $0x7b0] sm:$0xff]  ;;  %v8945_v12 = vld [vmem:[%s17317_s5 + $0x7c0] sm:$0xff] }
 0x7cd   : > { %v8940_v58 = vld [vmem:[%s17317_s5 + $0x798] sm:$0xff] }
 0x7cf   : > { %11047 = vmatpush1.bf16.msra.mxu0 %v11046_v31  ;;  %11090 = vmatpush1.bf16.msra.mxu1 %v11089_v24  ;;  %v8908_v31 = vld [vmem:[%s17317_s5 + $0x6b8] sm:$0xff]  ;;  %v8910_v24 = vld [vmem:[%s17317_s5 + $0x6c8] sm:$0xff] }
 0x7d0   : > { %11049 = vmatprep.subr.bf16.mxu0 %v11048_v30  ;;  %11091 = vmatprep.subr.bf16.mxu1 %v11949_v35  ;;  %v11070_v30 = vpack.c.bf16 %v8906_v46, %v8903_v23  ;;  %v11107_v3 = vpack.c.bf16 %v8908_v31, %v8905_v41  ;;  %v11072_v44 = vpack.c.bf16 %v8913_v39, %v8910_v24  ;;  %v8946_v46 = vld [vmem:[%s17317_s5 + $0x7c8] sm:$0xff]  ;;  %v8949_v31 = vld [vmem:[%s17317_s5 + $0x7e0] sm:$0xff]  ;;  %v8948_v24 = vld [vmem:[%s17317_s5 + $0x7d8] sm:$0xff] }
 0x7d1   : > { %v11126_v23 = vpack.c.bf16 %v8943_v50, %v8940_v58  ;;  %v8951_v39 = vld [vmem:[%s17317_s5 + $0x7f0] sm:$0xff]  ;;  %v8978_v50 = vld [vmem:[%s17317_s5 + $0x8c8] sm:$0xff] }
 0x7d3   : > { %11051 = vmatpush1.bf16.msra.mxu0 %v11050_v26  ;;  %11093 = vmatpush1.bf16.msra.mxu1 %v11092_v0  ;;  %v8914_v26 = vld [vmem:[%s17317_s5 + $0x6e8] sm:$0xff]  ;;  %v11074_v0 = vpack.c.bf16 %v8912_v16, %v8909_v29  ;;  %v11130_v29 = vpack.c.bf16 %v8949_v31, %v8946_v46  ;;  %v8952_v16 = vld [vmem:[%s17317_s5 + $0x7f8] sm:$0xff] }
 0x7d4   : > { %11053 = vmatprep.subr.bf16.mxu0 %v11052_v20  ;;  %11094 = vmatprep.subr.bf16.mxu1 %v11949_v35  ;;  %v11110_v17 = vpack.c.bf16 %v8914_v26, %v8911_v49  ;;  %v8916_v20 = vld [vmem:[%s17317_s5 + $0x6f8] sm:$0xff]  ;;  %v8955_v26 = vld [vmem:[%s17317_s5 + $0x810] sm:$0xff] }
 0x7d5   : > { %v8984_v31 = vld [vmem:[%s17317_s5 + $0x8f8] sm:$0xff] }
 0x7d7   : > { %11055 = vmatpush1.bf16.msra.mxu0 %v11054_v42  ;;  %11096 = vmatpush1.bf16.msra.mxu1 %v11095_v11  ;;  %v8925_v42 = vld [vmem:[%s17317_s5 + $0x720] sm:$0xff]  ;;  %v8924_v11 = vld [vmem:[%s17317_s5 + $0x718] sm:$0xff] }
 0x7d8   : > { %11057 = vmatprep.subr.bf16.mxu0 %v11056_v55  ;;  %11097 = vmatprep.subr.bf16.mxu1 %v11949_v35  ;;  %v11112_v55 = vpack.c.bf16 %v8926_v60, %v8923_v54  ;;  %v11114_v5 = vpack.c.bf16 %v8925_v42, %v8922_v27  ;;  %v11161_v14 = vpack.c.bf16 %v8927_v32, %v8924_v11  ;;  %v8962_v54 = vld [vmem:[%s17317_s5 + $0x848] sm:$0xff]  ;;  %v8961_v42 = vld [vmem:[%s17317_s5 + $0x840] sm:$0xff]  ;;  %v8960_v11 = vld [vmem:[%s17317_s5 + $0x838] sm:$0xff] }
 0x7d9   : > { %v11134_v60 = vpack.c.bf16 %v8955_v26, %v8952_v16  ;;  %v8963_v32 = vld [vmem:[%s17317_s5 + $0x850] sm:$0xff]  ;;  %v8990_v26 = vld [vmem:[%s17317_s5 + $0x928] sm:$0xff] }
 0x7db   : > { %11059 = vmatpush1.bf16.msra.mxu0 %v11058_v4  ;;  %11099 = vmatpush1.bf16.msra.mxu1 %v11098_v37  ;;  %v8931_v4 = vld [vmem:[%s17317_s5 + $0x750] sm:$0xff]  ;;  %v8930_v37 = vld [vmem:[%s17317_s5 + $0x748] sm:$0xff] }
 0x7dc   : > { %11061 = vmatprep.subr.bf16.mxu0 %v11060_v8  ;;  %11100 = vmatprep.subr.bf16.mxu1 %v11949_v35  ;;  %v11116_v8 = vpack.c.bf16 %v8932_v57, %v8929_v9  ;;  %v11118_v53 = vpack.c.bf16 %v8931_v4, %v8928_v28  ;;  %v11164_v15 = vpack.c.bf16 %v8933_v13, %v8930_v37  ;;  %v8968_v9 = vld [vmem:[%s17317_s5 + $0x878] sm:$0xff]  ;;  %v8967_v4 = vld [vmem:[%s17317_s5 + $0x870] sm:$0xff]  ;;  %v8966_v37 = vld [vmem:[%s17317_s5 + $0x868] sm:$0xff] }
 0x7dd   : > { %v8969_v13 = vld [vmem:[%s17317_s5 + $0x880] sm:$0xff] }
 0x7df   : > { %11063 = vmatpush1.bf16.msra.mxu0 %v11062_v10  ;;  %11102 = vmatpush1.bf16.msra.mxu1 %v11101_v19  ;;  %v8937_v10 = vld [vmem:[%s17317_s5 + $0x780] sm:$0xff]  ;;  %v8939_v19 = vld [vmem:[%s17317_s5 + $0x790] sm:$0xff] }
 0x7e0   : > { %11065 = vmatprep.subr.bf16.mxu0 %v11064_v47  ;;  %11103 = vmatprep.subr.bf16.mxu1 %v11949_v35  ;;  %v11122_v47 = vpack.c.bf16 %v8937_v10, %v8934_v61  ;;  %v8972_v10 = vld [vmem:[%s17317_s5 + $0x898] sm:$0xff] }
 0x7e3   : > { %11067 = vmatpush1.bf16.msra.mxu0 %v11066_v18  ;;  %11105 = vmatpush1.bf16.msra.mxu1 %v11104_v34  ;;  %v8947_v18 = vld [vmem:[%s17317_s5 + $0x7d0] sm:$0xff]  ;;  %v8950_v34 = vld [vmem:[%s17317_s5 + $0x7e8] sm:$0xff] }
 0x7e4   : > { %11069 = vmatprep.subr.bf16.mxu0 %v11068_v59  ;;  %11106 = vmatprep.subr.bf16.mxu1 %v11949_v35  ;;  %v11128_v41 = vpack.c.bf16 %v8950_v34, %v8947_v18  ;;  %v8986_v18 = vld [vmem:[%s17317_s5 + $0x908] sm:$0xff] }
 0x7e7   : > { %11071 = vmatpush1.bf16.msra.mxu0 %v11070_v30  ;;  %11108 = vmatpush1.bf16.msra.mxu1 %v11107_v3  ;;  %v8953_v30 = vld [vmem:[%s17317_s5 + $0x800] sm:$0xff]  ;;  %v8956_v3 = vld [vmem:[%s17317_s5 + $0x818] sm:$0xff] }
 0x7e8   : > { %11073 = vmatprep.subr.bf16.mxu0 %v11072_v44  ;;  %11109 = vmatprep.subr.bf16.mxu1 %v11949_v35  ;;  %v11173_v44 = vpack.c.bf16 %v8951_v39, %v8948_v24  ;;  %v11132_v49 = vpack.c.bf16 %v8956_v3, %v8953_v30  ;;  %v8987_v24 = vld [vmem:[%s17317_s5 + $0x910] sm:$0xff]  ;;  %v8989_v39 = vld [vmem:[%s17317_s5 + $0x920] sm:$0xff]  ;;  %v8992_v30 = vld [vmem:[%s17317_s5 + $0x938] sm:$0xff] }
 0x7e9   : > { %v11156_v16 = vpack.c.bf16 %v8992_v30, %v8989_v39 }
 0x7eb   : > { %11075 = vmatpush1.bf16.msra.mxu0 %v11074_v0  ;;  %11111 = vmatpush1.bf16.msra.mxu1 %v11110_v17  ;;  %v8954_v0 = vld [vmem:[%s17317_s5 + $0x808] sm:$0xff]  ;;  %v8957_v17 = vld [vmem:[%s17317_s5 + $0x820] sm:$0xff] }
 0x7ec   : > { %5619 = vmatprep.subr.mxu0 %v8916_v20  ;;  %5696 = vmatprep.subr.mxu1 %v17368_v56  ;;  %v8959_v20 = vld [vmem:[%s17317_s5 + $0x830] sm:$0xff] }
 0x7ed   : > { %v11136_v27 = vpack.c.bf16 %v8962_v54, %v8959_v20  ;;  %v8995_v54 = vld [vmem:[%s17317_s5 + $0x950] sm:$0xff] }
 0x7ef   : > { %5620 = vmatpush1.msra.mxu0 %v8915_v43  ;;  %5697 = vmatpush1.msra.mxu1 %v8917_v22  ;;  %v11176_v43 = vpack.c.bf16 %v8957_v17, %v8954_v0  ;;  %v8958_v22 = vld [vmem:[%s17317_s5 + $0x828] sm:$0xff]  ;;  %v8993_v0 = vld [vmem:[%s17317_s5 + $0x940] sm:$0xff] }
 0x7f0   : > { %5636 = vmatmul.mubr.f32.vlgmr.msra.gmra.mrb[76].mxu0 %v15455_v1  ;;  %5713 = vmatmul.mubr.f32.vlgmr.msra.gmra.mrb[74].mxu1 %v15455_v1  ;;  %v8935_v1 = vld [vmem:[%s17317_s5 + $0x770] sm:$0xff]  ;;  %v11138_v57 = vpack.c.bf16 %v8961_v42, %v8958_v22  ;;  %v11194_v20 = vpack.c.bf16 %v8993_v0, %v8990_v26  ;;  %v8994_v22 = vld [vmem:[%s17317_s5 + $0x948] sm:$0xff]  ;;  %v9001_v42 = vld [vmem:[%s17317_s5 + $0x960] sm:$0xff] }
 0x7f1   : > { %11113 = vmatprep.subr.bf16.mxu0 %v11112_v55  ;;  %11160 = vmatprep.subr.bf16.mxu1 %v11949_v35  ;;  %v11120_v62 = vpack.c.bf16 %v8938_v7, %v8935_v1  ;;  %v8965_v55 = vld [vmem:[%s17317_s5 + $0x860] sm:$0xff]  ;;  %v8974_v1 = vld [vmem:[%s17317_s5 + $0x8a8] sm:$0xff] }
 0x7f2   : > { %8919 = vmatprep.mubr.msk.f32.mxu0 %vm5166_vm9, %v15492_v63  ;;  %8921 = vmatprep.mubr.msk.f32.mxu1 %vm5166_vm9, %v15492_v63  ;;  %v8936_v63 = vld [vmem:[%s17317_s5 + $0x778] sm:$0xff]  ;;  %v11140_v28 = vpack.c.bf16 %v8968_v9, %v8965_v55  ;;  %v9006_v55 = vld [vmem:[%s17317_s5 + $0x988] sm:$0xff]  ;;  %v9041_v0 = vld [vmem:[%s17317_s5 + $0xaa0] sm:$0xff] }
 0x7f3   : > { %11115 = vmatpush1.bf16.msra.mxu0 %v11114_v5  ;;  %11162 = vmatpush1.bf16.msra.mxu1 %v11161_v14  ;;  %v11167_v51 = vpack.c.bf16 %v8939_v19, %v8936_v63  ;;  %v11179_v5 = vpack.c.bf16 %v8963_v32, %v8960_v11  ;;  %v8964_v14 = vld [vmem:[%s17317_s5 + $0x858] sm:$0xff]  ;;  %v8975_v63 = vld [vmem:[%s17317_s5 + $0x8b0] sm:$0xff]  ;;  %v8977_v19 = vld [vmem:[%s17317_s5 + $0x8c0] sm:$0xff] }
 0x7f4   : > { %5642 = vmatmul.mubr.f32.gmra.mrb[78].mxu0 %v15477_v38  ;;  %5718 = vmatmul.mubr.f32.gmra.mrb[76].mxu1 %v15477_v38  ;;  %v8941_v38 = vld [vmem:[%s17317_s5 + $0x7a0] sm:$0xff]  ;;  %v11142_v7 = vpack.c.bf16 %v8967_v4, %v8964_v14  ;;  %v9004_v11 = vld [vmem:[%s17317_s5 + $0x978] sm:$0xff]  ;;  %v9003_v32 = vld [vmem:[%s17317_s5 + $0x970] sm:$0xff] }
 0x7f5   : > { %11117 = vmatprep.subr.bf16.mxu0 %v11116_v8  ;;  %11163 = vmatprep.subr.bf16.mxu1 %v11949_v35  ;;  %v11124_v48 = vpack.c.bf16 %v8944_v52, %v8941_v38  ;;  %v8971_v8 = vld [vmem:[%s17317_s5 + $0x890] sm:$0xff]  ;;  %v8980_v38 = vld [vmem:[%s17317_s5 + $0x8d8] sm:$0xff]  ;;  %v11198_v14 = vpack.c.bf16 %v9004_v11, %v9001_v42  ;;  %v9038_v26 = vld [vmem:[%s17317_s5 + $0xa88] sm:$0xff] }
 0x7f6   : > { %8997 = vmatprep.mubr.msk.f32.mxu0 %vm5166_vm9, %v15462_v2  ;;  %8999 = vmatprep.mubr.msk.f32.mxu1 %vm5166_vm9, %v15462_v2  ;;  %v8942_v2 = vld [vmem:[%s17317_s5 + $0x7a8] sm:$0xff]  ;;  %v11144_v61 = vpack.c.bf16 %v8974_v1, %v8971_v8  ;;  %v11148_v58 = vpack.c.bf16 %v8980_v38, %v8977_v19  ;;  %v9007_v4 = vld [vmem:[%s17317_s5 + $0x990] sm:$0xff]  ;;  %v9012_v8 = vld [vmem:[%s17317_s5 + $0x9b8] sm:$0xff] }
 0x7f7   : > { %11119 = vmatpush1.bf16.msra.mxu0 %v11118_v53  ;;  %11165 = vmatpush1.bf16.msra.mxu1 %v11164_v15  ;;  %v11170_v59 = vpack.c.bf16 %v8945_v12, %v8942_v2  ;;  %v11182_v53 = vpack.c.bf16 %v8969_v13, %v8966_v37  ;;  %v8970_v15 = vld [vmem:[%s17317_s5 + $0x888] sm:$0xff]  ;;  %v8981_v2 = vld [vmem:[%s17317_s5 + $0x8e0] sm:$0xff]  ;;  %v8983_v12 = vld [vmem:[%s17317_s5 + $0x8f0] sm:$0xff] }
 0x7f8   : > { %11121 = vmatprep.subr.bf16.mxu0 %v11120_v62  ;;  %11166 = vmatprep.subr.bf16.mxu1 %v11949_v35  ;;  %v8973_v62 = vld [vmem:[%s17317_s5 + $0x8a0] sm:$0xff]  ;;  %v11152_v46 = vpack.c.bf16 %v8986_v18, %v8983_v12  ;;  %v9010_v37 = vld [vmem:[%s17317_s5 + $0x9a8] sm:$0xff]  ;;  %v9023_v19 = vld [vmem:[%s17317_s5 + $0xa10] sm:$0xff] }
 0x7f9   : > { %v11146_v52 = vpack.c.bf16 %v8973_v62, %v8970_v15  ;;  %v9009_v13 = vld [vmem:[%s17317_s5 + $0x9a0] sm:$0xff]  ;;  %v9044_v42 = vld [vmem:[%s17317_s5 + $0xab8] sm:$0xff]  ;;  %v9047_v11 = vld [vmem:[%s17317_s5 + $0xad0] sm:$0xff] }
 0x7fa   : > { %v11248_v15 = vpack.c.bf16 %v9012_v8, %v9009_v13 }
 0x7fb   : > { %11123 = vmatpush1.bf16.msra.mxu0 %v11122_v47  ;;  %11168 = vmatpush1.bf16.msra.mxu1 %v11167_v51  ;;  %v11185_v47 = vpack.c.bf16 %v8975_v63, %v8972_v10  ;;  %v8976_v51 = vld [vmem:[%s17317_s5 + $0x8b8] sm:$0xff]  ;;  %v9018_v63 = vld [vmem:[%s17317_s5 + $0x9e8] sm:$0xff] }
 0x7fc   : > { %11125 = vmatprep.subr.bf16.mxu0 %v11124_v48  ;;  %11169 = vmatprep.subr.bf16.mxu1 %v11949_v35  ;;  %v8979_v48 = vld [vmem:[%s17317_s5 + $0x8d0] sm:$0xff]  ;;  %v9016_v10 = vld [vmem:[%s17317_s5 + $0x9d8] sm:$0xff] }
 0x7fd   : > { %v11150_v34 = vpack.c.bf16 %v8979_v48, %v8976_v51  ;;  %v9024_v48 = vld [vmem:[%s17317_s5 + $0xa18] sm:$0xff] }
 0x7ff   : > { %11127 = vmatpush1.bf16.msra.mxu0 %v11126_v23  ;;  %11171 = vmatpush1.bf16.msra.mxu1 %v11170_v59  ;;  %v11188_v23 = vpack.c.bf16 %v8981_v2, %v8978_v50  ;;  %v8982_v59 = vld [vmem:[%s17317_s5 + $0x8e8] sm:$0xff]  ;;  %v9029_v2 = vld [vmem:[%s17317_s5 + $0xa40] sm:$0xff] }
 0x800   : > { %11129 = vmatprep.subr.bf16.mxu0 %v11128_v41  ;;  %11172 = vmatprep.subr.bf16.mxu1 %v11949_v35  ;;  %v8985_v41 = vld [vmem:[%s17317_s5 + $0x900] sm:$0xff]  ;;  %v9026_v50 = vld [vmem:[%s17317_s5 + $0xa28] sm:$0xff] }
 0x801   : > { %v11154_v3 = vpack.c.bf16 %v8985_v41, %v8982_v59  ;;  %v9028_v59 = vld [vmem:[%s17317_s5 + $0xa38] sm:$0xff]  ;;  %v9030_v41 = vld [vmem:[%s17317_s5 + $0xa48] sm:$0xff] }
 0x803   : > { %11131 = vmatpush1.bf16.msra.mxu0 %v11130_v29  ;;  %11174 = vmatpush1.bf16.msra.mxu1 %v11173_v44  ;;  %v11191_v29 = vpack.c.bf16 %v8987_v24, %v8984_v31  ;;  %v8988_v44 = vld [vmem:[%s17317_s5 + $0x918] sm:$0xff]  ;;  %v9035_v24 = vld [vmem:[%s17317_s5 + $0xa70] sm:$0xff] }
 0x804   : > { %11133 = vmatprep.subr.bf16.mxu0 %v11132_v49  ;;  %11175 = vmatprep.subr.bf16.mxu1 %v11949_v35  ;;  %v8991_v49 = vld [vmem:[%s17317_s5 + $0x930] sm:$0xff]  ;;  %v9032_v31 = vld [vmem:[%s17317_s5 + $0xa58] sm:$0xff] }
 0x805   : > { %v11158_v17 = vpack.c.bf16 %v8991_v49, %v8988_v44  ;;  %v9034_v44 = vld [vmem:[%s17317_s5 + $0xa68] sm:$0xff]  ;;  %v9036_v49 = vld [vmem:[%s17317_s5 + $0xa78] sm:$0xff] }
 0x807   : > { %11135 = vmatpush1.bf16.msra.mxu0 %v11134_v60  ;;  %11177 = vmatpush1.bf16.msra.mxu1 %v11176_v43  ;;  %v9002_v60 = vld [vmem:[%s17317_s5 + $0x968] sm:$0xff]  ;;  %v9005_v43 = vld [vmem:[%s17317_s5 + $0x980] sm:$0xff] }
 0x808   : > { %11137 = vmatprep.subr.bf16.mxu0 %v11136_v27  ;;  %11178 = vmatprep.subr.bf16.mxu1 %v11949_v35  ;;  %v8996_v27 = vld [vmem:[%s17317_s5 + $0x958] sm:$0xff]  ;;  %v11196_v9 = vpack.c.bf16 %v9005_v43, %v9002_v60  ;;  %v11220_v60 = vpack.c.bf16 %v9041_v0, %v9038_v26 }
 0x809   : > { %v9040_v43 = vld [vmem:[%s17317_s5 + $0xa98] sm:$0xff] }
 0x80b   : > { %11139 = vmatpush1.bf16.msra.mxu0 %v11138_v57  ;;  %11180 = vmatpush1.bf16.msra.mxu1 %v11179_v5  ;;  %v9008_v57 = vld [vmem:[%s17317_s5 + $0x998] sm:$0xff]  ;;  %v9011_v5 = vld [vmem:[%s17317_s5 + $0x9b0] sm:$0xff] }
 0x80c   : > { %11141 = vmatprep.subr.bf16.mxu0 %v11140_v28  ;;  %11181 = vmatprep.subr.bf16.mxu1 %v11949_v35  ;;  %v11245_v28 = vpack.c.bf16 %v9006_v55, %v9003_v32  ;;  %v11200_v1 = vpack.c.bf16 %v9011_v5, %v9008_v57  ;;  %v11224_v57 = vpack.c.bf16 %v9047_v11, %v9044_v42  ;;  %v9046_v5 = vld [vmem:[%s17317_s5 + $0xac8] sm:$0xff]  ;;  %v6254_v11 = vld [vmem:[%s17319_s7 + $0x10] sm:$0xff] }
 0x80f   : > { %11143 = vmatpush1.bf16.msra.mxu0 %v11142_v7  ;;  %11183 = vmatpush1.bf16.msra.mxu1 %v11182_v53  ;;  %v9017_v7 = vld [vmem:[%s17317_s5 + $0x9e0] sm:$0xff]  ;;  %v11202_v53 = vpack.c.bf16 %v9010_v37, %v9007_v4  ;;  %v9050_v4 = vld [vmem:[%s17317_s5 + $0xae8] sm:$0xff] }
 0x810   : > { %11145 = vmatprep.subr.bf16.mxu0 %v11144_v61  ;;  %11184 = vmatprep.subr.bf16.mxu1 %v11949_v35  ;;  %v9013_v61 = vld [vmem:[%s17317_s5 + $0x9c0] sm:$0xff] }
 0x811   : > { %v11206_v38 = vpack.c.bf16 %v9016_v10, %v9013_v61  ;;  %v9053_v37 = vld [vmem:[%s17317_s5 + $0xb00] sm:$0xff]  ;;  %v9056_v61 = vld [vmem:[%s17317_s5 + $0xb18] sm:$0xff] }
 0x813   : > { %11147 = vmatpush1.bf16.msra.mxu0 %v11146_v52  ;;  %11186 = vmatpush1.bf16.msra.mxu1 %v11185_v47  ;;  %v9019_v47 = vld [vmem:[%s17317_s5 + $0x9f0] sm:$0xff] }
 0x814   : > { %11149 = vmatprep.subr.bf16.mxu0 %v11148_v58  ;;  %11187 = vmatprep.subr.bf16.mxu1 %v11949_v35  ;;  %v9022_v58 = vld [vmem:[%s17317_s5 + $0xa08] sm:$0xff] }
 0x815   : > { %v11210_v12 = vpack.c.bf16 %v9022_v58, %v9019_v47  ;;  %v9062_v47 = vld [vmem:[%s17317_s5 + $0xb48] sm:$0xff] }
 0x817   : > { %11151 = vmatpush1.bf16.msra.mxu0 %v11150_v34  ;;  %11189 = vmatpush1.bf16.msra.mxu1 %v11188_v23  ;;  %v9025_v34 = vld [vmem:[%s17317_s5 + $0xa20] sm:$0xff]  ;;  %v11212_v23 = vpack.c.bf16 %v9029_v2, %v9026_v50  ;;  %v9064_v2 = vld [vmem:[%s17317_s5 + $0xb58] sm:$0xff] }
 0x818   : > { %11153 = vmatprep.subr.bf16.mxu0 %v11152_v46  ;;  %11190 = vmatprep.subr.bf16.mxu1 %v11949_v35  ;;  %v9027_v46 = vld [vmem:[%s17317_s5 + $0xa30] sm:$0xff]  ;;  %v11214_v39 = vpack.c.bf16 %v9028_v59, %v9025_v34  ;;  %v9068_v34 = vld [vmem:[%s17317_s5 + $0xb78] sm:$0xff] }
 0x819   : > { %v11257_v30 = vpack.c.bf16 %v9030_v41, %v9027_v46  ;;  %v9067_v41 = vld [vmem:[%s17317_s5 + $0xb70] sm:$0xff] }
 0x81b   : > { %11155 = vmatpush1.bf16.msra.mxu0 %v11154_v3  ;;  %11192 = vmatpush1.bf16.msra.mxu1 %v11191_v29  ;;  %v9031_v3 = vld [vmem:[%s17317_s5 + $0xa50] sm:$0xff]  ;;  %v11216_v29 = vpack.c.bf16 %v9035_v24, %v9032_v31  ;;  %v9070_v24 = vld [vmem:[%s17317_s5 + $0xb88] sm:$0xff] }
 0x81c   : > { %11157 = vmatprep.subr.bf16.mxu0 %v11156_v16  ;;  %11193 = vmatprep.subr.bf16.mxu1 %v11949_v35  ;;  %v9033_v16 = vld [vmem:[%s17317_s5 + $0xa60] sm:$0xff] }
 0x81f   : > { %11159 = vmatpush1.bf16.msra.mxu0 %v11158_v17  ;;  %11195 = vmatpush1.bf16.msra.mxu1 %v11194_v20  ;;  %v11218_v17 = vpack.c.bf16 %v9034_v44, %v9031_v3  ;;  %v11260_v20 = vpack.c.bf16 %v9036_v49, %v9033_v16  ;;  %v11242_v3 = vpack.c.bf16 %v9070_v24, %v9067_v41  ;;  %v9074_v44 = vld [vmem:[%s17317_s5 + $0xba8] sm:$0xff]  ;;  %v9073_v16 = vld [vmem:[%s17317_s5 + $0xba0] sm:$0xff]  ;;  %v9075_v49 = vld [vmem:[%s17317_s5 + $0xbb0] sm:$0xff] }
 0x820   : > { %5869 = vmatprep.subr.mxu0 %v8995_v54  ;;  %5946 = vmatprep.subr.mxu1 %v17368_v56  ;;  %v9037_v54 = vld [vmem:[%s17317_s5 + $0xa80] sm:$0xff] }
 0x821   : > { %v11222_v32 = vpack.c.bf16 %v9040_v43, %v9037_v54  ;;  %v6268_v54 = vld [vmem:[%s17319_s7 + $0x80] sm:$0xff]  ;;  %v6270_v43 = vld [vmem:[%s17319_s7 + $0x90] sm:$0xff] }
 0x822   : > { %v6264_v41 = vld [vmem:[%s17319_s7 + $0x60] sm:$0xff] }
 0x823   : > { %5870 = vmatpush1.msra.mxu0 %v8994_v22  ;;  %5947 = vmatpush1.msra.mxu1 %v8996_v27  ;;  %v9039_v22 = vld [vmem:[%s17317_s5 + $0xa90] sm:$0xff]  ;;  %v9042_v27 = vld [vmem:[%s17317_s5 + $0xaa8] sm:$0xff] }
 0x824   : > { %5886 = vmatmul.mubr.f32.vlgmr.msra.gmra.mrb[76].mxu0 %v15505_v45  ;;  %5963 = vmatmul.mubr.f32.vlgmr.msra.gmra.mrb[78].mxu1 %v15505_v45  ;;  %v9014_v45 = vld [vmem:[%s17317_s5 + $0x9c8] sm:$0xff]  ;;  %v11263_v55 = vpack.c.bf16 %v9042_v27, %v9039_v22  ;;  %v6271_v22 = vld [vmem:[%s17319_s7 + $0x98] sm:$0xff] }
 0x825   : > { %11197 = vmatprep.subr.bf16.mxu0 %v11196_v9  ;;  %11244 = vmatprep.subr.bf16.mxu1 %v11949_v35  ;;  %v11204_v62 = vpack.c.bf16 %v9017_v7, %v9014_v45  ;;  %v9043_v9 = vld [vmem:[%s17317_s5 + $0xab0] sm:$0xff]  ;;  %v11228_v45 = vpack.c.bf16 %v9053_v37, %v9050_v4  ;;  %v9052_v7 = vld [vmem:[%s17317_s5 + $0xaf8] sm:$0xff]  ;;  %v11284_v42 = vpack.c.bf16 %v6271_v22, %v6270_v43 }
 0x826   : > { %8998 = vmatprep.mubr.msk.f32.mxu0 %vm5166_vm9, %v15508_v25  ;;  %9000 = vmatprep.mubr.msk.f32.mxu1 %vm5166_vm9, %v15508_v25  ;;  %v9015_v25 = vld [vmem:[%s17317_s5 + $0x9d0] sm:$0xff]  ;;  %v11226_v13 = vpack.c.bf16 %v9046_v5, %v9043_v9  ;;  %v6273_v9 = vld [vmem:[%s17319_s7 + $0xa8] sm:$0xff]  ;;  %v6275_v37 = vld [vmem:[%s17319_s7 + $0xb8] sm:$0xff] }
 0x827   : > { %11199 = vmatpush1.bf16.msra.mxu0 %v11198_v14  ;;  %11246 = vmatpush1.bf16.msra.mxu1 %v11245_v28  ;;  %v11251_v52 = vpack.c.bf16 %v9018_v63, %v9015_v25  ;;  %v9045_v14 = vld [vmem:[%s17317_s5 + $0xac0] sm:$0xff]  ;;  %v9048_v28 = vld [vmem:[%s17317_s5 + $0xad8] sm:$0xff]  ;;  %v9055_v63 = vld [vmem:[%s17317_s5 + $0xb10] sm:$0xff] }
 0x828   : > { %5892 = vmatmul.mubr.f32.gmra.mrb[78].mxu0 %v15513_v40  ;;  %5968 = vmatmul.mubr.f32.gmra.mrb[80].mxu1 %v15513_v40  ;;  %v9020_v40 = vld [vmem:[%s17317_s5 + $0x9f8] sm:$0xff]  ;;  %v11266_v8 = vpack.c.bf16 %v9048_v28, %v9045_v14  ;;  %v6256_v14 = vld [vmem:[%s17319_s7 + $0x20] sm:$0xff]  ;;  %v6257_v28 = vld [vmem:[%s17319_s7 + $0x28] sm:$0xff] }
 0x829   : > { %11201 = vmatprep.subr.bf16.mxu0 %v11200_v1  ;;  %11247 = vmatprep.subr.bf16.mxu1 %v11949_v35  ;;  %v11208_v51 = vpack.c.bf16 %v9023_v19, %v9020_v40  ;;  %v9049_v1 = vld [vmem:[%s17317_s5 + $0xae0] sm:$0xff]  ;;  %v9058_v19 = vld [vmem:[%s17317_s5 + $0xb28] sm:$0xff]  ;;  %v6274_v4 = vld [vmem:[%s17319_s7 + $0xb0] sm:$0xff] }
 0x82a   : > { %9076 = vmatprep.mubr.msk.f32.mxu0 %vm5166_vm9, %v15516_v21  ;;  %9078 = vmatprep.mubr.msk.f32.mxu1 %vm5166_vm9, %v15516_v21  ;;  %v9021_v21 = vld [vmem:[%s17317_s5 + $0xa00] sm:$0xff]  ;;  %v11230_v10 = vpack.c.bf16 %v9052_v7, %v9049_v1  ;;  %v11234_v58 = vpack.c.bf16 %v9058_v19, %v9055_v63  ;;  %v11290_v1 = vpack.c.bf16 %v6257_v28, %v6256_v14 }
 0x82b   : > { %11203 = vmatpush1.bf16.msra.mxu0 %v11202_v53  ;;  %11249 = vmatpush1.bf16.msra.mxu1 %v11248_v15  ;;  %v11254_v18 = vpack.c.bf16 %v9024_v48, %v9021_v21  ;;  %v9051_v53 = vld [vmem:[%s17317_s5 + $0xaf0] sm:$0xff]  ;;  %v9054_v15 = vld [vmem:[%s17317_s5 + $0xb08] sm:$0xff]  ;;  %v9061_v48 = vld [vmem:[%s17317_s5 + $0xb40] sm:$0xff] }
 0x82c   : > { %11205 = vmatprep.subr.bf16.mxu0 %v11204_v62  ;;  %11250 = vmatprep.subr.bf16.mxu1 %v11949_v35  ;;  %v9059_v62 = vld [vmem:[%s17317_s5 + $0xb30] sm:$0xff]  ;;  %v11269_v25 = vpack.c.bf16 %v9054_v15, %v9051_v53  ;;  %v11238_v59 = vpack.c.bf16 %v9064_v2, %v9061_v48  ;;  %v11292_v53 = vpack.c.bf16 %v6275_v37, %v6274_v4  ;;  %v6259_v15 = vld [vmem:[%s17319_s7 + $0x38] sm:$0xff]  ;;  %v6280_v2 = vld [vmem:[%s17319_s7 + $0xe0] sm:$0xff] }
 0x82d   : > { %v11232_v40 = vpack.c.bf16 %v9059_v62, %v9056_v61  ;;  %v6286_v61 = vld [vmem:[%s17319_s7 + $0x110] sm:$0xff]  ;;  %v6287_v62 = vld [vmem:[%s17319_s7 + $0x118] sm:$0xff]  ;;  %v6229_v28 = vld [vmem:[%s17318_s6] sm:$0x7] }
 0x82e   : > { %v11316_v63 = vpack.c.bf16 %v6287_v62, %v6286_v61  ;;  %v6262_v48 = vld [vmem:[%s17319_s7 + $0x50] sm:$0xff]  ;;  %v17381_v4 = vld [vmem:[#allocation9_spill] sm:$0xff] }
 0x82f   : > { %11207 = vmatpush1.bf16.msra.mxu0 %v11206_v38  ;;  %11252 = vmatpush1.bf16.msra.mxu1 %v11251_v52  ;;  %v9057_v38 = vld [vmem:[%s17317_s5 + $0xb20] sm:$0xff]  ;;  %v9060_v52 = vld [vmem:[%s17317_s5 + $0xb38] sm:$0xff]  ;;  %v17382_v37 = vsub.s32 1, %v17381_v4 }
 0x830   : > { %11209 = vmatprep.subr.bf16.mxu0 %v11208_v51  ;;  %11253 = vmatprep.subr.bf16.mxu1 %v11949_v35  ;;  %v9065_v51 = vld [vmem:[%s17317_s5 + $0xb60] sm:$0xff]  ;;  %v11272_v21 = vpack.c.bf16 %v9060_v52, %v9057_v38  ;;  %v6261_v52 = vld [vmem:[%s17319_s7 + $0x48] sm:$0xff] }
 0x831   : > { %v11236_v50 = vpack.c.bf16 %v9065_v51, %v9062_v47  ;;  %v6260_v38 = vld [vmem:[%s17319_s7 + $0x40] sm:$0xff]  ;;  %v6278_v47 = vld [vmem:[%s17319_s7 + $0xd0] sm:$0xff]  ;;  %v6279_v51 = vld [vmem:[%s17319_s7 + $0xd8] sm:$0xff] }
 0x833   : > { %11211 = vmatpush1.bf16.msra.mxu0 %v11210_v12  ;;  %11255 = vmatpush1.bf16.msra.mxu1 %v11254_v18  ;;  %v9063_v12 = vld [vmem:[%s17317_s5 + $0xb50] sm:$0xff]  ;;  %v9066_v18 = vld [vmem:[%s17317_s5 + $0xb68] sm:$0xff] }
 0x834   : > { %11213 = vmatprep.subr.bf16.mxu0 %v11212_v23  ;;  %11256 = vmatprep.subr.bf16.mxu1 %v11949_v35  ;;  %v9071_v23 = vld [vmem:[%s17317_s5 + $0xb90] sm:$0xff]  ;;  %v11275_v46 = vpack.c.bf16 %v9066_v18, %v9063_v12  ;;  %v6281_v12 = vld [vmem:[%s17319_s7 + $0xe8] sm:$0xff] }
 0x835   : > { %v11240_v31 = vpack.c.bf16 %v9071_v23, %v9068_v34 }
 0x837   : > { %11215 = vmatpush1.bf16.msra.mxu0 %v11214_v39  ;;  %11258 = vmatpush1.bf16.msra.mxu1 %v11257_v30  ;;  %v9069_v39 = vld [vmem:[%s17317_s5 + $0xb80] sm:$0xff]  ;;  %v9072_v30 = vld [vmem:[%s17317_s5 + $0xb98] sm:$0xff] }
 0x838   : > { %11217 = vmatprep.subr.bf16.mxu0 %v11216_v29  ;;  %11259 = vmatprep.subr.bf16.mxu1 %v11949_v35  ;;  %v11278_v29 = vpack.c.bf16 %v9072_v30, %v9069_v39 }
 0x83b   : > { %11219 = vmatpush1.bf16.msra.mxu0 %v11218_v17  ;;  %11261 = vmatpush1.bf16.msra.mxu1 %v11260_v20 }
 0x83c   : > { %11221 = vmatprep.subr.bf16.mxu0 %v11220_v60  ;;  %11262 = vmatprep.subr.bf16.mxu1 %v11949_v35 }
 0x83f   : > { %11223 = vmatpush1.bf16.msra.mxu0 %v11222_v32  ;;  %11264 = vmatpush1.bf16.msra.mxu1 %v11263_v55  ;;  %v6255_v32 = vld [vmem:[%s17319_s7 + $0x18] sm:$0xff]  ;;  %v6272_v55 = vld [vmem:[%s17319_s7 + $0xa0] sm:$0xff] }
 0x840   : > { %11225 = vmatprep.subr.bf16.mxu0 %v11224_v57  ;;  %11265 = vmatprep.subr.bf16.mxu1 %v11949_v35  ;;  %v11286_v57 = vpack.c.bf16 %v6255_v32, %v6254_v11  ;;  %v11288_v5 = vpack.c.bf16 %v6273_v9, %v6272_v55 }
 0x843   : > { %11227 = vmatpush1.bf16.msra.mxu0 %v11226_v13  ;;  %11267 = vmatpush1.bf16.msra.mxu1 %v11266_v8  ;;  %v6284_v13 = vld [vmem:[%s17319_s7 + $0x100] sm:$0xff]  ;;  %v6285_v8 = vld [vmem:[%s17319_s7 + $0x108] sm:$0xff] }
 0x844   : > { %11229 = vmatprep.subr.bf16.mxu0 %v11228_v45  ;;  %11268 = vmatprep.subr.bf16.mxu1 %v11949_v35  ;;  %v6258_v45 = vld [vmem:[%s17319_s7 + $0x30] sm:$0xff]  ;;  %v11312_v7 = vpack.c.bf16 %v6285_v8, %v6284_v13  ;;  %v6238_v13 = vrot.slane %v6229_v28, %v17382_v37  ;;  %v17383_v8 = vsub.s32 0, %v17381_v4  ;;  %v9124_v37 = vld [vmem:[%s17319_s7 + $0x268] sm:$0xff] }
 0x847   : > { %11231 = vmatpush1.bf16.msra.mxu0 %v11230_v10  ;;  %11270 = vmatpush1.bf16.msra.mxu1 %v11269_v25  ;;  %v6276_v10 = vld [vmem:[%s17319_s7 + $0xc0] sm:$0xff]  ;;  %v6277_v25 = vld [vmem:[%s17319_s7 + $0xc8] sm:$0xff] }
 0x848   : > { %11233 = vmatprep.subr.bf16.mxu0 %v11232_v40  ;;  %11271 = vmatprep.subr.bf16.mxu1 %v11949_v35  ;;  %v11294_v40 = vpack.c.bf16 %v6259_v15, %v6258_v45  ;;  %v11296_v19 = vpack.c.bf16 %v6277_v25, %v6276_v10  ;;  %v17384_v45 = vsub.s32 2, %v17381_v4  ;;  %v9123_v4 = vld [vmem:[%s17319_s7 + $0x260] sm:$0xff] }
 0x84b   : > { %11235 = vmatpush1.bf16.msra.mxu0 %v11234_v58  ;;  %11273 = vmatpush1.bf16.msra.mxu1 %v11272_v21  ;;  %v11298_v58 = vpack.c.bf16 %v6261_v52, %v6260_v38  ;;  %v11300_v21 = vpack.c.bf16 %v6279_v51, %v6278_v47 }
 0x84c   : > { %11237 = vmatprep.subr.bf16.mxu0 %v11236_v50  ;;  %11274 = vmatprep.subr.bf16.mxu1 %v11949_v35  ;;  %v6263_v50 = vld [vmem:[%s17319_s7 + $0x58] sm:$0xff] }
 0x84f   : > { %11239 = vmatpush1.bf16.msra.mxu0 %v11238_v59  ;;  %11276 = vmatpush1.bf16.msra.mxu1 %v11275_v46  ;;  %v11302_v59 = vpack.c.bf16 %v6263_v50, %v6262_v48  ;;  %v11304_v46 = vpack.c.bf16 %v6281_v12, %v6280_v2 }
 0x850   : > { %11241 = vmatprep.subr.bf16.mxu0 %v11240_v31  ;;  %11277 = vmatprep.subr.bf16.mxu1 %v11949_v35  ;;  %v6265_v31 = vld [vmem:[%s17319_s7 + $0x68] sm:$0xff] }
 0x853   : > { %11243 = vmatpush1.bf16.msra.mxu0 %v11242_v3  ;;  %11279 = vmatpush1.bf16.msra.mxu1 %v11278_v29  ;;  %v11306_v3 = vpack.c.bf16 %v6265_v31, %v6264_v41  ;;  %v6282_v29 = vld [vmem:[%s17319_s7 + $0xf0] sm:$0xff]  ;;  %v9103_v31 = vld [vmem:[%s17319_s7 + $0x1c0] sm:$0xff] }
 0x854   : > { %6119 = vmatprep.subr.mxu0 %v9074_v44  ;;  %6196 = vmatprep.subr.mxu1 %v17368_v56  ;;  %v6283_v44 = vld [vmem:[%s17319_s7 + $0xf8] sm:$0xff] }
 0x857   : > { %6120 = vmatpush1.msra.mxu0 %v9073_v16  ;;  %6197 = vmatpush1.msra.mxu1 %v9075_v49  ;;  %v11308_v16 = vpack.c.bf16 %v6283_v44, %v6282_v29  ;;  %v6288_v49 = vld [vmem:[%s17319_s7 + $0x120] sm:$0xff]  ;;  %v9088_v29 = vld [vmem:[%s17319_s7 + $0x148] sm:$0xff] }
 0x858   : > { %6136 = vmatmul.mubr.f32.vlgmr.msra.gmra.mrb[76].mxu0 %v15522_v33  ;;  %6213 = vmatmul.mubr.f32.vlgmr.msra.gmra.mrb[82].mxu1 %v15522_v33  ;;  %v6269_v33 = vld [vmem:[%s17319_s7 + $0x88] sm:$0xff] }
 0x859   : > { %9077 = vmatprep.mubr.msk.f32.mxu0 %vm5166_vm9, %v15539_v6  ;;  %9079 = vmatprep.mubr.msk.f32.mxu1 %vm5166_vm9, %v15539_v6  ;;  %v6252_v6 = vld [vmem:[%s17319_s7] sm:$0xff]  ;;  %v11280_v60 = vpack.c.bf16 %v6269_v33, %v6268_v54  ;;  %v6290_v33 = vld [vmem:[%s17319_s7 + $0x130] sm:$0xff] }
 0x85a   : > { %11313 = vmatprep.subr.bf16.mxu1 %v11312_v7 }
 0x85b   : > { %11281 = vmatprep.subr.bf16.mxu0 %v11280_v60  ;;  %11315 = vmatpush3.bf16.msra.mxu1 %v11312_v7  ;;  %v6242_v7 = vrot.slane %v6229_v28, %v17384_v45  ;;  %v9093_v45 = vld [vmem:[%s17319_s7 + $0x170] sm:$0xff] }
 0x85c   : > { %6142 = vmatmul.mubr.f32.gmra.mrb[78].mxu0 %v15549_v36  ;;  %6218 = vmatmul.mubr.f32.gmra.mrb[84].mxu1 %v15549_v36  ;;  %v6253_v36 = vld [vmem:[%s17319_s7 + $0x8] sm:$0xff] }
 0x85d   : > { %v5314_v26 = vpop.f32.mrb[66].mxu1  ;;  %v11282_v27 = vpack.c.bf16 %v6253_v36, %v6252_v6  ;;  %11317 = vmatprep.subr.bf16.mxu1 %v11316_v63  ;;  %v6291_v6 = vld [vmem:[%s17319_s7 + $0x138] sm:$0xff] }
 0x85e   : > { %v5316_v0 = vpop.f32.mrb[67].mxu1  ;;  %v11324_v60 = vpack.c.bf16 %v6291_v6, %v6290_v33  ;;  %v9089_v33 = vld [vmem:[%s17319_s7 + $0x150] sm:$0xff]  ;;  %v9090_v6 = vld [vmem:[%s17319_s7 + $0x158] sm:$0xff] }
 0x85f   : > { %11283 = vmatpush3.bf16.msra.mxu0 %v11282_v27  ;;  %11319 = vmatpush3.bf16.msra.mxu1 %v11316_v63  ;;  %v6266_v0 = vld [vmem:[%s17319_s7 + $0x70] sm:$0xff] }
 0x860   : > { %11285 = vmatprep.subr.bf16.mxu0 %v11284_v42 }
 0x861   : > { %v16466_v17 = vpop.f32.mrb[68].mxu1 }
 0x862   : > { %v5321_v20 = vpop.f32.mrb[69].mxu1 }
 0x863   : > { %11287 = vmatpush3.bf16.msra.mxu0 %v11286_v57  ;;  %v6267_v20 = vld [vmem:[%s17319_s7 + $0x78] sm:$0xff] }
 0x864   : > { %11289 = vmatprep.subr.bf16.mxu0 %v11288_v5  ;;  %v11310_v54 = vpack.c.bf16 %v6267_v20, %v6266_v0  ;;  %v9120_v0 = vld [vmem:[%s17319_s7 + $0x248] sm:$0xff] }
 0x865   : > { %v16656_v20 = vld [vmem:[%s17320_s8 + $0x8] sm:$0x1f] }
 0x867   : > { %11291 = vmatpush3.bf16.msra.mxu0 %v11290_v1  ;;  %v6234_v1 = vrot.slane %v6229_v28, %v17383_v8  ;;  %v9110_v28 = vld [vmem:[%s17319_s7 + $0x1f8] sm:$0xff] }
 0x868   : > { %11293 = vmatprep.subr.bf16.mxu0 %v11292_v53 }
 0x86b   : > { %11295 = vmatpush3.bf16.msra.mxu0 %v11294_v40 }
 0x86c   : > { %11297 = vmatprep.subr.bf16.mxu0 %v11296_v19 }
 0x86f   : > { %11299 = vmatpush3.bf16.msra.mxu0 %v11298_v58 }
 0x870   : > { %11301 = vmatprep.subr.bf16.mxu0 %v11300_v21 }
 0x873   : > { %11303 = vmatpush3.bf16.msra.mxu0 %v11302_v59 }
 0x874   : > { %11305 = vmatprep.subr.bf16.mxu0 %v11304_v46 }
 0x877   : > { %11307 = vmatpush3.bf16.msra.mxu0 %v11306_v3  ;;  %v9087_v3 = vld [vmem:[%s17319_s7 + $0x140] sm:$0xff] }
 0x878   : > { %11309 = vmatprep.subr.bf16.mxu0 %v11308_v16  ;;  %v9105_v16 = vld [vmem:[%s17319_s7 + $0x1d0] sm:$0xff] }
 0x87b   : > { %11311 = vmatpush3.bf16.msra.mxu0 %v11310_v54  ;;  %v11339_v54 = vpack.c.bf16 %v9088_v29, %v9087_v3 }
 0x87c   : > { %11331 = vmatprep.subr.bf16.mxu0 %v11949_v35 }
 0x88f   : > { %v5470_v18 = vpop.f32.mrb[70].mxu1 }
 0x890   : > { %v5471_v34 = vadd.f32 %v5470_v18, %v5314_v26  ;;  %v5472_v23 = vpop.f32.mrb[71].mxu1  ;;  %v6289_v26 = vld [vmem:[%s17319_s7 + $0x128] sm:$0xff] }
 0x893   : > { %v5475_v24 = vpop.f32.mrb[72].mxu1 }
 0x894   : > { %v5476_v39 = vadd.f32 %v5475_v24, %v16466_v17  ;;  %v5477_v30 = vpop.f32.mrb[73].mxu1  ;;  %v11320_v17 = vpack.c.bf16 %v6289_v26, %v6288_v49  ;;  %v9104_v24 = vld [vmem:[%s17319_s7 + $0x1c8] sm:$0xff]  ;;  %v9106_v49 = vld [vmem:[%s17319_s7 + $0x1d8] sm:$0xff]  ;;  %v9119_v26 = vld [vmem:[%s17319_s7 + $0x240] sm:$0xff] }
 0x895   : > { %v11337_v30 = vpack.c.bf16 %v9104_v24, %v9103_v31  ;;  %v9099_v31 = vld [vmem:[%s17319_s7 + $0x1a0] sm:$0xff]  ;;  %v9100_v24 = vld [vmem:[%s17319_s7 + $0x1a8] sm:$0xff] }
 0x896   : > { %11321 = vmatprep.subr.bf16.mxu1 %v11320_v17  ;;  %v11363_v3 = vpack.c.bf16 %v9100_v24, %v9099_v31 }
 0x897   : > { %11323 = vmatpush3.bf16.msra.mxu1 %v11320_v17  ;;  %v16651_v17 = vld [vmem:[%s17320_s8] sm:$0x1f] }
 0x898   : > { %11325 = vmatprep.subr.bf16.mxu1 %v11324_v60 }
 0x89b   : > { %11327 = vmatpush3.bf16.msra.mxu1 %v11324_v60  ;;  %v11341_v60 = vpack.c.bf16 %v9106_v49, %v9105_v16  ;;  %v9102_v16 = vld [vmem:[%s17319_s7 + $0x1b8] sm:$0xff]  ;;  %v9164_v49 = vld [vmem:[%s17319_s7 + $0x380] sm:$0xff] }
 0x89c   : > { %11328 = vmatprep.subr.bf16.mxu1 %v11949_v35 }
 0x8c3   : > { %v5714_v36 = vpop.f32.mrb[74].mxu1 }
 0x8c4   : > { %v5725_v43 = vadd.f32 %v5714_v36, %v5471_v34  ;;  %v5716_v22 = vpop.f32.mrb[75].mxu1  ;;  %v11369_v36 = vpack.c.bf16 %v9120_v0, %v9119_v26  ;;  %v9165_v26 = vld [vmem:[%s17319_s7 + $0x388] sm:$0xff] }
 0x8c5   : > { %v9108_v22 = vld [vmem:[%s17319_s7 + $0x1e8] sm:$0xff] }
 0x8c7   : > { %v5719_v27 = vpop.f32.mrb[76].mxu1 }
 0x8c8   : > { %v5728_v42 = vadd.f32 %v5719_v27, %v5476_v39  ;;  %v5721_v11 = vpop.f32.mrb[77].mxu1  ;;  %v9121_v27 = vld [vmem:[%s17319_s7 + $0x250] sm:$0xff] }
 0x8c9   : > { %v16684_v11 = vld [vmem:[%s17320_s8 + $0x10] sm:$0x1f] }
 0x8f7   : > { %v5964_v32 = vpop.f32.mrb[78].mxu1 }
 0x8f8   : > { %v5975_v55 = vadd.f32 %v5964_v32, %v5725_v43  ;;  %v5966_v9 = vpop.f32.mrb[79].mxu1  ;;  %v9107_v43 = vld [vmem:[%s17319_s7 + $0x1e0] sm:$0xff]  ;;  %v11343_v32 = vpack.c.bf16 %v9090_v6, %v9089_v33  ;;  %v9166_v33 = vld [vmem:[%s17319_s7 + $0x390] sm:$0xff]  ;;  %v9167_v6 = vld [vmem:[%s17319_s7 + $0x398] sm:$0xff] }
 0x8f9   : > { %v9091_v9 = vld [vmem:[%s17319_s7 + $0x160] sm:$0xff] }
 0x8fb   : > { %v5969_v57 = vpop.f32.mrb[80].mxu1 }
 0x8fc   : > { %v5978_v5 = vadd.f32 %v5969_v57, %v5728_v42  ;;  %v5971_v14 = vpop.f32.mrb[81].mxu1  ;;  %v9122_v42 = vld [vmem:[%s17319_s7 + $0x258] sm:$0xff]  ;;  %v9092_v57 = vld [vmem:[%s17319_s7 + $0x168] sm:$0xff] }
 0x8fd   : > { %v11373_v14 = vpack.c.bf16 %v9122_v42, %v9121_v27  ;;  %v9170_v27 = vld [vmem:[%s17319_s7 + $0x3b0] sm:$0xff]  ;;  %v9171_v42 = vld [vmem:[%s17319_s7 + $0x3b8] sm:$0xff] }
 0x92b   : > { %v6137_v53 = vpop.f32.mrb[76].mxu0  ;;  %v6214_v15 = vpop.f32.mrb[82].mxu1 }
 0x92c   : > { %v6225_v61 = vadd.f32 %v6214_v15, %v5975_v55  ;;  %v6139_v62 = vpop.f32.mrb[77].mxu0  ;;  %v6216_v10 = vpop.f32.mrb[83].mxu1  ;;  %v16602_v63 = vadd.f32 %v6234_v1, %v6137_v53  ;;  %v11345_v55 = vpack.c.bf16 %v9108_v22, %v9107_v43  ;;  %v9111_v53 = vld [vmem:[%s17319_s7 + $0x200] sm:$0xff]  ;;  %v9112_v15 = vld [vmem:[%s17319_s7 + $0x208] sm:$0xff] }
 0x92d   : > { %v16600_v25 = vadd.f32 %v6238_v13, %v6139_v62  ;;  %v9126_v62 = vld [vmem:[%s17319_s7 + $0x278] sm:$0xff]  ;;  %v9169_v43 = vld [vmem:[%s17319_s7 + $0x3a8] sm:$0xff] }
 0x92e   : > { %v16604_v40 = vadd.f32 %v6242_v7, %v6225_v61  ;;  %v9125_v61 = vld [vmem:[%s17319_s7 + $0x270] sm:$0xff] }
 0x92f   : > { %v6143_v19 = vpop.f32.mrb[78].mxu0  ;;  %v6219_v38 = vpop.f32.mrb[84].mxu1  ;;  %6362 = vmatprep.mubr.f32.mxu0 %v16600_v25 }
 0x930   : > { %v6228_v52 = vadd.f32 %v6219_v38, %v5978_v5  ;;  %v6145_v47 = vpop.f32.mrb[79].mxu0  ;;  %v6221_v51 = vpop.f32.mrb[85].mxu1  ;;  %6363 = vmatmul.mubr.f32.vlgmr.msra.gmra.mrb[80].mxu0 %v16602_v63  ;;  %9736 = vmatprep.mubr.msk.f32.mxu1 %vm551_vm1, %v16604_v40  ;;  %v16612_v21 = vadd.f32 %v6234_v1, %v6143_v19  ;;  %v9109_v5 = vld [vmem:[%s17319_s7 + $0x1f0] sm:$0xff]  ;;  %v11377_v1 = vpack.c.bf16 %v9124_v37, %v9123_v4 }
 0x931   : > { %v16610_v58 = vadd.f32 %v6238_v13, %v6145_v47  ;;  %v11347_v13 = vpack.c.bf16 %v9092_v57, %v9091_v9  ;;  %v11349_v8 = vpack.c.bf16 %v9110_v28, %v9109_v5  ;;  %v11353_v19 = vpack.c.bf16 %v9112_v15, %v9111_v53  ;;  %v9096_v47 = vld [vmem:[%s17319_s7 + $0x188] sm:$0xff]  ;;  %v9113_v51 = vld [vmem:[%s17319_s7 + $0x210] sm:$0xff] }
 0x932   : > { %v16614_v48 = vadd.f32 %v6242_v7, %v6228_v52  ;;  %v9094_v7 = vld [vmem:[%s17319_s7 + $0x178] sm:$0xff]  ;;  %v11381_v38 = vpack.c.bf16 %v9126_v62, %v9125_v61  ;;  %v9095_v52 = vld [vmem:[%s17319_s7 + $0x180] sm:$0xff] }
 0x933   : > { %6367 = vmatprep.mubr.f32.mxu0 %v16610_v58  ;;  %v11351_v10 = vpack.c.bf16 %v9094_v7, %v9093_v45 }
 0x934   : > { %6368 = vmatmul.mubr.f32.gmra.mrb[82].mxu0 %v16612_v21  ;;  %9737 = vmatmul.mubr.msk.f32.vlgmr.msra.gmra.mrb[86].mxu1 %vm551_vm1, %v16614_v48 }
 0x935   : > { %9743 = vmatprep.mubr.msk.f32.mxu1 %vm11950_vm10, %v17368_v56  ;;  %9750 = vmatprep.mubr.msk.f32.mxu0 %vm11950_vm10, %v17368_v56 }
 0xa03   : > { %v9357_v50 = vpop.f32.mrb[80].mxu0 }
 0xa04   : > { %v9358_v2 = vpop.f32.mrb[81].mxu0 }
 0xa05   : > { %v9359_v12 = vadd.f32 %v9358_v2, %v9357_v50  ;;  %v9114_v50 = vld [vmem:[%s17319_s7 + $0x218] sm:$0xff]  ;;  %v11355_v2 = vpack.c.bf16 %v9096_v47, %v9095_v52 }
 0xa07   : > { %v9360_v18 = vpop.f32.mrb[82].mxu0  ;;  %v9738_v34 = vpop.f32.mrb[86].mxu1 }
 0xa08   : > { %v9361_v23 = vpop.f32.mrb[83].mxu0  ;;  %v6439_v59 = vpop.f32.mrb[87].mxu1 }
 0xa09   : > { %v9362_v46 = vadd.f32 %v9361_v23, %v9360_v18  ;;  %v6440_v41 = vadd.f32 %v9359_v12, %v6439_v59  ;;  %v11357_v12 = vpack.c.bf16 %v9114_v50, %v9113_v51  ;;  %v9097_v18 = vld [vmem:[%s17319_s7 + $0x190] sm:$0xff]  ;;  %v9115_v23 = vld [vmem:[%s17319_s7 + $0x220] sm:$0xff]  ;;  %v9116_v59 = vld [vmem:[%s17319_s7 + $0x228] sm:$0xff] }
 0xa0a   : > { %v9132_v51 = vld [vmem:[%s17319_s7 + $0x280] sm:$0xff]  ;;  %v9133_v50 = vld [vmem:[%s17319_s7 + $0x288] sm:$0xff] }
 0xa0b   : > { %v6445_v39 = vadd.f32 %v9738_v34, %v9362_v46  ;;  %v9098_v34 = vld [vmem:[%s17319_s7 + $0x198] sm:$0xff] }
 0xa0c   : > { %v11359_v46 = vpack.c.bf16 %v9098_v34, %v9097_v18  ;;  %v11396_v18 = vpack.c.bf16 %v9133_v50, %v9132_v51 }
 0xa0d   : > { %v11329_v44 = vpack.c.bf16 %v6445_v39, %v6440_v41  ;;  %v11361_v41 = vpack.c.bf16 %v9116_v59, %v9115_v23  ;;  %v9117_v39 = vld [vmem:[%s17319_s7 + $0x230] sm:$0xff]  ;;  %v9135_v59 = vld [vmem:[%s17319_s7 + $0x298] sm:$0xff] }
 0xa0e   : > { %v9134_v23 = vld [vmem:[%s17319_s7 + $0x290] sm:$0xff] }
 0xa0f   : > { %11330 = vmatpush3.bf16.msra.mxu1 %v11329_v44  ;;  %11333 = vmatpush3.bf16.msra.mxu0 %v11329_v44  ;;  %v11400_v31 = vpack.c.bf16 %v9135_v59, %v9134_v23 }
 0xa10   : > { %11334 = vmatprep.subr.bf16.mxu1 %v11949_v35  ;;  %11338 = vmatprep.subr.bf16.mxu0 %v11337_v30  ;;  %v9118_v30 = vld [vmem:[%s17319_s7 + $0x238] sm:$0xff] }
 0xa11   : > { %v11365_v29 = vpack.c.bf16 %v9118_v30, %v9117_v39  ;;  %v9136_v39 = vld [vmem:[%s17319_s7 + $0x2a0] sm:$0xff]  ;;  %v9137_v30 = vld [vmem:[%s17319_s7 + $0x2a8] sm:$0xff] }
 0xa12   : > { %9744 = vmatmul.mubr.msk.f32.vlgmr.msra.gmra.mrb[88].mxu1 %vm6449_vm11, %v16651_v17  ;;  %9751 = vmatmul.mubr.msk.f32.vlgmr.msra.gmra.mrb[84].mxu0 %vm6449_vm11, %v16656_v20 }
 0xa13   : > { %11336 = vmatpush3.bf16.msra.mxu1 %v11329_v44  ;;  %11340 = vmatpush3.bf16.msra.mxu0 %v11339_v54  ;;  %v9101_v44 = vld [vmem:[%s17319_s7 + $0x1b0] sm:$0xff]  ;;  %v11426_v54 = vpack.c.bf16 %v9165_v26, %v9164_v49  ;;  %v9139_v49 = vld [vmem:[%s17319_s7 + $0x2b8] sm:$0xff]  ;;  %v9156_v26 = vld [vmem:[%s17319_s7 + $0x340] sm:$0xff] }
 0xa14   : > { %6780 = vmatprep.mubr.f32.mxu0 %v16600_v25  ;;  %9757 = vmatprep.mubr.msk.f32.mxu1 %vm11950_vm10, %v17368_v56  ;;  %v11367_v0 = vpack.c.bf16 %v9102_v16, %v9101_v44  ;;  %v9138_v16 = vld [vmem:[%s17319_s7 + $0x2b0] sm:$0xff] }
 0xa15   : > { %11342 = vmatprep.subr.bf16.mxu0 %v11341_v60  ;;  %11370 = vmatprep.subr.bf16.mxu1 %v11369_v36  ;;  %v11430_v60 = vpack.c.bf16 %v9167_v6, %v9166_v33  ;;  %v9140_v6 = vld [vmem:[%s17319_s7 + $0x2c0] sm:$0xff] }
 0xa16   : > { %9758 = vmatmul.mubr.msk.f32.vlgmr.msra.gmra.mrb[90].mxu1 %vm6449_vm11, %v16684_v11 }
 0xa17   : > { %11344 = vmatpush3.bf16.msra.mxu0 %v11343_v32  ;;  %11372 = vmatpush3.bf16.msra.mxu1 %v11369_v36  ;;  %v9168_v36 = vld [vmem:[%s17319_s7 + $0x3a0] sm:$0xff]  ;;  %v11438_v32 = vpack.c.bf16 %v9171_v42, %v9170_v27  ;;  %v9142_v42 = vld [vmem:[%s17319_s7 + $0x2d0] sm:$0xff] }
 0xa18   : > { %9776 = vmatprep.mubr.msk.f32.mxu1 %vm551_vm1, %v16604_v40  ;;  %11346 = vmatprep.subr.bf16.mxu0 %v11345_v55  ;;  %v11434_v22 = vpack.c.bf16 %v9169_v43, %v9168_v36  ;;  %v9158_v36 = vld [vmem:[%s17319_s7 + $0x350] sm:$0xff]  ;;  %v9159_v43 = vld [vmem:[%s17319_s7 + $0x358] sm:$0xff] }
 0xa19   : > { %11374 = vmatprep.subr.bf16.mxu1 %v11373_v14  ;;  %v11414_v27 = vpack.c.bf16 %v9159_v43, %v9158_v36  ;;  %v7493_v36 = vld [vmem:[%s17321_s9 + $0x48] sm:$0xff] }
 0xa1b   : > { %11348 = vmatpush3.bf16.msra.mxu0 %v11347_v13  ;;  %11376 = vmatpush3.bf16.msra.mxu1 %v11373_v14 }
 0xa1c   : > { %11350 = vmatprep.subr.bf16.mxu0 %v11349_v8  ;;  %11378 = vmatprep.subr.bf16.mxu1 %v11377_v1 }
 0xa1f   : > { %11352 = vmatpush3.bf16.msra.mxu0 %v11351_v10  ;;  %11380 = vmatpush3.bf16.msra.mxu1 %v11377_v1  ;;  %v9148_v10 = vld [vmem:[%s17319_s7 + $0x300] sm:$0xff] }
 0xa20   : > { %11354 = vmatprep.subr.bf16.mxu0 %v11353_v19  ;;  %11382 = vmatprep.subr.bf16.mxu1 %v11381_v38  ;;  %v9149_v19 = vld [vmem:[%s17319_s7 + $0x308] sm:$0xff] }
 0xa21   : > { %v11394_v47 = vpack.c.bf16 %v9149_v19, %v9148_v10  ;;  %v7490_v19 = vld [vmem:[%s17321_s9 + $0x30] sm:$0xff] }
 0xa23   : > { %11356 = vmatpush3.bf16.msra.mxu0 %v11355_v2  ;;  %11384 = vmatpush3.bf16.msra.mxu1 %v11381_v38  ;;  %v9150_v2 = vld [vmem:[%s17319_s7 + $0x310] sm:$0xff] }
 0xa24   : > { %11358 = vmatprep.subr.bf16.mxu0 %v11357_v12  ;;  %11385 = vmatprep.subr.bf16.mxu1 %v11949_v35  ;;  %v9151_v12 = vld [vmem:[%s17319_s7 + $0x318] sm:$0xff] }
 0xa25   : > { %v11398_v34 = vpack.c.bf16 %v9151_v12, %v9150_v2 }
 0xa26   : > { %9777 = vmatmul.mubr.msk.f32.vlgmr.msra.gmra.mrb[92].mxu1 %vm551_vm1, %v16614_v48 }
 0xa27   : > { %11360 = vmatpush3.bf16.msra.mxu0 %v11359_v46  ;;  %9783 = vmatprep.mubr.msk.f32.mxu1 %vm11950_vm10, %v17368_v56  ;;  %v9152_v46 = vld [vmem:[%s17319_s7 + $0x320] sm:$0xff] }
 0xa28   : > { %11362 = vmatprep.subr.bf16.mxu0 %v11361_v41  ;;  %v9153_v41 = vld [vmem:[%s17319_s7 + $0x328] sm:$0xff] }
 0xa29   : > { %v11402_v24 = vpack.c.bf16 %v9153_v41, %v9152_v46 }
 0xa2b   : > { %11364 = vmatpush3.bf16.msra.mxu0 %v11363_v3  ;;  %v9154_v3 = vld [vmem:[%s17319_s7 + $0x330] sm:$0xff] }
 0xa2c   : > { %11366 = vmatprep.subr.bf16.mxu0 %v11365_v29  ;;  %v9155_v29 = vld [vmem:[%s17319_s7 + $0x338] sm:$0xff] }
 0xa2d   : > { %v11406_v44 = vpack.c.bf16 %v9155_v29, %v9154_v3 }
 0xa2f   : > { %11368 = vmatpush3.bf16.msra.mxu0 %v11367_v0  ;;  %v9157_v0 = vld [vmem:[%s17319_s7 + $0x348] sm:$0xff] }
 0xa30   : > { %11427 = vmatprep.subr.bf16.mxu0 %v11426_v54  ;;  %v11410_v33 = vpack.c.bf16 %v9157_v0, %v9156_v26  ;;  %v9181_v26 = vld [vmem:[%s17321_s9 + $0x88] sm:$0xff]  ;;  %v9182_v0 = vld [vmem:[%s17321_s9 + $0x90] sm:$0xff] }
 0xa32   : > { %6781 = vmatmul.mubr.f32.vlgmr.msra.gmra.mrb[86].mxu0 %v16602_v63 }
 0xa33   : > { %6785 = vmatprep.mubr.f32.mxu0 %v16610_v58  ;;  %11429 = vmatpush3.bf16.msra.mxu0 %v11426_v54  ;;  %v11408_v54 = vpack.c.bf16 %v9139_v49, %v9138_v16  ;;  %v9179_v16 = vld [vmem:[%s17321_s9 + $0x78] sm:$0xff]  ;;  %v9180_v49 = vld [vmem:[%s17321_s9 + $0x80] sm:$0xff] }
 0xa34   : > { %11431 = vmatprep.subr.bf16.mxu0 %v11430_v60 }
 0xa36   : > { %6786 = vmatmul.mubr.f32.gmra.mrb[88].mxu0 %v16612_v21 }
 0xa37   : > { %11433 = vmatpush3.bf16.msra.mxu0 %v11430_v60  ;;  %9816 = vmatprep.mubr.msk.f32.mxu0 %vm551_vm1, %v16604_v40  ;;  %v9141_v60 = vld [vmem:[%s17319_s7 + $0x2c8] sm:$0xff] }
 0xa38   : > { %11435 = vmatprep.subr.bf16.mxu0 %v11434_v22 }
 0xa3b   : > { %11437 = vmatpush3.bf16.msra.mxu0 %v11434_v22  ;;  %v11412_v22 = vpack.c.bf16 %v9141_v60, %v9140_v6  ;;  %v7492_v60 = vld [vmem:[%s17321_s9 + $0x40] sm:$0xff] }
 0xa3c   : > { %11439 = vmatprep.subr.bf16.mxu0 %v11438_v32  ;;  %v11482_v43 = vpack.c.bf16 %v7493_v36, %v7492_v60  ;;  %v9224_v60 = vld [vmem:[%s17321_s9 + $0x1a0] sm:$0xff]  ;;  %v9225_v36 = vld [vmem:[%s17321_s9 + $0x1a8] sm:$0xff] }
 0xa3f   : > { %11441 = vmatpush3.bf16.msra.mxu0 %v11438_v32  ;;  %v9143_v32 = vld [vmem:[%s17319_s7 + $0x2d8] sm:$0xff] }
 0xa40   : > { %11442 = vmatprep.subr.bf16.mxu0 %v11949_v35 }
 0xa42   : > { %9817 = vmatmul.mubr.msk.f32.vlgmr.msra.gmra.mrb[90].mxu0 %vm551_vm1, %v16614_v48 }
 0xa43   : > { %9823 = vmatprep.mubr.msk.f32.mxu0 %vm11950_vm10, %v17368_v56 }
 0xae5   : > { %v6594_v55 = vpop.f32.mrb[84].mxu0  ;;  %v6519_v9 = vpop.f32.mrb[88].mxu1 }
 0xae6   : > { %v6598_v57 = vmax.f32 %v6519_v9, %v6594_v55  ;;  %v9752_v5 = vpop.f32.mrb[85].mxu0  ;;  %v9745_v14 = vpop.f32.mrb[89].mxu1  ;;  %v9160_v55 = vld [vmem:[%s17319_s7 + $0x360] sm:$0xff]  ;;  %v9161_v9 = vld [vmem:[%s17319_s7 + $0x368] sm:$0xff] }
 0xae7   : > { %v11418_v5 = vpack.c.bf16 %v9161_v9, %v9160_v55  ;;  %v9144_v14 = vld [vmem:[%s17319_s7 + $0x2e0] sm:$0xff]  ;;  %v7495_v55 = vld [vmem:[%s17321_s9 + $0x58] sm:$0xff] }
 0xae9   : > { %v6670_v28 = vpop.f32.mrb[90].mxu1 }
 0xaea   : > { %v16810_v40 = vmax.f32 %v6598_v57, %v6670_v28  ;;  %v9759_v4 = vpop.f32.mrb[91].mxu1  ;;  %v11416_v57 = vpack.c.bf16 %v9143_v32, %v9142_v42  ;;  %v9145_v28 = vld [vmem:[%s17319_s7 + $0x2e8] sm:$0xff]  ;;  %v7494_v32 = vld [vmem:[%s17321_s9 + $0x50] sm:$0xff] }
 0xaeb   : > { %v9162_v4 = vld [vmem:[%s17319_s7 + $0x370] sm:$0xff]  ;;  %v11485_v9 = vpack.c.bf16 %v7495_v55, %v7494_v32  ;;  %v9227_v55 = vld [vmem:[%s17321_s9 + $0x1b8] sm:$0xff] }
 0xaec   : > { %v9226_v32 = vld [vmem:[%s17321_s9 + $0x1b0] sm:$0xff] }
 0xaf9   : > { %v9778_v37 = vpop.f32.mrb[92].mxu1 }
 0xafa   : > { %v6857_v13 = vpop.f32.mrb[93].mxu1 }
 0xb05   : > { %v9414_v8 = vpop.f32.mrb[86].mxu0 }
 0xb06   : > { %v9415_v1 = vpop.f32.mrb[87].mxu0 }
 0xb07   : > { %v9416_v45 = vadd.f32 %v9415_v1, %v9414_v8  ;;  %v9146_v1 = vld [vmem:[%s17319_s7 + $0x2f0] sm:$0xff] }
 0xb09   : > { %v6858_v7 = vadd.f32 %v9416_v45, %v6857_v13  ;;  %v9417_v53 = vpop.f32.mrb[88].mxu0  ;;  %v11420_v13 = vpack.c.bf16 %v9145_v28, %v9144_v14  ;;  %v9147_v45 = vld [vmem:[%s17319_s7 + $0x2f8] sm:$0xff]  ;;  %v7496_v28 = vld [vmem:[%s17321_s9 + $0x60] sm:$0xf] }
 0xb0a   : > { %v9418_v48 = vpop.f32.mrb[89].mxu0 }
 0xb0b   : > { %v9419_v15 = vadd.f32 %v9418_v48, %v9417_v53  ;;  %v7484_v53 = vld [vmem:[%s17321_s9] sm:$0xff]  ;;  %v7485_v48 = vld [vmem:[%s17321_s9 + $0x8] sm:$0xff] }
 0xb0d   : > { %v6863_v61 = vadd.f32 %v9778_v37, %v9419_v15  ;;  %v9163_v37 = vld [vmem:[%s17319_s7 + $0x378] sm:$0xff]  ;;  %v11470_v15 = vpack.c.bf16 %v7485_v48, %v7484_v53  ;;  %v9210_v48 = vld [vmem:[%s17321_s9 + $0x140] sm:$0xff] }
 0xb0e   : > { %v11422_v8 = vpack.c.bf16 %v9163_v37, %v9162_v4  ;;  %v9189_v4 = vld [vmem:[%s17321_s9 + $0xc8] sm:$0xf]  ;;  %v9209_v53 = vld [vmem:[%s17321_s9 + $0x138] sm:$0xff] }
 0xb0f   : > { %v11386_v62 = vpack.c.bf16 %v6863_v61, %v6858_v7  ;;  %v11424_v7 = vpack.c.bf16 %v9147_v45, %v9146_v1  ;;  %v7488_v61 = vld [vmem:[%s17321_s9 + $0x20] sm:$0xff] }
 0xb11   : > { %11387 = vmatpush3.bf16.msra.mxu1 %v11386_v62 }
 0xb12   : > { %11388 = vmatprep.subr.bf16.mxu1 %v11949_v35 }
 0xb14   : > { %9784 = vmatmul.mubr.msk.f32.vlgmr.msra.gmra.mrb[94].mxu1 %vm6449_vm11, %v16651_v17 }
 0xb15   : > { %11390 = vmatpush3.bf16.msra.mxu1 %v11386_v62  ;;  %v16821_v38 = vpop.f32.mrb[90].mxu0  ;;  %9790 = vmatprep.mubr.msk.f32.mxu1 %vm11950_vm10, %v17368_v56 }
 0xb16   : > { %v16825_v52 = vpop.f32.mrb[91].mxu0  ;;  %11391 = vmatprep.subr.bf16.mxu1 %v11949_v35 }
 0xb18   : > { %9791 = vmatmul.mubr.msk.f32.vlgmr.msra.gmra.mrb[96].mxu1 %vm6449_vm11, %v16656_v20 }
 0xb19   : > { %11393 = vmatpush3.bf16.msra.mxu1 %v11386_v62  ;;  %9797 = vmatprep.mubr.msk.f32.mxu1 %vm11950_vm10, %v17368_v56  ;;  %v7489_v62 = vld [vmem:[%s17321_s9 + $0x28] sm:$0xff] }
 0xb1a   : > { %11395 = vmatprep.subr.bf16.mxu1 %v11394_v47  ;;  %v11476_v10 = vpack.c.bf16 %v7489_v62, %v7488_v61  ;;  %v7491_v47 = vld [vmem:[%s17321_s9 + $0x38] sm:$0xff]  ;;  %v11506_v62 = vpack.c.bf16 %v9210_v48, %v9209_v53  ;;  %v9236_v48 = vld [vmem:[%s17321_s9 + $0x200] sm:$0xf] }
 0xb1b   : > { %v11479_v51 = vpack.c.bf16 %v7491_v47, %v7490_v19  ;;  %v9195_v61 = vld [vmem:[%s17321_s9 + $0xd8] sm:$0xff]  ;;  %v9211_v19 = vld [vmem:[%s17321_s9 + $0x148] sm:$0xff]  ;;  %v9212_v47 = vld [vmem:[%s17321_s9 + $0x150] sm:$0xff] }
 0xb1c   : > { %9798 = vmatmul.mubr.msk.f32.vlgmr.msra.gmra.mrb[98].mxu1 %vm6449_vm11, %v16684_v11 }
 0xb1d   : > { %11397 = vmatpush3.bf16.msra.mxu1 %v11396_v18  ;;  %7184 = vmatprep.mubr.f32.mxu1 %v16600_v25  ;;  %v11404_v25 = vpack.c.bf16 %v9137_v30, %v9136_v39 }
 0xb1e   : > { %11399 = vmatprep.subr.bf16.mxu1 %v11398_v34 }
 0xb21   : > { %11401 = vmatpush3.bf16.msra.mxu1 %v11400_v31 }
 0xb22   : > { %11403 = vmatprep.subr.bf16.mxu1 %v11402_v24 }
 0xb25   : > { %11405 = vmatpush3.bf16.msra.mxu1 %v11404_v25 }
 0xb26   : > { %11407 = vmatprep.subr.bf16.mxu1 %v11406_v44 }
 0xb29   : > { %11409 = vmatpush3.bf16.msra.mxu1 %v11408_v54  ;;  %v11458_v54 = vpack.c.bf16 %v9182_v0, %v9181_v26  ;;  %v9204_v0 = vld [vmem:[%s17321_s9 + $0x120] sm:$0xff] }
 0xb2a   : > { %11411 = vmatprep.subr.bf16.mxu1 %v11410_v33  ;;  %v9184_v33 = vld [vmem:[%s17321_s9 + $0xa0] sm:$0xff] }
 0xb2d   : > { %11413 = vmatpush3.bf16.msra.mxu1 %v11412_v22  ;;  %v9185_v22 = vld [vmem:[%s17321_s9 + $0xa8] sm:$0xff] }
 0xb2e   : > { %11415 = vmatprep.subr.bf16.mxu1 %v11414_v27  ;;  %v9186_v27 = vld [vmem:[%s17321_s9 + $0xb0] sm:$0xff] }
 0xb2f   : > { %v11464_v42 = vpack.c.bf16 %v9186_v27, %v9185_v22  ;;  %v9206_v22 = vld [vmem:[%s17321_s9 + $0x130] sm:$0xf]  ;;  %v11524_v27 = vpack.c.bf16 %v9225_v36, %v9224_v60 }
 0xb31   : > { %11417 = vmatpush3.bf16.msra.mxu1 %v11416_v57  ;;  %v9187_v57 = vld [vmem:[%s17321_s9 + $0xb8] sm:$0xff] }
 0xb32   : > { %11419 = vmatprep.subr.bf16.mxu1 %v11418_v5  ;;  %v9188_v5 = vld [vmem:[%s17321_s9 + $0xc0] sm:$0xff] }
 0xb33   : > { %v11467_v14 = vpack.c.bf16 %v9188_v5, %v9187_v57  ;;  %v9228_v57 = vld [vmem:[%s17321_s9 + $0x1c0] sm:$0xff]  ;;  %v9229_v5 = vld [vmem:[%s17321_s9 + $0x1c8] sm:$0xff] }
 0xb35   : > { %11421 = vmatpush3.bf16.msra.mxu1 %v11420_v13 }
 0xb36   : > { %11423 = vmatprep.subr.bf16.mxu1 %v11422_v8 }
 0xb39   : > { %11425 = vmatpush3.bf16.msra.mxu1 %v11424_v7 }
 0xb3a   : > { %11469 = vmatprep.subr.bf16.mxu1 %v11949_v35 }
 0xb3c   : > { %7185 = vmatmul.mubr.f32.vlgmr.msra.gmra.mrb[100].mxu1 %v16602_v63  ;;  %v7486_v63 = vld [vmem:[%s17321_s9 + $0x10] sm:$0xff] }
 0xb3d   : > { %7189 = vmatprep.mubr.f32.mxu1 %v16610_v58  ;;  %v7487_v58 = vld [vmem:[%s17321_s9 + $0x18] sm:$0xff]  ;;  %11471 = vmatpush3.bf16.msra.mxu1 %v11470_v15 }
 0xb3e   : > { %11472 = vmatprep.subr.bf16.mxu1 %v11949_v35 }
 0xb40   : > { %7190 = vmatmul.mubr.f32.gmra.mrb[102].mxu1 %v16612_v21  ;;  %v11473_v21 = vpack.c.bf16 %v7487_v58, %v7486_v63 }
 0xb41   : > { %9895 = vmatprep.mubr.msk.f32.mxu1 %vm11950_vm10, %v17368_v56 }
 0xb42   : > { %11474 = vmatpush3.bf16.msra.mxu1 %v11473_v21  ;;  %v9194_v21 = vld [vmem:[%s17321_s9 + $0xd0] sm:$0xff] }
 0xb43   : > { %11475 = vmatprep.subr.bf16.mxu1 %v11949_v35 }
 0xb46   : > { %11477 = vmatpush3.bf16.msra.mxu1 %v11476_v10 }
 0xb47   : > { %11478 = vmatprep.subr.bf16.mxu1 %v11949_v35 }
 0xb4a   : > { %11480 = vmatpush3.bf16.msra.mxu1 %v11479_v51  ;;  %v11488_v51 = vpack.c.bf16 %v9195_v61, %v9194_v21  ;;  %v7941_v21 = vld [vmem:[%s17323_s11 + $0x10] sm:$0xff] }
 0xb4b   : > { %11481 = vmatprep.subr.bf16.mxu1 %v11949_v35 }
 0xb4e   : > { %11483 = vmatpush3.bf16.msra.mxu1 %v11482_v43 }
 0xb4f   : > { %11484 = vmatprep.subr.bf16.mxu1 %v11949_v35 }
 0xb52   : > { %11486 = vmatpush3.bf16.msra.mxu1 %v11485_v9  ;;  %v11527_v9 = vpack.c.bf16 %v9227_v55, %v9226_v32 }
 0xb53   : > { %9893 = vmatprep.subr.mxu1 %v17368_v56 }
 0xb56   : > { %9894 = vmatpush3.msk.msra.mxu1 %vm2175_vm4, %v7496_v28  ;;  %v9230_v28 = vld [vmem:[%s17321_s9 + $0x1d0] sm:$0xff] }
 0xb57   : > { %11505 = vmatprep.subr.bf16.mxu1 %v11949_v35 }
 0xbe7   : > { %v6932_v50 = vpop.f32.mrb[94].mxu1 }
 0xbe8   : > { %v6936_v2 = vmax.f32 %v16810_v40, %v6932_v50  ;;  %v9785_v12 = vpop.f32.mrb[95].mxu1 }
 0xbe9   : > { %v9197_v12 = vld [vmem:[%s17321_s9 + $0xe8] sm:$0xff] }
 0xbeb   : > { %v7003_v18 = vpop.f32.mrb[96].mxu1 }
 0xbec   : > { %v16960_v34 = vmax.f32 %v6936_v2, %v7003_v18  ;;  %v9792_v23 = vpop.f32.mrb[97].mxu1  ;;  %v9196_v2 = vld [vmem:[%s17321_s9 + $0xe0] sm:$0xff]  ;;  %v11509_v18 = vpack.c.bf16 %v9212_v47, %v9211_v19  ;;  %v7944_v47 = vld [vmem:[%s17323_s11 + $0x28] sm:$0xff] }
 0xbed   : > { %v9214_v23 = vld [vmem:[%s17321_s9 + $0x160] sm:$0xff] }
 0xbee   : > { %v7943_v19 = vld [vmem:[%s17323_s11 + $0x20] sm:$0xff] }
 0xbef   : > { %v16962_v59 = vpop.f32.mrb[98].mxu1 }
 0xbf0   : > { %v7078_v46 = vmax.f32 %v16960_v34, %v16962_v59  ;;  %v9799_v41 = vpop.f32.mrb[99].mxu1  ;;  %v9213_v34 = vld [vmem:[%s17321_s9 + $0x158] sm:$0xff]  ;;  %v11491_v59 = vpack.c.bf16 %v9197_v12, %v9196_v2 }
 0xbf1   : > { %v9199_v41 = vld [vmem:[%s17321_s9 + $0xf8] sm:$0xff] }
 0xbf2   : > { %v7946_v2 = vld [vmem:[%s17323_s11 + $0x38] sm:$0xff] }
 0xc0f   : > { %v9471_v31 = vpop.f32.mrb[100].mxu1 }
 0xc10   : > { %v9472_v24 = vpop.f32.mrb[101].mxu1 }
 0xc11   : > { %v9473_v39 = vadd.f32 %v9472_v24, %v9471_v31  ;;  %v11512_v31 = vpack.c.bf16 %v9214_v23, %v9213_v34  ;;  %v9215_v24 = vld [vmem:[%s17321_s9 + $0x168] sm:$0xff] }
 0xc12   : > { %v7948_v34 = vld [vmem:[%s17323_s11 + $0x48] sm:$0xff] }
 0xc13   : > { %v7262_v30 = vadd.f32 %v9473_v39, %v16825_v52  ;;  %v9474_v3 = vpop.f32.mrb[102].mxu1  ;;  %v9177_v52 = vld [vmem:[%s17321_s9 + $0x68] sm:$0xff]  ;;  %v9216_v39 = vld [vmem:[%s17321_s9 + $0x170] sm:$0xff] }
 0xc14   : > { %v9475_v29 = vpop.f32.mrb[103].mxu1 }
 0xc15   : > { %v9476_v25 = vadd.f32 %v9475_v29, %v9474_v3  ;;  %v9200_v3 = vld [vmem:[%s17321_s9 + $0x100] sm:$0xff]  ;;  %v9201_v29 = vld [vmem:[%s17321_s9 + $0x108] sm:$0xff] }
 0xc17   : > { %v7267_v40 = vadd.f32 %v16821_v38, %v9476_v25  ;;  %v9178_v38 = vld [vmem:[%s17321_s9 + $0x70] sm:$0xff]  ;;  %v11515_v25 = vpack.c.bf16 %v9216_v39, %v9215_v24 }
 0xc19   : > { %v11443_v44 = vpack.c.bf16 %v7267_v40, %v7262_v30  ;;  %v9217_v40 = vld [vmem:[%s17321_s9 + $0x178] sm:$0xff] }
 0xc1b   : > { %11444 = vmatpush3.bf16.msra.mxu0 %v11443_v44 }
 0xc1c   : > { %11445 = vmatprep.subr.bf16.mxu0 %v11949_v35 }
 0xc1e   : > { %9824 = vmatmul.mubr.msk.f32.vlgmr.msra.gmra.mrb[92].mxu0 %vm6449_vm11, %v16651_v17  ;;  %v11452_v17 = vpack.c.bf16 %v9178_v38, %v9177_v52  ;;  %v11497_v52 = vpack.c.bf16 %v9201_v29, %v9200_v3  ;;  %v9202_v38 = vld [vmem:[%s17321_s9 + $0x110] sm:$0xff] }
 0xc1f   : > { %11447 = vmatpush3.bf16.msra.mxu0 %v11443_v44  ;;  %9830 = vmatprep.mubr.msk.f32.mxu0 %vm11950_vm10, %v17368_v56 }
 0xc20   : > { %11448 = vmatprep.subr.bf16.mxu0 %v11949_v35 }
 0xc22   : > { %9831 = vmatmul.mubr.msk.f32.vlgmr.msra.gmra.mrb[94].mxu0 %vm6449_vm11, %v16656_v20  ;;  %v11455_v20 = vpack.c.bf16 %v9180_v49, %v9179_v16  ;;  %v9219_v49 = vld [vmem:[%s17321_s9 + $0x188] sm:$0xff] }
 0xc23   : > { %11450 = vmatpush3.bf16.msra.mxu0 %v11443_v44  ;;  %9837 = vmatprep.mubr.msk.f32.mxu0 %vm11950_vm10, %v17368_v56  ;;  %v9218_v44 = vld [vmem:[%s17321_s9 + $0x180] sm:$0xff] }
 0xc24   : > { %11451 = vmatprep.subr.bf16.mxu0 %v11949_v35  ;;  %v11518_v16 = vpack.c.bf16 %v9218_v44, %v9217_v40 }
 0xc26   : > { %9838 = vmatmul.mubr.msk.f32.vlgmr.msra.gmra.mrb[96].mxu0 %vm6449_vm11, %v16684_v11  ;;  %v9183_v11 = vld [vmem:[%s17321_s9 + $0x98] sm:$0xff] }
 0xc27   : > { %11453 = vmatpush3.bf16.msra.mxu0 %v11452_v17  ;;  %9866 = vmatprep.mubr.msk.f32.mxu0 %vm11950_vm10, %v17368_v56  ;;  %v11461_v6 = vpack.c.bf16 %v9184_v33, %v9183_v11  ;;  %v9203_v17 = vld [vmem:[%s17321_s9 + $0x118] sm:$0xff] }
 0xc28   : > { %11454 = vmatprep.subr.bf16.mxu0 %v11949_v35  ;;  %v11500_v26 = vpack.c.bf16 %v9203_v17, %v9202_v38  ;;  %v7937_v17 = vld [vmem:[%s17322_s10] sm:$0x1] }
 0xc2b   : > { %11456 = vmatpush3.bf16.msra.mxu0 %v11455_v20  ;;  %v9220_v20 = vld [vmem:[%s17321_s9 + $0x190] sm:$0xff] }
 0xc2c   : > { %11457 = vmatprep.subr.bf16.mxu0 %v11949_v35  ;;  %v11521_v11 = vpack.c.bf16 %v9220_v20, %v9219_v49 }
 0xc2f   : > { %11459 = vmatpush3.bf16.msra.mxu0 %v11458_v54  ;;  %v9205_v54 = vld [vmem:[%s17321_s9 + $0x128] sm:$0xff] }
 0xc30   : > { %11460 = vmatprep.subr.bf16.mxu0 %v11949_v35  ;;  %v11503_v33 = vpack.c.bf16 %v9205_v54, %v9204_v0 }
 0xc33   : > { %11462 = vmatpush3.bf16.msra.mxu0 %v11461_v6  ;;  %v9221_v6 = vld [vmem:[%s17321_s9 + $0x198] sm:$0xf] }
 0xc34   : > { %11463 = vmatprep.subr.bf16.mxu0 %v11949_v35 }
 0xc37   : > { %11465 = vmatpush3.bf16.msra.mxu0 %v11464_v42 }
 0xc38   : > { %11466 = vmatprep.subr.bf16.mxu0 %v11949_v35 }
 0xc3b   : > { %11468 = vmatpush3.bf16.msra.mxu0 %v11467_v14  ;;  %v11530_v14 = vpack.c.bf16 %v9229_v5, %v9228_v57 }
 0xc3c   : > { %9864 = vmatprep.subr.mxu0 %v17368_v56 }
 0xc3f   : > { %9865 = vmatpush3.msk.msra.mxu0 %vm2175_vm4, %v9189_v4  ;;  %v9231_v4 = vld [vmem:[%s17321_s9 + $0x1d8] sm:$0xff] }
 0xc40   : > { %11487 = vmatprep.subr.bf16.mxu0 %v11949_v35 }
 0xcf1   : > { %v7336_v37 = vpop.f32.mrb[92].mxu0 }
 0xcf2   : > { %v7340_v13 = vmax.f32 %v7078_v46, %v7336_v37  ;;  %v9825_v8 = vpop.f32.mrb[93].mxu0  ;;  %v9198_v46 = vld [vmem:[%s17321_s9 + $0xf0] sm:$0xff]  ;;  %v11533_v37 = vpack.c.bf16 %v9231_v4, %v9230_v28 }
 0xcf3   : > { %v11494_v30 = vpack.c.bf16 %v9199_v41, %v9198_v46  ;;  %v9233_v8 = vld [vmem:[%s17321_s9 + $0x1e8] sm:$0xff]  ;;  %v7950_v46 = vld [vmem:[%s17323_s11 + $0x58] sm:$0xff] }
 0xcf5   : > { %v7407_v1 = vpop.f32.mrb[94].mxu0 }
 0xcf6   : > { %v7411_v45 = vmax.f32 %v7340_v13, %v7407_v1  ;;  %v9832_v7 = vpop.f32.mrb[95].mxu0  ;;  %v9232_v13 = vld [vmem:[%s17321_s9 + $0x1e0] sm:$0xff] }
 0xcf7   : > { %v11536_v1 = vpack.c.bf16 %v9233_v8, %v9232_v13  ;;  %v9235_v7 = vld [vmem:[%s17321_s9 + $0x1f8] sm:$0xff] }
 0xcf9   : > { %v7478_v15 = vpop.f32.mrb[96].mxu0 }
 0xcfa   : > { %v7482_v63 = vmax.f32 %v7411_v45, %v7478_v15  ;;  %v9839_v58 = vpop.f32.mrb[97].mxu0  ;;  %v9234_v45 = vld [vmem:[%s17321_s9 + $0x1f0] sm:$0xff] }
 0xcfb   : > { %v11539_v53 = vpack.c.bf16 %v9235_v7, %v9234_v45  ;;  %v7940_v58 = vld [vmem:[%s17323_s11 + $0x8] sm:$0xff] }
 0xcfc   : > { %v17064_v10 = vmax.f32 %v7482_v63, 0.0  ;;  %v7939_v63 = vld [vmem:[%s17323_s11] sm:$0xff] }
 0xcfd   : > { %v11542_v61 = vpack.c.bf16 %v7940_v58, %v7939_v63 }
 0xcfe   : > { %9896 = vmatmul.mubr.msk.f32.vlgmr.msra.gmra.mrb[104].mxu1 %vm7513_vm12, %v17064_v10  ;;  %v7512_v50 = vrot.slane %v17064_v10, 1  ;;  %v7769_v43 = vrot.slane %v17064_v10, 3  ;;  %v7678_v42 = vrot.slane %v17064_v10, 2  ;;  %v7860_v15 = vrot.slane %v17064_v10, 4 }
 0xcff   : > { %11507 = vmatpush3.bf16.msra.mxu1 %v11506_v62  ;;  %9953 = vmatprep.mubr.msk.f32.mxu1 %vm11950_vm10, %v17368_v56  ;;  %v7942_v62 = vld [vmem:[%s17323_s11 + $0x18] sm:$0xff] }
 0xd00   : > { %9867 = vmatmul.mubr.msk.f32.vlgmr.msra.gmra.mrb[98].mxu0 %vm7513_vm12, %v7512_v50  ;;  %11508 = vmatprep.subr.bf16.mxu1 %v11949_v35  ;;  %v11545_v10 = vpack.c.bf16 %v7942_v62, %v7941_v21  ;;  %v7945_v50 = vld [vmem:[%s17323_s11 + $0x30] sm:$0xff] }
 0xd01   : > { %11489 = vmatpush3.bf16.msra.mxu0 %v11488_v51  ;;  %9924 = vmatprep.mubr.msk.f32.mxu0 %vm11950_vm10, %v17368_v56  ;;  %v11548_v51 = vpack.c.bf16 %v7944_v47, %v7943_v19  ;;  %v11551_v12 = vpack.c.bf16 %v7946_v2, %v7945_v50 }
 0xd02   : > { %11490 = vmatprep.subr.bf16.mxu0 %v11949_v35 }
 0xd03   : > { %11510 = vmatpush3.bf16.msra.mxu1 %v11509_v18  ;;  %v7947_v18 = vld [vmem:[%s17323_s11 + $0x40] sm:$0xff] }
 0xd04   : > { %11511 = vmatprep.subr.bf16.mxu1 %v11949_v35  ;;  %v11554_v23 = vpack.c.bf16 %v7948_v34, %v7947_v18 }
 0xd05   : > { %11492 = vmatpush3.bf16.msra.mxu0 %v11491_v59  ;;  %v7949_v59 = vld [vmem:[%s17323_s11 + $0x50] sm:$0xff] }
 0xd06   : > { %11493 = vmatprep.subr.bf16.mxu0 %v11949_v35  ;;  %v11557_v41 = vpack.c.bf16 %v7950_v46, %v7949_v59 }
 0xd07   : > { %11513 = vmatpush3.bf16.msra.mxu1 %v11512_v31  ;;  %v7951_v31 = vld [vmem:[%s17323_s11 + $0x60] sm:$0xf] }
 0xd08   : > { %11514 = vmatprep.subr.bf16.mxu1 %v11949_v35 }
 0xd09   : > { %11495 = vmatpush3.bf16.msra.mxu0 %v11494_v30 }
 0xd0a   : > { %11496 = vmatprep.subr.bf16.mxu0 %v11949_v35 }
 0xd0b   : > { %11516 = vmatpush3.bf16.msra.mxu1 %v11515_v25 }
 0xd0c   : > { %11517 = vmatprep.subr.bf16.mxu1 %v11949_v35 }
 0xd0d   : > { %11498 = vmatpush3.bf16.msra.mxu0 %v11497_v52 }
 0xd0e   : > { %11499 = vmatprep.subr.bf16.mxu0 %v11949_v35 }
 0xd0f   : > { %11519 = vmatpush3.bf16.msra.mxu1 %v11518_v16 }
 0xd10   : > { %11520 = vmatprep.subr.bf16.mxu1 %v11949_v35 }
 0xd11   : > { %11501 = vmatpush3.bf16.msra.mxu0 %v11500_v26  ;;  %v7952_v26 = vld [vmem:[%s17324_s12] sm:$0x1] }
 0xd12   : > { %11502 = vmatprep.subr.bf16.mxu0 %v11949_v35 }
 0xd13   : > { %11522 = vmatpush3.bf16.msra.mxu1 %v11521_v11 }
 0xd14   : > { %9951 = vmatprep.subr.mxu1 %v17368_v56 }
 0xd15   : > { %11504 = vmatpush3.bf16.msra.mxu0 %v11503_v33 }
 0xd16   : > { %9922 = vmatprep.subr.mxu0 %v17368_v56 }
 0xd17   : > { %9952 = vmatpush3.msk.msra.mxu1 %vm2175_vm4, %v9221_v6 }
 0xd18   : > { %9954 = vmatmul.mubr.msk.f32.vlgmr.msra.gmra.mrb[106].mxu1 %vm7513_vm12, %v7769_v43  ;;  %11541 = vmatprep.subr.bf16.mxu1 %v11949_v35 }
 0xd19   : > { %9923 = vmatpush3.msk.msra.mxu0 %vm2175_vm4, %v9206_v22  ;;  %10011 = vmatprep.mubr.msk.f32.mxu1 %vm11950_vm10, %v17368_v56 }
 0xd1a   : > { %9925 = vmatmul.mubr.msk.f32.vlgmr.msra.gmra.mrb[100].mxu0 %vm7513_vm12, %v7678_v42  ;;  %11523 = vmatprep.subr.bf16.mxu0 %v11949_v35 }
 0xd1b   : > { %11525 = vmatpush3.bf16.msra.mxu0 %v11524_v27  ;;  %9982 = vmatprep.mubr.msk.f32.mxu0 %vm11950_vm10, %v17368_v56 }
 0xd1c   : > { %11526 = vmatprep.subr.bf16.mxu0 %v11949_v35  ;;  %11543 = vmatpush3.bf16.msra.mxu1 %v11542_v61 }
 0xd1d   : > { %11544 = vmatprep.subr.bf16.mxu1 %v11949_v35 }
 0xd1f   : > { %11528 = vmatpush3.bf16.msra.mxu0 %v11527_v9 }
 0xd20   : > { %11529 = vmatprep.subr.bf16.mxu0 %v11949_v35  ;;  %11546 = vmatpush3.bf16.msra.mxu1 %v11545_v10 }
 0xd21   : > { %11547 = vmatprep.subr.bf16.mxu1 %v11949_v35 }
 0xd23   : > { %11531 = vmatpush3.bf16.msra.mxu0 %v11530_v14 }
 0xd24   : > { %11532 = vmatprep.subr.bf16.mxu0 %v11949_v35  ;;  %11549 = vmatpush3.bf16.msra.mxu1 %v11548_v51 }
 0xd25   : > { %11550 = vmatprep.subr.bf16.mxu1 %v11949_v35 }
 0xd27   : > { %11534 = vmatpush3.bf16.msra.mxu0 %v11533_v37 }
 0xd28   : > { %11535 = vmatprep.subr.bf16.mxu0 %v11949_v35  ;;  %11552 = vmatpush3.bf16.msra.mxu1 %v11551_v12 }
 0xd29   : > { %11553 = vmatprep.subr.bf16.mxu1 %v11949_v35 }
 0xd2b   : > { %11537 = vmatpush3.bf16.msra.mxu0 %v11536_v1 }
 0xd2c   : > { %11538 = vmatprep.subr.bf16.mxu0 %v11949_v35  ;;  %11555 = vmatpush3.bf16.msra.mxu1 %v11554_v23 }
 0xd2d   : > { %11556 = vmatprep.subr.bf16.mxu1 %v11949_v35 }
 0xd2f   : > { %11540 = vmatpush3.bf16.msra.mxu0 %v11539_v53 }
 0xd30   : > { %9980 = vmatprep.subr.mxu0 %v17368_v56  ;;  %11558 = vmatpush3.bf16.msra.mxu1 %v11557_v41 }
 0xd31   : > { %10009 = vmatprep.subr.mxu1 %v17368_v56 }
 0xd33   : > { %9981 = vmatpush3.msk.msra.mxu0 %vm2175_vm4, %v9236_v48 }
 0xd34   : > { %9983 = vmatmul.mubr.msk.f32.vlgmr.msra.gmra.mrb[102].mxu0 %vm7513_vm12, %v7860_v15  ;;  %10010 = vmatpush3.msk.msra.mxu1 %vm2175_vm4, %v7951_v31 }
 0xdd1   : > { %v7660_v24 = vpop.f32.mrb[104].mxu1 }
 0xdd2   : > { %v9897_v35 = vpop.f32.mrb[105].mxu1 }
 0xdd3   : > { %v7585_v39 = vpop.f32.mrb[98].mxu0 }
 0xdd4   : > { %v7661_v30 = vadd.f32 %v7660_v24, %v7585_v39  ;;  %v9868_v3 = vpop.f32.mrb[99].mxu0 }
 0xdeb   : > { %v7841_v29 = vpop.f32.mrb[106].mxu1 }
 0xdec   : > { %v9955_v25 = vpop.f32.mrb[107].mxu1 }
 0xded   : > { %v7750_v40 = vpop.f32.mrb[100].mxu0 }
 0xdee   : > { %v7754_v44 = vadd.f32 %v7750_v40, %v7661_v30  ;;  %v9926_v52 = vpop.f32.mrb[101].mxu0 }
 0xdf0   : > { %v7845_v38 = vadd.f32 %v7841_v29, %v7754_v44 }
 0xe07   : > { %v7932_v56 = vpop.f32.mrb[102].mxu0 }
 0xe08   : > { %v7936_v16 = vadd.f32 %v7932_v56, %v7845_v38  ;;  %v9984_v49 = vpop.f32.mrb[103].mxu0 }
 0xe0a   : > { %v7938_v20 = vadd.f32 %v7937_v17, %v7936_v16 }
 0xe0c   : > { %10012 = vmatmul.mubr.msk.f32.vlgmr.msra.gmra.mrb[108].mxu1 %vm7513_vm12, %v7938_v20 }
 0xedf   : > { %v8025_v0 = vpop.f32.mrb[108].mxu1 }
 0xee0   : > { %v8026_v54 = vadd.f32 %v8025_v0, %v7952_v26  ;;  %v10013_v11 = vpop.f32.mrb[109].mxu1 }
 0xee2   : > { %8030 = vst.msk [vmem:[%s432_s27] sm:$0x1] %vm8029_vm13, %v8026_v54 }
 0xee3   : > { %11896 = shalt.err (!%p11893_p3)
}
 0xee4   : > { %s11897_s24 = scalar_lea.hbm %s17270_s20, 16  ;;  %s11901_s27 = scalar_lea.hbm %s17325_s13, 32 }
 0xee5   : > { %p11898_p4 = scmp.ne.s32.totalorder %s17270_s20, %s11897_s24  ;;  %p11902_p9 = scmp.lt.u32.totalorder %s17270_s20, %s17325_s13 }
 0xee6   : > { %p11903_p10 = scmp.lt.u32.totalorder %s11901_s27, %s11897_s24  ;;  %p11905_p12 = scmp.lt.u32.totalorder %s11897_s24, %s17270_s20 }
 0xee7   : > { %p11899_p7 = pnand %p11898_p4, %p12060_p5 }
 0xee8   : > { %p11904_p11 = por %p11903_p10, %p11902_p9 }
 0xee9   : > { %p11900_p8 = pneg %p11899_p7 }
 0xeea   : > { %p11906_p13 = por %p11905_p12, %p11904_p11 }
 0xeec   : > { %p11907_p0 = pnand %p11906_p13, %p11900_p8 }
 0xeee   : > { %11910 = shalt.err (!%p11907_p0)
}
 0xeef   : > { %11831 = dma.vmem_to_hbm [thread:$0]  (%p12060_p5), %s17272_s14, 16, %s17270_s20, %s8032_s22  }
 0xef0 PF: > { %p11837_p1 = scmp.ge.s32.totalorder %s11945_s28, 2  ;;  %s8056_s29 = sand.u32 1, %s11933_s25  }
 0xef1   : > { %s8057_s23 = scalar_lea.sflag [#allocation3], %s8056_s29 }
 0xef2   : > { %p11834_p2 = pnand %p11837_p1, %p12064_p6 }
 0xef4   : > { %11928 = dma.done.wait (!%p11834_p2), %s8057_s23, 16  }
 0xef5   : > { %11930 = vsyncadd (!%p11834_p2), %s8057_s23, 4294967280  ;;  %s17386_s28 = sld [smem:[#allocation6_spill]]  ;;  %s17387_s30 = sld [smem:[#allocation5_spill]] }
 0xef6   : > { %s17388_s27 = sld [smem:[#allocation7_spill]]  ;;  %s17389_s25 = smov %s11937_s26 }
 0xefb   : > { %p23_p3 = scmp.ge.s32.totalorder %s17386_s28, 4   ;;  %s17390_s26 = smov %s17387_s30 }
 0xefd   :  { %25 = sbr.rel (!%p23_p3) target bundleno = 3 (0x3), region = 127 }
 0xf04   :  { %8061 = vsyncpa [#allocation3], 1 }
 0xf05   :  { %8063 = vsyncpa [#allocation3 + $0x1], 1 }

</bundles_post_ra>
